<compile_context>
chip_gen: v6e
topology: v6e:2x2x1
jax: 0.10.0
libtpu: 0.0.40
codegen_flags: <defaults>
</compile_context>

<pallas_src>
import math

import jax
import jax.numpy as jnp
from jax import lax
from jax.experimental import pallas as pl
from jax.experimental.pallas import tpu as pltpu

PAD = 2           # halo for the widest conv (K=5, padding='same' -> pad 2)
ATT_DIM = 128     # AttentionModel out_dim
NEG_INF = -1e30   # finite "-inf" for the key mask (avoids NaN on fully-masked rows)


# ----------------------------------------------------------------------------
# In-kernel helpers
# ----------------------------------------------------------------------------
def _conv_scale(xpad_ref, w_ref, b_ref, bl, l):
    """relu(Conv1d(padding='same')) for one scale, rows folded to (B*L, Cout).

    xpad_ref : (B, L + 2*PAD, Cin)  input with shared zero halo along L
    w_ref    : (K, Cin, Cout)       tap-major weights (bf16), K in {1, 3, 5}
    b_ref    : (1, Cout)            bias (f32)
    """
    K, cin, cout = w_ref.shape
    off0 = PAD - K // 2
    acc = jnp.zeros((bl, cout), jnp.float32)
    for t in range(K):                                   # K is a tiny static constant
        xs = xpad_ref[:, off0 + t:off0 + t + l, :]       # (B, L, Cin) shifted window
        xs2 = xs.reshape(bl, cin).astype(jnp.bfloat16)   # fold B*L -> MXU rows
        acc = acc + jnp.dot(xs2, w_ref[t], preferred_element_type=jnp.float32)
    return jnp.maximum(acc + b_ref[...], 0.0)            # (B*L, Cout) f32


# ----------------------------------------------------------------------------
# Fused stage kernel: 3 convs (+ReLU) + m-sum + AttentionModel
# ----------------------------------------------------------------------------
def _stage_kernel(seq_ref,                       # (B, 1, 1) int32 sequence lengths
                  x1_ref, x2_ref, x3_ref,        # (B, Lp, Cin) padded inputs
                  w1_ref, w2_ref, w3_ref,        # (K, Cin, Cout) bf16, K = 1 / 3 / 5
                  b1_ref, b2_ref, b3_ref,        # (1, Cout) f32
                  wqkv_ref, bqkv_ref,            # (Cout, 3*128) bf16 / (1, 3*128) f32
                  m1_ref, m2_ref, m3_ref,        # (B, L, Cout) bf16 outputs
                  s_ref,                         # (B, L, 128) f32 attention output
                  msum_ref):                     # (B, L, Cout) f32, m1+m2+m3
    B, Lp, _ = x1_ref.shape
    L = Lp - 2 * PAD
    BL = B * L
    Cout = w1_ref.shape[2]
    d = ATT_DIM

    # --- multi-scale convs (kernel sizes 1/3/5), rows folded to B*L -----------
    m1 = _conv_scale(x1_ref, w1_ref, b1_ref, BL, L)
    m2 = _conv_scale(x2_ref, w2_ref, b2_ref, BL, L)
    m3 = _conv_scale(x3_ref, w3_ref, b3_ref, BL, L)

    m1_ref[...] = m1.reshape(B, L, Cout).astype(jnp.bfloat16)
    m2_ref[...] = m2.reshape(B, L, Cout).astype(jnp.bfloat16)
    m3_ref[...] = m3.reshape(B, L, Cout).astype(jnp.bfloat16)

    att_in = m1 + m2 + m3                                 # (B*L, Cout) f32
    msum_ref[...] = att_in.reshape(B, L, Cout)

    # --- AttentionModel: packed QKV, scaled scores, key-masked softmax, +V ----
    qkv = jnp.dot(att_in.astype(jnp.bfloat16), wqkv_ref[...],
                  preferred_element_type=jnp.float32) + bqkv_ref[...]   # (B*L, 3d)
    q = qkv[:, 0 * d:1 * d].reshape(B, L, d)
    k = qkv[:, 1 * d:2 * d].reshape(B, L, d)
    v = qkv[:, 2 * d:3 * d].reshape(B, L, d)

    norm = 1.0 / math.sqrt(float(d))
    scores = jnp.einsum('bqd,bkd->bqk',
                        q.astype(jnp.bfloat16), k.astype(jnp.bfloat16),
                        preferred_element_type=jnp.float32) * norm       # (B, L, L)

    # masked_softmax: key positions >= seqlengths[b] are masked, softmax over keys
    key_idx = lax.broadcasted_iota(jnp.int32, (B, L, L), 2)
    scores = jnp.where(key_idx < seq_ref[...], scores, NEG_INF)

    m = jnp.max(scores, axis=-1, keepdims=True)
    e = jnp.exp(scores - m)
    denom = jnp.sum(e, axis=-1, keepdims=True)
    atten = e * pl.reciprocal(denom, approx=True)

    out = jnp.einsum('bqk,bkd->bqd',
                     atten.astype(jnp.bfloat16), v.astype(jnp.bfloat16),
                     preferred_element_type=jnp.float32) + v             # output + V
    s_ref[...] = out


def fused_stage(x1p, x2p, x3p, seq3, sp):
    """One Task_shared stage in a single pallas_call.

    x*p  : (B, L + 2*PAD, Cin) zero-padded inputs (stage 1 passes the same array 3x)
    seq3 : (B, 1, 1) int32
    sp   : stage params dict (w1/w2/w3, b1/b2/b3, wqkv, bqkv)
    Returns (m1, m2, m3, s, msum) with m* bf16 (B, L, Cout), s/msum f32.
    """
    B, Lp, _ = x1p.shape
    L = Lp - 2 * PAD
    Cout = sp['w1'].shape[2]

    out_shape = (
        jax.ShapeDtypeStruct((B, L, Cout), jnp.bfloat16),
        jax.ShapeDtypeStruct((B, L, Cout), jnp.bfloat16),
        jax.ShapeDtypeStruct((B, L, Cout), jnp.bfloat16),
        jax.ShapeDtypeStruct((B, L, ATT_DIM), jnp.float32),
        jax.ShapeDtypeStruct((B, L, Cout), jnp.float32),
    )
    vmem = pl.BlockSpec(memory_space=pltpu.MemorySpace.VMEM)
    return pl.pallas_call(
        _stage_kernel,
        out_shape=out_shape,
        in_specs=[vmem] * 12,
        out_specs=(vmem,) * 5,
    )(seq3, x1p, x2p, x3p,
      sp['w1'], sp['w2'], sp['w3'],
      sp['b1'], sp['b2'], sp['b3'],
      sp['wqkv'], sp['bqkv'])


# ----------------------------------------------------------------------------
# Parameter init (deterministic, synthetic; weights stored bf16 for the MXU)
# ----------------------------------------------------------------------------
def init_params(key, inputdim):
    keys = iter(jax.random.split(key, 64))

    def conv_w(cin, cout, K):
        s = 1.0 / math.sqrt(cin * K)
        w = jax.random.uniform(next(keys), (K, cin, cout), jnp.float32, -s, s)
        b = jax.random.uniform(next(keys), (cout,), jnp.float32, -s, s)
        return w.astype(jnp.bfloat16), b.reshape(1, cout)

    def att_w(cin, cout=ATT_DIM):
        s = 1.0 / math.sqrt(cin)
        ws, bs = [], []
        for _ in range(3):                       # q, k, v packed along columns
            ws.append(jax.random.uniform(next(keys), (cin, cout), jnp.float32, -s, s))
            bs.append(jax.random.uniform(next(keys), (cout,), jnp.float32, -s, s))
        wqkv = jnp.concatenate(ws, axis=1).astype(jnp.bfloat16)   # (cin, 3*cout)
        bqkv = jnp.concatenate(bs).reshape(1, 3 * cout)
        return wqkv, bqkv

    def stage(cin, cout):
        w1, b1 = conv_w(cin, cout, 1)
        w2, b2 = conv_w(cin, cout, 3)
        w3, b3 = conv_w(cin, cout, 5)
        wqkv, bqkv = att_w(cout)
        return dict(w1=w1, w2=w2, w3=w3, b1=b1, b2=b2, b3=b3,
                    wqkv=wqkv, bqkv=bqkv)

    return {'stage1': stage(inputdim, 512),
            'stage2': stage(512, 256),
            'stage3': stage(256, 128)}


# ----------------------------------------------------------------------------
# Task_shared forward
# ----------------------------------------------------------------------------
def _pad_l(x):
    # Pad once to the max conv radius; all kernel sizes (1/3/5) reuse this halo.
    return jnp.pad(x, ((0, 0), (PAD, PAD), (0, 0)))


def task_shared_forward(params, prot_input, seqlengths):
    """prot_input: (B, L, inputdim) channels-last; seqlengths: (B,) with max == L."""
    B, L, _ = prot_input.shape
    seq3 = seqlengths.astype(jnp.int32).reshape(B, 1, 1)

    xp = _pad_l(prot_input)
    m1, m2, m3, s1, _ = fused_stage(xp, xp, xp, seq3, params['stage1'])

    m1, m2, m3, s2, _ = fused_stage(_pad_l(m1), _pad_l(m2), _pad_l(m3),
                                    seq3, params['stage2'])

    _, _, _, s3, msum = fused_stage(_pad_l(m1), _pad_l(m2), _pad_l(m3),
                                    seq3, params['stage3'])

    # mscnn (= m1+m2+m3 of stage 3, computed in-kernel) + (s1 + s2 + s3)
    return msum + (s1 + s2 + s3)        # (B, L, 128)


if __name__ == "__main__":
    key = jax.random.PRNGKey(0)
    kp, kx = jax.random.split(key)

    B, L, inputdim = 2, 16, 32
    params = init_params(kp, inputdim)
    prot_input = jax.random.normal(kx, (B, L, inputdim), jnp.float32)
    # max(seqlengths) == L, matching the PyTorch masked_softmax broadcasting.
    seqlengths = jnp.array([16, 11], dtype=jnp.int32)

    fwd = jax.jit(task_shared_forward)
    out = jax.block_until_ready(fwd(params, prot_input, seqlengths))

    assert out.shape == (B, L, 128)
    assert bool(jnp.all(jnp.isfinite(out)))
    print("KERNEL_OK")
</pallas_src>

<mosaic_0001>
module attributes {stable_mosaic.version = 11 : i64} {
  func.func @_stage_kernel(%arg0: memref<2x1x1xi32, #tpu.memory_space<vmem>>, %arg1: memref<2x20x512xbf16, #tpu.memory_space<vmem>>, %arg2: memref<2x20x512xbf16, #tpu.memory_space<vmem>>, %arg3: memref<2x20x512xbf16, #tpu.memory_space<vmem>>, %arg4: memref<1x512x256xbf16, #tpu.memory_space<vmem>>, %arg5: memref<3x512x256xbf16, #tpu.memory_space<vmem>>, %arg6: memref<5x512x256xbf16, #tpu.memory_space<vmem>>, %arg7: memref<1x256xf32, #tpu.memory_space<vmem>>, %arg8: memref<1x256xf32, #tpu.memory_space<vmem>>, %arg9: memref<1x256xf32, #tpu.memory_space<vmem>>, %arg10: memref<256x384xbf16, #tpu.memory_space<vmem>>, %arg11: memref<1x384xf32, #tpu.memory_space<vmem>>, %arg12: memref<2x16x256xbf16, #tpu.memory_space<vmem>>, %arg13: memref<2x16x256xbf16, #tpu.memory_space<vmem>>, %arg14: memref<2x16x256xbf16, #tpu.memory_space<vmem>>, %arg15: memref<2x16x128xf32, #tpu.memory_space<vmem>>, %arg16: memref<2x16x256xf32, #tpu.memory_space<vmem>>) attributes {dimension_semantics = [], scalar_prefetch = 0 : i64, scratch_operands = 0 : i64, tpu.core_type = #tpu.core_type<tc>} {
    %cst = arith.constant 0.000000e+00 : f32
    %0 = vector.broadcast %cst : f32 to vector<32x256xf32>
    %c0 = arith.constant 0 : index
    %c2 = arith.constant 2 : index
    %c0_0 = arith.constant 0 : index
    %1 = vector.load %arg1[%c0, %c2, %c0_0] : memref<2x20x512xbf16, #tpu.memory_space<vmem>>, vector<2x16x512xbf16>
    %2 = vector.shape_cast %1 : vector<2x16x512xbf16> to vector<32x512xbf16>
    %c0_1 = arith.constant 0 : index
    %c0_2 = arith.constant 0 : index
    %c0_3 = arith.constant 0 : index
    %3 = vector.load %arg4[%c0_1, %c0_2, %c0_3] : memref<1x512x256xbf16, #tpu.memory_space<vmem>>, vector<1x512x256xbf16>
    %4 = vector.shape_cast %3 : vector<1x512x256xbf16> to vector<512x256xbf16>
    %cst_4 = arith.constant dense<0.000000e+00> : vector<32x256xf32>
    %5 = tpu.matmul %2, %4, %cst_4 {dimension_numbers = #tpu.dot_dimension_numbers<[1], [0], [0], [1], [0, 0, 1, 1], [], []>} : vector<32x512xbf16>, vector<512x256xbf16>, vector<32x256xf32> -> vector<32x256xf32>
    %6 = arith.addf %0, %5 : vector<32x256xf32>
    %c0_5 = arith.constant 0 : index
    %c0_6 = arith.constant 0 : index
    %7 = vector.load %arg7[%c0_5, %c0_6] : memref<1x256xf32, #tpu.memory_space<vmem>>, vector<1x256xf32>
    %8 = vector.broadcast %7 : vector<1x256xf32> to vector<32x256xf32>
    %9 = arith.addf %6, %8 : vector<32x256xf32>
    %cst_7 = arith.constant 0.000000e+00 : f32
    %10 = vector.broadcast %cst_7 : f32 to vector<32x256xf32>
    %11 = arith.maximumf %9, %10 : vector<32x256xf32>
    %cst_8 = arith.constant 0.000000e+00 : f32
    %12 = vector.broadcast %cst_8 : f32 to vector<32x256xf32>
    %c0_9 = arith.constant 0 : index
    %c1 = arith.constant 1 : index
    %c0_10 = arith.constant 0 : index
    %13 = vector.load %arg2[%c0_9, %c1, %c0_10] : memref<2x20x512xbf16, #tpu.memory_space<vmem>>, vector<2x16x512xbf16>
    %14 = vector.shape_cast %13 : vector<2x16x512xbf16> to vector<32x512xbf16>
    %c0_11 = arith.constant 0 : index
    %c0_12 = arith.constant 0 : index
    %c0_13 = arith.constant 0 : index
    %15 = vector.load %arg5[%c0_11, %c0_12, %c0_13] : memref<3x512x256xbf16, #tpu.memory_space<vmem>>, vector<1x512x256xbf16>
    %16 = vector.shape_cast %15 : vector<1x512x256xbf16> to vector<512x256xbf16>
    %cst_14 = arith.constant dense<0.000000e+00> : vector<32x256xf32>
    %17 = tpu.matmul %14, %16, %cst_14 {dimension_numbers = #tpu.dot_dimension_numbers<[1], [0], [0], [1], [0, 0, 1, 1], [], []>} : vector<32x512xbf16>, vector<512x256xbf16>, vector<32x256xf32> -> vector<32x256xf32>
    %18 = arith.addf %12, %17 : vector<32x256xf32>
    %c0_15 = arith.constant 0 : index
    %c2_16 = arith.constant 2 : index
    %c0_17 = arith.constant 0 : index
    %19 = vector.load %arg2[%c0_15, %c2_16, %c0_17] : memref<2x20x512xbf16, #tpu.memory_space<vmem>>, vector<2x16x512xbf16>
    %20 = vector.shape_cast %19 : vector<2x16x512xbf16> to vector<32x512xbf16>
    %c1_18 = arith.constant 1 : index
    %c0_19 = arith.constant 0 : index
    %c0_20 = arith.constant 0 : index
    %21 = vector.load %arg5[%c1_18, %c0_19, %c0_20] : memref<3x512x256xbf16, #tpu.memory_space<vmem>>, vector<1x512x256xbf16>
    %22 = vector.shape_cast %21 : vector<1x512x256xbf16> to vector<512x256xbf16>
    %cst_21 = arith.constant dense<0.000000e+00> : vector<32x256xf32>
    %23 = tpu.matmul %20, %22, %cst_21 {dimension_numbers = #tpu.dot_dimension_numbers<[1], [0], [0], [1], [0, 0, 1, 1], [], []>} : vector<32x512xbf16>, vector<512x256xbf16>, vector<32x256xf32> -> vector<32x256xf32>
    %24 = arith.addf %18, %23 : vector<32x256xf32>
    %c0_22 = arith.constant 0 : index
    %c3 = arith.constant 3 : index
    %c0_23 = arith.constant 0 : index
    %25 = vector.load %arg2[%c0_22, %c3, %c0_23] : memref<2x20x512xbf16, #tpu.memory_space<vmem>>, vector<2x16x512xbf16>
    %26 = vector.shape_cast %25 : vector<2x16x512xbf16> to vector<32x512xbf16>
    %c2_24 = arith.constant 2 : index
    %c0_25 = arith.constant 0 : index
    %c0_26 = arith.constant 0 : index
    %27 = vector.load %arg5[%c2_24, %c0_25, %c0_26] : memref<3x512x256xbf16, #tpu.memory_space<vmem>>, vector<1x512x256xbf16>
    %28 = vector.shape_cast %27 : vector<1x512x256xbf16> to vector<512x256xbf16>
    %cst_27 = arith.constant dense<0.000000e+00> : vector<32x256xf32>
    %29 = tpu.matmul %26, %28, %cst_27 {dimension_numbers = #tpu.dot_dimension_numbers<[1], [0], [0], [1], [0, 0, 1, 1], [], []>} : vector<32x512xbf16>, vector<512x256xbf16>, vector<32x256xf32> -> vector<32x256xf32>
    %30 = arith.addf %24, %29 : vector<32x256xf32>
    %c0_28 = arith.constant 0 : index
    %c0_29 = arith.constant 0 : index
    %31 = vector.load %arg8[%c0_28, %c0_29] : memref<1x256xf32, #tpu.memory_space<vmem>>, vector<1x256xf32>
    %32 = vector.broadcast %31 : vector<1x256xf32> to vector<32x256xf32>
    %33 = arith.addf %30, %32 : vector<32x256xf32>
    %cst_30 = arith.constant 0.000000e+00 : f32
    %34 = vector.broadcast %cst_30 : f32 to vector<32x256xf32>
    %35 = arith.maximumf %33, %34 : vector<32x256xf32>
    %cst_31 = arith.constant 0.000000e+00 : f32
    %36 = vector.broadcast %cst_31 : f32 to vector<32x256xf32>
    %c0_32 = arith.constant 0 : index
    %c0_33 = arith.constant 0 : index
    %c0_34 = arith.constant 0 : index
    %37 = vector.load %arg3[%c0_32, %c0_33, %c0_34] : memref<2x20x512xbf16, #tpu.memory_space<vmem>>, vector<2x16x512xbf16>
    %38 = vector.shape_cast %37 : vector<2x16x512xbf16> to vector<32x512xbf16>
    %c0_35 = arith.constant 0 : index
    %c0_36 = arith.constant 0 : index
    %c0_37 = arith.constant 0 : index
    %39 = vector.load %arg6[%c0_35, %c0_36, %c0_37] : memref<5x512x256xbf16, #tpu.memory_space<vmem>>, vector<1x512x256xbf16>
    %40 = vector.shape_cast %39 : vector<1x512x256xbf16> to vector<512x256xbf16>
    %cst_38 = arith.constant dense<0.000000e+00> : vector<32x256xf32>
    %41 = tpu.matmul %38, %40, %cst_38 {dimension_numbers = #tpu.dot_dimension_numbers<[1], [0], [0], [1], [0, 0, 1, 1], [], []>} : vector<32x512xbf16>, vector<512x256xbf16>, vector<32x256xf32> -> vector<32x256xf32>
    %42 = arith.addf %36, %41 : vector<32x256xf32>
    %c0_39 = arith.constant 0 : index
    %c1_40 = arith.constant 1 : index
    %c0_41 = arith.constant 0 : index
    %43 = vector.load %arg3[%c0_39, %c1_40, %c0_41] : memref<2x20x512xbf16, #tpu.memory_space<vmem>>, vector<2x16x512xbf16>
    %44 = vector.shape_cast %43 : vector<2x16x512xbf16> to vector<32x512xbf16>
    %c1_42 = arith.constant 1 : index
    %c0_43 = arith.constant 0 : index
    %c0_44 = arith.constant 0 : index
    %45 = vector.load %arg6[%c1_42, %c0_43, %c0_44] : memref<5x512x256xbf16, #tpu.memory_space<vmem>>, vector<1x512x256xbf16>
    %46 = vector.shape_cast %45 : vector<1x512x256xbf16> to vector<512x256xbf16>
    %cst_45 = arith.constant dense<0.000000e+00> : vector<32x256xf32>
    %47 = tpu.matmul %44, %46, %cst_45 {dimension_numbers = #tpu.dot_dimension_numbers<[1], [0], [0], [1], [0, 0, 1, 1], [], []>} : vector<32x512xbf16>, vector<512x256xbf16>, vector<32x256xf32> -> vector<32x256xf32>
    %48 = arith.addf %42, %47 : vector<32x256xf32>
    %c0_46 = arith.constant 0 : index
    %c2_47 = arith.constant 2 : index
    %c0_48 = arith.constant 0 : index
    %49 = vector.load %arg3[%c0_46, %c2_47, %c0_48] : memref<2x20x512xbf16, #tpu.memory_space<vmem>>, vector<2x16x512xbf16>
    %50 = vector.shape_cast %49 : vector<2x16x512xbf16> to vector<32x512xbf16>
    %c2_49 = arith.constant 2 : index
    %c0_50 = arith.constant 0 : index
    %c0_51 = arith.constant 0 : index
    %51 = vector.load %arg6[%c2_49, %c0_50, %c0_51] : memref<5x512x256xbf16, #tpu.memory_space<vmem>>, vector<1x512x256xbf16>
    %52 = vector.shape_cast %51 : vector<1x512x256xbf16> to vector<512x256xbf16>
    %cst_52 = arith.constant dense<0.000000e+00> : vector<32x256xf32>
    %53 = tpu.matmul %50, %52, %cst_52 {dimension_numbers = #tpu.dot_dimension_numbers<[1], [0], [0], [1], [0, 0, 1, 1], [], []>} : vector<32x512xbf16>, vector<512x256xbf16>, vector<32x256xf32> -> vector<32x256xf32>
    %54 = arith.addf %48, %53 : vector<32x256xf32>
    %c0_53 = arith.constant 0 : index
    %c3_54 = arith.constant 3 : index
    %c0_55 = arith.constant 0 : index
    %55 = vector.load %arg3[%c0_53, %c3_54, %c0_55] : memref<2x20x512xbf16, #tpu.memory_space<vmem>>, vector<2x16x512xbf16>
    %56 = vector.shape_cast %55 : vector<2x16x512xbf16> to vector<32x512xbf16>
    %c3_56 = arith.constant 3 : index
    %c0_57 = arith.constant 0 : index
    %c0_58 = arith.constant 0 : index
    %57 = vector.load %arg6[%c3_56, %c0_57, %c0_58] : memref<5x512x256xbf16, #tpu.memory_space<vmem>>, vector<1x512x256xbf16>
    %58 = vector.shape_cast %57 : vector<1x512x256xbf16> to vector<512x256xbf16>
    %cst_59 = arith.constant dense<0.000000e+00> : vector<32x256xf32>
    %59 = tpu.matmul %56, %58, %cst_59 {dimension_numbers = #tpu.dot_dimension_numbers<[1], [0], [0], [1], [0, 0, 1, 1], [], []>} : vector<32x512xbf16>, vector<512x256xbf16>, vector<32x256xf32> -> vector<32x256xf32>
    %60 = arith.addf %54, %59 : vector<32x256xf32>
    %c0_60 = arith.constant 0 : index
    %c4 = arith.constant 4 : index
    %c0_61 = arith.constant 0 : index
    %61 = vector.load %arg3[%c0_60, %c4, %c0_61] : memref<2x20x512xbf16, #tpu.memory_space<vmem>>, vector<2x16x512xbf16>
    %62 = vector.shape_cast %61 : vector<2x16x512xbf16> to vector<32x512xbf16>
    %c4_62 = arith.constant 4 : index
    %c0_63 = arith.constant 0 : index
    %c0_64 = arith.constant 0 : index
    %63 = vector.load %arg6[%c4_62, %c0_63, %c0_64] : memref<5x512x256xbf16, #tpu.memory_space<vmem>>, vector<1x512x256xbf16>
    %64 = vector.shape_cast %63 : vector<1x512x256xbf16> to vector<512x256xbf16>
    %cst_65 = arith.constant dense<0.000000e+00> : vector<32x256xf32>
    %65 = tpu.matmul %62, %64, %cst_65 {dimension_numbers = #tpu.dot_dimension_numbers<[1], [0], [0], [1], [0, 0, 1, 1], [], []>} : vector<32x512xbf16>, vector<512x256xbf16>, vector<32x256xf32> -> vector<32x256xf32>
    %66 = arith.addf %60, %65 : vector<32x256xf32>
    %c0_66 = arith.constant 0 : index
    %c0_67 = arith.constant 0 : index
    %67 = vector.load %arg9[%c0_66, %c0_67] : memref<1x256xf32, #tpu.memory_space<vmem>>, vector<1x256xf32>
    %68 = vector.broadcast %67 : vector<1x256xf32> to vector<32x256xf32>
    %69 = arith.addf %66, %68 : vector<32x256xf32>
    %cst_68 = arith.constant 0.000000e+00 : f32
    %70 = vector.broadcast %cst_68 : f32 to vector<32x256xf32>
    %71 = arith.maximumf %69, %70 : vector<32x256xf32>
    %72 = vector.shape_cast %11 : vector<32x256xf32> to vector<2x16x256xf32>
    %73 = arith.truncf %72 : vector<2x16x256xf32> to vector<2x16x256xbf16>
    %c0_69 = arith.constant 0 : index
    %c0_70 = arith.constant 0 : index
    %c0_71 = arith.constant 0 : index
    %74 = vector.load %arg12[%c0_69, %c0_70, %c0_71] : memref<2x16x256xbf16, #tpu.memory_space<vmem>>, vector<2x16x256xbf16>
    tpu.vector_store %arg12[%c0_69, %c0_70, %c0_71], %73 {strides = array<i32>} : memref<2x16x256xbf16, #tpu.memory_space<vmem>>, vector<2x16x256xbf16>,
    %75 = vector.shape_cast %35 : vector<32x256xf32> to vector<2x16x256xf32>
    %76 = arith.truncf %75 : vector<2x16x256xf32> to vector<2x16x256xbf16>
    %c0_72 = arith.constant 0 : index
    %c0_73 = arith.constant 0 : index
    %c0_74 = arith.constant 0 : index
    %77 = vector.load %arg13[%c0_72, %c0_73, %c0_74] : memref<2x16x256xbf16, #tpu.memory_space<vmem>>, vector<2x16x256xbf16>
    tpu.vector_store %arg13[%c0_72, %c0_73, %c0_74], %76 {strides = array<i32>} : memref<2x16x256xbf16, #tpu.memory_space<vmem>>, vector<2x16x256xbf16>,
    %78 = vector.shape_cast %71 : vector<32x256xf32> to vector<2x16x256xf32>
    %79 = arith.truncf %78 : vector<2x16x256xf32> to vector<2x16x256xbf16>
    %c0_75 = arith.constant 0 : index
    %c0_76 = arith.constant 0 : index
    %c0_77 = arith.constant 0 : index
    %80 = vector.load %arg14[%c0_75, %c0_76, %c0_77] : memref<2x16x256xbf16, #tpu.memory_space<vmem>>, vector<2x16x256xbf16>
    tpu.vector_store %arg14[%c0_75, %c0_76, %c0_77], %79 {strides = array<i32>} : memref<2x16x256xbf16, #tpu.memory_space<vmem>>, vector<2x16x256xbf16>,
    %81 = arith.addf %11, %35 : vector<32x256xf32>
    %82 = arith.addf %81, %71 : vector<32x256xf32>
    %83 = vector.shape_cast %82 : vector<32x256xf32> to vector<2x16x256xf32>
    %c0_78 = arith.constant 0 : index
    %c0_79 = arith.constant 0 : index
    %c0_80 = arith.constant 0 : index
    %84 = vector.load %arg16[%c0_78, %c0_79, %c0_80] : memref<2x16x256xf32, #tpu.memory_space<vmem>>, vector<2x16x256xf32>
    tpu.vector_store %arg16[%c0_78, %c0_79, %c0_80], %83 {strides = array<i32>} : memref<2x16x256xf32, #tpu.memory_space<vmem>>, vector<2x16x256xf32>,
    %85 = arith.truncf %82 : vector<32x256xf32> to vector<32x256xbf16>
    %c0_81 = arith.constant 0 : index
    %c0_82 = arith.constant 0 : index
    %86 = vector.load %arg10[%c0_81, %c0_82] : memref<256x384xbf16, #tpu.memory_space<vmem>>, vector<256x384xbf16>
    %cst_83 = arith.constant dense<0.000000e+00> : vector<32x384xf32>
    %87 = tpu.matmul %85, %86, %cst_83 {dimension_numbers = #tpu.dot_dimension_numbers<[1], [0], [0], [1], [0, 0, 1, 1], [], []>} : vector<32x256xbf16>, vector<256x384xbf16>, vector<32x384xf32> -> vector<32x384xf32>
    %c0_84 = arith.constant 0 : index
    %c0_85 = arith.constant 0 : index
    %88 = vector.load %arg11[%c0_84, %c0_85] : memref<1x384xf32, #tpu.memory_space<vmem>>, vector<1x384xf32>
    %89 = vector.broadcast %88 : vector<1x384xf32> to vector<32x384xf32>
    %90 = arith.addf %87, %89 : vector<32x384xf32>
    %91 = vector.extract_strided_slice %90 {offsets = [0, 0], sizes = [32, 128], strides = [1, 1]} : vector<32x384xf32> to vector<32x128xf32>
    %92 = vector.shape_cast %91 : vector<32x128xf32> to vector<2x16x128xf32>
    %93 = vector.extract_strided_slice %90 {offsets = [0, 128], sizes = [32, 128], strides = [1, 1]} : vector<32x384xf32> to vector<32x128xf32>
    %94 = vector.shape_cast %93 : vector<32x128xf32> to vector<2x16x128xf32>
    %95 = vector.extract_strided_slice %90 {offsets = [0, 256], sizes = [32, 128], strides = [1, 1]} : vector<32x384xf32> to vector<32x128xf32>
    %96 = vector.shape_cast %95 : vector<32x128xf32> to vector<2x16x128xf32>
    %97 = arith.truncf %92 : vector<2x16x128xf32> to vector<2x16x128xbf16>
    %98 = arith.truncf %94 : vector<2x16x128xf32> to vector<2x16x128xbf16>
    "tpu.trace_start"() <{level = 10 : i32, message = "bqd,bkd->bqk"}> : () -> ()
    %cst_86 = arith.constant dense<0.000000e+00> : vector<2x16x16xf32>
    %99 = tpu.matmul %97, %98, %cst_86 {dimension_numbers = #tpu.dot_dimension_numbers<[2], [2], [1], [1], [0, 0, 0, 1, 1, 1], [0], [0]>} : vector<2x16x128xbf16>, vector<2x16x128xbf16>, vector<2x16x16xf32> -> vector<2x16x16xf32>
    "tpu.trace_stop"() : () -> ()
    %cst_87 = arith.constant 0.0883883461 : f32
    %100 = vector.broadcast %cst_87 : f32 to vector<2x16x16xf32>
    %101 = arith.mulf %99, %100 : vector<2x16x16xf32>
    %102 = tpu.iota {dimensions = array<i32: 2>} : vector<2x16x16xi32>
    %c0_88 = arith.constant 0 : index
    %c0_89 = arith.constant 0 : index
    %c0_90 = arith.constant 0 : index
    %103 = vector.load %arg0[%c0_88, %c0_89, %c0_90] : memref<2x1x1xi32, #tpu.memory_space<vmem>>, vector<2x1x1xi32>
    %104 = vector.broadcast %103 : vector<2x1x1xi32> to vector<2x16x16xi32>
    %105 = arith.cmpi slt, %102, %104 : vector<2x16x16xi32>
    %cst_91 = arith.constant -1.000000e+30 : f32
    %106 = vector.broadcast %cst_91 : f32 to vector<2x16x16xf32>
    %107 = arith.select %105, %101, %106 : vector<2x16x16xi1>, vector<2x16x16xf32>
    %cst_92 = arith.constant dense<0xFF800000> : vector<2x16xf32>
    %108 = vector.multi_reduction <maximumf>, %107, %cst_92 [2] : vector<2x16x16xf32> to vector<2x16xf32>
    %109 = vector.shape_cast %108 : vector<2x16xf32> to vector<2x16x1xf32>
    %110 = vector.broadcast %109 : vector<2x16x1xf32> to vector<2x16x16xf32>
    %111 = arith.subf %107, %110 : vector<2x16x16xf32>
    %112 = math.exp %111 : vector<2x16x16xf32>
    %cst_93 = arith.constant dense<0.000000e+00> : vector<2x16xf32>
    %113 = vector.multi_reduction <add>, %112, %cst_93 [2] : vector<2x16x16xf32> to vector<2x16xf32>
    %114 = vector.shape_cast %113 : vector<2x16xf32> to vector<2x16x1xf32>
    %115 = tpu.reciprocal %114 {approx = true} : vector<2x16x1xf32> -> vector<2x16x1xf32>
    %116 = vector.broadcast %115 : vector<2x16x1xf32> to vector<2x16x16xf32>
    %117 = arith.mulf %112, %116 : vector<2x16x16xf32>
    %118 = arith.truncf %117 : vector<2x16x16xf32> to vector<2x16x16xbf16>
    %119 = arith.truncf %96 : vector<2x16x128xf32> to vector<2x16x128xbf16>
    "tpu.trace_start"() <{level = 10 : i32, message = "bqk,bkd->bqd"}> : () -> ()
    %cst_94 = arith.constant dense<0.000000e+00> : vector<2x16x128xf32>
    %120 = tpu.matmul %118, %119, %cst_94 {dimension_numbers = #tpu.dot_dimension_numbers<[2], [1], [1], [2], [0, 0, 0, 1, 1, 2], [0], [0]>} : vector<2x16x16xbf16>, vector<2x16x128xbf16>, vector<2x16x128xf32> -> vector<2x16x128xf32>
    "tpu.trace_stop"() : () -> ()
    %121 = arith.addf %120, %96 : vector<2x16x128xf32>
    %c0_95 = arith.constant 0 : index
    %c0_96 = arith.constant 0 : index
    %c0_97 = arith.constant 0 : index
    %122 = vector.load %arg15[%c0_95, %c0_96, %c0_97] : memref<2x16x128xf32, #tpu.memory_space<vmem>>, vector<2x16x128xf32>
    tpu.vector_store %arg15[%c0_95, %c0_96, %c0_97], %121 {strides = array<i32>} : memref<2x16x128xf32, #tpu.memory_space<vmem>>, vector<2x16x128xf32>,
    return
  }
}

module attributes {stable_mosaic.version = 11 : i64} {
  func.func @_stage_kernel(%arg0: memref<2x1x1xi32, #tpu.memory_space<vmem>>, %arg1: memref<2x20x256xbf16, #tpu.memory_space<vmem>>, %arg2: memref<2x20x256xbf16, #tpu.memory_space<vmem>>, %arg3: memref<2x20x256xbf16, #tpu.memory_space<vmem>>, %arg4: memref<1x256x128xbf16, #tpu.memory_space<vmem>>, %arg5: memref<3x256x128xbf16, #tpu.memory_space<vmem>>, %arg6: memref<5x256x128xbf16, #tpu.memory_space<vmem>>, %arg7: memref<1x128xf32, #tpu.memory_space<vmem>>, %arg8: memref<1x128xf32, #tpu.memory_space<vmem>>, %arg9: memref<1x128xf32, #tpu.memory_space<vmem>>, %arg10: memref<128x384xbf16, #tpu.memory_space<vmem>>, %arg11: memref<1x384xf32, #tpu.memory_space<vmem>>, %arg12: memref<2x16x128xbf16, #tpu.memory_space<vmem>>, %arg13: memref<2x16x128xbf16, #tpu.memory_space<vmem>>, %arg14: memref<2x16x128xbf16, #tpu.memory_space<vmem>>, %arg15: memref<2x16x128xf32, #tpu.memory_space<vmem>>, %arg16: memref<2x16x128xf32, #tpu.memory_space<vmem>>) attributes {dimension_semantics = [], scalar_prefetch = 0 : i64, scratch_operands = 0 : i64, tpu.core_type = #tpu.core_type<tc>} {
    %cst = arith.constant 0.000000e+00 : f32
    %0 = vector.broadcast %cst : f32 to vector<32x128xf32>
    %c0 = arith.constant 0 : index
    %c2 = arith.constant 2 : index
    %c0_0 = arith.constant 0 : index
    %1 = vector.load %arg1[%c0, %c2, %c0_0] : memref<2x20x256xbf16, #tpu.memory_space<vmem>>, vector<2x16x256xbf16>
    %2 = vector.shape_cast %1 : vector<2x16x256xbf16> to vector<32x256xbf16>
    %c0_1 = arith.constant 0 : index
    %c0_2 = arith.constant 0 : index
    %c0_3 = arith.constant 0 : index
    %3 = vector.load %arg4[%c0_1, %c0_2, %c0_3] : memref<1x256x128xbf16, #tpu.memory_space<vmem>>, vector<1x256x128xbf16>
    %4 = vector.shape_cast %3 : vector<1x256x128xbf16> to vector<256x128xbf16>
    %cst_4 = arith.constant dense<0.000000e+00> : vector<32x128xf32>
    %5 = tpu.matmul %2, %4, %cst_4 {dimension_numbers = #tpu.dot_dimension_numbers<[1], [0], [0], [1], [0, 0, 1, 1], [], []>} : vector<32x256xbf16>, vector<256x128xbf16>, vector<32x128xf32> -> vector<32x128xf32>
    %6 = arith.addf %0, %5 : vector<32x128xf32>
    %c0_5 = arith.constant 0 : index
    %c0_6 = arith.constant 0 : index
    %7 = vector.load %arg7[%c0_5, %c0_6] : memref<1x128xf32, #tpu.memory_space<vmem>>, vector<1x128xf32>
    %8 = vector.broadcast %7 : vector<1x128xf32> to vector<32x128xf32>
    %9 = arith.addf %6, %8 : vector<32x128xf32>
    %cst_7 = arith.constant 0.000000e+00 : f32
    %10 = vector.broadcast %cst_7 : f32 to vector<32x128xf32>
    %11 = arith.maximumf %9, %10 : vector<32x128xf32>
    %cst_8 = arith.constant 0.000000e+00 : f32
    %12 = vector.broadcast %cst_8 : f32 to vector<32x128xf32>
    %c0_9 = arith.constant 0 : index
    %c1 = arith.constant 1 : index
    %c0_10 = arith.constant 0 : index
    %13 = vector.load %arg2[%c0_9, %c1, %c0_10] : memref<2x20x256xbf16, #tpu.memory_space<vmem>>, vector<2x16x256xbf16>
    %14 = vector.shape_cast %13 : vector<2x16x256xbf16> to vector<32x256xbf16>
    %c0_11 = arith.constant 0 : index
    %c0_12 = arith.constant 0 : index
    %c0_13 = arith.constant 0 : index
    %15 = vector.load %arg5[%c0_11, %c0_12, %c0_13] : memref<3x256x128xbf16, #tpu.memory_space<vmem>>, vector<1x256x128xbf16>
    %16 = vector.shape_cast %15 : vector<1x256x128xbf16> to vector<256x128xbf16>
    %cst_14 = arith.constant dense<0.000000e+00> : vector<32x128xf32>
    %17 = tpu.matmul %14, %16, %cst_14 {dimension_numbers = #tpu.dot_dimension_numbers<[1], [0], [0], [1], [0, 0, 1, 1], [], []>} : vector<32x256xbf16>, vector<256x128xbf16>, vector<32x128xf32> -> vector<32x128xf32>
    %18 = arith.addf %12, %17 : vector<32x128xf32>
    %c0_15 = arith.constant 0 : index
    %c2_16 = arith.constant 2 : index
    %c0_17 = arith.constant 0 : index
    %19 = vector.load %arg2[%c0_15, %c2_16, %c0_17] : memref<2x20x256xbf16, #tpu.memory_space<vmem>>, vector<2x16x256xbf16>
    %20 = vector.shape_cast %19 : vector<2x16x256xbf16> to vector<32x256xbf16>
    %c1_18 = arith.constant 1 : index
    %c0_19 = arith.constant 0 : index
    %c0_20 = arith.constant 0 : index
    %21 = vector.load %arg5[%c1_18, %c0_19, %c0_20] : memref<3x256x128xbf16, #tpu.memory_space<vmem>>, vector<1x256x128xbf16>
    %22 = vector.shape_cast %21 : vector<1x256x128xbf16> to vector<256x128xbf16>
    %cst_21 = arith.constant dense<0.000000e+00> : vector<32x128xf32>
    %23 = tpu.matmul %20, %22, %cst_21 {dimension_numbers = #tpu.dot_dimension_numbers<[1], [0], [0], [1], [0, 0, 1, 1], [], []>} : vector<32x256xbf16>, vector<256x128xbf16>, vector<32x128xf32> -> vector<32x128xf32>
    %24 = arith.addf %18, %23 : vector<32x128xf32>
    %c0_22 = arith.constant 0 : index
    %c3 = arith.constant 3 : index
    %c0_23 = arith.constant 0 : index
    %25 = vector.load %arg2[%c0_22, %c3, %c0_23] : memref<2x20x256xbf16, #tpu.memory_space<vmem>>, vector<2x16x256xbf16>
    %26 = vector.shape_cast %25 : vector<2x16x256xbf16> to vector<32x256xbf16>
    %c2_24 = arith.constant 2 : index
    %c0_25 = arith.constant 0 : index
    %c0_26 = arith.constant 0 : index
    %27 = vector.load %arg5[%c2_24, %c0_25, %c0_26] : memref<3x256x128xbf16, #tpu.memory_space<vmem>>, vector<1x256x128xbf16>
    %28 = vector.shape_cast %27 : vector<1x256x128xbf16> to vector<256x128xbf16>
    %cst_27 = arith.constant dense<0.000000e+00> : vector<32x128xf32>
    %29 = tpu.matmul %26, %28, %cst_27 {dimension_numbers = #tpu.dot_dimension_numbers<[1], [0], [0], [1], [0, 0, 1, 1], [], []>} : vector<32x256xbf16>, vector<256x128xbf16>, vector<32x128xf32> -> vector<32x128xf32>
    %30 = arith.addf %24, %29 : vector<32x128xf32>
    %c0_28 = arith.constant 0 : index
    %c0_29 = arith.constant 0 : index
    %31 = vector.load %arg8[%c0_28, %c0_29] : memref<1x128xf32, #tpu.memory_space<vmem>>, vector<1x128xf32>
    %32 = vector.broadcast %31 : vector<1x128xf32> to vector<32x128xf32>
    %33 = arith.addf %30, %32 : vector<32x128xf32>
    %cst_30 = arith.constant 0.000000e+00 : f32
    %34 = vector.broadcast %cst_30 : f32 to vector<32x128xf32>
    %35 = arith.maximumf %33, %34 : vector<32x128xf32>
    %cst_31 = arith.constant 0.000000e+00 : f32
    %36 = vector.broadcast %cst_31 : f32 to vector<32x128xf32>
    %c0_32 = arith.constant 0 : index
    %c0_33 = arith.constant 0 : index
    %c0_34 = arith.constant 0 : index
    %37 = vector.load %arg3[%c0_32, %c0_33, %c0_34] : memref<2x20x256xbf16, #tpu.memory_space<vmem>>, vector<2x16x256xbf16>
    %38 = vector.shape_cast %37 : vector<2x16x256xbf16> to vector<32x256xbf16>
    %c0_35 = arith.constant 0 : index
    %c0_36 = arith.constant 0 : index
    %c0_37 = arith.constant 0 : index
    %39 = vector.load %arg6[%c0_35, %c0_36, %c0_37] : memref<5x256x128xbf16, #tpu.memory_space<vmem>>, vector<1x256x128xbf16>
    %40 = vector.shape_cast %39 : vector<1x256x128xbf16> to vector<256x128xbf16>
    %cst_38 = arith.constant dense<0.000000e+00> : vector<32x128xf32>
    %41 = tpu.matmul %38, %40, %cst_38 {dimension_numbers = #tpu.dot_dimension_numbers<[1], [0], [0], [1], [0, 0, 1, 1], [], []>} : vector<32x256xbf16>, vector<256x128xbf16>, vector<32x128xf32> -> vector<32x128xf32>
    %42 = arith.addf %36, %41 : vector<32x128xf32>
    %c0_39 = arith.constant 0 : index
    %c1_40 = arith.constant 1 : index
    %c0_41 = arith.constant 0 : index
    %43 = vector.load %arg3[%c0_39, %c1_40, %c0_41] : memref<2x20x256xbf16, #tpu.memory_space<vmem>>, vector<2x16x256xbf16>
    %44 = vector.shape_cast %43 : vector<2x16x256xbf16> to vector<32x256xbf16>
    %c1_42 = arith.constant 1 : index
    %c0_43 = arith.constant 0 : index
    %c0_44 = arith.constant 0 : index
    %45 = vector.load %arg6[%c1_42, %c0_43, %c0_44] : memref<5x256x128xbf16, #tpu.memory_space<vmem>>, vector<1x256x128xbf16>
    %46 = vector.shape_cast %45 : vector<1x256x128xbf16> to vector<256x128xbf16>
    %cst_45 = arith.constant dense<0.000000e+00> : vector<32x128xf32>
    %47 = tpu.matmul %44, %46, %cst_45 {dimension_numbers = #tpu.dot_dimension_numbers<[1], [0], [0], [1], [0, 0, 1, 1], [], []>} : vector<32x256xbf16>, vector<256x128xbf16>, vector<32x128xf32> -> vector<32x128xf32>
    %48 = arith.addf %42, %47 : vector<32x128xf32>
    %c0_46 = arith.constant 0 : index
    %c2_47 = arith.constant 2 : index
    %c0_48 = arith.constant 0 : index
    %49 = vector.load %arg3[%c0_46, %c2_47, %c0_48] : memref<2x20x256xbf16, #tpu.memory_space<vmem>>, vector<2x16x256xbf16>
    %50 = vector.shape_cast %49 : vector<2x16x256xbf16> to vector<32x256xbf16>
    %c2_49 = arith.constant 2 : index
    %c0_50 = arith.constant 0 : index
    %c0_51 = arith.constant 0 : index
    %51 = vector.load %arg6[%c2_49, %c0_50, %c0_51] : memref<5x256x128xbf16, #tpu.memory_space<vmem>>, vector<1x256x128xbf16>
    %52 = vector.shape_cast %51 : vector<1x256x128xbf16> to vector<256x128xbf16>
    %cst_52 = arith.constant dense<0.000000e+00> : vector<32x128xf32>
    %53 = tpu.matmul %50, %52, %cst_52 {dimension_numbers = #tpu.dot_dimension_numbers<[1], [0], [0], [1], [0, 0, 1, 1], [], []>} : vector<32x256xbf16>, vector<256x128xbf16>, vector<32x128xf32> -> vector<32x128xf32>
    %54 = arith.addf %48, %53 : vector<32x128xf32>
    %c0_53 = arith.constant 0 : index
    %c3_54 = arith.constant 3 : index
    %c0_55 = arith.constant 0 : index
    %55 = vector.load %arg3[%c0_53, %c3_54, %c0_55] : memref<2x20x256xbf16, #tpu.memory_space<vmem>>, vector<2x16x256xbf16>
    %56 = vector.shape_cast %55 : vector<2x16x256xbf16> to vector<32x256xbf16>
    %c3_56 = arith.constant 3 : index
    %c0_57 = arith.constant 0 : index
    %c0_58 = arith.constant 0 : index
    %57 = vector.load %arg6[%c3_56, %c0_57, %c0_58] : memref<5x256x128xbf16, #tpu.memory_space<vmem>>, vector<1x256x128xbf16>
    %58 = vector.shape_cast %57 : vector<1x256x128xbf16> to vector<256x128xbf16>
    %cst_59 = arith.constant dense<0.000000e+00> : vector<32x128xf32>
    %59 = tpu.matmul %56, %58, %cst_59 {dimension_numbers = #tpu.dot_dimension_numbers<[1], [0], [0], [1], [0, 0, 1, 1], [], []>} : vector<32x256xbf16>, vector<256x128xbf16>, vector<32x128xf32> -> vector<32x128xf32>
    %60 = arith.addf %54, %59 : vector<32x128xf32>
    %c0_60 = arith.constant 0 : index
    %c4 = arith.constant 4 : index
    %c0_61 = arith.constant 0 : index
    %61 = vector.load %arg3[%c0_60, %c4, %c0_61] : memref<2x20x256xbf16, #tpu.memory_space<vmem>>, vector<2x16x256xbf16>
    %62 = vector.shape_cast %61 : vector<2x16x256xbf16> to vector<32x256xbf16>
    %c4_62 = arith.constant 4 : index
    %c0_63 = arith.constant 0 : index
    %c0_64 = arith.constant 0 : index
    %63 = vector.load %arg6[%c4_62, %c0_63, %c0_64] : memref<5x256x128xbf16, #tpu.memory_space<vmem>>, vector<1x256x128xbf16>
    %64 = vector.shape_cast %63 : vector<1x256x128xbf16> to vector<256x128xbf16>
    %cst_65 = arith.constant dense<0.000000e+00> : vector<32x128xf32>
    %65 = tpu.matmul %62, %64, %cst_65 {dimension_numbers = #tpu.dot_dimension_numbers<[1], [0], [0], [1], [0, 0, 1, 1], [], []>} : vector<32x256xbf16>, vector<256x128xbf16>, vector<32x128xf32> -> vector<32x128xf32>
    %66 = arith.addf %60, %65 : vector<32x128xf32>
    %c0_66 = arith.constant 0 : index
    %c0_67 = arith.constant 0 : index
    %67 = vector.load %arg9[%c0_66, %c0_67] : memref<1x128xf32, #tpu.memory_space<vmem>>, vector<1x128xf32>
    %68 = vector.broadcast %67 : vector<1x128xf32> to vector<32x128xf32>
    %69 = arith.addf %66, %68 : vector<32x128xf32>
    %cst_68 = arith.constant 0.000000e+00 : f32
    %70 = vector.broadcast %cst_68 : f32 to vector<32x128xf32>
    %71 = arith.maximumf %69, %70 : vector<32x128xf32>
    %72 = vector.shape_cast %11 : vector<32x128xf32> to vector<2x16x128xf32>
    %73 = arith.truncf %72 : vector<2x16x128xf32> to vector<2x16x128xbf16>
    %c0_69 = arith.constant 0 : index
    %c0_70 = arith.constant 0 : index
    %c0_71 = arith.constant 0 : index
    %74 = vector.load %arg12[%c0_69, %c0_70, %c0_71] : memref<2x16x128xbf16, #tpu.memory_space<vmem>>, vector<2x16x128xbf16>
    tpu.vector_store %arg12[%c0_69, %c0_70, %c0_71], %73 {strides = array<i32>} : memref<2x16x128xbf16, #tpu.memory_space<vmem>>, vector<2x16x128xbf16>,
    %75 = vector.shape_cast %35 : vector<32x128xf32> to vector<2x16x128xf32>
    %76 = arith.truncf %75 : vector<2x16x128xf32> to vector<2x16x128xbf16>
    %c0_72 = arith.constant 0 : index
    %c0_73 = arith.constant 0 : index
    %c0_74 = arith.constant 0 : index
    %77 = vector.load %arg13[%c0_72, %c0_73, %c0_74] : memref<2x16x128xbf16, #tpu.memory_space<vmem>>, vector<2x16x128xbf16>
    tpu.vector_store %arg13[%c0_72, %c0_73, %c0_74], %76 {strides = array<i32>} : memref<2x16x128xbf16, #tpu.memory_space<vmem>>, vector<2x16x128xbf16>,
    %78 = vector.shape_cast %71 : vector<32x128xf32> to vector<2x16x128xf32>
    %79 = arith.truncf %78 : vector<2x16x128xf32> to vector<2x16x128xbf16>
    %c0_75 = arith.constant 0 : index
    %c0_76 = arith.constant 0 : index
    %c0_77 = arith.constant 0 : index
    %80 = vector.load %arg14[%c0_75, %c0_76, %c0_77] : memref<2x16x128xbf16, #tpu.memory_space<vmem>>, vector<2x16x128xbf16>
    tpu.vector_store %arg14[%c0_75, %c0_76, %c0_77], %79 {strides = array<i32>} : memref<2x16x128xbf16, #tpu.memory_space<vmem>>, vector<2x16x128xbf16>,
    %81 = arith.addf %11, %35 : vector<32x128xf32>
    %82 = arith.addf %81, %71 : vector<32x128xf32>
    %83 = vector.shape_cast %82 : vector<32x128xf32> to vector<2x16x128xf32>
    %c0_78 = arith.constant 0 : index
    %c0_79 = arith.constant 0 : index
    %c0_80 = arith.constant 0 : index
    %84 = vector.load %arg16[%c0_78, %c0_79, %c0_80] : memref<2x16x128xf32, #tpu.memory_space<vmem>>, vector<2x16x128xf32>
    tpu.vector_store %arg16[%c0_78, %c0_79, %c0_80], %83 {strides = array<i32>} : memref<2x16x128xf32, #tpu.memory_space<vmem>>, vector<2x16x128xf32>,
    %85 = arith.truncf %82 : vector<32x128xf32> to vector<32x128xbf16>
    %c0_81 = arith.constant 0 : index
    %c0_82 = arith.constant 0 : index
    %86 = vector.load %arg10[%c0_81, %c0_82] : memref<128x384xbf16, #tpu.memory_space<vmem>>, vector<128x384xbf16>
    %cst_83 = arith.constant dense<0.000000e+00> : vector<32x384xf32>
    %87 = tpu.matmul %85, %86, %cst_83 {dimension_numbers = #tpu.dot_dimension_numbers<[1], [0], [0], [1], [0, 0, 1, 1], [], []>} : vector<32x128xbf16>, vector<128x384xbf16>, vector<32x384xf32> -> vector<32x384xf32>
    %c0_84 = arith.constant 0 : index
    %c0_85 = arith.constant 0 : index
    %88 = vector.load %arg11[%c0_84, %c0_85] : memref<1x384xf32, #tpu.memory_space<vmem>>, vector<1x384xf32>
    %89 = vector.broadcast %88 : vector<1x384xf32> to vector<32x384xf32>
    %90 = arith.addf %87, %89 : vector<32x384xf32>
    %91 = vector.extract_strided_slice %90 {offsets = [0, 0], sizes = [32, 128], strides = [1, 1]} : vector<32x384xf32> to vector<32x128xf32>
    %92 = vector.shape_cast %91 : vector<32x128xf32> to vector<2x16x128xf32>
    %93 = vector.extract_strided_slice %90 {offsets = [0, 128], sizes = [32, 128], strides = [1, 1]} : vector<32x384xf32> to vector<32x128xf32>
    %94 = vector.shape_cast %93 : vector<32x128xf32> to vector<2x16x128xf32>
    %95 = vector.extract_strided_slice %90 {offsets = [0, 256], sizes = [32, 128], strides = [1, 1]} : vector<32x384xf32> to vector<32x128xf32>
    %96 = vector.shape_cast %95 : vector<32x128xf32> to vector<2x16x128xf32>
    %97 = arith.truncf %92 : vector<2x16x128xf32> to vector<2x16x128xbf16>
    %98 = arith.truncf %94 : vector<2x16x128xf32> to vector<2x16x128xbf16>
    "tpu.trace_start"() <{level = 10 : i32, message = "bqd,bkd->bqk"}> : () -> ()
    %cst_86 = arith.constant dense<0.000000e+00> : vector<2x16x16xf32>
    %99 = tpu.matmul %97, %98, %cst_86 {dimension_numbers = #tpu.dot_dimension_numbers<[2], [2], [1], [1], [0, 0, 0, 1, 1, 1], [0], [0]>} : vector<2x16x128xbf16>, vector<2x16x128xbf16>, vector<2x16x16xf32> -> vector<2x16x16xf32>
    "tpu.trace_stop"() : () -> ()
    %cst_87 = arith.constant 0.0883883461 : f32
    %100 = vector.broadcast %cst_87 : f32 to vector<2x16x16xf32>
    %101 = arith.mulf %99, %100 : vector<2x16x16xf32>
    %102 = tpu.iota {dimensions = array<i32: 2>} : vector<2x16x16xi32>
    %c0_88 = arith.constant 0 : index
    %c0_89 = arith.constant 0 : index
    %c0_90 = arith.constant 0 : index
    %103 = vector.load %arg0[%c0_88, %c0_89, %c0_90] : memref<2x1x1xi32, #tpu.memory_space<vmem>>, vector<2x1x1xi32>
    %104 = vector.broadcast %103 : vector<2x1x1xi32> to vector<2x16x16xi32>
    %105 = arith.cmpi slt, %102, %104 : vector<2x16x16xi32>
    %cst_91 = arith.constant -1.000000e+30 : f32
    %106 = vector.broadcast %cst_91 : f32 to vector<2x16x16xf32>
    %107 = arith.select %105, %101, %106 : vector<2x16x16xi1>, vector<2x16x16xf32>
    %cst_92 = arith.constant dense<0xFF800000> : vector<2x16xf32>
    %108 = vector.multi_reduction <maximumf>, %107, %cst_92 [2] : vector<2x16x16xf32> to vector<2x16xf32>
    %109 = vector.shape_cast %108 : vector<2x16xf32> to vector<2x16x1xf32>
    %110 = vector.broadcast %109 : vector<2x16x1xf32> to vector<2x16x16xf32>
    %111 = arith.subf %107, %110 : vector<2x16x16xf32>
    %112 = math.exp %111 : vector<2x16x16xf32>
    %cst_93 = arith.constant dense<0.000000e+00> : vector<2x16xf32>
    %113 = vector.multi_reduction <add>, %112, %cst_93 [2] : vector<2x16x16xf32> to vector<2x16xf32>
    %114 = vector.shape_cast %113 : vector<2x16xf32> to vector<2x16x1xf32>
    %115 = tpu.reciprocal %114 {approx = true} : vector<2x16x1xf32> -> vector<2x16x1xf32>
    %116 = vector.broadcast %115 : vector<2x16x1xf32> to vector<2x16x16xf32>
    %117 = arith.mulf %112, %116 : vector<2x16x16xf32>
    %118 = arith.truncf %117 : vector<2x16x16xf32> to vector<2x16x16xbf16>
    %119 = arith.truncf %96 : vector<2x16x128xf32> to vector<2x16x128xbf16>
    "tpu.trace_start"() <{level = 10 : i32, message = "bqk,bkd->bqd"}> : () -> ()
    %cst_94 = arith.constant dense<0.000000e+00> : vector<2x16x128xf32>
    %120 = tpu.matmul %118, %119, %cst_94 {dimension_numbers = #tpu.dot_dimension_numbers<[2], [1], [1], [2], [0, 0, 0, 1, 1, 2], [0], [0]>} : vector<2x16x16xbf16>, vector<2x16x128xbf16>, vector<2x16x128xf32> -> vector<2x16x128xf32>
    "tpu.trace_stop"() : () -> ()
    %121 = arith.addf %120, %96 : vector<2x16x128xf32>
    %c0_95 = arith.constant 0 : index
    %c0_96 = arith.constant 0 : index
    %c0_97 = arith.constant 0 : index
    %122 = vector.load %arg15[%c0_95, %c0_96, %c0_97] : memref<2x16x128xf32, #tpu.memory_space<vmem>>, vector<2x16x128xf32>
    tpu.vector_store %arg15[%c0_95, %c0_96, %c0_97], %121 {strides = array<i32>} : memref<2x16x128xf32, #tpu.memory_space<vmem>>, vector<2x16x128xf32>,
    return
  }
}

module attributes {stable_mosaic.version = 11 : i64} {
  func.func @_stage_kernel(%arg0: memref<2x1x1xi32, #tpu.memory_space<vmem>>, %arg1: memref<2x20x32xf32, #tpu.memory_space<vmem>>, %arg2: memref<2x20x32xf32, #tpu.memory_space<vmem>>, %arg3: memref<2x20x32xf32, #tpu.memory_space<vmem>>, %arg4: memref<1x32x512xbf16, #tpu.memory_space<vmem>>, %arg5: memref<3x32x512xbf16, #tpu.memory_space<vmem>>, %arg6: memref<5x32x512xbf16, #tpu.memory_space<vmem>>, %arg7: memref<1x512xf32, #tpu.memory_space<vmem>>, %arg8: memref<1x512xf32, #tpu.memory_space<vmem>>, %arg9: memref<1x512xf32, #tpu.memory_space<vmem>>, %arg10: memref<512x384xbf16, #tpu.memory_space<vmem>>, %arg11: memref<1x384xf32, #tpu.memory_space<vmem>>, %arg12: memref<2x16x512xbf16, #tpu.memory_space<vmem>>, %arg13: memref<2x16x512xbf16, #tpu.memory_space<vmem>>, %arg14: memref<2x16x512xbf16, #tpu.memory_space<vmem>>, %arg15: memref<2x16x128xf32, #tpu.memory_space<vmem>>, %arg16: memref<2x16x512xf32, #tpu.memory_space<vmem>>) attributes {dimension_semantics = [], scalar_prefetch = 0 : i64, scratch_operands = 0 : i64, tpu.core_type = #tpu.core_type<tc>} {
    %cst = arith.constant 0.000000e+00 : f32
    %0 = vector.broadcast %cst : f32 to vector<32x512xf32>
    %c0 = arith.constant 0 : index
    %c2 = arith.constant 2 : index
    %c0_0 = arith.constant 0 : index
    %1 = vector.load %arg1[%c0, %c2, %c0_0] : memref<2x20x32xf32, #tpu.memory_space<vmem>>, vector<2x16x32xf32>
    %2 = vector.shape_cast %1 : vector<2x16x32xf32> to vector<32x32xf32>
    %3 = arith.truncf %2 : vector<32x32xf32> to vector<32x32xbf16>
    %c0_1 = arith.constant 0 : index
    %c0_2 = arith.constant 0 : index
    %c0_3 = arith.constant 0 : index
    %4 = vector.load %arg4[%c0_1, %c0_2, %c0_3] : memref<1x32x512xbf16, #tpu.memory_space<vmem>>, vector<1x32x512xbf16>
    %5 = vector.shape_cast %4 : vector<1x32x512xbf16> to vector<32x512xbf16>
    %cst_4 = arith.constant dense<0.000000e+00> : vector<32x512xf32>
    %6 = tpu.matmul %3, %5, %cst_4 {dimension_numbers = #tpu.dot_dimension_numbers<[1], [0], [0], [1], [0, 0, 1, 1], [], []>} : vector<32x32xbf16>, vector<32x512xbf16>, vector<32x512xf32> -> vector<32x512xf32>
    %7 = arith.addf %0, %6 : vector<32x512xf32>
    %c0_5 = arith.constant 0 : index
    %c0_6 = arith.constant 0 : index
    %8 = vector.load %arg7[%c0_5, %c0_6] : memref<1x512xf32, #tpu.memory_space<vmem>>, vector<1x512xf32>
    %9 = vector.broadcast %8 : vector<1x512xf32> to vector<32x512xf32>
    %10 = arith.addf %7, %9 : vector<32x512xf32>
    %cst_7 = arith.constant 0.000000e+00 : f32
    %11 = vector.broadcast %cst_7 : f32 to vector<32x512xf32>
    %12 = arith.maximumf %10, %11 : vector<32x512xf32>
    %cst_8 = arith.constant 0.000000e+00 : f32
    %13 = vector.broadcast %cst_8 : f32 to vector<32x512xf32>
    %c0_9 = arith.constant 0 : index
    %c1 = arith.constant 1 : index
    %c0_10 = arith.constant 0 : index
    %14 = vector.load %arg2[%c0_9, %c1, %c0_10] : memref<2x20x32xf32, #tpu.memory_space<vmem>>, vector<2x16x32xf32>
    %15 = vector.shape_cast %14 : vector<2x16x32xf32> to vector<32x32xf32>
    %16 = arith.truncf %15 : vector<32x32xf32> to vector<32x32xbf16>
    %c0_11 = arith.constant 0 : index
    %c0_12 = arith.constant 0 : index
    %c0_13 = arith.constant 0 : index
    %17 = vector.load %arg5[%c0_11, %c0_12, %c0_13] : memref<3x32x512xbf16, #tpu.memory_space<vmem>>, vector<1x32x512xbf16>
    %18 = vector.shape_cast %17 : vector<1x32x512xbf16> to vector<32x512xbf16>
    %cst_14 = arith.constant dense<0.000000e+00> : vector<32x512xf32>
    %19 = tpu.matmul %16, %18, %cst_14 {dimension_numbers = #tpu.dot_dimension_numbers<[1], [0], [0], [1], [0, 0, 1, 1], [], []>} : vector<32x32xbf16>, vector<32x512xbf16>, vector<32x512xf32> -> vector<32x512xf32>
    %20 = arith.addf %13, %19 : vector<32x512xf32>
    %c0_15 = arith.constant 0 : index
    %c2_16 = arith.constant 2 : index
    %c0_17 = arith.constant 0 : index
    %21 = vector.load %arg2[%c0_15, %c2_16, %c0_17] : memref<2x20x32xf32, #tpu.memory_space<vmem>>, vector<2x16x32xf32>
    %22 = vector.shape_cast %21 : vector<2x16x32xf32> to vector<32x32xf32>
    %23 = arith.truncf %22 : vector<32x32xf32> to vector<32x32xbf16>
    %c1_18 = arith.constant 1 : index
    %c0_19 = arith.constant 0 : index
    %c0_20 = arith.constant 0 : index
    %24 = vector.load %arg5[%c1_18, %c0_19, %c0_20] : memref<3x32x512xbf16, #tpu.memory_space<vmem>>, vector<1x32x512xbf16>
    %25 = vector.shape_cast %24 : vector<1x32x512xbf16> to vector<32x512xbf16>
    %cst_21 = arith.constant dense<0.000000e+00> : vector<32x512xf32>
    %26 = tpu.matmul %23, %25, %cst_21 {dimension_numbers = #tpu.dot_dimension_numbers<[1], [0], [0], [1], [0, 0, 1, 1], [], []>} : vector<32x32xbf16>, vector<32x512xbf16>, vector<32x512xf32> -> vector<32x512xf32>
    %27 = arith.addf %20, %26 : vector<32x512xf32>
    %c0_22 = arith.constant 0 : index
    %c3 = arith.constant 3 : index
    %c0_23 = arith.constant 0 : index
    %28 = vector.load %arg2[%c0_22, %c3, %c0_23] : memref<2x20x32xf32, #tpu.memory_space<vmem>>, vector<2x16x32xf32>
    %29 = vector.shape_cast %28 : vector<2x16x32xf32> to vector<32x32xf32>
    %30 = arith.truncf %29 : vector<32x32xf32> to vector<32x32xbf16>
    %c2_24 = arith.constant 2 : index
    %c0_25 = arith.constant 0 : index
    %c0_26 = arith.constant 0 : index
    %31 = vector.load %arg5[%c2_24, %c0_25, %c0_26] : memref<3x32x512xbf16, #tpu.memory_space<vmem>>, vector<1x32x512xbf16>
    %32 = vector.shape_cast %31 : vector<1x32x512xbf16> to vector<32x512xbf16>
    %cst_27 = arith.constant dense<0.000000e+00> : vector<32x512xf32>
    %33 = tpu.matmul %30, %32, %cst_27 {dimension_numbers = #tpu.dot_dimension_numbers<[1], [0], [0], [1], [0, 0, 1, 1], [], []>} : vector<32x32xbf16>, vector<32x512xbf16>, vector<32x512xf32> -> vector<32x512xf32>
    %34 = arith.addf %27, %33 : vector<32x512xf32>
    %c0_28 = arith.constant 0 : index
    %c0_29 = arith.constant 0 : index
    %35 = vector.load %arg8[%c0_28, %c0_29] : memref<1x512xf32, #tpu.memory_space<vmem>>, vector<1x512xf32>
    %36 = vector.broadcast %35 : vector<1x512xf32> to vector<32x512xf32>
    %37 = arith.addf %34, %36 : vector<32x512xf32>
    %cst_30 = arith.constant 0.000000e+00 : f32
    %38 = vector.broadcast %cst_30 : f32 to vector<32x512xf32>
    %39 = arith.maximumf %37, %38 : vector<32x512xf32>
    %cst_31 = arith.constant 0.000000e+00 : f32
    %40 = vector.broadcast %cst_31 : f32 to vector<32x512xf32>
    %c0_32 = arith.constant 0 : index
    %c0_33 = arith.constant 0 : index
    %c0_34 = arith.constant 0 : index
    %41 = vector.load %arg3[%c0_32, %c0_33, %c0_34] : memref<2x20x32xf32, #tpu.memory_space<vmem>>, vector<2x16x32xf32>
    %42 = vector.shape_cast %41 : vector<2x16x32xf32> to vector<32x32xf32>
    %43 = arith.truncf %42 : vector<32x32xf32> to vector<32x32xbf16>
    %c0_35 = arith.constant 0 : index
    %c0_36 = arith.constant 0 : index
    %c0_37 = arith.constant 0 : index
    %44 = vector.load %arg6[%c0_35, %c0_36, %c0_37] : memref<5x32x512xbf16, #tpu.memory_space<vmem>>, vector<1x32x512xbf16>
    %45 = vector.shape_cast %44 : vector<1x32x512xbf16> to vector<32x512xbf16>
    %cst_38 = arith.constant dense<0.000000e+00> : vector<32x512xf32>
    %46 = tpu.matmul %43, %45, %cst_38 {dimension_numbers = #tpu.dot_dimension_numbers<[1], [0], [0], [1], [0, 0, 1, 1], [], []>} : vector<32x32xbf16>, vector<32x512xbf16>, vector<32x512xf32> -> vector<32x512xf32>
    %47 = arith.addf %40, %46 : vector<32x512xf32>
    %c0_39 = arith.constant 0 : index
    %c1_40 = arith.constant 1 : index
    %c0_41 = arith.constant 0 : index
    %48 = vector.load %arg3[%c0_39, %c1_40, %c0_41] : memref<2x20x32xf32, #tpu.memory_space<vmem>>, vector<2x16x32xf32>
    %49 = vector.shape_cast %48 : vector<2x16x32xf32> to vector<32x32xf32>
    %50 = arith.truncf %49 : vector<32x32xf32> to vector<32x32xbf16>
    %c1_42 = arith.constant 1 : index
    %c0_43 = arith.constant 0 : index
    %c0_44 = arith.constant 0 : index
    %51 = vector.load %arg6[%c1_42, %c0_43, %c0_44] : memref<5x32x512xbf16, #tpu.memory_space<vmem>>, vector<1x32x512xbf16>
    %52 = vector.shape_cast %51 : vector<1x32x512xbf16> to vector<32x512xbf16>
    %cst_45 = arith.constant dense<0.000000e+00> : vector<32x512xf32>
    %53 = tpu.matmul %50, %52, %cst_45 {dimension_numbers = #tpu.dot_dimension_numbers<[1], [0], [0], [1], [0, 0, 1, 1], [], []>} : vector<32x32xbf16>, vector<32x512xbf16>, vector<32x512xf32> -> vector<32x512xf32>
    %54 = arith.addf %47, %53 : vector<32x512xf32>
    %c0_46 = arith.constant 0 : index
    %c2_47 = arith.constant 2 : index
    %c0_48 = arith.constant 0 : index
    %55 = vector.load %arg3[%c0_46, %c2_47, %c0_48] : memref<2x20x32xf32, #tpu.memory_space<vmem>>, vector<2x16x32xf32>
    %56 = vector.shape_cast %55 : vector<2x16x32xf32> to vector<32x32xf32>
    %57 = arith.truncf %56 : vector<32x32xf32> to vector<32x32xbf16>
    %c2_49 = arith.constant 2 : index
    %c0_50 = arith.constant 0 : index
    %c0_51 = arith.constant 0 : index
    %58 = vector.load %arg6[%c2_49, %c0_50, %c0_51] : memref<5x32x512xbf16, #tpu.memory_space<vmem>>, vector<1x32x512xbf16>
    %59 = vector.shape_cast %58 : vector<1x32x512xbf16> to vector<32x512xbf16>
    %cst_52 = arith.constant dense<0.000000e+00> : vector<32x512xf32>
    %60 = tpu.matmul %57, %59, %cst_52 {dimension_numbers = #tpu.dot_dimension_numbers<[1], [0], [0], [1], [0, 0, 1, 1], [], []>} : vector<32x32xbf16>, vector<32x512xbf16>, vector<32x512xf32> -> vector<32x512xf32>
    %61 = arith.addf %54, %60 : vector<32x512xf32>
    %c0_53 = arith.constant 0 : index
    %c3_54 = arith.constant 3 : index
    %c0_55 = arith.constant 0 : index
    %62 = vector.load %arg3[%c0_53, %c3_54, %c0_55] : memref<2x20x32xf32, #tpu.memory_space<vmem>>, vector<2x16x32xf32>
    %63 = vector.shape_cast %62 : vector<2x16x32xf32> to vector<32x32xf32>
    %64 = arith.truncf %63 : vector<32x32xf32> to vector<32x32xbf16>
    %c3_56 = arith.constant 3 : index
    %c0_57 = arith.constant 0 : index
    %c0_58 = arith.constant 0 : index
    %65 = vector.load %arg6[%c3_56, %c0_57, %c0_58] : memref<5x32x512xbf16, #tpu.memory_space<vmem>>, vector<1x32x512xbf16>
    %66 = vector.shape_cast %65 : vector<1x32x512xbf16> to vector<32x512xbf16>
    %cst_59 = arith.constant dense<0.000000e+00> : vector<32x512xf32>
    %67 = tpu.matmul %64, %66, %cst_59 {dimension_numbers = #tpu.dot_dimension_numbers<[1], [0], [0], [1], [0, 0, 1, 1], [], []>} : vector<32x32xbf16>, vector<32x512xbf16>, vector<32x512xf32> -> vector<32x512xf32>
    %68 = arith.addf %61, %67 : vector<32x512xf32>
    %c0_60 = arith.constant 0 : index
    %c4 = arith.constant 4 : index
    %c0_61 = arith.constant 0 : index
    %69 = vector.load %arg3[%c0_60, %c4, %c0_61] : memref<2x20x32xf32, #tpu.memory_space<vmem>>, vector<2x16x32xf32>
    %70 = vector.shape_cast %69 : vector<2x16x32xf32> to vector<32x32xf32>
    %71 = arith.truncf %70 : vector<32x32xf32> to vector<32x32xbf16>
    %c4_62 = arith.constant 4 : index
    %c0_63 = arith.constant 0 : index
    %c0_64 = arith.constant 0 : index
    %72 = vector.load %arg6[%c4_62, %c0_63, %c0_64] : memref<5x32x512xbf16, #tpu.memory_space<vmem>>, vector<1x32x512xbf16>
    %73 = vector.shape_cast %72 : vector<1x32x512xbf16> to vector<32x512xbf16>
    %cst_65 = arith.constant dense<0.000000e+00> : vector<32x512xf32>
    %74 = tpu.matmul %71, %73, %cst_65 {dimension_numbers = #tpu.dot_dimension_numbers<[1], [0], [0], [1], [0, 0, 1, 1], [], []>} : vector<32x32xbf16>, vector<32x512xbf16>, vector<32x512xf32> -> vector<32x512xf32>
    %75 = arith.addf %68, %74 : vector<32x512xf32>
    %c0_66 = arith.constant 0 : index
    %c0_67 = arith.constant 0 : index
    %76 = vector.load %arg9[%c0_66, %c0_67] : memref<1x512xf32, #tpu.memory_space<vmem>>, vector<1x512xf32>
    %77 = vector.broadcast %76 : vector<1x512xf32> to vector<32x512xf32>
    %78 = arith.addf %75, %77 : vector<32x512xf32>
    %cst_68 = arith.constant 0.000000e+00 : f32
    %79 = vector.broadcast %cst_68 : f32 to vector<32x512xf32>
    %80 = arith.maximumf %78, %79 : vector<32x512xf32>
    %81 = vector.shape_cast %12 : vector<32x512xf32> to vector<2x16x512xf32>
    %82 = arith.truncf %81 : vector<2x16x512xf32> to vector<2x16x512xbf16>
    %c0_69 = arith.constant 0 : index
    %c0_70 = arith.constant 0 : index
    %c0_71 = arith.constant 0 : index
    %83 = vector.load %arg12[%c0_69, %c0_70, %c0_71] : memref<2x16x512xbf16, #tpu.memory_space<vmem>>, vector<2x16x512xbf16>
    tpu.vector_store %arg12[%c0_69, %c0_70, %c0_71], %82 {strides = array<i32>} : memref<2x16x512xbf16, #tpu.memory_space<vmem>>, vector<2x16x512xbf16>,
    %84 = vector.shape_cast %39 : vector<32x512xf32> to vector<2x16x512xf32>
    %85 = arith.truncf %84 : vector<2x16x512xf32> to vector<2x16x512xbf16>
    %c0_72 = arith.constant 0 : index
    %c0_73 = arith.constant 0 : index
    %c0_74 = arith.constant 0 : index
    %86 = vector.load %arg13[%c0_72, %c0_73, %c0_74] : memref<2x16x512xbf16, #tpu.memory_space<vmem>>, vector<2x16x512xbf16>
    tpu.vector_store %arg13[%c0_72, %c0_73, %c0_74], %85 {strides = array<i32>} : memref<2x16x512xbf16, #tpu.memory_space<vmem>>, vector<2x16x512xbf16>,
    %87 = vector.shape_cast %80 : vector<32x512xf32> to vector<2x16x512xf32>
    %88 = arith.truncf %87 : vector<2x16x512xf32> to vector<2x16x512xbf16>
    %c0_75 = arith.constant 0 : index
    %c0_76 = arith.constant 0 : index
    %c0_77 = arith.constant 0 : index
    %89 = vector.load %arg14[%c0_75, %c0_76, %c0_77] : memref<2x16x512xbf16, #tpu.memory_space<vmem>>, vector<2x16x512xbf16>
    tpu.vector_store %arg14[%c0_75, %c0_76, %c0_77], %88 {strides = array<i32>} : memref<2x16x512xbf16, #tpu.memory_space<vmem>>, vector<2x16x512xbf16>,
    %90 = arith.addf %12, %39 : vector<32x512xf32>
    %91 = arith.addf %90, %80 : vector<32x512xf32>
    %92 = vector.shape_cast %91 : vector<32x512xf32> to vector<2x16x512xf32>
    %c0_78 = arith.constant 0 : index
    %c0_79 = arith.constant 0 : index
    %c0_80 = arith.constant 0 : index
    %93 = vector.load %arg16[%c0_78, %c0_79, %c0_80] : memref<2x16x512xf32, #tpu.memory_space<vmem>>, vector<2x16x512xf32>
    tpu.vector_store %arg16[%c0_78, %c0_79, %c0_80], %92 {strides = array<i32>} : memref<2x16x512xf32, #tpu.memory_space<vmem>>, vector<2x16x512xf32>,
    %94 = arith.truncf %91 : vector<32x512xf32> to vector<32x512xbf16>
    %c0_81 = arith.constant 0 : index
    %c0_82 = arith.constant 0 : index
    %95 = vector.load %arg10[%c0_81, %c0_82] : memref<512x384xbf16, #tpu.memory_space<vmem>>, vector<512x384xbf16>
    %cst_83 = arith.constant dense<0.000000e+00> : vector<32x384xf32>
    %96 = tpu.matmul %94, %95, %cst_83 {dimension_numbers = #tpu.dot_dimension_numbers<[1], [0], [0], [1], [0, 0, 1, 1], [], []>} : vector<32x512xbf16>, vector<512x384xbf16>, vector<32x384xf32> -> vector<32x384xf32>
    %c0_84 = arith.constant 0 : index
    %c0_85 = arith.constant 0 : index
    %97 = vector.load %arg11[%c0_84, %c0_85] : memref<1x384xf32, #tpu.memory_space<vmem>>, vector<1x384xf32>
    %98 = vector.broadcast %97 : vector<1x384xf32> to vector<32x384xf32>
    %99 = arith.addf %96, %98 : vector<32x384xf32>
    %100 = vector.extract_strided_slice %99 {offsets = [0, 0], sizes = [32, 128], strides = [1, 1]} : vector<32x384xf32> to vector<32x128xf32>
    %101 = vector.shape_cast %100 : vector<32x128xf32> to vector<2x16x128xf32>
    %102 = vector.extract_strided_slice %99 {offsets = [0, 128], sizes = [32, 128], strides = [1, 1]} : vector<32x384xf32> to vector<32x128xf32>
    %103 = vector.shape_cast %102 : vector<32x128xf32> to vector<2x16x128xf32>
    %104 = vector.extract_strided_slice %99 {offsets = [0, 256], sizes = [32, 128], strides = [1, 1]} : vector<32x384xf32> to vector<32x128xf32>
    %105 = vector.shape_cast %104 : vector<32x128xf32> to vector<2x16x128xf32>
    %106 = arith.truncf %101 : vector<2x16x128xf32> to vector<2x16x128xbf16>
    %107 = arith.truncf %103 : vector<2x16x128xf32> to vector<2x16x128xbf16>
    "tpu.trace_start"() <{level = 10 : i32, message = "bqd,bkd->bqk"}> : () -> ()
    %cst_86 = arith.constant dense<0.000000e+00> : vector<2x16x16xf32>
    %108 = tpu.matmul %106, %107, %cst_86 {dimension_numbers = #tpu.dot_dimension_numbers<[2], [2], [1], [1], [0, 0, 0, 1, 1, 1], [0], [0]>} : vector<2x16x128xbf16>, vector<2x16x128xbf16>, vector<2x16x16xf32> -> vector<2x16x16xf32>
    "tpu.trace_stop"() : () -> ()
    %cst_87 = arith.constant 0.0883883461 : f32
    %109 = vector.broadcast %cst_87 : f32 to vector<2x16x16xf32>
    %110 = arith.mulf %108, %109 : vector<2x16x16xf32>
    %111 = tpu.iota {dimensions = array<i32: 2>} : vector<2x16x16xi32>
    %c0_88 = arith.constant 0 : index
    %c0_89 = arith.constant 0 : index
    %c0_90 = arith.constant 0 : index
    %112 = vector.load %arg0[%c0_88, %c0_89, %c0_90] : memref<2x1x1xi32, #tpu.memory_space<vmem>>, vector<2x1x1xi32>
    %113 = vector.broadcast %112 : vector<2x1x1xi32> to vector<2x16x16xi32>
    %114 = arith.cmpi slt, %111, %113 : vector<2x16x16xi32>
    %cst_91 = arith.constant -1.000000e+30 : f32
    %115 = vector.broadcast %cst_91 : f32 to vector<2x16x16xf32>
    %116 = arith.select %114, %110, %115 : vector<2x16x16xi1>, vector<2x16x16xf32>
    %cst_92 = arith.constant dense<0xFF800000> : vector<2x16xf32>
    %117 = vector.multi_reduction <maximumf>, %116, %cst_92 [2] : vector<2x16x16xf32> to vector<2x16xf32>
    %118 = vector.shape_cast %117 : vector<2x16xf32> to vector<2x16x1xf32>
    %119 = vector.broadcast %118 : vector<2x16x1xf32> to vector<2x16x16xf32>
    %120 = arith.subf %116, %119 : vector<2x16x16xf32>
    %121 = math.exp %120 : vector<2x16x16xf32>
    %cst_93 = arith.constant dense<0.000000e+00> : vector<2x16xf32>
    %122 = vector.multi_reduction <add>, %121, %cst_93 [2] : vector<2x16x16xf32> to vector<2x16xf32>
    %123 = vector.shape_cast %122 : vector<2x16xf32> to vector<2x16x1xf32>
    %124 = tpu.reciprocal %123 {approx = true} : vector<2x16x1xf32> -> vector<2x16x1xf32>
    %125 = vector.broadcast %124 : vector<2x16x1xf32> to vector<2x16x16xf32>
    %126 = arith.mulf %121, %125 : vector<2x16x16xf32>
    %127 = arith.truncf %126 : vector<2x16x16xf32> to vector<2x16x16xbf16>
    %128 = arith.truncf %105 : vector<2x16x128xf32> to vector<2x16x128xbf16>
    "tpu.trace_start"() <{level = 10 : i32, message = "bqk,bkd->bqd"}> : () -> ()
    %cst_94 = arith.constant dense<0.000000e+00> : vector<2x16x128xf32>
    %129 = tpu.matmul %127, %128, %cst_94 {dimension_numbers = #tpu.dot_dimension_numbers<[2], [1], [1], [2], [0, 0, 0, 1, 1, 2], [0], [0]>} : vector<2x16x16xbf16>, vector<2x16x128xbf16>, vector<2x16x128xf32> -> vector<2x16x128xf32>
    "tpu.trace_stop"() : () -> ()
    %130 = arith.addf %129, %105 : vector<2x16x128xf32>
    %c0_95 = arith.constant 0 : index
    %c0_96 = arith.constant 0 : index
    %c0_97 = arith.constant 0 : index
    %131 = vector.load %arg15[%c0_95, %c0_96, %c0_97] : memref<2x16x128xf32, #tpu.memory_space<vmem>>, vector<2x16x128xf32>
    tpu.vector_store %arg15[%c0_95, %c0_96, %c0_97], %130 {strides = array<i32>} : memref<2x16x128xf32, #tpu.memory_space<vmem>>, vector<2x16x128xf32>,
    return
  }
}

</mosaic_0001>

<bundles_post_ra>
// kernel: task_shared_forward.3
= control target key start
LH: loop header
LB: loop body
LE: loop exit
PB: predicated region body
PF: predicated region fallthrough
CT: control target
= control target key end

     0   :  { %s4829_s0 = inlined_call_operand.vmem [shape: s32[2,1,1], index: 0, kind: input, shape index: {}]   ;;  %s4830_s1 = inlined_call_operand.vmem [shape: f32[2,20,32], index: 1, kind: input, shape index: {}, may-alias: {1,2,3}]   ;;  %s4831_s2 = inlined_call_operand.vmem [shape: f32[2,20,32], index: 2, kind: input, shape index: {}, may-alias: {1,2,3}]   ;;  %s4832_s3 = inlined_call_operand.vmem [shape: f32[2,20,32], index: 3, kind: input, shape index: {}, may-alias: {1,2,3}]   ;;  %s4833_s4 = inlined_call_operand.hbm [shape: bf16[1,32,512], index: 4, kind: input, shape index: {}]   ;;  %s4834_s5 = inlined_call_operand.hbm [shape: bf16[3,32,512], index: 5, kind: input, shape index: {}]   ;;  %s4835_s6 = inlined_call_operand.hbm [shape: bf16[5,32,512], index: 6, kind: input, shape index: {}]   ;;  %s4836_s7 = inlined_call_operand.hbm [shape: f32[1,512], index: 7, kind: input, shape index: {}]   ;;  %s4837_s8 = inlined_call_operand.hbm [shape: f32[1,512], index: 8, kind: input, shape index: {}]   ;;  %s4838_s9 = inlined_call_operand.hbm [shape: f32[1,512], index: 9, kind: input, shape index: {}]   ;;  %s4839_s10 = inlined_call_operand.hbm [shape: bf16[512,384], index: 10, kind: input, shape index: {}]   ;;  %s4840_s11 = inlined_call_operand.hbm [shape: f32[1,384], index: 11, kind: input, shape index: {}]   ;;  %s4841_s12 = inlined_call_operand.vmem [shape: bf16[2,16,512], index: 12, kind: output, shape index: {0}]   ;;  %s4842_s13 = inlined_call_operand.vmem [shape: bf16[2,16,512], index: 13, kind: output, shape index: {1}]   ;;  %s4843_s14 = inlined_call_operand.vmem [shape: bf16[2,16,512], index: 14, kind: output, shape index: {2}]   ;;  %s4844_s15 = inlined_call_operand.vmem [shape: f32[2,16,128], index: 15, kind: output, shape index: {3}]   ;;  %s4845_s16 = inlined_call_operand.hbm [shape: f32[2,16,512], index: 16, kind: output, shape index: {4}]  }
   0x1   :  { %4879 = sst [smem:[#allocation52_spill]] %s4829_s0 }
   0x2   :  { %22 = vsyncpa [#allocation3], 0 }
   0x3   :  { %23 = vsyncpa [#allocation6], 0 }
   0x4   :  { %24 = vsyncpa [#allocation9], 0 }
   0x5   :  { %25 = vsyncpa [#allocation12], 0 }
   0x6   :  { %26 = vsyncpa [#allocation15], 0 }
   0x7   :  { %27 = vsyncpa [#allocation4], 0  ;;  %s4044_s21 = smov [#allocation5]   ;;  %s4045_s23 = smov [#allocation8]  }
   0x8   :  { %s53_s22 = sshll.u32 %s4044_s21, 4  ;;  %s78_s24 = sshll.u32 %s4045_s23, 4  ;;  %s54_s22 = int_to_ptr.vmem [resolvable:$true] %s53_s22  ;;  %s79_s24 = int_to_ptr.vmem [resolvable:$true] %s78_s24 }
   0x9   :  { %s3860_s25 = scalar_lea.vmem %s54_s22, 3072  ;;  %p3865_p1 = scmp.lt.s32.totalorder %s54_s22, %s54_s22 }
   0xa   :  { %p3861_p0 = scmp.ne.s32.totalorder %s54_s22, %s3860_s25  ;;  %p3866_p2 = scmp.lt.s32.totalorder %s3860_s25, %s3860_s25 }
   0xc   :  { %p3867_p3 = por %p3866_p2, %p3865_p1 }
   0xe   :  { %p3868_p4 = pnand %p3867_p3, %p3861_p0 }
  0x10   :  { %3871 = shalt.err (!%p3868_p4)
}
  0x11   :  { %s4046_s26 = smov 256   ;;  %s4047_s27 = smov 16  }
  0x12   :  { %59 = dma.hbm_to_vmem [thread:$0]  %s4834_s5, 3072, %s54_s22, [#allocation6], %s4046_s26, %s4046_s26, %s4047_s27  }
  0x13   :  { %s3880_s30 = scalar_lea.vmem %s79_s24, 64  ;;  %p3885_p6 = scmp.lt.s32.totalorder %s79_s24, %s79_s24 }
  0x14   :  { %p3881_p5 = scmp.ne.s32.totalorder %s79_s24, %s3880_s30  ;;  %p3886_p7 = scmp.lt.s32.totalorder %s3880_s30, %s3880_s30 }
  0x16   :  { %p3887_p8 = por %p3886_p7, %p3885_p6 }
  0x18   :  { %p3888_p9 = pnand %p3887_p8, %p3881_p5 }
  0x1a   :  { %3891 = shalt.err (!%p3888_p9)
}
  0x1b   :  { %81 = dma.hbm_to_vmem [thread:$0]  %s4836_s7, 64, %s79_s24, [#allocation9]  }
  0x1c   :  { %s4048_s18 = smov [#allocation11]   ;;  %s4049_s20 = smov [#allocation2]  }
  0x1d   :  { %s98_s19 = sshll.u32 %s4048_s18, 4  ;;  %s41_s21 = sshll.u32 %s4049_s20, 4  ;;  %s99_s19 = int_to_ptr.vmem [resolvable:$true] %s98_s19  ;;  %s42_s21 = int_to_ptr.vmem [resolvable:$true] %s41_s21 }
  0x1e   :  { %s3900_s23 = scalar_lea.vmem %s99_s19, 64  ;;  %p3905_p11 = scmp.lt.s32.totalorder %s99_s19, %s99_s19 }
  0x1f   :  { %p3901_p10 = scmp.ne.s32.totalorder %s99_s19, %s3900_s23  ;;  %p3906_p12 = scmp.lt.s32.totalorder %s3900_s23, %s3900_s23 }
  0x21   :  { %p3907_p13 = por %p3906_p12, %p3905_p11 }
  0x23   :  { %p3908_p0 = pnand %p3907_p13, %p3901_p10 }
  0x25   :  { %3911 = shalt.err (!%p3908_p0)
}
  0x26   :  { %101 = dma.hbm_to_vmem [thread:$0]  %s4838_s9, 64, %s99_s19, [#allocation12]  }
  0x27   :  { %s3920_s25 = scalar_lea.vmem %s42_s21, 1024  ;;  %p3925_p2 = scmp.lt.s32.totalorder %s42_s21, %s42_s21 }
  0x28   :  { %p3921_p1 = scmp.ne.s32.totalorder %s42_s21, %s3920_s25  ;;  %p3926_p3 = scmp.lt.s32.totalorder %s3920_s25, %s3920_s25 }
  0x2a   :  { %p3927_p4 = por %p3926_p3, %p3925_p2 }
  0x2c   :  { %p3928_p5 = pnand %p3927_p4, %p3921_p1 }
  0x2e   :  { %3931 = shalt.err (!%p3928_p5)
}
  0x2f   :  { %47 = dma.hbm_to_vmem [thread:$0]  %s4833_s4, 1024, %s42_s21, [#allocation3], %s4046_s26, %s4046_s26, %s4047_s27  }
  0x30   :  { %s4050_s28 = smov [#allocation7]   ;;  %s4051_s30 = smov [#allocation10]  }
  0x31   :  { %s65_s29 = sshll.u32 %s4050_s28, 4  ;;  %s88_s0 = sshll.u32 %s4051_s30, 4  ;;  %s66_s29 = int_to_ptr.vmem [resolvable:$true] %s65_s29  ;;  %s89_s0 = int_to_ptr.vmem [resolvable:$true] %s88_s0 }
  0x32   :  { %s3940_s9 = scalar_lea.vmem %s66_s29, 5120  ;;  %p3945_p7 = scmp.lt.s32.totalorder %s66_s29, %s66_s29 }
  0x33   :  { %p3941_p6 = scmp.ne.s32.totalorder %s66_s29, %s3940_s9  ;;  %p3946_p8 = scmp.lt.s32.totalorder %s3940_s9, %s3940_s9 }
  0x35   :  { %p3947_p9 = por %p3946_p8, %p3945_p7 }
  0x37   :  { %p3948_p10 = pnand %p3947_p9, %p3941_p6 }
  0x39   :  { %3951 = shalt.err (!%p3948_p10)
}
  0x3a   :  { %71 = dma.hbm_to_vmem [thread:$0]  %s4835_s6, 5120, %s66_s29, [#allocation6], %s4046_s26, %s4046_s26, %s4047_s27  }
  0x3b   :  { %s3960_s4 = scalar_lea.vmem %s89_s0, 64  ;;  %p3965_p12 = scmp.lt.s32.totalorder %s89_s0, %s89_s0 }
  0x3c   :  { %p3961_p11 = scmp.ne.s32.totalorder %s89_s0, %s3960_s4  ;;  %p3966_p13 = scmp.lt.s32.totalorder %s3960_s4, %s3960_s4 }
  0x3e   :  { %p3967_p0 = por %p3966_p13, %p3965_p12 }
  0x40   :  { %p3968_p1 = pnand %p3967_p0, %p3961_p11 }
  0x42   :  { %3971 = shalt.err (!%p3968_p1)
}
  0x43   :  { %91 = dma.hbm_to_vmem [thread:$0]  %s4837_s8, 64, %s89_s0, [#allocation9]  }
  0x44   :  { %s4052_s21 = smov [#allocation13]  }
  0x45   :  { %s107_s23 = sshll.u32 %s4052_s21, 4  ;;  %s108_s23 = int_to_ptr.vmem [resolvable:$true] %s107_s23 }
  0x46   :  { %s3980_s5 = scalar_lea.vmem %s108_s23, 12288  ;;  %p3985_p3 = scmp.lt.s32.totalorder %s108_s23, %s108_s23 }
  0x47   :  { %p3981_p2 = scmp.ne.s32.totalorder %s108_s23, %s3980_s5  ;;  %p3986_p4 = scmp.lt.s32.totalorder %s3980_s5, %s3980_s5 }
  0x49   :  { %p3987_p5 = por %p3986_p4, %p3985_p3 }
  0x4b   :  { %p3988_p6 = pnand %p3987_p5, %p3981_p2 }
  0x4d   :  { %3991 = shalt.err (!%p3988_p6)
}
  0x4e   :  { %s4053_s6 = smov 192   ;;  %s4054_s26 = smov 12  }
  0x4f   :  { %113 = dma.hbm_to_vmem [thread:$0]  %s4839_s10, 12288, %s108_s23, [#allocation12], %s4053_s6, %s4053_s6, %s4054_s26  }
  0x50   :  { %s4055_s25 = smov [#allocation14]  }
  0x51   :  { %s120_s7 = sshll.u32 %s4055_s25, 4  ;;  %s121_s7 = int_to_ptr.vmem [resolvable:$true] %s120_s7 }
  0x52   :  { %s4000_s8 = scalar_lea.vmem %s121_s7, 48  ;;  %s4004_s24 = scalar_lea.vmem %s121_s7, 64 }
  0x53   :  { %p4001_p7 = scmp.ne.s32.totalorder %s121_s7, %s4000_s8  ;;  %p4005_p8 = scmp.lt.s32.totalorder %s121_s7, %s121_s7 }
  0x54   :  { %p4006_p9 = scmp.lt.s32.totalorder %s4004_s24, %s4000_s8 }
  0x56   :  { %p4007_p10 = por %p4006_p9, %p4005_p8 }
  0x58   :  { %p4008_p11 = pnand %p4007_p10, %p4001_p7 }
  0x5a   :  { %4011 = shalt.err (!%p4008_p11)
}
  0x5b   :  { %123 = dma.hbm_to_vmem [thread:$0]  %s4840_s11, 48, %s121_s7, [#allocation15]  }
  0x5c   :  { %4032 = dma.done.wait [#allocation3], 1024  }
  0x5d   :  { %4033 = vsyncadd [#allocation3], 4294966272 }
  0x5e   :  { %4034 = dma.done.wait [#allocation6], 8192  }
  0x5f   :  { %4035 = vsyncadd [#allocation6], 4294959104 }
  0x60   :  { %4036 = dma.done.wait [#allocation9], 128  }
  0x61   :  { %4037 = vsyncadd [#allocation9], 4294967168 }
  0x62   :  { %4038 = dma.done.wait [#allocation12], 12352  }
  0x63   :  { %4039 = vsyncadd [#allocation12], 4294954944 }
  0x64   :  { %4040 = dma.done.wait [#allocation15], 48  }
  0x65   :  { %4041 = vsyncadd [#allocation15], 4294967248  ;;  %v4056_v0 = vmov 0   ;;  %v3600_v1 = vld [vmem:[#allocation2 + $0x24] ss:$16 sps:$4 sm:$0xff]   ;;  %v150_v10 = vld [vmem:[%s4830_s1 + $0xa] sm:$0xff] }
  0x66   :  { %264 = vmatprep.mubr.bf16.mxu0 %v4056_v0  ;;  %317 = vmatprep.mubr.bf16.mxu1 %v4056_v0  ;;  %v3602_v2 = vld [vmem:[#allocation2 + $0x2c] ss:$16 sps:$4 sm:$0xff]   ;;  %v3604_v3 = vld [vmem:[#allocation2 + $0x20] ss:$16 sps:$4 sm:$0xff]   ;;  %v3605_v4 = vld [vmem:[#allocation2 + $0x28] ss:$16 sps:$4 sm:$0xff]  }
  0x67   :  { %3599 = vset.pattern.permute.xlu0 %v4056_v0  ;;  %244 = vmatprep.subr.bf16.mxu0 %v3600_v1  ;;  %v3606_v5 = vld [vmem:[#allocation2 + $0x4] ss:$16 sps:$4 sm:$0xff]   ;;  %v3608_v6 = vld [vmem:[#allocation2 + $0xc] ss:$16 sps:$4 sm:$0xff]   ;;  %v3610_v7 = vld [vmem:[#allocation2] ss:$16 sps:$4 sm:$0xff]  }
  0x68   :  { %297 = vmatprep.subr.bf16.mxu1 %v3602_v2  ;;  %245 = vmatpush1.bf16.msra.mxu0 %v3604_v3  ;;  %v3611_v8 = vld [vmem:[#allocation2 + $0x8] ss:$16 sps:$4 sm:$0xff]   ;;  %v3614_v12 = vld [vmem:[#allocation5 + $0x64] ss:$16 sps:$4 sm:$0xff]   ;;  %vm225_vm0 = vcmask 261120   ;;  %vm4058_vm1 = vmmov 0  }
  0x69   :  { %298 = vmatpush1.bf16.msra.mxu1 %v3605_v4  ;;  %246 = vmatprep.subr.bf16.mxu0 %v3606_v5  ;;  %v149_v9 = vld [vmem:[%s4830_s1 + $0x2] sm:$0xff]  ;;  %v3617_v14 = vld [vmem:[#allocation5 + $0x6c] ss:$16 sps:$4 sm:$0xff]   ;;  %s4964_s27 = sld [smem:[#allocation52_spill]]  ;;  %vm3059_vm3 = vcmask 130048   ;;  %s4059_s7 = smov [#allocation16]  }
  0x6a   :  { %299 = vmatprep.subr.bf16.mxu1 %v3608_v6  ;;  %v153_v11 = vpack.c.bf16 %v150_v10, %v149_v9  ;;  %v3612_v13 = vld [vmem:[#allocation5 + $0x60] ss:$16 sps:$4 sm:$0xff]   ;;  %v3615_v15 = vld [vmem:[#allocation5 + $0x68] ss:$16 sps:$4 sm:$0xff]   ;;  %v3620_v16 = vld [vmem:[#allocation5 + $0x44] ss:$16 sps:$4 sm:$0xff]  }
  0x6b   :  { %v3623_v17 = vld [vmem:[#allocation5 + $0x4c] ss:$16 sps:$4 sm:$0xff]   ;;  %v152_v19 = vld [vmem:[%s4830_s1 + $0x22] sm:$0xff]  ;;  %s3213_s8 = sshll.u32 %s4059_s7, 4  ;;  %s3214_s8 = int_to_ptr.vmem [resolvable:$true] %s3213_s8 }
  0x6c   :  { %247 = vmatpush1.bf16.msra.mxu0 %v3610_v7  ;;  %v151_v18 = vld [vmem:[%s4830_s1 + $0x1a] sm:$0xff]  ;;  %v3626_v22 = vld [vmem:[#allocation5 + $0x24] ss:$16 sps:$4 sm:$0xff]   ;;  %v369_v26 = vld [vmem:[%s4831_s2 + $0xa] sm:$0xff]  ;;  %s4012_s24 = scalar_lea.vmem %s3214_s8, 2048  ;;  %p4017_p13 = scmp.lt.s32.totalorder %s3214_s8, %s3214_s8 }
  0x6d   :  { %300 = vmatpush1.bf16.msra.mxu1 %v3611_v8  ;;  %441 = vmatprep.subr.bf16.mxu0 %v3614_v12  ;;  %v3618_v20 = vld [vmem:[#allocation5 + $0x40] ss:$16 sps:$4 sm:$0xff]   ;;  %v3621_v21 = vld [vmem:[#allocation5 + $0x48] ss:$16 sps:$4 sm:$0xff]   ;;  %v154_v23 = vpack.c.bf16 %v152_v19, %v151_v18  ;;  %v3629_v24 = vld [vmem:[#allocation5 + $0x2c] ss:$16 sps:$4 sm:$0xff]   ;;  %p4013_p12 = scmp.ne.s32.totalorder %s3214_s8, %s4012_s24  ;;  %p4018_p0 = scmp.lt.s32.totalorder %s4012_s24, %s4012_s24 }
  0x6e   :  { %494 = vmatprep.subr.bf16.mxu1 %v3617_v14  ;;  %v368_v25 = vld [vmem:[%s4831_s2 + $0x2] sm:$0xff]  ;;  %v3635_v31 = vld [vmem:[#allocation5 + $0xc] ss:$16 sps:$4 sm:$0xff]  }
  0x6f   :  { %3245 = vmatmul.mubr.msk.bf16.vlgmr.msra.gmra.mxu0 %vm225_vm0, %v153_v11  ;;  %v372_v27 = vpack.c.bf16 %v369_v26, %v368_v25  ;;  %v3624_v28 = vld [vmem:[#allocation5 + $0x20] ss:$16 sps:$4 sm:$0xff]   ;;  %v3627_v29 = vld [vmem:[#allocation5 + $0x28] ss:$16 sps:$4 sm:$0xff]   ;;  %v3632_v30 = vld [vmem:[#allocation5 + $0x4] ss:$16 sps:$4 sm:$0xff]   ;;  %p4019_p1 = por %p4018_p0, %p4017_p13 }
  0x70   :  { %3247 = vmatmul.mubr.msk.bf16.vlgmr.msra.gmra.mxu1 %vm225_vm0, %v153_v11  ;;  %274 = vmatprep.mubr.bf16.mxu0 %v4056_v0  ;;  %v370_v32 = vld [vmem:[%s4831_s2 + $0x1a] sm:$0xff]  ;;  %v371_v33 = vld [vmem:[%s4831_s2 + $0x22] sm:$0xff]  ;;  %v688_v54 = vld [vmem:[%s4831_s2 + $0xb] sm:$0xff] }
  0x71   :  { %327 = vmatprep.mubr.bf16.mxu1 %v4056_v0  ;;  %442 = vmatpush1.bf16.msra.mxu0 %v3612_v13  ;;  %v3630_v34 = vld [vmem:[#allocation5] ss:$16 sps:$4 sm:$0xff]   ;;  %v3633_v35 = vld [vmem:[#allocation5 + $0x8] ss:$16 sps:$4 sm:$0xff]   ;;  %v3638_v36 = vld [vmem:[#allocation5 + $0xa4] ss:$16 sps:$4 sm:$0xff]   ;;  %v373_v38 = vpack.c.bf16 %v371_v33, %v370_v32  ;;  %p4020_p2 = pnand %p4019_p1, %p4013_p12 }
  0x72   :  { %495 = vmatpush1.bf16.msra.mxu1 %v3615_v15  ;;  %443 = vmatprep.subr.bf16.mxu0 %v3620_v16  ;;  %v3641_v37 = vld [vmem:[#allocation5 + $0xac] ss:$16 sps:$4 sm:$0xff]   ;;  %v354_v39 = vld [vmem:[%s4831_s2 + $0x1] sm:$0xff] }
  0x73   :  { %496 = vmatprep.subr.bf16.mxu1 %v3623_v17  ;;  %v355_v40 = vld [vmem:[%s4831_s2 + $0x9] sm:$0xff]  ;;  %v3644_v44 = vld [vmem:[#allocation5 + $0x84] ss:$16 sps:$4 sm:$0xff]   ;;  %v356_v46 = vld [vmem:[%s4831_s2 + $0x19] sm:$0xff] }
  0x74   :  { %v358_v41 = vpack.c.bf16 %v355_v40, %v354_v39  ;;  %v3636_v42 = vld [vmem:[#allocation5 + $0xa0] ss:$16 sps:$4 sm:$0xff]   ;;  %v3639_v43 = vld [vmem:[#allocation5 + $0xa8] ss:$16 sps:$4 sm:$0xff]   ;;  %v3647_v45 = vld [vmem:[#allocation5 + $0x8c] ss:$16 sps:$4 sm:$0xff]  }
  0x75   :  { %444 = vmatpush1.bf16.msra.mxu0 %v3618_v20  ;;  %v357_v47 = vld [vmem:[%s4831_s2 + $0x21] sm:$0xff]  ;;  %v3653_v51 = vld [vmem:[#allocation7 + $0x6c] ss:$16 sps:$4 sm:$0xff]  }
  0x76   :  { %497 = vmatpush1.bf16.msra.mxu1 %v3621_v21  ;;  %593 = vmatprep.subr.bf16.mxu0 %v3626_v22  ;;  %v3642_v48 = vld [vmem:[#allocation5 + $0x80] ss:$16 sps:$4 sm:$0xff]   ;;  %v3645_v49 = vld [vmem:[#allocation5 + $0x88] ss:$16 sps:$4 sm:$0xff]   ;;  %v3650_v50 = vld [vmem:[#allocation7 + $0x64] ss:$16 sps:$4 sm:$0xff]   ;;  %v359_v52 = vpack.c.bf16 %v357_v47, %v356_v46 }
  0x77   :  { %3246 = vmatmul.mubr.msk.bf16.gmra.mxu0 %vm225_vm0, %v154_v23  ;;  %646 = vmatprep.subr.bf16.mxu1 %v3629_v24  ;;  %v687_v53 = vld [vmem:[%s4831_s2 + $0x3] sm:$0xff]  ;;  %v689_v58 = vld [vmem:[%s4831_s2 + $0x1b] sm:$0xff]  ;;  %v1441_v47 = vld [vmem:[%s4832_s3 + $0xb] sm:$0xff] }
  0x78   :  { %3248 = vmatmul.mubr.msk.bf16.gmra.mxu1 %vm225_vm0, %v154_v23  ;;  %461 = vmatprep.mubr.bf16.mxu0 %v4056_v0  ;;  %v691_v55 = vpack.c.bf16 %v688_v54, %v687_v53  ;;  %v3648_v56 = vld [vmem:[#allocation7 + $0x60] ss:$16 sps:$4 sm:$0xff]   ;;  %v3651_v57 = vld [vmem:[#allocation7 + $0x68] ss:$16 sps:$4 sm:$0xff]   ;;  %v3656_v59 = vld [vmem:[#allocation7 + $0x44] ss:$16 sps:$4 sm:$0xff]  }
  0x79   :  { %514 = vmatprep.mubr.bf16.mxu1 %v4056_v0  ;;  %v3659_v60 = vld [vmem:[#allocation7 + $0x4c] ss:$16 sps:$4 sm:$0xff]   ;;  %v690_v61 = vld [vmem:[%s4831_s2 + $0x23] sm:$0xff] }
  0x7a   :  { %v3654_v62 = vld [vmem:[#allocation7 + $0x40] ss:$16 sps:$4 sm:$0xff]   ;;  %v3657_v63 = vld [vmem:[#allocation7 + $0x48] ss:$16 sps:$4 sm:$0xff]   ;;  %v3662_v1 = vld [vmem:[#allocation7 + $0x24] ss:$16 sps:$4 sm:$0xff]   ;;  %v692_v3 = vpack.c.bf16 %v690_v61, %v689_v58 }
  0x7b   :  { %v3665_v2 = vld [vmem:[#allocation7 + $0x2c] ss:$16 sps:$4 sm:$0xff]   ;;  %v938_v4 = vld [vmem:[%s4832_s3 + $0x1] sm:$0xff] }
  0x7c   :  { %v939_v5 = vld [vmem:[%s4832_s3 + $0x9] sm:$0xff]  ;;  %v3668_v9 = vld [vmem:[#allocation7 + $0x4] ss:$16 sps:$4 sm:$0xff]   ;;  %v940_v11 = vld [vmem:[%s4832_s3 + $0x19] sm:$0xff] }
  0x7d   :  { %v942_v6 = vpack.c.bf16 %v939_v5, %v938_v4  ;;  %v3660_v7 = vld [vmem:[#allocation7 + $0x20] ss:$16 sps:$4 sm:$0xff]   ;;  %v3663_v8 = vld [vmem:[#allocation7 + $0x28] ss:$16 sps:$4 sm:$0xff]   ;;  %v3671_v10 = vld [vmem:[#allocation7 + $0xc] ss:$16 sps:$4 sm:$0xff]  }
  0x7e   :  { %v941_v12 = vld [vmem:[%s4832_s3 + $0x21] sm:$0xff]  ;;  %v3677_v16 = vld [vmem:[#allocation7 + $0xac] ss:$16 sps:$4 sm:$0xff]  }
  0x7f   :  { %3257 = vmatmul.mubr.msk.bf16.vlgmr.msra.gmra.mxu0 %vm225_vm0, %v372_v27  ;;  %v3666_v13 = vld [vmem:[#allocation7] ss:$16 sps:$4 sm:$0xff]   ;;  %v3669_v14 = vld [vmem:[#allocation7 + $0x8] ss:$16 sps:$4 sm:$0xff]   ;;  %v3674_v15 = vld [vmem:[#allocation7 + $0xa4] ss:$16 sps:$4 sm:$0xff]   ;;  %v943_v17 = vpack.c.bf16 %v941_v12, %v940_v11 }
  0x80   :  { %3259 = vmatmul.mubr.msk.bf16.vlgmr.msra.gmra.mxu1 %vm225_vm0, %v372_v27  ;;  %471 = vmatprep.mubr.bf16.mxu0 %v4056_v0  ;;  %v924_v18 = vld [vmem:[%s4832_s3] sm:$0xff]  ;;  %v925_v19 = vld [vmem:[%s4832_s3 + $0x8] sm:$0xff]  ;;  %v926_v25 = vld [vmem:[%s4832_s3 + $0x18] sm:$0xff] }
  0x81   :  { %524 = vmatprep.mubr.bf16.mxu1 %v4056_v0  ;;  %594 = vmatpush1.bf16.msra.mxu0 %v3624_v28  ;;  %v928_v20 = vpack.c.bf16 %v925_v19, %v924_v18  ;;  %v3672_v21 = vld [vmem:[#allocation7 + $0xa0] ss:$16 sps:$4 sm:$0xff]   ;;  %v3675_v22 = vld [vmem:[#allocation7 + $0xa8] ss:$16 sps:$4 sm:$0xff]   ;;  %v3680_v23 = vld [vmem:[#allocation7 + $0x84] ss:$16 sps:$4 sm:$0xff]  }
  0x82   :  { %647 = vmatpush1.bf16.msra.mxu1 %v3627_v29  ;;  %595 = vmatprep.subr.bf16.mxu0 %v3632_v30  ;;  %v3683_v24 = vld [vmem:[#allocation7 + $0x8c] ss:$16 sps:$4 sm:$0xff]   ;;  %v927_v26 = vld [vmem:[%s4832_s3 + $0x20] sm:$0xff]  ;;  %v3681_v28 = vld [vmem:[#allocation7 + $0x88] ss:$16 sps:$4 sm:$0xff]  }
  0x83   :  { %648 = vmatprep.subr.bf16.mxu1 %v3635_v31  ;;  %v3678_v27 = vld [vmem:[#allocation7 + $0x80] ss:$16 sps:$4 sm:$0xff]   ;;  %v3686_v29 = vld [vmem:[#allocation7 + $0xe4] ss:$16 sps:$4 sm:$0xff]   ;;  %v3689_v30 = vld [vmem:[#allocation7 + $0xec] ss:$16 sps:$4 sm:$0xff]   ;;  %v929_v31 = vpack.c.bf16 %v927_v26, %v926_v25 }
  0x84   :  { %v1257_v32 = vld [vmem:[%s4832_s3 + $0x2] sm:$0xff]  ;;  %v1258_v33 = vld [vmem:[%s4832_s3 + $0xa] sm:$0xff]  ;;  %v1259_v39 = vld [vmem:[%s4832_s3 + $0x1a] sm:$0xff] }
  0x85   :  { %596 = vmatpush1.bf16.msra.mxu0 %v3630_v34  ;;  %v1261_v34 = vpack.c.bf16 %v1258_v33, %v1257_v32  ;;  %v1260_v40 = vld [vmem:[%s4832_s3 + $0x22] sm:$0xff]  ;;  %v3726_v12 = vld [vmem:[#allocation13 + $0x60] ss:$12 sps:$4 sm:$0xff]   ;;  %v4847_v32 = vlaneseq }
  0x86   :  { %649 = vmatpush1.bf16.msra.mxu1 %v3633_v35  ;;  %760 = vmatprep.subr.bf16.mxu0 %v3638_v36  ;;  %v3684_v35 = vld [vmem:[#allocation7 + $0xe0] ss:$16 sps:$4 sm:$0xff]   ;;  %v3687_v36 = vld [vmem:[#allocation7 + $0xe8] ss:$16 sps:$4 sm:$0xff]  }
  0x87   :  { %813 = vmatprep.subr.bf16.mxu1 %v3641_v37  ;;  %3258 = vmatmul.mubr.msk.bf16.gmra.mxu0 %vm225_vm0, %v373_v38  ;;  %v3692_v37 = vld [vmem:[#allocation7 + $0xc4] ss:$16 sps:$4 sm:$0xff]   ;;  %v1442_v53 = vld [vmem:[%s4832_s3 + $0x1b] sm:$0xff] }
  0x88   :  { %3260 = vmatmul.mubr.msk.bf16.gmra.mxu1 %vm225_vm0, %v373_v38  ;;  %613 = vmatprep.mubr.bf16.mxu0 %v4056_v0  ;;  %v3695_v38 = vld [vmem:[#allocation7 + $0xcc] ss:$16 sps:$4 sm:$0xff]   ;;  %v1440_v46 = vld [vmem:[%s4832_s3 + $0x3] sm:$0xff] }
  0x89   :  { %666 = vmatprep.mubr.bf16.mxu1 %v4056_v0  ;;  %v1443_v54 = vld [vmem:[%s4832_s3 + $0x23] sm:$0xff] }
  0x8a   :  { %v1623_v58 = vld [vmem:[%s4832_s3 + $0x4] sm:$0xff]  ;;  %v1625_v61 = vld [vmem:[%s4832_s3 + $0x1c] sm:$0xff] }
  0x8b   :  { %v3713_v4 = vld [vmem:[#allocation13 + $0x22c] ss:$12 sps:$4 sm:$0xff]   ;;  %v3716_v5 = vld [vmem:[#allocation13 + $0x94] ss:$12 sps:$4 sm:$0xff]   ;;  %v3725_v11 = vld [vmem:[#allocation13 + $0x1fc] ss:$12 sps:$4 sm:$0xff]  }
  0x8c   :  { %v3735_v18 = vld [vmem:[#allocation13 + $0x1c8] ss:$12 sps:$4 sm:$0xff]   ;;  %v3737_v19 = vld [vmem:[#allocation13 + $0x1cc] ss:$12 sps:$4 sm:$0xff]  }
  0x8d   :  { %v3746_v25 = vld [vmem:[#allocation13 + $0x1c] ss:$12 sps:$4 sm:$0xff]   ;;  %v3747_v26 = vld [vmem:[#allocation13 + $0x198] ss:$12 sps:$4 sm:$0xff]  }
  0x8e   :  { %v3756_v33 = vld [vmem:[#allocation13 + $0x168] ss:$12 sps:$4 sm:$0xff]  }
  0x8f   :  { %3269 = vmatmul.mubr.msk.bf16.vlgmr.msra.gmra.mxu0 %vm225_vm0, %v358_v41 }
  0x90   :  { %3271 = vmatmul.mubr.msk.bf16.vlgmr.msra.gmra.mxu1 %vm225_vm0, %v358_v41  ;;  %623 = vmatprep.mubr.bf16.mxu0 %v4056_v0  ;;  %v3690_v41 = vld [vmem:[#allocation7 + $0xc0] ss:$16 sps:$4 sm:$0xff]  }
  0x91   :  { %676 = vmatprep.mubr.bf16.mxu1 %v4056_v0  ;;  %761 = vmatpush1.bf16.msra.mxu0 %v3636_v42  ;;  %v3693_v42 = vld [vmem:[#allocation7 + $0xc8] ss:$16 sps:$4 sm:$0xff]  }
  0x92   :  { %814 = vmatpush1.bf16.msra.mxu1 %v3639_v43  ;;  %762 = vmatprep.subr.bf16.mxu0 %v3644_v44  ;;  %v3698_v43 = vld [vmem:[#allocation7 + $0x124] ss:$16 sps:$4 sm:$0xff]   ;;  %v3701_v44 = vld [vmem:[#allocation7 + $0x12c] ss:$16 sps:$4 sm:$0xff]  }
  0x93   :  { %815 = vmatprep.subr.bf16.mxu1 %v3647_v45  ;;  %v1262_v45 = vpack.c.bf16 %v1260_v40, %v1259_v39  ;;  %v3764_v39 = vld [vmem:[#allocation13 + $0x154] ss:$12 sps:$4 sm:$0xff]   ;;  %v3765_v40 = vld [vmem:[#allocation13 + $0x2d0] ss:$12 sps:$4 sm:$0xff]  }
  0x95   :  { %763 = vmatpush1.bf16.msra.mxu0 %v3642_v48  ;;  %v1444_v48 = vpack.c.bf16 %v1441_v47, %v1440_v46  ;;  %v3771_v46 = vld [vmem:[#allocation13 + $0x2b8] ss:$12 sps:$4 sm:$0xff]   ;;  %v163_v47 = vld [vmem:[#allocation8] sm:$0xf] }
  0x96   :  { %816 = vmatpush1.bf16.msra.mxu1 %v3645_v49  ;;  %1011 = vmatprep.subr.bf16.mxu0 %v3650_v50  ;;  %v3696_v49 = vld [vmem:[#allocation7 + $0x120] ss:$16 sps:$4 sm:$0xff]   ;;  %v3699_v50 = vld [vmem:[#allocation7 + $0x128] ss:$16 sps:$4 sm:$0xff]  }
  0x97   :  { %1064 = vmatprep.subr.bf16.mxu1 %v3653_v51  ;;  %3270 = vmatmul.mubr.msk.bf16.gmra.mxu0 %vm225_vm0, %v359_v52  ;;  %v3704_v51 = vld [vmem:[#allocation7 + $0x104] ss:$16 sps:$4 sm:$0xff]  }
  0x98   :  { %3272 = vmatmul.mubr.msk.bf16.gmra.mxu1 %vm225_vm0, %v359_v52  ;;  %780 = vmatprep.mubr.bf16.mxu0 %v4056_v0  ;;  %v3707_v52 = vld [vmem:[#allocation7 + $0x10c] ss:$16 sps:$4 sm:$0xff]  }
  0x99   :  { %833 = vmatprep.mubr.bf16.mxu1 %v4056_v0 }
  0x9f   :  { %3281 = vmatmul.mubr.msk.bf16.vlgmr.msra.gmra.mxu0 %vm225_vm0, %v691_v55 }
  0xa0   :  { %3283 = vmatmul.mubr.msk.bf16.vlgmr.msra.gmra.mxu1 %vm225_vm0, %v691_v55  ;;  %790 = vmatprep.mubr.bf16.mxu0 %v4056_v0  ;;  %v3702_v55 = vld [vmem:[#allocation7 + $0x100] ss:$16 sps:$4 sm:$0xff]  }
  0xa1   :  { %843 = vmatprep.mubr.bf16.mxu1 %v4056_v0  ;;  %1012 = vmatpush1.bf16.msra.mxu0 %v3648_v56  ;;  %v3705_v56 = vld [vmem:[#allocation7 + $0x108] ss:$16 sps:$4 sm:$0xff]  }
  0xa2   :  { %1065 = vmatpush1.bf16.msra.mxu1 %v3651_v57  ;;  %1013 = vmatprep.subr.bf16.mxu0 %v3656_v59  ;;  %v1445_v57 = vpack.c.bf16 %v1443_v54, %v1442_v53  ;;  %v1624_v59 = vld [vmem:[%s4832_s3 + $0xc] sm:$0xff] }
  0xa3   :  { %1066 = vmatprep.subr.bf16.mxu1 %v3659_v60  ;;  %v1627_v60 = vpack.c.bf16 %v1624_v59, %v1623_v58  ;;  %v3774_v53 = vld [vmem:[#allocation13 + $0x120] ss:$12 sps:$4 sm:$0xff]   ;;  %v3776_v54 = vld [vmem:[#allocation13 + $0x124] ss:$12 sps:$4 sm:$0xff]  }
  0xa5   :  { %1014 = vmatpush1.bf16.msra.mxu0 %v3654_v62  ;;  %v1626_v62 = vld [vmem:[%s4832_s3 + $0x24] sm:$0xff] }
  0xa6   :  { %1067 = vmatpush1.bf16.msra.mxu1 %v3657_v63  ;;  %1163 = vmatprep.subr.bf16.mxu0 %v3662_v1  ;;  %v1628_v63 = vpack.c.bf16 %v1626_v62, %v1625_v61  ;;  %v3708_v1 = vld [vmem:[#allocation13 + $0xa8] ss:$12 sps:$4 sm:$0xff]  }
  0xa7   :  { %1216 = vmatprep.subr.bf16.mxu1 %v3665_v2  ;;  %3282 = vmatmul.mubr.msk.bf16.gmra.mxu0 %vm225_vm0, %v692_v3  ;;  %v3710_v2 = vld [vmem:[#allocation13 + $0xac] ss:$12 sps:$4 sm:$0xff]  }
  0xa8   :  { %3284 = vmatmul.mubr.msk.bf16.gmra.mxu1 %vm225_vm0, %v692_v3  ;;  %1031 = vmatprep.mubr.bf16.mxu0 %v4056_v0  ;;  %v3711_v3 = vld [vmem:[#allocation13 + $0x228] ss:$12 sps:$4 sm:$0xff]  }
  0xa9   :  { %1084 = vmatprep.mubr.bf16.mxu1 %v4056_v0 }
  0xaf   :  { %3293 = vmatmul.mubr.msk.bf16.vlgmr.msra.gmra.mxu0 %vm225_vm0, %v942_v6 }
  0xb0   :  { %3295 = vmatmul.mubr.msk.bf16.vlgmr.msra.gmra.mxu1 %vm225_vm0, %v942_v6  ;;  %1041 = vmatprep.mubr.bf16.mxu0 %v4056_v0  ;;  %v3717_v6 = vld [vmem:[#allocation13 + $0x210] ss:$12 sps:$4 sm:$0xff]  }
  0xb1   :  { %1094 = vmatprep.mubr.bf16.mxu1 %v4056_v0  ;;  %1164 = vmatpush1.bf16.msra.mxu0 %v3660_v7  ;;  %v3719_v7 = vld [vmem:[#allocation13 + $0x214] ss:$12 sps:$4 sm:$0xff]  }
  0xb2   :  { %1217 = vmatpush1.bf16.msra.mxu1 %v3663_v8  ;;  %1165 = vmatprep.subr.bf16.mxu0 %v3668_v9  ;;  %v3720_v8 = vld [vmem:[#allocation13 + $0x78] ss:$12 sps:$4 sm:$0xff]   ;;  %v3722_v9 = vld [vmem:[#allocation13 + $0x7c] ss:$12 sps:$4 sm:$0xff]  }
  0xb3   :  { %1218 = vmatprep.subr.bf16.mxu1 %v3671_v10  ;;  %v3723_v10 = vld [vmem:[#allocation13 + $0x1f8] ss:$12 sps:$4 sm:$0xff]  }
  0xb5   :  { %1166 = vmatpush1.bf16.msra.mxu0 %v3666_v13  ;;  %v3728_v13 = vld [vmem:[#allocation13 + $0x64] ss:$12 sps:$4 sm:$0xff]  }
  0xb6   :  { %1219 = vmatpush1.bf16.msra.mxu1 %v3669_v14  ;;  %1330 = vmatprep.subr.bf16.mxu0 %v3674_v15  ;;  %v3729_v14 = vld [vmem:[#allocation13 + $0x1e0] ss:$12 sps:$4 sm:$0xff]   ;;  %v3731_v15 = vld [vmem:[#allocation13 + $0x1e4] ss:$12 sps:$4 sm:$0xff]  }
  0xb7   :  { %1383 = vmatprep.subr.bf16.mxu1 %v3677_v16  ;;  %3294 = vmatmul.mubr.msk.bf16.gmra.mxu0 %vm225_vm0, %v943_v17  ;;  %v3732_v16 = vld [vmem:[#allocation13 + $0x48] ss:$12 sps:$4 sm:$0xff]  }
  0xb8   :  { %3296 = vmatmul.mubr.msk.bf16.gmra.mxu1 %vm225_vm0, %v943_v17  ;;  %1183 = vmatprep.mubr.bf16.mxu0 %v4056_v0  ;;  %v3734_v17 = vld [vmem:[#allocation13 + $0x4c] ss:$12 sps:$4 sm:$0xff]  }
  0xb9   :  { %1236 = vmatprep.mubr.bf16.mxu1 %v4056_v0 }
  0xbf   :  { %3305 = vmatmul.mubr.msk.bf16.vlgmr.msra.gmra.mxu0 %vm225_vm0, %v928_v20 }
  0xc0   :  { %3307 = vmatmul.mubr.msk.bf16.vlgmr.msra.gmra.mxu1 %vm225_vm0, %v928_v20  ;;  %1193 = vmatprep.mubr.bf16.mxu0 %v4056_v0  ;;  %v3738_v20 = vld [vmem:[#allocation13 + $0x30] ss:$12 sps:$4 sm:$0xff]  }
  0xc1   :  { %1246 = vmatprep.mubr.bf16.mxu1 %v4056_v0  ;;  %1331 = vmatpush1.bf16.msra.mxu0 %v3672_v21  ;;  %v3740_v21 = vld [vmem:[#allocation13 + $0x34] ss:$12 sps:$4 sm:$0xff]  }
  0xc2   :  { %1384 = vmatpush1.bf16.msra.mxu1 %v3675_v22  ;;  %1332 = vmatprep.subr.bf16.mxu0 %v3680_v23  ;;  %v3741_v22 = vld [vmem:[#allocation13 + $0x1b0] ss:$12 sps:$4 sm:$0xff]   ;;  %v3743_v23 = vld [vmem:[#allocation13 + $0x1b4] ss:$12 sps:$4 sm:$0xff]  }
  0xc3   :  { %1385 = vmatprep.subr.bf16.mxu1 %v3683_v24  ;;  %v3744_v24 = vld [vmem:[#allocation13 + $0x18] ss:$12 sps:$4 sm:$0xff]  }
  0xc5   :  { %1333 = vmatpush1.bf16.msra.mxu0 %v3678_v27  ;;  %v3749_v27 = vld [vmem:[#allocation13 + $0x19c] ss:$12 sps:$4 sm:$0xff]  }
  0xc6   :  { %1386 = vmatpush1.bf16.msra.mxu1 %v3681_v28  ;;  %1513 = vmatprep.subr.bf16.mxu0 %v3686_v29  ;;  %v3750_v28 = vld [vmem:[#allocation13] ss:$12 sps:$4 sm:$0xff]   ;;  %v3752_v29 = vld [vmem:[#allocation13 + $0x4] ss:$12 sps:$4 sm:$0xff]  }
  0xc7   :  { %1566 = vmatprep.subr.bf16.mxu1 %v3689_v30  ;;  %3306 = vmatmul.mubr.msk.bf16.gmra.mxu0 %vm225_vm0, %v929_v31  ;;  %v3753_v30 = vld [vmem:[#allocation13 + $0x180] ss:$12 sps:$4 sm:$0xff]  }
  0xc8   :  { %3308 = vmatmul.mubr.msk.bf16.gmra.mxu1 %vm225_vm0, %v929_v31  ;;  %1350 = vmatprep.mubr.bf16.mxu0 %v4056_v0  ;;  %v3755_v31 = vld [vmem:[#allocation13 + $0x184] ss:$12 sps:$4 sm:$0xff]  }
  0xc9   :  { %1403 = vmatprep.mubr.bf16.mxu1 %v4056_v0 }
  0xcf   :  { %3317 = vmatmul.mubr.msk.bf16.vlgmr.msra.gmra.mxu0 %vm225_vm0, %v1261_v34 }
  0xd0   :  { %3319 = vmatmul.mubr.msk.bf16.vlgmr.msra.gmra.mxu1 %vm225_vm0, %v1261_v34  ;;  %1360 = vmatprep.mubr.bf16.mxu0 %v4056_v0  ;;  %v3758_v34 = vld [vmem:[#allocation13 + $0x16c] ss:$12 sps:$4 sm:$0xff]  }
  0xd1   :  { %1413 = vmatprep.mubr.bf16.mxu1 %v4056_v0  ;;  %1514 = vmatpush1.bf16.msra.mxu0 %v3684_v35  ;;  %v3759_v35 = vld [vmem:[#allocation13 + $0x2e8] ss:$12 sps:$4 sm:$0xff]  }
  0xd2   :  { %1567 = vmatpush1.bf16.msra.mxu1 %v3687_v36  ;;  %1515 = vmatprep.subr.bf16.mxu0 %v3692_v37  ;;  %v3761_v36 = vld [vmem:[#allocation13 + $0x2ec] ss:$12 sps:$4 sm:$0xff]   ;;  %v166_v37 = vshrl.u32 %v4847_v32, 7 }
  0xd3   :  { %1568 = vmatprep.subr.bf16.mxu1 %v3695_v38  ;;  %v3762_v38 = vld [vmem:[#allocation13 + $0x150] ss:$12 sps:$4 sm:$0xff]  }
  0xd5   :  { %1516 = vmatpush1.bf16.msra.mxu0 %v3690_v41  ;;  %v3767_v41 = vld [vmem:[#allocation13 + $0x2d4] ss:$12 sps:$4 sm:$0xff]  }
  0xd6   :  { %1569 = vmatpush1.bf16.msra.mxu1 %v3693_v42  ;;  %1696 = vmatprep.subr.bf16.mxu0 %v3698_v43  ;;  %v4362_v42 = vsub.s32 0, %v166_v37  ;;  %v4364_v43 = vsub.s32 2, %v166_v37 }
  0xd7   :  { %1749 = vmatprep.subr.bf16.mxu1 %v3701_v44  ;;  %3318 = vmatmul.mubr.msk.bf16.gmra.mxu0 %vm225_vm0, %v1262_v45  ;;  %v3768_v44 = vld [vmem:[#allocation13 + $0x138] ss:$12 sps:$4 sm:$0xff]  }
  0xd8   :  { %3320 = vmatmul.mubr.msk.bf16.gmra.mxu1 %vm225_vm0, %v1262_v45  ;;  %1533 = vmatprep.mubr.bf16.mxu0 %v4056_v0  ;;  %4880 = vst [vmem:[#allocation23_spill] sm:$0xff] %v4362_v42  ;;  %4881 = vst [vmem:[#allocation24_spill] sm:$0xff] %v4364_v43  ;;  %v3770_v45 = vld [vmem:[#allocation13 + $0x13c] ss:$12 sps:$4 sm:$0xff]  }
  0xd9   :  { %1586 = vmatprep.mubr.bf16.mxu1 %v4056_v0 }
  0xdf   :  { %3329 = vmatmul.mubr.msk.bf16.vlgmr.msra.gmra.mxu0 %vm225_vm0, %v1444_v48 }
  0xe0   :  { %3331 = vmatmul.mubr.msk.bf16.vlgmr.msra.gmra.mxu1 %vm225_vm0, %v1444_v48  ;;  %1543 = vmatprep.mubr.bf16.mxu0 %v4056_v0  ;;  %v3773_v48 = vld [vmem:[#allocation13 + $0x2bc] ss:$12 sps:$4 sm:$0xff]  }
  0xe1   :  { %1596 = vmatprep.mubr.bf16.mxu1 %v4056_v0  ;;  %1697 = vmatpush1.bf16.msra.mxu0 %v3696_v49  ;;  %v4366_v49 = vsub.s32 1, %v166_v37 }
  0xe2   :  { %1750 = vmatpush1.bf16.msra.mxu1 %v3699_v50  ;;  %1698 = vmatprep.subr.bf16.mxu0 %v3704_v51  ;;  %v4368_v50 = vsub.s32 3, %v166_v37  ;;  %v4371_v51 = vrot.slane %v163_v47, %v4362_v42  ;;  %v3797_v37 = vld [vmem:[#allocation13 + $0x25c] ss:$12 sps:$4 sm:$0xff]  }
  0xe3   :  { %1751 = vmatprep.subr.bf16.mxu1 %v3707_v52  ;;  %4882 = vst [vmem:[#allocation25_spill] sm:$0xff] %v4366_v49  ;;  %v4374_v52 = vrot.slane %v163_v47, %v4364_v43 }
  0xe4   :  { %4883 = vst [vmem:[#allocation26_spill] sm:$0xff] %v4368_v50  ;;  %v4380_v58 = vrot.slane %v163_v47, %v4368_v50 }
  0xe5   :  { %1699 = vmatpush1.bf16.msra.mxu0 %v3702_v55  ;;  %v3777_v55 = vld [vmem:[#allocation13 + $0x2a0] ss:$12 sps:$4 sm:$0xff]  }
  0xe6   :  { %1752 = vmatpush1.bf16.msra.mxu1 %v3705_v56  ;;  %2741 = vmatprep.subr.bf16.mxu0 %v3710_v2  ;;  %v3779_v56 = vld [vmem:[#allocation13 + $0x2a4] ss:$12 sps:$4 sm:$0xff]   ;;  %v3782_v2 = vld [vmem:[#allocation13 + $0x10c] ss:$12 sps:$4 sm:$0xff]  }
  0xe7   :  { %3330 = vmatmul.mubr.msk.bf16.gmra.mxu0 %vm225_vm0, %v1445_v57  ;;  %2794 = vmatprep.subr.bf16.mxu1 %v3713_v4 }
  0xe8   :  { %3332 = vmatmul.mubr.msk.bf16.gmra.mxu1 %vm225_vm0, %v1445_v57  ;;  %1716 = vmatprep.mubr.bf16.mxu0 %v4056_v0  ;;  %v4377_v57 = vrot.slane %v163_v47, %v4366_v49 }
  0xe9   :  { %1769 = vmatprep.mubr.bf16.mxu1 %v4056_v0 }
  0xef   :  { %3341 = vmatmul.mubr.msk.bf16.vlgmr.msra.gmra.mxu0 %vm225_vm0, %v1627_v60 }
  0xf0   :  { %3343 = vmatmul.mubr.msk.bf16.vlgmr.msra.gmra.mxu1 %vm225_vm0, %v1627_v60  ;;  %1726 = vmatprep.mubr.bf16.mxu0 %v4056_v0 }
  0xf1   :  { %1779 = vmatprep.mubr.bf16.mxu1 %v4056_v0  ;;  %2742 = vmatpush1.bf16.msra.mxu0 %v3708_v1  ;;  %v3714_v0 = vld [vmem:[#allocation13 + $0x90] ss:$12 sps:$4 sm:$0xff]  }
  0xf2   :  { %2795 = vmatpush1.bf16.msra.mxu1 %v3711_v3  ;;  %2743 = vmatprep.subr.bf16.mxu0 %v3716_v5  ;;  %v3785_v3 = vld [vmem:[#allocation13 + $0x28c] ss:$12 sps:$4 sm:$0xff]  }
  0xf3   :  { %2796 = vmatprep.subr.bf16.mxu1 %v3719_v7  ;;  %v3783_v7 = vld [vmem:[#allocation13 + $0x288] ss:$12 sps:$4 sm:$0xff]  }
  0xf5   :  { %2744 = vmatpush1.bf16.msra.mxu0 %v3714_v0 }
  0xf6   :  { %2797 = vmatpush1.bf16.msra.mxu1 %v3717_v6  ;;  %2745 = vmatprep.subr.bf16.mxu0 %v3722_v9  ;;  %v3780_v6 = vld [vmem:[#allocation13 + $0x108] ss:$12 sps:$4 sm:$0xff]  }
  0xf7   :  { %3342 = vmatmul.mubr.msk.bf16.gmra.mxu0 %vm225_vm0, %v1628_v63  ;;  %2798 = vmatprep.subr.bf16.mxu1 %v3725_v11 }
  0xf8   :  { %3344 = vmatmul.mubr.msk.bf16.gmra.mxu1 %vm225_vm0, %v1628_v63 }
  0xf9   :  { %2746 = vmatpush1.bf16.msra.mxu0 %v3720_v8 }
  0xfa   :  { %2799 = vmatpush1.bf16.msra.mxu1 %v3723_v10  ;;  %2747 = vmatprep.subr.bf16.mxu0 %v3728_v13 }
  0xfb   :  { %2800 = vmatprep.subr.bf16.mxu1 %v3731_v15 }
  0xfd   :  { %2748 = vmatpush1.bf16.msra.mxu0 %v3726_v12 }
  0xfe   :  { %2801 = vmatpush1.bf16.msra.mxu1 %v3729_v14  ;;  %2749 = vmatprep.subr.bf16.mxu0 %v3734_v17  ;;  %v3788_v17 = vld [vmem:[#allocation13 + $0xf4] ss:$12 sps:$4 sm:$0xff]  }
  0xff   :  { %2802 = vmatprep.subr.bf16.mxu1 %v3737_v19 }
 0x101   :  { %2750 = vmatpush1.bf16.msra.mxu0 %v3732_v16 }
 0x102   :  { %2803 = vmatpush1.bf16.msra.mxu1 %v3735_v18  ;;  %2751 = vmatprep.subr.bf16.mxu0 %v3740_v21  ;;  %v3791_v18 = vld [vmem:[#allocation13 + $0x274] ss:$12 sps:$4 sm:$0xff]   ;;  %v3786_v21 = vld [vmem:[#allocation13 + $0xf0] ss:$12 sps:$4 sm:$0xff]  }
 0x103   :  { %2804 = vmatprep.subr.bf16.mxu1 %v3743_v23 }
 0x105   :  { %2752 = vmatpush1.bf16.msra.mxu0 %v3738_v20 }
 0x106   :  { %2805 = vmatpush1.bf16.msra.mxu1 %v3741_v22  ;;  %2753 = vmatprep.subr.bf16.mxu0 %v3746_v25  ;;  %v3789_v22 = vld [vmem:[#allocation13 + $0x270] ss:$12 sps:$4 sm:$0xff]  }
 0x107   :  { %2806 = vmatprep.subr.bf16.mxu1 %v3749_v27 }
 0x109   :  { %2754 = vmatpush1.bf16.msra.mxu0 %v3744_v24 }
 0x10a   :  { %2807 = vmatpush1.bf16.msra.mxu1 %v3747_v26  ;;  %2755 = vmatprep.subr.bf16.mxu0 %v3752_v29 }
 0x10b   :  { %2808 = vmatprep.subr.bf16.mxu1 %v3755_v31 }
 0x10d   :  { %2756 = vmatpush1.bf16.msra.mxu0 %v3750_v28 }
 0x10e   :  { %2809 = vmatpush1.bf16.msra.mxu1 %v3753_v30  ;;  %2757 = vmatprep.subr.bf16.mxu0 %v3758_v34 }
 0x10f   :  { %2810 = vmatprep.subr.bf16.mxu1 %v3761_v36  ;;  %v3794_v36 = vld [vmem:[#allocation13 + $0xdc] ss:$12 sps:$4 sm:$0xff]  }
 0x111   :  { %2758 = vmatpush2.bf16.msra.mxu0 %v3756_v33 }
 0x112   :  { %2811 = vmatpush2.bf16.msra.mxu1 %v3759_v35  ;;  %2759 = vmatprep.subr.bf16.mxu0 %v3764_v39 }
 0x113   :  { %2812 = vmatprep.subr.bf16.mxu1 %v3767_v41  ;;  %v3792_v41 = vld [vmem:[#allocation13 + $0xd8] ss:$12 sps:$4 sm:$0xff]  }
 0x115   :  { %2760 = vmatpush2.bf16.msra.mxu0 %v3762_v38 }
 0x116   :  { %2813 = vmatpush2.bf16.msra.mxu1 %v3765_v40  ;;  %2761 = vmatprep.subr.bf16.mxu0 %v3770_v45 }
 0x117   :  { %2814 = vmatprep.subr.bf16.mxu1 %v3773_v48 }
 0x119   :  { %2762 = vmatpush2.bf16.msra.mxu0 %v3768_v44  ;;  %v3795_v44 = vld [vmem:[#allocation13 + $0x258] ss:$12 sps:$4 sm:$0xff]  }
 0x11a   :  { %2815 = vmatpush2.bf16.msra.mxu1 %v3771_v46  ;;  %2763 = vmatprep.subr.bf16.mxu0 %v3776_v54 }
 0x11b   :  { %2816 = vmatprep.subr.bf16.mxu1 %v3779_v56 }
 0x11d   :  { %2764 = vmatpush2.bf16.msra.mxu0 %v3774_v53 }
 0x11e   :  { %2817 = vmatpush2.bf16.msra.mxu1 %v3777_v55  ;;  %2765 = vmatprep.subr.bf16.mxu0 %v3782_v2 }
 0x11f   :  { %2818 = vmatprep.subr.bf16.mxu1 %v3785_v3  ;;  %v3800_v3 = vld [vmem:[#allocation13 + $0xc4] ss:$12 sps:$4 sm:$0xff]  }
 0x121   :  { %2766 = vmatpush2.bf16.msra.mxu0 %v3780_v6  ;;  %v3803_v6 = vld [vmem:[#allocation13 + $0x244] ss:$12 sps:$4 sm:$0xff]  }
 0x122   :  { %2819 = vmatpush2.bf16.msra.mxu1 %v3783_v7  ;;  %2767 = vmatprep.subr.bf16.mxu0 %v3788_v17 }
 0x123   :  { %2820 = vmatprep.subr.bf16.mxu1 %v3791_v18 }
 0x125   :  { %2768 = vmatpush2.bf16.msra.mxu0 %v3786_v21 }
 0x126   :  { %2821 = vmatpush2.bf16.msra.mxu1 %v3789_v22  ;;  %2769 = vmatprep.subr.bf16.mxu0 %v3794_v36 }
 0x127   :  { %2822 = vmatprep.subr.bf16.mxu1 %v3797_v37 }
 0x129   :  { %2770 = vmatpush2.bf16.msra.mxu0 %v3792_v41 }
 0x12a   :  { %2823 = vmatpush2.bf16.msra.mxu1 %v3795_v44  ;;  %2771 = vmatprep.subr.bf16.mxu0 %v3800_v3 }
 0x12b   :  { %2824 = vmatprep.subr.bf16.mxu1 %v3803_v6 }
 0x12f   :  { %v266_v59 = vpop.f32.mrf.mxu0 }
 0x130   :  { %v319_v60 = vpop.f32.mrf.mxu1  ;;  %v4383_v61 = vadd.f32 %v266_v59, %v4371_v51 }
 0x131   :  { %v4386_v62 = vadd.f32 %v319_v60, %v4374_v52  ;;  %v268_v63 = vpop.f32.mrf.mxu0 }
 0x132   :  { %v321_v1 = vpop.f32.mrf.mxu1  ;;  %v4390_v0 = vadd.f32 %v268_v63, %v4377_v57  ;;  %v4863_v8 = vmax.f32 %v4383_v61, 0.0 }
 0x133   :  { %v4862_v4 = vmax.f32 %v4386_v62, 0.0  ;;  %v4393_v5 = vadd.f32 %v321_v1, %v4380_v58  ;;  %v270_v9 = vpop.f32.mrf.mxu0 }
 0x134   :  { %v323_v10 = vpop.f32.mrf.mxu1  ;;  %v4861_v11 = vmax.f32 %v4390_v0, 0.0  ;;  %v4399_v13 = vadd.f32 %v270_v9, %v4371_v51 }
 0x135   :  { %v4860_v12 = vmax.f32 %v4393_v5, 0.0  ;;  %v4402_v14 = vadd.f32 %v323_v10, %v4374_v52  ;;  %v272_v15 = vpop.f32.mrf.mxu0  ;;  %v3798_v10 = vld [vmem:[#allocation13 + $0xc0] ss:$12 sps:$4 sm:$0xff]  }
 0x136   :  { %v325_v16 = vpop.f32.mrf.mxu1  ;;  %v3469_v19 = vpack.c.bf16 %v4861_v11, %v4863_v8  ;;  %v4413_v23 = vadd.f32 %v272_v15, %v4377_v57  ;;  %v4859_v27 = vmax.f32 %v4399_v13, 0.0  ;;  %v3801_v15 = vld [vmem:[#allocation13 + $0x240] ss:$12 sps:$4 sm:$0xff]   ;;  %2772 = vmatpush2.bf16.msra.mxu0 %v3798_v10 }
 0x137   :  { %v3470_v20 = vpack.c.bf16 %v4860_v12, %v4862_v4  ;;  %v4416_v24 = vadd.f32 %v325_v16, %v4380_v58  ;;  %v276_v25 = vpop.f32.mrf.mxu0  ;;  %v4858_v28 = vmax.f32 %v4402_v14, 0.0  ;;  %2825 = vmatpush2.bf16.msra.mxu1 %v3801_v15 }
 0x138   :  { %v329_v26 = vpop.f32.mrf.mxu1  ;;  %1908 = vst [vmem:[%s4841_s12] sm:$0xff] %v3469_v19  ;;  %v4427_v29 = vadd.f32 %v276_v25, %v4371_v51  ;;  %v4857_v31 = vmax.f32 %v4413_v23, 0.0 }
 0x139   :  { %1909 = vst [vmem:[%s4841_s12 + $0x8] sm:$0xff] %v3470_v20  ;;  %v4430_v30 = vadd.f32 %v329_v26, %v4374_v52  ;;  %v4856_v33 = vmax.f32 %v4416_v24, 0.0  ;;  %v278_v34 = vpop.f32.mrf.mxu0  ;;  %v3804_v26 = vld [vmem:[#allocation13 + $0x170] ss:$12 sps:$4 sm:$0xff]  }
 0x13a   :  { %v331_v35 = vpop.f32.mrf.mxu1  ;;  %v4436_v39 = vadd.f32 %v278_v34, %v4377_v57  ;;  %v3471_v45 = vpack.c.bf16 %v4857_v31, %v4859_v27  ;;  %v4855_v53 = vmax.f32 %v4427_v29, 0.0  ;;  %v3805_v34 = vld [vmem:[#allocation13 + $0x2f0] ss:$12 sps:$4 sm:$0xff]   ;;  %3493 = vmatprep.subr.bf16.mxu0 %v3804_v26 }
 0x13b   :  { %v4854_v38 = vmax.f32 %v4430_v30, 0.0  ;;  %v4439_v40 = vadd.f32 %v331_v35, %v4380_v58  ;;  %v3472_v46 = vpack.c.bf16 %v4856_v33, %v4858_v28  ;;  %v280_v47 = vpop.f32.mrf.mxu0  ;;  %3521 = vmatprep.subr.bf16.mxu1 %v3805_v34 }
 0x13c   :  { %v333_v48 = vpop.f32.mrf.mxu1  ;;  %v4853_v54 = vmax.f32 %v4436_v39, 0.0  ;;  %1910 = vst [vmem:[%s4841_s12 + $0x10] sm:$0xff] %v3471_v45  ;;  %v4459_v56 = vadd.f32 %v280_v47, %v4371_v51 }
 0x13d   :  { %v4852_v55 = vmax.f32 %v4439_v40, 0.0  ;;  %1911 = vst [vmem:[%s4841_s12 + $0x18] sm:$0xff] %v3472_v46  ;;  %v4462_v59 = vadd.f32 %v333_v48, %v4374_v52  ;;  %v282_v60 = vpop.f32.mrf.mxu0 }
 0x13e   :  { %4884 = vst [vmem:[#allocation27_spill] sm:$0xff] %v4459_v56  ;;  %v335_v63 = vpop.f32.mrf.mxu1  ;;  %v3473_v1 = vpack.c.bf16 %v4853_v54, %v4855_v53  ;;  %v4473_v51 = vadd.f32 %v282_v60, %v4377_v57  ;;  %v4851_v57 = vmax.f32 %v4459_v56, 0.0 }
 0x13f   :  { %4885 = vst [vmem:[#allocation28_spill] sm:$0xff] %v4462_v59  ;;  %v3474_v2 = vpack.c.bf16 %v4852_v55, %v4854_v38  ;;  %v4476_v52 = vadd.f32 %v335_v63, %v4380_v58  ;;  %v463_v7 = vpop.f32.mrf.mxu0  ;;  %v4850_v16 = vmax.f32 %v4462_v59, 0.0 }
 0x140   :  { %4886 = vst [vmem:[#allocation29_spill] sm:$0xff] %v4473_v51  ;;  %v516_v9 = vpop.f32.mrf.mxu1  ;;  %1912 = vst [vmem:[%s4841_s12 + $0x20] sm:$0xff] %v3473_v1  ;;  %v4849_v58 = vmax.f32 %v4473_v51, 0.0 }
 0x141   :  { %4887 = vst [vmem:[#allocation30_spill] sm:$0xff] %v4476_v52  ;;  %1913 = vst [vmem:[%s4841_s12 + $0x28] sm:$0xff] %v3474_v2  ;;  %v4848_v17 = vmax.f32 %v4476_v52, 0.0  ;;  %v465_v18 = vpop.f32.mrf.mxu0 }
 0x142   :  { %v518_v19 = vpop.f32.mrf.mxu1  ;;  %v3475_v20 = vpack.c.bf16 %v4849_v58, %v4851_v57 }
 0x143   :  { %v3476_v21 = vpack.c.bf16 %v4848_v17, %v4850_v16  ;;  %v467_v22 = vpop.f32.mrf.mxu0  ;;  %v870_v16 = vld [vmem:[#allocation10] sm:$0xf] }
 0x144   :  { %v520_v25 = vpop.f32.mrf.mxu1  ;;  %1914 = vst [vmem:[%s4841_s12 + $0x30] sm:$0xff] %v3475_v20  ;;  %v4503_v53 = vrot.slane %v870_v16, %v4362_v42  ;;  %v4506_v33 = vrot.slane %v870_v16, %v4364_v43  ;;  %v4509_v11 = vrot.slane %v870_v16, %v4366_v49  ;;  %v4512_v4 = vrot.slane %v870_v16, %v4368_v50 }
 0x145   :  { %1915 = vst [vmem:[%s4841_s12 + $0x38] sm:$0xff] %v3476_v21  ;;  %v469_v35 = vpop.f32.mrf.mxu0 }
 0x146   :  { %v522_v36 = vpop.f32.mrf.mxu1 }
 0x147   :  { %v473_v37 = vpop.f32.mrf.mxu0 }
 0x148   :  { %v526_v41 = vpop.f32.mrf.mxu1 }
 0x149   :  { %v475_v44 = vpop.f32.mrf.mxu0 }
 0x14a   :  { %v528_v45 = vpop.f32.mrf.mxu1 }
 0x14b   :  { %v477_v46 = vpop.f32.mrf.mxu0 }
 0x14c   :  { %v530_v47 = vpop.f32.mrf.mxu1 }
 0x14d   :  { %v479_v48 = vpop.f32.mrf.mxu0 }
 0x14e   :  { %v532_v60 = vpop.f32.mrf.mxu1 }
 0x14f   :  { %v615_v63 = vpop.f32.mrf.mxu0 }
 0x150   :  { %v668_v1 = vpop.f32.mrf.mxu1  ;;  %v616_v54 = vadd.f32 %v615_v63, %v463_v7 }
 0x151   :  { %v617_v2 = vpop.f32.mrf.mxu0  ;;  %v669_v38 = vadd.f32 %v668_v1, %v516_v9 }
 0x152   :  { %v670_v3 = vpop.f32.mrf.mxu1  ;;  %v618_v31 = vadd.f32 %v617_v2, %v465_v18 }
 0x153   :  { %v619_v6 = vpop.f32.mrf.mxu0  ;;  %v671_v28 = vadd.f32 %v670_v3, %v518_v19 }
 0x154   :  { %v672_v10 = vpop.f32.mrf.mxu1  ;;  %v620_v8 = vadd.f32 %v619_v6, %v467_v22 }
 0x155   :  { %v621_v15 = vpop.f32.mrf.mxu0  ;;  %v673_v52 = vadd.f32 %v672_v10, %v520_v25 }
 0x156   :  { %v674_v20 = vpop.f32.mrf.mxu1  ;;  %v622_v63 = vadd.f32 %v621_v15, %v469_v35 }
 0x157   :  { %v625_v21 = vpop.f32.mrf.mxu0  ;;  %v675_v1 = vadd.f32 %v674_v20, %v522_v36 }
 0x158   :  { %v678_v32 = vpop.f32.mrf.mxu1  ;;  %v626_v42 = vadd.f32 %v625_v21, %v473_v37 }
 0x159   :  { %v627_v26 = vpop.f32.mrf.mxu0  ;;  %v679_v51 = vadd.f32 %v678_v32, %v526_v41 }
 0x15a   :  { %v680_v34 = vpop.f32.mrf.mxu1  ;;  %v628_v49 = vadd.f32 %v627_v26, %v475_v44 }
 0x15b   :  { %v629_v17 = vpop.f32.mrf.mxu0  ;;  %v681_v56 = vadd.f32 %v680_v34, %v528_v45 }
 0x15c   :  { %v682_v58 = vpop.f32.mrf.mxu1  ;;  %v630_v16 = vadd.f32 %v629_v17, %v477_v46 }
 0x15d   :  { %v631_v57 = vpop.f32.mrf.mxu0  ;;  %v683_v50 = vadd.f32 %v682_v58, %v530_v47  ;;  %v4892_v47 = vmax.f32 %v4390_v0, 0.0 }
 0x15e   :  { %v684_v55 = vpop.f32.mrf.mxu1 }
 0x15f   :  { %v782_v27 = vpop.f32.mrf.mxu0  ;;  %v685_v35 = vadd.f32 %v684_v55, %v532_v60 }
 0x160   :  { %v835_v12 = vpop.f32.mrf.mxu1  ;;  %v854_v7 = vadd.f32 %v782_v27, %v616_v54  ;;  %v632_v54 = vadd.f32 %v631_v57, %v479_v48 }
 0x161   :  { %v856_v9 = vadd.f32 %v835_v12, %v669_v38  ;;  %v784_v43 = vpop.f32.mrf.mxu0 }
 0x162   :  { %v837_v59 = vpop.f32.mrf.mxu1  ;;  %v892_v18 = vadd.f32 %v4503_v53, %v854_v7  ;;  %v855_v2 = vadd.f32 %v784_v43, %v618_v31  ;;  %v4888_v43 = vmax.f32 %v4383_v61, 0.0  ;;  %v4890_v31 = vmax.f32 %v4386_v62, 0.0 }
 0x163   :  { %v894_v19 = vadd.f32 %v4506_v33, %v856_v9  ;;  %v857_v3 = vadd.f32 %v837_v59, %v671_v28  ;;  %v786_v22 = vpop.f32.mrf.mxu0  ;;  %v4894_v62 = vmax.f32 %v4393_v5, 0.0 }
 0x164   :  { %v839_v25 = vpop.f32.mrf.mxu1  ;;  %v908_v27 = vmax.f32 %v892_v18, 0.0  ;;  %v893_v38 = vadd.f32 %v4509_v11, %v855_v2  ;;  %v858_v36 = vadd.f32 %v786_v22, %v620_v8  ;;  %v4898_v18 = vmax.f32 %v4402_v14, 0.0 }
 0x165   :  { %v910_v12 = vmax.f32 %v894_v19, 0.0  ;;  %v895_v32 = vadd.f32 %v4512_v4, %v857_v3  ;;  %v860_v37 = vadd.f32 %v839_v25, %v673_v52  ;;  %v788_v41 = vpop.f32.mrf.mxu0 }
 0x166   :  { %v841_v6 = vpop.f32.mrf.mxu1  ;;  %v4520_v28 = vadd.f32 %v908_v27, %v4888_v43  ;;  %v909_v58 = vmax.f32 %v893_v38, 0.0  ;;  %v896_v44 = vadd.f32 %v4503_v53, %v858_v36  ;;  %v859_v57 = vadd.f32 %v788_v41, %v622_v63 }
 0x167   :  { %v4524_v59 = vadd.f32 %v910_v12, %v4890_v31  ;;  %v911_v17 = vmax.f32 %v895_v32, 0.0  ;;  %v898_v45 = vadd.f32 %v4506_v33, %v860_v37  ;;  %v861_v55 = vadd.f32 %v841_v6, %v675_v1  ;;  %v792_v8 = vpop.f32.mrf.mxu0 }
 0x168   :  { %4889 = vst [vmem:[#allocation31_spill] sm:$0xff] %v4520_v28  ;;  %v845_v52 = vpop.f32.mrf.mxu1  ;;  %v3477_v46 = vpack.c.bf16 %v909_v58, %v908_v27  ;;  %v4530_v61 = vadd.f32 %v909_v58, %v4892_v47  ;;  %v912_v10 = vmax.f32 %v896_v44, 0.0  ;;  %v897_v20 = vadd.f32 %v4509_v11, %v859_v57  ;;  %v4936_v28 = vld [vmem:[#allocation26_spill] sm:$0xff] }
 0x169   :  { %4891 = vst [vmem:[#allocation32_spill] sm:$0xff] %v4524_v59  ;;  %v3478_v48 = vpack.c.bf16 %v911_v17, %v910_v12  ;;  %v4534_v60 = vadd.f32 %v911_v17, %v4894_v62  ;;  %v914_v15 = vmax.f32 %v898_v45, 0.0  ;;  %v899_v21 = vadd.f32 %v4512_v4, %v861_v55  ;;  %v794_v26 = vpop.f32.mrf.mxu0 }
 0x16a   :  { %4893 = vst [vmem:[#allocation33_spill] sm:$0xff] %v4530_v61  ;;  %v847_v34 = vpop.f32.mrf.mxu1  ;;  %1964 = vst [vmem:[%s4842_s13] sm:$0xff] %v3477_v46  ;;  %v862_v0 = vadd.f32 %v792_v8, %v626_v42  ;;  %v864_v5 = vadd.f32 %v845_v52, %v679_v51  ;;  %v863_v7 = vadd.f32 %v794_v26, %v628_v49  ;;  %v4896_v63 = vmax.f32 %v4399_v13, 0.0  ;;  %v4912_v26 = vld [vmem:[#allocation27_spill] sm:$0xff]  ;;  %v4934_v61 = vld [vmem:[#allocation25_spill] sm:$0xff] }
 0x16b   :  { %4895 = vst [vmem:[#allocation34_spill] sm:$0xff] %v4534_v60  ;;  %1965 = vst [vmem:[%s4842_s13 + $0x8] sm:$0xff] %v3478_v48  ;;  %v865_v9 = vadd.f32 %v847_v34, %v681_v56  ;;  %v4550_v19 = vadd.f32 %v914_v15, %v4898_v18  ;;  %v913_v2 = vmax.f32 %v897_v20, 0.0  ;;  %v915_v3 = vmax.f32 %v899_v21, 0.0  ;;  %v796_v22 = vpop.f32.mrf.mxu0  ;;  %v4918_v18 = vld [vmem:[#allocation29_spill] sm:$0xff] }
 0x16c   :  { %v4546_v1 = vadd.f32 %v912_v10, %v4896_v63  ;;  %v849_v25 = vpop.f32.mrf.mxu1  ;;  %v900_v27 = vadd.f32 %v4503_v53, %v862_v0  ;;  %v902_v12 = vadd.f32 %v4506_v33, %v864_v5  ;;  %v901_v42 = vadd.f32 %v4509_v11, %v863_v7  ;;  %v4915_v5 = vld [vmem:[#allocation28_spill] sm:$0xff] }
 0x16d   :  { %4899 = vst [vmem:[#allocation36_spill] sm:$0xff] %v4550_v19  ;;  %v903_v49 = vadd.f32 %v4512_v4, %v865_v9  ;;  %v3479_v56 = vpack.c.bf16 %v913_v2, %v912_v10  ;;  %v4900_v13 = vmax.f32 %v4413_v23, 0.0  ;;  %v3480_v14 = vpack.c.bf16 %v915_v3, %v914_v15  ;;  %v798_v36 = vpop.f32.mrf.mxu0 }
 0x16e   :  { %4897 = vst [vmem:[#allocation35_spill] sm:$0xff] %v4546_v1  ;;  %v4902_v38 = vmax.f32 %v4416_v24, 0.0  ;;  %v851_v37 = vpop.f32.mrf.mxu1  ;;  %v916_v41 = vmax.f32 %v900_v27, 0.0  ;;  %v918_v6 = vmax.f32 %v902_v12, 0.0  ;;  %v917_v43 = vmax.f32 %v901_v42, 0.0  ;;  %v4932_v1 = vld [vmem:[#allocation24_spill] sm:$0xff] }
 0x16f   :  { %v4558_v51 = vadd.f32 %v913_v2, %v4900_v13  ;;  %v919_v31 = vmax.f32 %v903_v49, 0.0  ;;  %1966 = vst [vmem:[%s4842_s13 + $0x10] sm:$0xff] %v3479_v56  ;;  %1967 = vst [vmem:[%s4842_s13 + $0x18] sm:$0xff] %v3480_v14  ;;  %v866_v23 = vadd.f32 %v796_v22, %v630_v16  ;;  %v868_v58 = vadd.f32 %v849_v25, %v683_v50  ;;  %v4570_v44 = vpop.f32.mrf.mxu0  ;;  %v4921_v25 = vld [vmem:[#allocation30_spill] sm:$0xff] }
 0x170   :  { %v4562_v32 = vadd.f32 %v915_v3, %v4902_v38  ;;  %v867_v17 = vadd.f32 %v798_v36, %v632_v54  ;;  %v869_v24 = vadd.f32 %v851_v37, %v685_v35  ;;  %v4572_v45 = vpop.f32.mrf.mxu1  ;;  %v4904_v57 = vmax.f32 %v4427_v29, 0.0 }
 0x171   :  { %4901 = vst [vmem:[#allocation37_spill] sm:$0xff] %v4558_v51  ;;  %v4906_v8 = vmax.f32 %v4430_v30, 0.0  ;;  %v3481_v46 = vpack.c.bf16 %v917_v43, %v916_v41  ;;  %v4908_v47 = vmax.f32 %v4436_v39, 0.0  ;;  %v3482_v50 = vpack.c.bf16 %v919_v31, %v918_v6  ;;  %v4592_v62 = vpop.f32.mrf.mxu0  ;;  %v4930_v51 = vld [vmem:[#allocation23_spill] sm:$0xff] }
 0x172   :  { %4903 = vst [vmem:[#allocation38_spill] sm:$0xff] %v4562_v32  ;;  %v4576_v55 = vadd.f32 %v916_v41, %v4904_v57  ;;  %v4910_v16 = vmax.f32 %v4439_v40, 0.0  ;;  %v904_v35 = vadd.f32 %v4503_v53, %v866_v23  ;;  %v906_v29 = vadd.f32 %v4506_v33, %v868_v58  ;;  %v4594_v10 = vpop.f32.mrf.mxu1 }
 0x173   :  { %v4580_v52 = vadd.f32 %v918_v6, %v4906_v8  ;;  %v4584_v48 = vadd.f32 %v917_v43, %v4908_v47  ;;  %1968 = vst [vmem:[%s4842_s13 + $0x20] sm:$0xff] %v3481_v46  ;;  %v905_v30 = vadd.f32 %v4509_v11, %v867_v17  ;;  %v907_v39 = vadd.f32 %v4512_v4, %v869_v24  ;;  %v4604_v15 = vpop.f32.mrf.mxu0 }
 0x174   :  { %4905 = vst [vmem:[#allocation39_spill] sm:$0xff] %v4576_v55  ;;  %v4588_v54 = vadd.f32 %v919_v31, %v4910_v16  ;;  %1969 = vst [vmem:[%s4842_s13 + $0x28] sm:$0xff] %v3482_v50  ;;  %v920_v40 = vmax.f32 %v904_v35, 0.0  ;;  %v922_v53 = vmax.f32 %v906_v29, 0.0  ;;  %v4606_v33 = vpop.f32.mrf.mxu1  ;;  %v4913_v34 = vmax.f32 %v4912_v26, 0.0 }
 0x175   :  { %4907 = vst [vmem:[#allocation40_spill] sm:$0xff] %v4580_v52  ;;  %4909 = vst [vmem:[#allocation41_spill] sm:$0xff] %v4584_v48  ;;  %v921_v20 = vmax.f32 %v905_v30, 0.0  ;;  %v923_v21 = vmax.f32 %v907_v39, 0.0  ;;  %v4916_v11 = vmax.f32 %v4915_v5, 0.0  ;;  %v4616_v4 = vpop.f32.mrf.mxu0  ;;  %v4919_v2 = vmax.f32 %v4918_v18, 0.0 }
 0x176   :  { %4911 = vst [vmem:[#allocation42_spill] sm:$0xff] %v4588_v54  ;;  %v4610_v0 = vadd.f32 %v920_v40, %v4913_v34  ;;  %v4618_v9 = vpop.f32.mrf.mxu1  ;;  %v4922_v27 = vmax.f32 %v4921_v25, 0.0  ;;  %v1806_v52 = vld [vmem:[#allocation11] sm:$0xf] }
 0x177   :  { %v4614_v7 = vadd.f32 %v922_v53, %v4916_v11  ;;  %v3483_v63 = vpack.c.bf16 %v921_v20, %v920_v40  ;;  %v4622_v3 = vadd.f32 %v921_v20, %v4919_v2  ;;  %v3484_v22 = vpack.c.bf16 %v923_v21, %v922_v53  ;;  %v4628_v42 = vpop.f32.mrf.mxu0 }
 0x178   :  { %4914 = vst [vmem:[#allocation27_spill] sm:$0xff] %v4610_v0  ;;  %v4626_v12 = vadd.f32 %v923_v21, %v4922_v27  ;;  %v4630_v49 = vpop.f32.mrf.mxu1  ;;  %v4651_v19 = vrot.slane %v1806_v52, %v4930_v51  ;;  %v4654_v60 = vrot.slane %v1806_v52, %v4932_v1  ;;  %v4657_v59 = vrot.slane %v1806_v52, %v4934_v61 }
 0x179   :  { %4917 = vst [vmem:[#allocation28_spill] sm:$0xff] %v4614_v7  ;;  %4920 = vst [vmem:[#allocation29_spill] sm:$0xff] %v4622_v3  ;;  %v4638_v56 = vpop.f32.mrf.mxu0 }
 0x17a   :  { %4923 = vst [vmem:[#allocation30_spill] sm:$0xff] %v4626_v12  ;;  %1970 = vst [vmem:[%s4842_s13 + $0x30] sm:$0xff] %v3483_v63  ;;  %v4640_v13 = vpop.f32.mrf.mxu1 }
 0x17b   :  { %1971 = vst [vmem:[%s4842_s13 + $0x38] sm:$0xff] %v3484_v22  ;;  %4924 = vst [vmem:[#allocation43_spill] sm:$0xff] %v4638_v56  ;;  %v4642_v14 = vpop.f32.mrf.mxu0 }
 0x17c   :  { %4925 = vst [vmem:[#allocation44_spill] sm:$0xff] %v4640_v13  ;;  %4926 = vst [vmem:[#allocation45_spill] sm:$0xff] %v4642_v14  ;;  %v4644_v38 = vpop.f32.mrf.mxu1 }
 0x17d   :  { %4927 = vst [vmem:[#allocation46_spill] sm:$0xff] %v4644_v38  ;;  %v4646_v36 = vpop.f32.mrf.mxu0  ;;  %4931 = vst [vmem:[#allocation49_spill] sm:$0xff] %v4651_v19 }
 0x17e   :  { %4928 = vst [vmem:[#allocation47_spill] sm:$0xff] %v4646_v36  ;;  %v4648_v37 = vpop.f32.mrf.mxu1  ;;  %4933 = vst [vmem:[#allocation50_spill] sm:$0xff] %v4654_v60 }
 0x17f   :  { %4929 = vst [vmem:[#allocation48_spill] sm:$0xff] %v4648_v37  ;;  %v1185_v41 = vpop.f32.mrf.mxu0  ;;  %4935 = vst [vmem:[#allocation51_spill] sm:$0xff] %v4657_v59  ;;  %v4660_v37 = vrot.slane %v1806_v52, %v4936_v28 }
 0x180   :  { %v1238_v6 = vpop.f32.mrf.mxu1  ;;  %v1186_v36 = vadd.f32 %v1185_v41, %v4570_v44 }
 0x181   :  { %v1187_v43 = vpop.f32.mrf.mxu0  ;;  %4937 = vst [vmem:[#allocation26_spill] sm:$0xff] %v4660_v37  ;;  %v1239_v38 = vadd.f32 %v1238_v6, %v4572_v45 }
 0x182   :  { %v1240_v31 = vpop.f32.mrf.mxu1  ;;  %v1188_v14 = vadd.f32 %v1187_v43, %v4592_v62  ;;  %v4938_v52 = vld [vmem:[#allocation43_spill] sm:$0xff] }
 0x183   :  { %v1189_v23 = vpop.f32.mrf.mxu0  ;;  %v1241_v13 = vadd.f32 %v1240_v31, %v4594_v10  ;;  %v4939_v41 = vld [vmem:[#allocation44_spill] sm:$0xff]  ;;  %v4940_v43 = vld [vmem:[#allocation45_spill] sm:$0xff] }
 0x184   :  { %v1242_v58 = vpop.f32.mrf.mxu1  ;;  %v1190_v19 = vadd.f32 %v1189_v23, %v4604_v15  ;;  %v4941_v37 = vld [vmem:[#allocation46_spill] sm:$0xff] }
 0x185   :  { %v1191_v17 = vpop.f32.mrf.mxu0  ;;  %v1243_v1 = vadd.f32 %v1242_v58, %v4606_v33  ;;  %v4942_v23 = vld [vmem:[#allocation47_spill] sm:$0xff] }
 0x186   :  { %v1244_v24 = vpop.f32.mrf.mxu1  ;;  %v1192_v61 = vadd.f32 %v1191_v17, %v4616_v4  ;;  %v4943_v58 = vld [vmem:[#allocation48_spill] sm:$0xff] }
 0x187   :  { %v1195_v57 = vpop.f32.mrf.mxu0  ;;  %v1245_v59 = vadd.f32 %v1244_v24, %v4618_v9 }
 0x188   :  { %v1248_v8 = vpop.f32.mrf.mxu1  ;;  %v1196_v28 = vadd.f32 %v1195_v57, %v4628_v42 }
 0x189   :  { %v1197_v46 = vpop.f32.mrf.mxu0  ;;  %v1249_v44 = vadd.f32 %v1248_v8, %v4630_v49 }
 0x18a   :  { %v1250_v47 = vpop.f32.mrf.mxu1  ;;  %v1198_v45 = vadd.f32 %v1197_v46, %v4938_v52 }
 0x18b   :  { %v1199_v50 = vpop.f32.mrf.mxu0  ;;  %v1251_v62 = vadd.f32 %v1250_v47, %v4939_v41 }
 0x18c   :  { %v1252_v16 = vpop.f32.mrf.mxu1  ;;  %v1200_v31 = vadd.f32 %v1199_v50, %v4940_v43 }
 0x18d   :  { %v1201_v35 = vpop.f32.mrf.mxu0  ;;  %v1253_v15 = vadd.f32 %v1252_v16, %v4941_v37 }
 0x18e   :  { %v1254_v29 = vpop.f32.mrf.mxu1  ;;  %v1202_v33 = vadd.f32 %v1201_v35, %v4942_v23 }
 0x18f   :  { %v1352_v30 = vpop.f32.mrf.mxu0  ;;  %v1255_v4 = vadd.f32 %v1254_v29, %v4943_v58 }
 0x190   :  { %v1405_v39 = vpop.f32.mrf.mxu1  ;;  %v1424_v17 = vadd.f32 %v1352_v30, %v1186_v36 }
 0x191   :  { %v1354_v40 = vpop.f32.mrf.mxu0  ;;  %v1426_v9 = vadd.f32 %v1405_v39, %v1239_v38 }
 0x192   :  { %v1407_v53 = vpop.f32.mrf.mxu1  ;;  %v1425_v24 = vadd.f32 %v1354_v40, %v1188_v14 }
 0x193   :  { %v1356_v20 = vpop.f32.mrf.mxu0  ;;  %v1427_v42 = vadd.f32 %v1407_v53, %v1241_v13 }
 0x194   :  { %v1409_v21 = vpop.f32.mrf.mxu1  ;;  %v1428_v8 = vadd.f32 %v1356_v20, %v1190_v19 }
 0x195   :  { %v1358_v26 = vpop.f32.mrf.mxu0  ;;  %v1430_v46 = vadd.f32 %v1409_v21, %v1243_v1 }
 0x196   :  { %v1411_v34 = vpop.f32.mrf.mxu1  ;;  %v1429_v52 = vadd.f32 %v1358_v26, %v1192_v61 }
 0x197   :  { %v1362_v5 = vpop.f32.mrf.mxu0  ;;  %v1431_v47 = vadd.f32 %v1411_v34, %v1245_v59 }
 0x198   :  { %v1415_v11 = vpop.f32.mrf.mxu1  ;;  %v1432_v41 = vadd.f32 %v1362_v5, %v1196_v28  ;;  %v4944_v5 = vld [vmem:[#allocation49_spill] sm:$0xff] }
 0x199   :  { %v1364_v63 = vpop.f32.mrf.mxu0  ;;  %v1434_v60 = vadd.f32 %v1415_v11, %v1249_v44 }
 0x19a   :  { %v1417_v18 = vpop.f32.mrf.mxu1  ;;  %v1433_v43 = vadd.f32 %v1364_v63, %v1198_v45 }
 0x19b   :  { %v1366_v2 = vpop.f32.mrf.mxu0  ;;  %v1435_v50 = vadd.f32 %v1417_v18, %v1251_v62 }
 0x19c   :  { %v1419_v22 = vpop.f32.mrf.mxu1  ;;  %v1436_v23 = vadd.f32 %v1366_v2, %v1200_v31 }
 0x19d   :  { %v1368_v25 = vpop.f32.mrf.mxu0  ;;  %v1438_v35 = vadd.f32 %v1419_v22, %v1253_v15  ;;  %v4949_v15 = vld [vmem:[#allocation32_spill] sm:$0xff] }
 0x19e   :  { %v1421_v27 = vpop.f32.mrf.mxu1  ;;  %v1437_v36 = vadd.f32 %v1368_v25, %v1202_v33 }
 0x19f   :  { %v1535_v12 = vpop.f32.mrf.mxu0  ;;  %v1439_v38 = vadd.f32 %v1421_v27, %v1255_v4 }
 0x1a0   :  { %v1588_v3 = vpop.f32.mrf.mxu1  ;;  %v1607_v29 = vadd.f32 %v1535_v12, %v1424_v17  ;;  %v4945_v12 = vld [vmem:[#allocation50_spill] sm:$0xff] }
 0x1a1   :  { %v1537_v7 = vpop.f32.mrf.mxu0  ;;  %v1609_v58 = vadd.f32 %v1588_v3, %v1426_v9 }
 0x1a2   :  { %v1590_v0 = vpop.f32.mrf.mxu1  ;;  %v1608_v14 = vadd.f32 %v1537_v7, %v1425_v24 }
 0x1a3   :  { %v1539_v54 = vpop.f32.mrf.mxu0  ;;  %v1610_v13 = vadd.f32 %v1590_v0, %v1427_v42 }
 0x1a4   :  { %v1592_v48 = vpop.f32.mrf.mxu1  ;;  %v1611_v19 = vadd.f32 %v1539_v54, %v1428_v8 }
 0x1a5   :  { %v1541_v55 = vpop.f32.mrf.mxu0  ;;  %v1613_v1 = vadd.f32 %v1592_v48, %v1430_v46 }
 0x1a6   :  { %v1594_v32 = vpop.f32.mrf.mxu1  ;;  %v1612_v40 = vadd.f32 %v1541_v55, %v1429_v52  ;;  %v4950_v52 = vld [vmem:[#allocation33_spill] sm:$0xff] }
 0x1a7   :  { %v1545_v56 = vpop.f32.mrf.mxu0  ;;  %v1614_v53 = vadd.f32 %v1594_v32, %v1431_v47 }
 0x1a8   :  { %v1598_v51 = vpop.f32.mrf.mxu1  ;;  %v1615_v20 = vadd.f32 %v1545_v56, %v1432_v41  ;;  %v4946_v56 = vld [vmem:[#allocation51_spill] sm:$0xff] }
 0x1a9   :  { %v1547_v6 = vpop.f32.mrf.mxu0  ;;  %v1617_v21 = vadd.f32 %v1598_v51, %v1434_v60  ;;  %v4947_v51 = vld [vmem:[#allocation26_spill] sm:$0xff] }
 0x1aa   :  { %v1600_v10 = vpop.f32.mrf.mxu1  ;;  %v1616_v7 = vadd.f32 %v1547_v6, %v1433_v43  ;;  %v4951_v43 = vld [vmem:[#allocation34_spill] sm:$0xff] }
 0x1ab   :  { %v1549_v57 = vpop.f32.mrf.mxu0  ;;  %v1618_v0 = vadd.f32 %v1600_v10, %v1435_v50  ;;  %v4948_v10 = vld [vmem:[#allocation31_spill] sm:$0xff] }
 0x1ac   :  { %v1602_v49 = vpop.f32.mrf.mxu1  ;;  %v4680_v2 = vadd.f32 %v1549_v57, %v1436_v23 }
 0x1ad   :  { %v1551_v16 = vpop.f32.mrf.mxu0  ;;  %v4682_v54 = vadd.f32 %v1602_v49, %v1438_v35 }
 0x1ae   :  { %v1604_v37 = vpop.f32.mrf.mxu1  ;;  %v4686_v27 = vadd.f32 %v1551_v16, %v1437_v36 }
 0x1af   :  { %v1718_v30 = vpop.f32.mrf.mxu0  ;;  %v4688_v28 = vadd.f32 %v1604_v37, %v1439_v38 }
 0x1b0   :  { %v1771_v39 = vpop.f32.mrf.mxu1  ;;  %v1790_v61 = vadd.f32 %v1718_v30, %v1607_v29  ;;  %v4952_v30 = vld [vmem:[#allocation35_spill] sm:$0xff] }
 0x1b1   :  { %v1792_v59 = vadd.f32 %v1771_v39, %v1609_v58  ;;  %v1720_v26 = vpop.f32.mrf.mxu0 }
 0x1b2   :  { %v1773_v34 = vpop.f32.mrf.mxu1  ;;  %v1828_v11 = vadd.f32 %v4944_v5, %v1790_v61  ;;  %v1791_v63 = vadd.f32 %v1720_v26, %v1608_v14 }
 0x1b3   :  { %v1830_v3 = vadd.f32 %v4945_v12, %v1792_v59  ;;  %v1793_v18 = vadd.f32 %v1773_v34, %v1610_v13  ;;  %v1722_v48 = vpop.f32.mrf.mxu0 }
 0x1b4   :  { %v1775_v22 = vpop.f32.mrf.mxu1  ;;  %v1844_v55 = vmax.f32 %v1828_v11, 0.0  ;;  %v1829_v60 = vadd.f32 %v4946_v56, %v1791_v63  ;;  %v1794_v44 = vadd.f32 %v1722_v48, %v1611_v19  ;;  %v4953_v19 = vld [vmem:[#allocation36_spill] sm:$0xff] }
 0x1b5   :  { %v1846_v32 = vmax.f32 %v1830_v3, 0.0  ;;  %v1831_v25 = vadd.f32 %v4947_v51, %v1793_v18  ;;  %v1796_v45 = vadd.f32 %v1775_v22, %v1613_v1  ;;  %v1724_v62 = vpop.f32.mrf.mxu0  ;;  %v4954_v18 = vld [vmem:[#allocation37_spill] sm:$0xff] }
 0x1b6   :  { %v1777_v6 = vpop.f32.mrf.mxu1  ;;  %v2044_v31 = vadd.f32 %v4948_v10, %v1844_v55  ;;  %v1845_v4 = vmax.f32 %v1829_v60, 0.0  ;;  %v1832_v9 = vadd.f32 %v4944_v5, %v1794_v44  ;;  %v1795_v42 = vadd.f32 %v1724_v62, %v1612_v40  ;;  %v4956_v10 = vld [vmem:[#allocation39_spill] sm:$0xff] }
 0x1b7   :  { %v2046_v33 = vadd.f32 %v4949_v15, %v1846_v32  ;;  %v1847_v17 = vmax.f32 %v1831_v25, 0.0  ;;  %v1834_v24 = vadd.f32 %v4945_v12, %v1796_v45  ;;  %v1797_v57 = vadd.f32 %v1777_v6, %v1614_v53  ;;  %v1728_v49 = vpop.f32.mrf.mxu0  ;;  %v4957_v15 = vld [vmem:[#allocation40_spill] sm:$0xff] }
 0x1b8   :  { %v1781_v8 = vpop.f32.mrf.mxu1  ;;  %2060 = vst [vmem:[#allocation16] sm:$0xff] %v2044_v31  ;;  %v3485_v46 = vpack.c.bf16 %v1845_v4, %v1844_v55  ;;  %v4695_v47 = vadd.f32 %v4950_v52, %v1845_v4  ;;  %v1848_v16 = vmax.f32 %v1832_v9, 0.0  ;;  %v1833_v23 = vadd.f32 %v4946_v56, %v1795_v42  ;;  %v4955_v55 = vld [vmem:[#allocation38_spill] sm:$0xff] }
 0x1b9   :  { %2062 = vst [vmem:[#allocation16 + $0x10] sm:$0xff] %v2046_v33  ;;  %v3486_v41 = vpack.c.bf16 %v1847_v17, %v1846_v32  ;;  %v4698_v50 = vadd.f32 %v4951_v43, %v1847_v17  ;;  %v1850_v37 = vmax.f32 %v1834_v24, 0.0  ;;  %v1835_v35 = vadd.f32 %v4947_v51, %v1797_v57  ;;  %v1730_v29 = vpop.f32.mrf.mxu0  ;;  %v4958_v24 = vld [vmem:[#allocation41_spill] sm:$0xff] }
 0x1ba   :  { %v1783_v58 = vpop.f32.mrf.mxu1  ;;  %2020 = vst [vmem:[%s4843_s14] sm:$0xff] %v3485_v46  ;;  %2061 = vst [vmem:[#allocation16 + $0x8] sm:$0xff] %v4695_v47  ;;  %v1798_v36 = vadd.f32 %v1728_v49, %v1615_v20  ;;  %v1800_v38 = vadd.f32 %v1781_v8, %v1617_v21  ;;  %v1799_v14 = vadd.f32 %v1730_v29, %v1616_v7  ;;  %v1849_v61 = vmax.f32 %v1833_v23, 0.0  ;;  %v4960_v23 = vld [vmem:[#allocation27_spill] sm:$0xff]  ;;  %v4961_v29 = vld [vmem:[#allocation28_spill] sm:$0xff] }
 0x1bb   :  { %2021 = vst [vmem:[%s4843_s14 + $0x8] sm:$0xff] %v3486_v41  ;;  %2063 = vst [vmem:[#allocation16 + $0x18] sm:$0xff] %v4698_v50  ;;  %v1801_v13 = vadd.f32 %v1783_v58, %v1618_v0  ;;  %v2048_v39 = vadd.f32 %v4952_v30, %v1848_v16  ;;  %v2050_v1 = vadd.f32 %v4953_v19, %v1850_v37  ;;  %v1851_v59 = vmax.f32 %v1835_v35, 0.0  ;;  %v1732_v40 = vpop.f32.mrf.mxu0  ;;  %v3810_v30 = vld [vmem:[#allocation13 + $0x98] ss:$12 sps:$4 sm:$0xff]  }
 0x1bc   :  { %v1785_v53 = vpop.f32.mrf.mxu1  ;;  %v1836_v26 = vadd.f32 %v4944_v5, %v1798_v36  ;;  %v1838_v34 = vadd.f32 %v4945_v12, %v1800_v38  ;;  %v1837_v11 = vadd.f32 %v4946_v56, %v1799_v14  ;;  %v3487_v63 = vpack.c.bf16 %v1849_v61, %v1848_v16  ;;  %v3808_v16 = vld [vmem:[#allocation13 + $0x158] ss:$12 sps:$4 sm:$0xff]  }
 0x1bd   :  { %v1839_v3 = vadd.f32 %v4947_v51, %v1801_v13  ;;  %2064 = vst [vmem:[#allocation16 + $0x20] sm:$0xff] %v2048_v39  ;;  %v4716_v20 = vpack.c.bf16 %v2048_v39, %v2044_v31  ;;  %2066 = vst [vmem:[#allocation16 + $0x30] sm:$0xff] %v2050_v1  ;;  %v4718_v21 = vpack.c.bf16 %v2050_v1, %v2046_v33  ;;  %v1734_v0 = vpop.f32.mrf.mxu0  ;;  %v4962_v38 = vld [vmem:[#allocation29_spill] sm:$0xff]  ;;  %v3812_v1 = vld [vmem:[#allocation13 + $0x140] ss:$12 sps:$4 sm:$0xff]  }
 0x1be   :  { %v2049_v7 = vadd.f32 %v4954_v18, %v1849_v61  ;;  %v1787_v48 = vpop.f32.mrf.mxu1  ;;  %v3488_v22 = vpack.c.bf16 %v1851_v59, %v1850_v37  ;;  %v2051_v32 = vadd.f32 %v4955_v55, %v1851_v59  ;;  %v1852_v60 = vmax.f32 %v1836_v26, 0.0  ;;  %2022 = vst [vmem:[%s4843_s14 + $0x10] sm:$0xff] %v3487_v63  ;;  %v3809_v37 = vld [vmem:[#allocation13 + $0x2d8] ss:$12 sps:$4 sm:$0xff]   ;;  %v3814_v26 = vld [vmem:[#allocation13 + $0x80] ss:$12 sps:$4 sm:$0xff]  }
 0x1bf   :  { %v1854_v25 = vmax.f32 %v1838_v34, 0.0  ;;  %v1853_v44 = vmax.f32 %v1837_v11, 0.0  ;;  %v1855_v45 = vmax.f32 %v1839_v3, 0.0  ;;  %v1802_v62 = vadd.f32 %v1732_v40, %v4680_v2  ;;  %v4959_v2 = vld [vmem:[#allocation42_spill] sm:$0xff]  ;;  %v3811_v39 = vld [vmem:[#allocation13 + $0x218] ss:$12 sps:$4 sm:$0xff]  }
 0x1c0   :  { %2065 = vst [vmem:[#allocation16 + $0x28] sm:$0xff] %v2049_v7  ;;  %v1804_v6 = vadd.f32 %v1785_v53, %v4682_v54  ;;  %2023 = vst [vmem:[%s4843_s14 + $0x18] sm:$0xff] %v3488_v22  ;;  %v2052_v31 = vadd.f32 %v4956_v10, %v1852_v60  ;;  %v1803_v4 = vadd.f32 %v1734_v0, %v4686_v27  ;;  %v3813_v53 = vld [vmem:[#allocation13 + $0x2c0] ss:$12 sps:$4 sm:$0xff]   ;;  %v3816_v11 = vld [vmem:[#allocation13 + $0x128] ss:$12 sps:$4 sm:$0xff]  }
 0x1c1   :  { %2067 = vst [vmem:[#allocation16 + $0x38] sm:$0xff] %v2051_v32  ;;  %v2054_v33 = vadd.f32 %v4957_v15, %v1854_v25  ;;  %v1805_v17 = vadd.f32 %v1787_v48, %v4688_v28  ;;  %v3489_v9 = vpack.c.bf16 %v1853_v44, %v1852_v60  ;;  %v2053_v42 = vadd.f32 %v4958_v24, %v1853_v44  ;;  %v3806_v28 = vld [vmem:[#allocation13 + $0xb0] ss:$12 sps:$4 sm:$0xff]   ;;  %v3815_v34 = vld [vmem:[#allocation13 + $0x200] ss:$12 sps:$4 sm:$0xff]  }
 0x1c2   :  { %v3490_v57 = vpack.c.bf16 %v1855_v45, %v1854_v25  ;;  %v2055_v49 = vadd.f32 %v4959_v2, %v1855_v45  ;;  %2068 = vst [vmem:[#allocation16 + $0x40] sm:$0xff] %v2052_v31  ;;  %v1840_v54 = vadd.f32 %v4944_v5, %v1802_v62  ;;  %v1842_v8 = vadd.f32 %v4945_v12, %v1804_v6  ;;  %v3807_v12 = vld [vmem:[#allocation13 + $0x230] ss:$12 sps:$4 sm:$0xff]   ;;  %v3817_v3 = vld [vmem:[#allocation13 + $0x2a8] ss:$12 sps:$4 sm:$0xff]  }
 0x1c3   :  { %2070 = vst [vmem:[#allocation16 + $0x50] sm:$0xff] %v2054_v33  ;;  %v1841_v46 = vadd.f32 %v4946_v56, %v1803_v4  ;;  %v1843_v52 = vadd.f32 %v4947_v51, %v1805_v17  ;;  %2024 = vst [vmem:[%s4843_s14 + $0x20] sm:$0xff] %v3489_v9  ;;  %v2077_v27 = vpack.c.bf16 %v2049_v7, %v4695_v47  ;;  %v3818_v63 = vld [vmem:[#allocation13 + $0x68] ss:$12 sps:$4 sm:$0xff]   ;;  %v3820_v7 = vld [vmem:[#allocation13 + $0x110] ss:$12 sps:$4 sm:$0xff]  }
 0x1c4   :  { %2069 = vst [vmem:[#allocation16 + $0x48] sm:$0xff] %v2053_v42  ;;  %2025 = vst [vmem:[%s4843_s14 + $0x28] sm:$0xff] %v3490_v57  ;;  %v2079_v5 = vpack.c.bf16 %v2051_v32, %v4698_v50  ;;  %v1856_v41 = vmax.f32 %v1840_v54, 0.0  ;;  %v1858_v56 = vmax.f32 %v1842_v8, 0.0  ;;  %v4963_v50 = vld [vmem:[#allocation30_spill] sm:$0xff]  ;;  %v4057_v4 = vmov 0.0  }
 0x1c5   :  { %2071 = vst [vmem:[#allocation16 + $0x58] sm:$0xff] %v2055_v49  ;;  %v1857_v43 = vmax.f32 %v1841_v46, 0.0  ;;  %v1859_v51 = vmax.f32 %v1843_v52, 0.0  ;;  %2773 = vmatprep.mubr.bf16.mxu0 %v2077_v27  ;;  %v3819_v18 = vld [vmem:[#allocation13 + $0x1e8] ss:$12 sps:$4 sm:$0xff]  }
 0x1c6   :  { %2826 = vmatprep.mubr.bf16.mxu1 %v2079_v5  ;;  %v2056_v35 = vadd.f32 %v4960_v23, %v1856_v41  ;;  %v2058_v58 = vadd.f32 %v4961_v29, %v1858_v56  ;;  %2774 = vmatmul.mubr.bf16.vlgmr.msra.gmra.mxu0 %v4716_v20  ;;  %v3821_v0 = vld [vmem:[#allocation13 + $0x290] ss:$12 sps:$4 sm:$0xff]   ;;  %v3824_v55 = vld [vmem:[#allocation13 + $0xf8] ss:$12 sps:$4 sm:$0xff]   ;;  %v3828_v44 = vld [vmem:[#allocation13 + $0xe0] ss:$12 sps:$4 sm:$0xff]  }
 0x1c7   :  { %v3491_v36 = vpack.c.bf16 %v1857_v43, %v1856_v41  ;;  %v2057_v14 = vadd.f32 %v4962_v38, %v1857_v43  ;;  %v3492_v47 = vpack.c.bf16 %v1859_v51, %v1858_v56  ;;  %v2059_v13 = vadd.f32 %v4963_v50, %v1859_v51  ;;  %2827 = vmatmul.mubr.bf16.vlgmr.msra.gmra.mxu1 %v4718_v21  ;;  %v3822_v48 = vld [vmem:[#allocation13 + $0x50] ss:$12 sps:$4 sm:$0xff]   ;;  %v3825_v32 = vld [vmem:[#allocation13 + $0x278] ss:$12 sps:$4 sm:$0xff]   ;;  %v3829_v45 = vld [vmem:[#allocation13 + $0x260] ss:$12 sps:$4 sm:$0xff]  }
 0x1c8   :  { %3494 = vmatpush3.bf16.msra.mxu0 %v3806_v28  ;;  %2072 = vst [vmem:[#allocation16 + $0x60] sm:$0xff] %v2056_v35  ;;  %2074 = vst [vmem:[#allocation16 + $0x70] sm:$0xff] %v2058_v58  ;;  %3522 = vmatpush3.bf16.msra.mxu1 %v3807_v12  ;;  %v4759_v61 = vpack.c.bf16 %v2056_v35, %v2052_v31  ;;  %v4761_v59 = vpack.c.bf16 %v2058_v58, %v2054_v33  ;;  %v3823_v22 = vld [vmem:[#allocation13 + $0x1d0] ss:$12 sps:$4 sm:$0xff]   ;;  %v3826_v60 = vld [vmem:[#allocation13 + $0x38] ss:$12 sps:$4 sm:$0xff]  }
 0x1c9   :  { %2026 = vst [vmem:[%s4843_s14 + $0x30] sm:$0xff] %v3491_v36  ;;  %2073 = vst [vmem:[#allocation16 + $0x68] sm:$0xff] %v2057_v14  ;;  %3495 = vmatprep.subr.bf16.mxu0 %v3808_v16  ;;  %v4757_v19 = vpack.c.bf16 %v2057_v14, %v2053_v42  ;;  %3523 = vmatprep.subr.bf16.mxu1 %v3809_v37  ;;  %v2083_v40 = vpack.c.bf16 %v2059_v13, %v2055_v49  ;;  %v3827_v25 = vld [vmem:[#allocation13 + $0x1b8] ss:$12 sps:$4 sm:$0xff]   ;;  %v3830_v62 = vld [vmem:[#allocation13 + $0x20] ss:$12 sps:$4 sm:$0xff]  }
 0x1ca   :  { %2027 = vst [vmem:[%s4843_s14 + $0x38] sm:$0xff] %v3492_v47  ;;  %2075 = vst [vmem:[#allocation16 + $0x78] sm:$0xff] %v2059_v13  ;;  %v3831_v6 = vld [vmem:[#allocation13 + $0x1a0] ss:$12 sps:$4 sm:$0xff]   ;;  %v3832_v10 = vld [vmem:[#allocation13 + $0xc8] ss:$12 sps:$4 sm:$0xff]  }
 0x1cb   :  { %2783 = vmatprep.mubr.bf16.mxu0 %v4757_v19  ;;  %2836 = vmatprep.mubr.bf16.mxu1 %v2083_v40  ;;  %v3833_v31 = vld [vmem:[#allocation13 + $0x248] ss:$12 sps:$4 sm:$0xff]   ;;  %v2212_v17 = vld [vmem:[#allocation14] sm:$0x7] }
 0x1cc   :  { %3496 = vmatpush3.bf16.msra.mxu0 %v3810_v30  ;;  %3524 = vmatpush3.bf16.msra.mxu1 %v3811_v39  ;;  %v3834_v15 = vld [vmem:[#allocation13 + $0x8] ss:$12 sps:$4 sm:$0xff]  }
 0x1cd   :  { %3497 = vmatprep.subr.bf16.mxu0 %v3812_v1  ;;  %3525 = vmatprep.subr.bf16.mxu1 %v3813_v53  ;;  %v3835_v33 = vld [vmem:[#allocation13 + $0x188] ss:$12 sps:$4 sm:$0xff]  }
 0x1ce   :  { %2784 = vmatmul.mubr.bf16.gmra.mxu0 %v4759_v61  ;;  %v4965_v42 = vld [vmem:[#allocation25_spill] sm:$0xff]  ;;  %v4966_v28 = vld [vmem:[#allocation23_spill] sm:$0xff] }
 0x1cf   :  { %2837 = vmatmul.mubr.bf16.gmra.mxu1 %v4761_v59  ;;  %2879 = vmatprep.mubr.bf16.mxu0 %v2077_v27  ;;  %v2221_v57 = vrot.slane %v2212_v17, %v4965_v42  ;;  %v2217_v12 = vrot.slane %v2212_v17, %v4966_v28  ;;  %v4968_v28 = vlaneseq }
 0x1d0   :  { %3498 = vmatpush3.bf16.msra.mxu0 %v3814_v26  ;;  %3526 = vmatpush3.bf16.msra.mxu1 %v3815_v34 }
 0x1d1   :  { %2928 = vmatprep.mubr.bf16.mxu1 %v2079_v5  ;;  %3499 = vmatprep.subr.bf16.mxu0 %v3816_v11 }
 0x1d2   :  { %3527 = vmatprep.subr.bf16.mxu1 %v3817_v3 }
 0x1d4   :  { %3500 = vmatpush3.bf16.msra.mxu0 %v3818_v63  ;;  %3528 = vmatpush3.bf16.msra.mxu1 %v3819_v18  ;;  %v4967_v18 = vld [vmem:[#allocation24_spill] sm:$0xff] }
 0x1d5   :  { %3501 = vmatprep.subr.bf16.mxu0 %v3820_v7  ;;  %3529 = vmatprep.subr.bf16.mxu1 %v3821_v0  ;;  %v2225_v7 = vrot.slane %v2212_v17, %v4967_v18 }
 0x1d8   :  { %3502 = vmatpush3.bf16.msra.mxu0 %v3822_v48  ;;  %3530 = vmatpush3.bf16.msra.mxu1 %v3823_v22 }
 0x1d9   :  { %3503 = vmatprep.subr.bf16.mxu0 %v3824_v55  ;;  %3531 = vmatprep.subr.bf16.mxu1 %v3825_v32 }
 0x1dc   :  { %3504 = vmatpush3.bf16.msra.mxu0 %v3826_v60  ;;  %3532 = vmatpush3.bf16.msra.mxu1 %v3827_v25 }
 0x1dd   :  { %3505 = vmatprep.subr.bf16.mxu0 %v3828_v44  ;;  %3533 = vmatprep.subr.bf16.mxu1 %v3829_v45 }
 0x1e0   :  { %3506 = vmatpush3.bf16.msra.mxu0 %v3830_v62  ;;  %3534 = vmatpush3.bf16.msra.mxu1 %v3831_v6 }
 0x1e1   :  { %3507 = vmatprep.subr.bf16.mxu0 %v3832_v10  ;;  %3535 = vmatprep.subr.bf16.mxu1 %v3833_v31 }
 0x1e4   :  { %3508 = vmatpush3.bf16.msra.mxu0 %v3834_v15  ;;  %3536 = vmatpush3.bf16.msra.mxu1 %v3835_v33 }
 0x1e5   :  { %3557 = vmatprep.subr.bf16.mxu0 %v4057_v4  ;;  %3563 = vmatprep.subr.bf16.mxu1 %v4057_v4 }
 0x1e7   :  { %2880 = vmatmul.mubr.bf16.vlgmr.msra.gmra.mxu0 %v4716_v20  ;;  %2929 = vmatmul.mubr.bf16.vlgmr.msra.gmra.mxu1 %v4718_v21  ;;  %v3465_v20 = vld [vmem:[%s4964_s27] ss:$0 sm:$0xff]  ;;  %v3466_v21 = vld [vmem:[%s4964_s27 + $0x1] ss:$0 sm:$0xff] }
 0x1e8   :  { %2887 = vmatprep.mubr.bf16.mxu0 %v4757_v19  ;;  %2936 = vmatprep.mubr.bf16.mxu1 %v2083_v40 }
 0x1e9   :  { %3048 = vperm.xlu0 %3599, %v3465_v20  }
 0x1ed   :  { %3051 = vperm.xlu0 %3599, %v3466_v21  }
 0x1ef   :  { %2888 = vmatmul.mubr.bf16.gmra.mxu0 %v4759_v61  ;;  %2937 = vmatmul.mubr.bf16.gmra.mxu1 %v4761_v59 }
 0x1f0   :  { %3559 = vmatprep.mubr.msk.bf16.mxu0 %vm4058_vm1, %v4057_v4  ;;  %3565 = vmatprep.mubr.msk.bf16.mxu1 %vm4058_vm1, %v4057_v4 }
 0x286   :  { %v2775_v9 = vpop.f32.mrf.mxu0 }
 0x287   :  { %v2828_v24 = vpop.f32.mrf.mxu1  ;;  %v2776_v29 = vadd.f32 %v2775_v9, %v2217_v12 }
 0x288   :  { %v2777_v2 = vpop.f32.mrf.mxu0 }
 0x289   :  { %v2830_v49 = vpop.f32.mrf.mxu1  ;;  %v2778_v8 = vadd.f32 %v2777_v2, %v2221_v57  ;;  %v2829_v13 = vadd.f32 %v2828_v24, %v2776_v29 }
 0x28a   :  { %v2779_v54 = vpop.f32.mrf.mxu0 }
 0x28b   :  { %v2832_v46 = vpop.f32.mrf.mxu1  ;;  %v2831_v56 = vadd.f32 %v2830_v49, %v2778_v8  ;;  %v2780_v16 = vadd.f32 %v2779_v54, %v2217_v12 }
 0x28c   :  { %v2781_v52 = vpop.f32.mrf.mxu0 }
 0x28d   :  { %v2782_v27 = vadd.f32 %v2781_v52, %v2221_v57  ;;  %v2834_v5 = vpop.f32.mrf.mxu1  ;;  %v2833_v14 = vadd.f32 %v2832_v46, %v2780_v16 }
 0x28e   :  { %v2785_v41 = vpop.f32.mrf.mxu0 }
 0x28f   :  { %v2835_v43 = vadd.f32 %v2834_v5, %v2782_v27  ;;  %v2838_v51 = vpop.f32.mrf.mxu1  ;;  %v2945_v1 = vpack.c.bf16 %v2833_v14, %v2829_v13  ;;  %v2786_v40 = vadd.f32 %v2785_v41, %v2217_v12  ;;  %v3049_v41 = vpop.permute.xlu0 %3048 }
 0x290   :  { %v2787_v37 = vpop.f32.mrf.mxu0 }
 0x291   :  { %v2947_v23 = vpack.c.bf16 %v2835_v43, %v2831_v56  ;;  %v2840_v35 = vpop.f32.mrf.mxu1  ;;  %v2788_v36 = vadd.f32 %v2787_v37, %v2221_v57  ;;  %v2839_v26 = vadd.f32 %v2838_v51, %v2786_v40 }
 0x292   :  { %v2789_v58 = vpop.f32.mrf.mxu0 }
 0x293   :  { %v2842_v38 = vpop.f32.mrf.mxu1  ;;  %3558 = vmatpush3.bf16.xpose.msra.mxu0 %v2947_v23  ;;  %v2841_v39 = vadd.f32 %v2840_v35, %v2788_v36  ;;  %v2790_v61 = vadd.f32 %v2789_v58, %v2217_v12  ;;  %v3036_v12 = vand.u32 127, %v4968_v28  ;;  %v3052_v58 = vpop.permute.xlu0 %3051 }
 0x294   :  { %v2791_v47 = vpop.f32.mrf.mxu0  ;;  %3569 = vmatprep.subr.bf16.mxu0 %v4057_v4 }
 0x295   :  { %v2792_v50 = vadd.f32 %v2791_v47, %v2221_v57  ;;  %v2844_v30 = vpop.f32.mrf.mxu1  ;;  %v2843_v53 = vadd.f32 %v2842_v38, %v2790_v61  ;;  %vm3053_vm2 = vcmp.lt.s32.totalorder %v3036_v12, %v3049_v41  ;;  %vm3054_vm4 = vcmp.lt.s32.totalorder %v3036_v12, %v3052_v58 }
 0x297   :  { %v2845_v19 = vadd.f32 %v2844_v30, %v2792_v50  ;;  %v2946_v34 = vpack.c.bf16 %v2843_v53, %v2839_v26 }
 0x299   :  { %v2948_v59 = vpack.c.bf16 %v2845_v19, %v2841_v39 }
 0x29a   :  { %3560 = vmatmul.mubr.bf16.vlgmr.msra.gmra.mxu0 %v2945_v1 }
 0x29b   :  { %3564 = vmatpush3.bf16.xpose.msra.mxu1 %v2948_v59  ;;  %3571 = vmatprep.mubr.msk.bf16.mxu0 %vm4058_vm1, %v4057_v4 }
 0x29c   :  { %3575 = vmatprep.subr.bf16.mxu1 %v4057_v4 }
 0x2a2   :  { %3566 = vmatmul.mubr.bf16.vlgmr.msra.gmra.mxu1 %v2946_v34 }
 0x2a3   :  { %3577 = vmatprep.mubr.msk.bf16.mxu1 %vm4058_vm1, %v4057_v4 }
 0x2a7   :  { %v3509_v11 = vpop.f32.mrf.mxu0  ;;  %v3537_v3 = vpop.f32.mrf.mxu1 }
 0x2a9   :  { %v3510_v63 = vpop.f32.mrf.mxu0  ;;  %v3538_v48 = vpop.f32.mrf.mxu1 }
 0x2aa   :  { %v3511_v0 = vadd.f32 %v3510_v63, %v3509_v11  ;;  %v3539_v62 = vadd.f32 %v3538_v48, %v3537_v3 }
 0x2ab   :  { %v3512_v22 = vpop.f32.mrf.mxu0  ;;  %v3540_v55 = vpop.f32.mrf.mxu1 }
 0x2ac   :  { %v2882_v60 = vadd.f32 %v3511_v0, %v2225_v7 }
 0x2ad   :  { %v3513_v32 = vpop.f32.mrf.mxu0  ;;  %v3541_v44 = vpop.f32.mrf.mxu1 }
 0x2ae   :  { %v3514_v25 = vadd.f32 %v3513_v32, %v3512_v22  ;;  %v3542_v10 = vadd.f32 %v3541_v44, %v3540_v55  ;;  %v4787_v33 = vadd.f32 %v3539_v62, %v2882_v60 }
 0x2af   :  { %v3515_v45 = vpop.f32.mrf.mxu0  ;;  %v3543_v31 = vpop.f32.mrf.mxu1 }
 0x2b0   :  { %v2885_v6 = vadd.f32 %v3514_v25, %v2225_v7 }
 0x2b1   :  { %v3516_v15 = vpop.f32.mrf.mxu0  ;;  %v3544_v21 = vpop.f32.mrf.mxu1 }
 0x2b2   :  { %v4789_v4 = vadd.f32 %v3542_v10, %v2885_v6  ;;  %v3517_v20 = vadd.f32 %v3516_v15, %v3515_v45  ;;  %v3545_v54 = vadd.f32 %v3544_v21, %v3543_v31 }
 0x2b3   :  { %v3518_v17 = vpop.f32.mrf.mxu0  ;;  %v3546_v24 = vpop.f32.mrf.mxu1 }
 0x2b4   :  { %v3106_v9 = vpack.c.bf16 %v4789_v4, %v4787_v33  ;;  %v2890_v57 = vadd.f32 %v3517_v20, %v2225_v7 }
 0x2b5   :  { %v3519_v42 = vpop.f32.mrf.mxu0  ;;  %v3547_v49 = vpop.f32.mrf.mxu1 }
 0x2b6   :  { %v3520_v2 = vadd.f32 %v3519_v42, %v3518_v17  ;;  %3570 = vmatpush3.bf16.msra.mxu0 %v3106_v9  ;;  %v3548_v46 = vadd.f32 %v3547_v49, %v3546_v24  ;;  %v4793_v52 = vadd.f32 %v3545_v54, %v2890_v57 }
 0x2b8   :  { %v2893_v8 = vadd.f32 %v3520_v2, %v2225_v7 }
 0x2ba   :  { %v4795_v27 = vadd.f32 %v3548_v46, %v2893_v8 }
 0x2bc   :  { %v3107_v5 = vpack.c.bf16 %v4795_v27, %v4793_v52 }
 0x2be   :  { %3576 = vmatpush3.bf16.msra.mxu1 %v3107_v5 }
 0x35a   :  { %v2983_v56 = vpop.f32.mrf.mxu0 }
 0x35b   :  { %v3031_v43 = vmul.f32 0.088388346, %v2983_v56 }
 0x35c   :  { %v3561_v51 = vpop.f32.mrf.mxu0 }
 0x35d   :  { %v3055_v16 = vsel %vm3053_vm2, %v3031_v43, -1e+30 }
 0x35e   :  { %v2986_v37 = vpop.f32.mrf.mxu0  ;;  %v3060_v23 = vsel %vm3059_vm3, %v3055_v16, -inf }
 0x35f   :  { %v3032_v35 = vmul.f32 0.088388346, %v2986_v37  ;;  %3061 = vmax.xlane.f32.xlu1 %v3060_v23 }
 0x360   :  { %v3562_v29 = vpop.f32.mrf.mxu0 }
 0x361   :  { %v3056_v36 = vsel %vm3053_vm2, %v3032_v35, -1e+30 }
 0x362   :  { %v3024_v38 = vpop.f32.mrf.mxu1  ;;  %v3063_v14 = vsel %vm3059_vm3, %v3056_v36, -inf }
 0x363   :  { %v3033_v47 = vmul.f32 0.088388346, %v3024_v38  ;;  %3064 = vmax.xlane.f32.xlu1 %v3063_v14 }
 0x364   :  { %v3567_v50 = vpop.f32.mrf.mxu1 }
 0x365   :  { %v3057_v13 = vsel %vm3054_vm4, %v3033_v47, -1e+30 }
 0x366   :  { %v3027_v30 = vpop.f32.mrf.mxu1  ;;  %v3066_v39 = vsel %vm3059_vm3, %v3057_v13, -inf }
 0x367   :  { %v3034_v19 = vmul.f32 0.088388346, %v3027_v30  ;;  %3067 = vmax.xlane.f32.xlu0 %v3066_v39 }
 0x368   :  { %v3568_v1 = vpop.f32.mrf.mxu1 }
 0x369   :  { %v3058_v61 = vsel %vm3054_vm4, %v3034_v19, -1e+30 }
 0x36a   :  { %v3069_v59 = vsel %vm3059_vm3, %v3058_v61, -inf }
 0x36b   :  { %3070 = vmax.xlane.f32.xlu1 %v3069_v59 }
 0x3e8   :  { %v3062_v40 = vpop.xlane.xlu1 %3061 }
 0x3e9   :  { %v3072_v53 = vsub.f32 %v3055_v16, %v3062_v40 }
 0x3eb   :  { %v3076_v26 = vmul.f32 1.442695, %v3072_v53 }
 0x3ec   :  { %v3065_v34 = vpop.xlane.xlu1 %3064 }
 0x3ed   :  { %3836 = vpow2.f32 %v3076_v26  ;;  %v3073_v11 = vsub.f32 %v3056_v36, %v3065_v34 }
 0x3ef   :  { %v3078_v3 = vmul.f32 1.442695, %v3073_v11 }
 0x3f0   :  { %v3068_v63 = vpop.xlane.xlu0 %3067 }
 0x3f1   :  { %3838 = vpow2.f32 %v3078_v3  ;;  %v3074_v18 = vsub.f32 %v3057_v13, %v3068_v63 }
 0x3f3   :  { %v3080_v7 = vmul.f32 1.442695, %v3074_v18 }
 0x3f4   :  { %v3071_v0 = vpop.xlane.xlu1 %3070 }
 0x3f5   :  { %3840 = vpow2.f32 %v3080_v7  ;;  %v3075_v48 = vsub.f32 %v3058_v61, %v3071_v0 }
 0x3f7   :  { %v3082_v22 = vmul.f32 1.442695, %v3075_v48 }
 0x3f9   :  { %3842 = vpow2.f32 %v3082_v22 }
 0x3fa   :  { %v3837_v55 = vpop.eup %3836 }
 0x3fb   :  { %v3084_v32 = vsel %vm3059_vm3, %v3837_v55, 0.0 }
 0x3fc   :  { %3085 = vadd.xlane.f32.xlu1 %v3084_v32 }
 0x3fe   :  { %v3839_v60 = vpop.eup %3838 }
 0x3ff   :  { %v3087_v25 = vsel %vm3059_vm3, %v3839_v60, 0.0 }
 0x400   :  { %3088 = vadd.xlane.f32.xlu1 %v3087_v25 }
 0x402   :  { %v3841_v44 = vpop.eup %3840 }
 0x403   :  { %v3090_v45 = vsel %vm3059_vm3, %v3841_v44, 0.0 }
 0x404   :  { %3091 = vadd.xlane.f32.xlu1 %v3090_v45 }
 0x406   :  { %v3843_v62 = vpop.eup %3842 }
 0x407   :  { %v3093_v6 = vsel %vm3059_vm3, %v3843_v62, 0.0 }
 0x408   :  { %3094 = vadd.xlane.f32.xlu1 %v3093_v6 }
 0x485   :  { %v3086_v10 = vpop.xlane.xlu1 %3085 }
 0x486   :  { %3844 = vrcp.f32 %v3086_v10 }
 0x489   :  { %v3089_v31 = vpop.xlane.xlu1 %3088 }
 0x48a   :  { %3846 = vrcp.f32 %v3089_v31 }
 0x48d   :  { %v3092_v15 = vpop.xlane.xlu1 %3091 }
 0x48e   :  { %3848 = vrcp.f32 %v3092_v15 }
 0x491   :  { %v3095_v20 = vpop.xlane.xlu1 %3094 }
 0x492   :  { %3850 = vrcp.f32 %v3095_v20 }
 0x493   :  { %v3845_v21 = vpop.eup %3844 }
 0x494   :  { %v3100_v9 = vmul.f32 %v3845_v21, %v3837_v55 }
 0x497   :  { %v3847_v17 = vpop.eup %3846 }
 0x498   :  { %v3101_v24 = vmul.f32 %v3847_v17, %v3839_v60 }
 0x49a   :  { %v3104_v42 = vpack.c.bf16 %v3101_v24, %v3100_v9 }
 0x49b   :  { %v3849_v57 = vpop.eup %3848 }
 0x49c   :  { %3572 = vmatmul.mubr.msk.bf16.vlgmr.msra.gmra.mxu0 %vm3059_vm3, %v3104_v42  ;;  %v3102_v54 = vmul.f32 %v3849_v57, %v3841_v44 }
 0x49f   :  { %v3851_v2 = vpop.eup %3850 }
 0x4a0   :  { %v3103_v49 = vmul.f32 %v3851_v2, %v3843_v62 }
 0x4a2   :  { %v3105_v8 = vpack.c.bf16 %v3103_v49, %v3102_v54 }
 0x4a4   :  { %3578 = vmatmul.mubr.msk.bf16.vlgmr.msra.gmra.mxu1 %vm3059_vm3, %v3105_v8 }
 0x4a5   :  { %4023 = shalt.err (!%p4020_p2)
}
 0x4a6   :  { %s4060_s3 = smov 512   ;;  %s4061_s28 = smov 32  }
 0x4a7   :  { %3219 = dma.vmem_to_hbm [thread:$0]  %s3214_s8, 2048, %s4845_s16, [#allocation4], %s4060_s3, %s4060_s3, %s4061_s28  }
 0x55c   :  { %v3145_v46 = vpop.f32.mrf.mxu0 }
 0x55d   :  { %v3146_v5 = vadd.f32 %v3145_v46, %v4787_v33 }
 0x55e   :  { %v3573_v28 = vpop.f32.mrf.mxu0 }
 0x55f   :  { %3196 = vst [vmem:[%s4844_s15] sm:$0xff] %v3146_v5 }
 0x560   :  { %v3148_v12 = vpop.f32.mrf.mxu0 }
 0x561   :  { %v3149_v41 = vadd.f32 %v3148_v12, %v4789_v4 }
 0x562   :  { %v3574_v56 = vpop.f32.mrf.mxu0 }
 0x563   :  { %3197 = vst [vmem:[%s4844_s15 + $0x8] sm:$0xff] %v3149_v41 }
 0x564   :  { %v3189_v43 = vpop.f32.mrf.mxu1 }
 0x565   :  { %v3190_v51 = vadd.f32 %v3189_v43, %v4793_v52 }
 0x566   :  { %v3579_v16 = vpop.f32.mrf.mxu1 }
 0x567   :  { %3198 = vst [vmem:[%s4844_s15 + $0x10] sm:$0xff] %v3190_v51 }
 0x568   :  { %v3192_v33 = vpop.f32.mrf.mxu1 }
 0x569   :  { %v3193_v37 = vadd.f32 %v3192_v33, %v4795_v27 }
 0x56a   :  { %v3580_v23 = vpop.f32.mrf.mxu1 }
 0x56b   :  { %3199 = vst [vmem:[%s4844_s15 + $0x18] sm:$0xff] %v3193_v37 }
 0x56c   :  { %4042 = dma.done.wait [#allocation4], 2048  }
 0x56d   :  { %4043 = vsyncadd [#allocation4], 4294965248 }
 0x56e   :  { %3231 = vsyncpa [#allocation3], 1 }
 0x56f   :  { %3232 = vsyncpa [#allocation6], 1 }
 0x570   :  { %3233 = vsyncpa [#allocation9], 1 }
 0x571   :  { %3234 = vsyncpa [#allocation12], 1 }
 0x572   :  { %3235 = vsyncpa [#allocation15], 1 }
 0x573   :  { %3236 = vsyncpa [#allocation4], 1 }

// kernel: task_shared_forward.5
= control target key start
LH: loop header
LB: loop body
LE: loop exit
PB: predicated region body
PF: predicated region fallthrough
CT: control target
= control target key end

     0   :  { %s4865_s0 = inlined_call_operand.vmem [shape: s32[2,1,1], index: 0, kind: input, shape index: {}]   ;;  %s4866_s1 = inlined_call_operand.vmem [shape: bf16[2,20,256], index: 1, kind: input, shape index: {}]   ;;  %s4867_s2 = inlined_call_operand.vmem [shape: bf16[2,20,256], index: 2, kind: input, shape index: {}]   ;;  %s4868_s3 = inlined_call_operand.vmem [shape: bf16[2,20,256], index: 3, kind: input, shape index: {}]   ;;  %s4869_s4 = inlined_call_operand.vmem [shape: bf16[1,256,128], index: 4, kind: input, shape index: {}]   ;;  %s4870_s5 = inlined_call_operand.vmem [shape: bf16[3,256,128], index: 5, kind: input, shape index: {}]   ;;  %s4871_s6 = inlined_call_operand.vmem [shape: bf16[5,256,128], index: 6, kind: input, shape index: {}]   ;;  %s4872_s7 = inlined_call_operand.vmem [shape: f32[1,128], index: 7, kind: input, shape index: {}]   ;;  %s4873_s8 = inlined_call_operand.vmem [shape: f32[1,128], index: 8, kind: input, shape index: {}]   ;;  %s4874_s9 = inlined_call_operand.vmem [shape: f32[1,128], index: 9, kind: input, shape index: {}]   ;;  %s4875_s10 = inlined_call_operand.vmem [shape: bf16[128,384], index: 10, kind: input, shape index: {}]   ;;  %s4876_s11 = inlined_call_operand.vmem [shape: f32[1,384], index: 11, kind: input, shape index: {}]   ;;  %s4877_s12 = inlined_call_operand.hbm [shape: bf16[2,16,128], index: 12, kind: output, shape index: {0}]   ;;  %s4878_s13 = inlined_call_operand.hbm [shape: bf16[2,16,128], index: 13, kind: output, shape index: {1}]   ;;  %s4879_s14 = inlined_call_operand.hbm [shape: bf16[2,16,128], index: 14, kind: output, shape index: {2}]   ;;  %s4880_s15 = inlined_call_operand.vmem [shape: f32[2,16,128], index: 15, kind: output, shape index: {3}]   ;;  %s4881_s16 = inlined_call_operand.vmem [shape: f32[2,16,128], index: 16, kind: output, shape index: {4}]  }
   0x1   :  { %4883 = sst [smem:[#allocation9_spill]] %s4865_s0 }
   0x2   :  { %22 = vsyncpa [#allocation3], 0  ;;  %v3611_v0 = vld [vmem:[%s4869_s4 + $0x78] sm:$0xff]   ;;  %v3615_v4 = vld [vmem:[%s4869_s4 + $0x70] sm:$0xff]   ;;  %vm61_vm0 = vcmask 1042432   ;;  %vm62_vm1 = vcmask 1046532  }
   0x3   :  { %v3612_v1 = vld [vmem:[%s4870_s5 + $0xf8] sm:$0xff]   ;;  %3288 = vmatprep.subr.bf16.mxu0 %v3611_v0  ;;  %v3616_v5 = vld [vmem:[%s4870_s5 + $0xf0] sm:$0xff]   ;;  %v3619_v8 = vld [vmem:[%s4869_s4 + $0x68] sm:$0xff]   ;;  %vm288_vm3 = vsmask.f32 3328  ;;  %vm1927_vm9 = vcmask 1041408  }
   0x4   :  { %v3613_v2 = vld [vmem:[%s4869_s4 + $0x38] sm:$0xff]   ;;  %3316 = vmatprep.subr.bf16.mxu1 %v3612_v1  ;;  %v3617_v6 = vld [vmem:[%s4869_s4 + $0x30] sm:$0xff]   ;;  %v3620_v9 = vld [vmem:[%s4870_s5 + $0xe8] sm:$0xff]   ;;  %vm289_vm4 = vsmask.f32 7440  ;;  %vm1928_vm10 = vcmask 1045508  }
   0x5   :  { %v3614_v3 = vld [vmem:[%s4870_s5 + $0xb8] sm:$0xff]   ;;  %3289 = vmatpush3.bf16.msra.mxu0 %v3613_v2  ;;  %v3618_v7 = vld [vmem:[%s4870_s5 + $0xb0] sm:$0xff]   ;;  %v3621_v10 = vld [vmem:[%s4869_s4 + $0x28] sm:$0xff]   ;;  %vm750_vm5 = vsmask.f32 2304 }
   0x6   :  { %3317 = vmatpush3.bf16.msra.mxu1 %v3614_v3  ;;  %3290 = vmatprep.subr.bf16.mxu0 %v3615_v4  ;;  %v3622_v11 = vld [vmem:[%s4870_s5 + $0xa8] sm:$0xff]   ;;  %v3623_v12 = vld [vmem:[%s4869_s4 + $0x60] sm:$0xff]   ;;  %v3627_v16 = vld [vmem:[%s4869_s4 + $0x58] sm:$0xff]   ;;  %vm751_vm6 = vsmask.f32 6416 }
   0x7   :  { %3318 = vmatprep.subr.bf16.mxu1 %v3616_v5  ;;  %v3624_v13 = vld [vmem:[%s4870_s5 + $0xe0] sm:$0xff]   ;;  %v3628_v17 = vld [vmem:[%s4870_s5 + $0xd8] sm:$0xff]   ;;  %v3631_v20 = vld [vmem:[%s4869_s4 + $0x50] sm:$0xff]  }
   0x8   :  { %v3625_v14 = vld [vmem:[%s4869_s4 + $0x20] sm:$0xff]   ;;  %v3629_v18 = vld [vmem:[%s4869_s4 + $0x18] sm:$0xff]   ;;  %v3632_v21 = vld [vmem:[%s4870_s5 + $0xd0] sm:$0xff]  }
   0x9   :  { %3291 = vmatpush3.bf16.msra.mxu0 %v3617_v6  ;;  %v3626_v15 = vld [vmem:[%s4870_s5 + $0xa0] sm:$0xff]   ;;  %v3630_v19 = vld [vmem:[%s4870_s5 + $0x98] sm:$0xff]   ;;  %v3633_v22 = vld [vmem:[%s4869_s4 + $0x10] sm:$0xff]  }
   0xa   :  { %3319 = vmatpush3.bf16.msra.mxu1 %v3618_v7  ;;  %3292 = vmatprep.subr.bf16.mxu0 %v3619_v8  ;;  %v3634_v23 = vld [vmem:[%s4870_s5 + $0x90] sm:$0xff]   ;;  %v3635_v24 = vld [vmem:[%s4869_s4 + $0x48] sm:$0xff]   ;;  %v3639_v28 = vld [vmem:[%s4869_s4 + $0x40] sm:$0xff]  }
   0xb   :  { %3320 = vmatprep.subr.bf16.mxu1 %v3620_v9  ;;  %v3636_v25 = vld [vmem:[%s4870_s5 + $0xc8] sm:$0xff]   ;;  %v3640_v29 = vld [vmem:[%s4870_s5 + $0xc0] sm:$0xff]   ;;  %v51_v34 = vld [vmem:[%s4866_s1 + $0x10] sm:$0x11] }
   0xc   :  { %v3637_v26 = vld [vmem:[%s4869_s4 + $0x8] sm:$0xff]   ;;  %v3641_v30 = vld [vmem:[%s4869_s4] sm:$0xff]   ;;  %vm4069_vm2 = vmor %vm61_vm0, %vm62_vm1  ;;  %v69_v38 = vrot.slane %v51_v34, 5 }
   0xd   :  { %3293 = vmatpush3.bf16.msra.mxu0 %v3621_v10  ;;  %v3638_v27 = vld [vmem:[%s4870_s5 + $0x88] sm:$0xff]   ;;  %v3642_v31 = vld [vmem:[%s4870_s5 + $0x80] sm:$0xff]   ;;  %v284_v40 = vld [vmem:[%s4867_s2 + $0x10] sm:$0x11] }
   0xe   :  { %3321 = vmatpush3.bf16.msra.mxu1 %v3622_v11  ;;  %3294 = vmatprep.subr.bf16.mxu0 %v3623_v12  ;;  %v49_v32 = vld [vmem:[%s4866_s1] sm:$0xee]  ;;  %v50_v33 = vld [vmem:[%s4866_s1 + $0x8] sm:$0xff]  ;;  %v384_v46 = vrot.slane %v284_v40, 5  ;;  %v3643_v47 = vld [vmem:[%s4870_s5 + $0x78] sm:$0xff]   ;;  %v311_v8 = vshll.u32 %v284_v40, 16 }
   0xf   :  { %3322 = vmatprep.subr.bf16.mxu1 %v3624_v13  ;;  %v2820_v36 = vrot.slane %v49_v32, 9  ;;  %v66_v37 = vrot.slane %v50_v33, 5  ;;  %v4076_v39 = vld [vmem:[%s4867_s2 + $0x8] sm:$0xff]  ;;  %v371_v41 = vld [vmem:[%s4867_s2] sm:$0xee]  ;;  %v3644_v51 = vld [vmem:[%s4870_s5 + $0x178] sm:$0xff]  }
  0x10   :  { %v381_v42 = vrot.slane %v4076_v39, 5  ;;  %v2843_v45 = vrot.slane %v371_v41, 9  ;;  %v3645_v55 = vld [vmem:[%s4870_s5 + $0x38] sm:$0xff]   ;;  %v3647_v59 = vld [vmem:[%s4870_s5 + $0x70] sm:$0xff]   ;;  %v3651_v63 = vld [vmem:[%s4870_s5 + $0x68] sm:$0xff]   ;;  %v301_v0 = vshll.u32 %v4076_v39, 16 }
  0x11   :  { %3295 = vmatpush3.bf16.msra.mxu0 %v3625_v14  ;;  %v67_v43 = vsel %vm4069_vm2, %v2820_v36, %v66_v37  ;;  %v68_v44 = vrot.slane %v66_v37, 4  ;;  %v3646_v58 = vld [vmem:[%s4870_s5 + $0x138] sm:$0xff]   ;;  %v3648_v60 = vld [vmem:[%s4870_s5 + $0x170] sm:$0xff]   ;;  %v3652_v1 = vld [vmem:[%s4870_s5 + $0x168] sm:$0xff]   ;;  %v305_v2 = vshrl.u32 %v4076_v39, 16  ;;  %v754_v4 = vshrl.u32 %v371_v41, 16 }
  0x12   :  { %3323 = vmatpush3.bf16.msra.mxu1 %v3626_v15  ;;  %3296 = vmatprep.subr.bf16.mxu0 %v3627_v16  ;;  %v383_v48 = vrot.slane %v381_v42, 4  ;;  %v382_v50 = vsel %vm4069_vm2, %v2843_v45, %v381_v42  ;;  %v3649_v61 = vld [vmem:[%s4870_s5 + $0x30] sm:$0xff]   ;;  %v3653_v3 = vld [vmem:[%s4870_s5 + $0x28] sm:$0xff]   ;;  %v757_v6 = vshll.u32 %v371_v41, 16  ;;  %v3655_v7 = vld [vmem:[%s4870_s5 + $0x60] sm:$0xff]   ;;  %v4140_v11 = vrot.slane %v301_v0, 5 }
  0x13   :  { %3324 = vmatprep.subr.bf16.mxu1 %v3628_v17  ;;  %v70_v49 = vsel %vm4069_vm2, %v68_v44, %v69_v38  ;;  %v3650_v62 = vld [vmem:[%s4870_s5 + $0x130] sm:$0xff]   ;;  %v3654_v5 = vld [vmem:[%s4870_s5 + $0x128] sm:$0xff]   ;;  %v3656_v9 = vld [vmem:[%s4870_s5 + $0x160] sm:$0xff]   ;;  %v756_v12 = vrot.slane %v754_v4, 5  ;;  %v307_v17 = vrot.slane %v305_v2, 4  ;;  %v763_v36 = vrot.slane %v301_v0, 6 }
  0x14   :  { %v2823_v52 = vcombine.low %v67_v43, %v70_v49  ;;  %v2824_v53 = vcombine.high %v67_v43, %v70_v49  ;;  %v385_v54 = vsel %vm4069_vm2, %v383_v48, %v384_v46  ;;  %v3657_v10 = vld [vmem:[%s4870_s5 + $0x20] sm:$0xff]   ;;  %v759_v14 = vrot.slane %v757_v6, 6  ;;  %v3659_v15 = vld [vmem:[%s4870_s5 + $0x58] sm:$0xff]   ;;  %v3664_v33 = vld [vmem:[%s4870_s5 + $0x150] sm:$0xff]  }
  0x15   :  { %3297 = vmatpush3.bf16.msra.mxu0 %v3629_v18  ;;  %v2877_v56 = vcombine.low %v382_v50, %v385_v54  ;;  %v2878_v57 = vcombine.high %v382_v50, %v385_v54  ;;  %v3658_v13 = vld [vmem:[%s4870_s5 + $0x120] sm:$0xff]   ;;  %v3660_v16 = vld [vmem:[%s4870_s5 + $0x158] sm:$0xff]   ;;  %v3665_v34 = vld [vmem:[%s4870_s5 + $0x10] sm:$0xff]  }
  0x16   :  { %3325 = vmatpush3.bf16.msra.mxu1 %v3630_v19  ;;  %3298 = vmatprep.subr.bf16.mxu0 %v3631_v20  ;;  %v3661_v18 = vld [vmem:[%s4870_s5 + $0x18] sm:$0xff]   ;;  %v4154_v19 = vrot.slane %v311_v8, 5  ;;  %v3666_v38 = vld [vmem:[%s4870_s5 + $0x110] sm:$0xff]   ;;  %v4188_v39 = vld [vmem:[%s4867_s2 + $0x20] sm:$0xff] }
  0x17   :  { %3326 = vmatprep.subr.bf16.mxu1 %v3632_v21  ;;  %261 = vmatprep.mubr.bf16.mxu0 %v2824_v53  ;;  %v3662_v20 = vld [vmem:[%s4870_s5 + $0x118] sm:$0xff]   ;;  %v4193_v40 = vld [vmem:[%s4867_s2 + $0x28] sm:$0x11]  ;;  %v388_v46 = vrot.slane %v4188_v39, 5  ;;  %v282_v4 = vld [vmem:[%s4867_s2] sm:$0xff] }
  0x18   :  { %570 = vmatprep.mubr.bf16.mxu1 %v2878_v57  ;;  %v52_v21 = vld [vmem:[%s4866_s1 + $0x18] sm:$0xee]  ;;  %v3667_v49 = vld [vmem:[%s4870_s5 + $0x48] sm:$0xff]   ;;  %v295_v6 = vshll.u32 %v282_v4, 16  ;;  %vm4248_vm7 = vmor %vm750_vm5, %vm751_vm6 }
  0x19   :  { %3299 = vmatpush3.bf16.msra.mxu0 %v3633_v22  ;;  %v53_v22 = vld [vmem:[%s4866_s1 + $0x20] sm:$0xff]  ;;  %v4202_v45 = vld [vmem:[%s4867_s2 + $0x18] sm:$0xee]  ;;  %v390_v50 = vrot.slane %v388_v46, 4  ;;  %v3669_v53 = vld [vmem:[%s4870_s5 + $0x8] sm:$0xff]  }
  0x1a   :  { %3327 = vmatpush3.bf16.msra.mxu1 %v3634_v23  ;;  %3300 = vmatprep.subr.bf16.mxu0 %v3635_v24  ;;  %v54_v23 = vld [vmem:[%s4866_s1 + $0x28] sm:$0x11]  ;;  %v760_v24 = vor.u32 %v759_v14, %v756_v12  ;;  %v2844_v48 = vrot.slane %v4202_v45, 9  ;;  %vm4258_vm8 = vmor %vm288_vm3, %vm289_vm4  ;;  %v1921_v14 = vld [vmem:[%s4868_s3] sm:$0xcc] }
  0x1b   :  { %3328 = vmatprep.subr.bf16.mxu1 %v3636_v25  ;;  %v762_v25 = vrot.slane %v305_v2, 5  ;;  %v3670_v57 = vld [vmem:[%s4870_s5 + $0x108] sm:$0xff]   ;;  %vm4608_vm11 = vmor %vm1927_vm9, %vm1928_vm10 }
  0x1c   :  { %v4197_v42 = vrot.slane %v760_v24, 4 }
  0x1d   :  { %3301 = vmatpush3.bf16.msra.mxu0 %v3637_v26  ;;  %v2821_v26 = vrot.slane %v52_v21, 9  ;;  %v764_v54 = vor.u32 %v763_v36, %v762_v25 }
  0x1e   :  { %3329 = vmatpush3.bf16.msra.mxu1 %v3638_v27  ;;  %3302 = vmatprep.subr.bf16.mxu0 %v3639_v28  ;;  %v73_v27 = vrot.slane %v53_v22, 5  ;;  %v76_v28 = vrot.slane %v54_v23, 5  ;;  %v3676_v22 = vld [vmem:[%s4871_s6 + $0x78] sm:$0xff]  }
  0x1f   :  { %3330 = vmatprep.subr.bf16.mxu1 %v3640_v29  ;;  %v3663_v29 = vld [vmem:[%s4870_s5 + $0x50] sm:$0xff]   ;;  %v766_v2 = vrot.slane %v764_v54, 4  ;;  %v765_v23 = vsel %vm4248_vm7, %v4197_v42, %v764_v54 }
  0x20   :  { %v75_v32 = vrot.slane %v73_v27, 4 }
  0x21   :  { %3303 = vmatpush3.bf16.msra.mxu0 %v3641_v30  ;;  %v308_v30 = vor.u32 %v307_v17, %v4140_v11  ;;  %v3737_v17 = vld [vmem:[%s4871_s6 + $0x1c8] sm:$0xff]  }
  0x22   :  { %3331 = vmatpush3.bf16.msra.mxu1 %v3642_v31  ;;  %3344 = vmatprep.subr.bf16.mxu0 %v3643_v47  ;;  %v74_v31 = vsel %vm4069_vm2, %v2821_v26, %v73_v27  ;;  %v77_v37 = vsel %vm4069_vm2, %v75_v32, %v76_v28  ;;  %v391_v47 = vrot.slane %v4193_v40, 5  ;;  %v777_v26 = vshrl.u32 %v4202_v45, 16 }
  0x23   :  { %3372 = vmatprep.subr.bf16.mxu1 %v3644_v51  ;;  %v4195_v41 = vrot.slane %v308_v30, 4  ;;  %v2826_v43 = vcombine.high %v74_v31, %v77_v37  ;;  %v2825_v44 = vcombine.low %v74_v31, %v77_v37  ;;  %v3668_v51 = vld [vmem:[%s4870_s5 + $0x148] sm:$0xff]   ;;  %v3677_v31 = vld [vmem:[%s4871_s6 + $0xb8] sm:$0xff]   ;;  %v780_v37 = vshll.u32 %v4202_v45, 16 }
  0x24   :  { %262 = vmatmul.mubr.bf16.vlgmr.msra.gmra.mxu0 %v2823_v52  ;;  %v389_v52 = vsel %vm4069_vm2, %v2844_v48, %v388_v46  ;;  %v779_v32 = vrot.slane %v777_v26, 5  ;;  %v3681_v46 = vld [vmem:[%s4871_s6 + $0xb0] sm:$0xff]  }
  0x25   :  { %571 = vmatmul.mubr.bf16.vlgmr.msra.gmra.mxu1 %v2877_v56  ;;  %3345 = vmatpush3.bf16.msra.mxu0 %v3645_v55  ;;  %v325_v55 = vshll.u32 %v4188_v39, 16  ;;  %v392_v56 = vsel %vm4069_vm2, %v390_v50, %v391_v47  ;;  %v314_v28 = vsel %vm4258_vm8, %v4195_v41, %v4154_v19  ;;  %v3678_v19 = vld [vmem:[%s4871_s6 + $0x38] sm:$0xff]   ;;  %v3680_v41 = vld [vmem:[%s4871_s6 + $0x70] sm:$0xff]   ;;  %v3684_v50 = vld [vmem:[%s4871_s6 + $0x68] sm:$0xff]  }
  0x26   :  { %3373 = vmatpush3.bf16.msra.mxu1 %v3646_v58  ;;  %3346 = vmatprep.subr.bf16.mxu0 %v3647_v59  ;;  %v329_v58 = vshrl.u32 %v4188_v39, 16  ;;  %v2880_v59 = vcombine.high %v389_v52, %v392_v56  ;;  %v3682_v47 = vld [vmem:[%s4871_s6 + $0x30] sm:$0xff]   ;;  %v749_v39 = vld [vmem:[%s4867_s2 + $0x28] sm:$0x33] }
  0x27   :  { %3374 = vmatprep.subr.bf16.mxu1 %v3648_v60  ;;  %269 = vmatprep.mubr.bf16.mxu0 %v2826_v43  ;;  %v2879_v60 = vcombine.low %v389_v52, %v392_v56  ;;  %v285_v43 = vld [vmem:[%s4867_s2 + $0x18] sm:$0xff]  ;;  %v786_v45 = vrot.slane %v325_v55, 6  ;;  %v794_v56 = vshll.u32 %v749_v39, 16  ;;  %v3698_v26 = vld [vmem:[%s4871_s6 + $0x10] sm:$0xff]  }
  0x28   :  { %v331_v0 = vrot.slane %v329_v58, 4  ;;  %578 = vmatprep.mubr.bf16.mxu1 %v2880_v59  ;;  %v785_v42 = vrot.slane %v329_v58, 5  ;;  %v316_v48 = vshrl.u32 %v285_v43, 16 }
  0x29   :  { %3347 = vmatpush3.bf16.msra.mxu0 %v3649_v61  ;;  %v3671_v61 = vld [vmem:[%s4870_s5 + $0x40] sm:$0xff]  }
  0x2a   :  { %3375 = vmatpush3.bf16.msra.mxu1 %v3650_v62  ;;  %3348 = vmatprep.subr.bf16.mxu0 %v3651_v63  ;;  %v4230_v62 = vrot.slane %v325_v55, 5  ;;  %v3672_v63 = vld [vmem:[%s4870_s5 + $0x140] sm:$0xff]   ;;  %v787_v52 = vor.u32 %v786_v45, %v785_v42  ;;  %v791_v55 = vshrl.u32 %v749_v39, 16  ;;  %v3709_v45 = vld [vmem:[%s4871_s6 + $0x178] sm:$0xff]  }
  0x2b   :  { %3376 = vmatprep.subr.bf16.mxu1 %v3652_v1  ;;  %v3673_v1 = vld [vmem:[%s4870_s5] sm:$0xff]  }
  0x2c   :  { %270 = vmatmul.mubr.bf16.gmra.mxu0 %v2825_v44  ;;  %v782_v44 = vrot.slane %v780_v37, 6  ;;  %v789_v59 = vrot.slane %v787_v52, 4  ;;  %v4397_v37 = vld [vmem:[%s4868_s3 + $0x10] sm:$0x11] }
  0x2d   :  { %3349 = vmatpush3.bf16.msra.mxu0 %v3653_v3  ;;  %579 = vmatmul.mubr.bf16.gmra.mxu1 %v2879_v60  ;;  %v3674_v3 = vld [vmem:[%s4870_s5 + $0x100] sm:$0xff]  }
  0x2e   :  { %3377 = vmatpush3.bf16.msra.mxu1 %v3654_v5  ;;  %3350 = vmatprep.subr.bf16.mxu0 %v3655_v7  ;;  %v292_v5 = vshrl.u32 %v282_v4, 16  ;;  %v748_v7 = vld [vmem:[%s4867_s2 + $0x10] sm:$0x33] }
  0x2f   :  { %3378 = vmatprep.subr.bf16.mxu1 %v3656_v9  ;;  %v768_v8 = vshrl.u32 %v748_v7, 16  ;;  %v771_v9 = vshll.u32 %v748_v7, 16  ;;  %v3687_v7 = vld [vmem:[%s4871_s6 + $0xe0] sm:$0xff]  }
  0x30   :  { %v294_v12 = vrot.slane %v292_v5, 4 }
  0x31   :  { %3351 = vmatpush3.bf16.msra.mxu0 %v3657_v10  ;;  %v332_v10 = vor.u32 %v331_v0, %v4230_v62  ;;  %v3685_v0 = vld [vmem:[%s4871_s6 + $0xa8] sm:$0xff]  }
  0x32   :  { %3379 = vmatpush3.bf16.msra.mxu1 %v3658_v13  ;;  %3352 = vmatprep.subr.bf16.mxu0 %v3659_v15  ;;  %v297_v13 = vrot.slane %v295_v6, 5  ;;  %v3675_v15 = vld [vmem:[%s4871_s6 + $0xf8] sm:$0xff]   ;;  %v3688_v6 = vld [vmem:[%s4871_s6 + $0x60] sm:$0xff]  }
  0x33   :  { %3380 = vmatprep.subr.bf16.mxu1 %v3660_v16  ;;  %v335_v16 = vshll.u32 %v4193_v40, 16  ;;  %v333_v25 = vrot.slane %v332_v10, 4  ;;  %v3689_v10 = vld [vmem:[%s4871_s6 + $0xa0] sm:$0xff]  }
  0x34   :  { %v298_v21 = vor.u32 %v297_v13, %v294_v12 }
  0x35   :  { %3353 = vmatpush3.bf16.msra.mxu0 %v3661_v18  ;;  %v770_v18 = vrot.slane %v768_v8, 5 }
  0x36   :  { %3381 = vmatpush3.bf16.msra.mxu1 %v3662_v20  ;;  %3354 = vmatprep.subr.bf16.mxu0 %v3663_v29  ;;  %v773_v20 = vrot.slane %v771_v9, 6  ;;  %v299_v27 = vrot.slane %v298_v21, 4  ;;  %v337_v29 = vrot.slane %v335_v16, 5  ;;  %v3693_v21 = vld [vmem:[%s4871_s6 + $0x98] sm:$0xff]  }
  0x37   :  { %3382 = vmatprep.subr.bf16.mxu1 %v3664_v33 }
  0x38   :  { %v774_v24 = vor.u32 %v773_v20, %v770_v18  ;;  %v304_v33 = vsel %vm4258_vm8, %v299_v27, %v4140_v11  ;;  %v3679_v11 = vld [vmem:[%s4871_s6 + $0xf0] sm:$0xff]   ;;  %v3690_v18 = vld [vmem:[%s4871_s6 + $0x20] sm:$0xff]   ;;  %v3691_v20 = vld [vmem:[%s4871_s6 + $0xd8] sm:$0xff]  }
  0x39   :  { %3355 = vmatpush3.bf16.msra.mxu0 %v3665_v34  ;;  %v2898_v40 = vcombine.high %v304_v33, %v314_v28  ;;  %v3700_v27 = vld [vmem:[%s4871_s6 + $0x48] sm:$0xff]  }
  0x3a   :  { %3383 = vmatpush3.bf16.msra.mxu1 %v3666_v38  ;;  %3356 = vmatprep.subr.bf16.mxu0 %v3667_v49  ;;  %v775_v30 = vsel %vm4248_vm7, %v766_v2, %v774_v24  ;;  %v2897_v38 = vcombine.low %v304_v33, %v314_v28  ;;  %v319_v49 = vshll.u32 %v285_v43, 16  ;;  %v3695_v24 = vld [vmem:[%s4871_s6 + $0xd0] sm:$0xff]   ;;  %v3699_v28 = vld [vmem:[%s4871_s6 + $0xc8] sm:$0xff]   ;;  %v3705_v33 = vld [vmem:[%s4871_s6 + $0x80] sm:$0xff]  }
  0x3b   :  { %3384 = vmatprep.subr.bf16.mxu1 %v3668_v51  ;;  %v2949_v34 = vcombine.low %v765_v23, %v775_v30  ;;  %v2950_v36 = vcombine.high %v765_v23, %v775_v30  ;;  %731 = vmatprep.mubr.bf16.mxu0 %v2898_v40  ;;  %v783_v51 = vor.u32 %v782_v44, %v779_v32  ;;  %v3696_v23 = vld [vmem:[%s4871_s6 + $0x50] sm:$0xff]   ;;  %v3702_v30 = vld [vmem:[%s4871_s6 + $0x8] sm:$0xff]   ;;  %v3703_v32 = vld [vmem:[%s4871_s6 + $0xc0] sm:$0xff]  }
  0x3c   :  { %v321_v54 = vrot.slane %v319_v49, 5 }
  0x3d   :  { %3357 = vmatpush3.bf16.msra.mxu0 %v3669_v53  ;;  %976 = vmatprep.mubr.bf16.mxu1 %v2950_v36  ;;  %v318_v53 = vrot.slane %v316_v48, 4  ;;  %v784_v58 = vrot.slane %v783_v51, 4  ;;  %v1012_v36 = vld [vmem:[%s4868_s3] sm:$0xff] }
  0x3e   :  { %3385 = vmatpush3.bf16.msra.mxu1 %v3670_v57  ;;  %3358 = vmatprep.subr.bf16.mxu0 %v3671_v61  ;;  %v3683_v57 = vld [vmem:[%s4871_s6 + $0xe8] sm:$0xff]   ;;  %v793_v61 = vrot.slane %v791_v55, 5  ;;  %v1054_v40 = vshll.u32 %v1012_v36, 16 }
  0x3f   :  { %3386 = vmatprep.subr.bf16.mxu1 %v3672_v63  ;;  %v322_v60 = vor.u32 %v321_v54, %v318_v53  ;;  %v796_v63 = vrot.slane %v794_v56, 6  ;;  %v788_v4 = vsel %vm4248_vm7, %v784_v58, %v787_v52  ;;  %v3711_v52 = vld [vmem:[%s4871_s6 + $0x1f8] sm:$0xff]  }
  0x40   :  { %v3712_v53 = vld [vmem:[%s4871_s6 + $0x1b8] sm:$0xff]  }
  0x41   :  { %3359 = vmatpush3.bf16.msra.mxu0 %v3673_v1  ;;  %v3686_v1 = vld [vmem:[%s4871_s6 + $0x28] sm:$0xff]   ;;  %v323_v2 = vrot.slane %v322_v60, 4  ;;  %v797_v5 = vor.u32 %v796_v63, %v793_v61  ;;  %v3710_v56 = vld [vmem:[%s4871_s6 + $0x138] sm:$0xff]   ;;  %v3716_v63 = vld [vmem:[%s4871_s6 + $0x1b0] sm:$0xff]  }
  0x42   :  { %3387 = vmatpush3.bf16.msra.mxu1 %v3674_v3  ;;  %3400 = vmatprep.subr.bf16.mxu0 %v3675_v15  ;;  %v338_v3 = vsel %vm4258_vm8, %v333_v25, %v337_v29  ;;  %v3697_v25 = vld [vmem:[%s4871_s6 + $0x90] sm:$0xff]   ;;  %v3701_v29 = vld [vmem:[%s4871_s6 + $0x88] sm:$0xff]  }
  0x43   :  { %3428 = vmatprep.subr.bf16.mxu1 %v3676_v22  ;;  %v328_v8 = vsel %vm4258_vm8, %v323_v2, %v4230_v62  ;;  %v798_v9 = vsel %vm4248_vm7, %v789_v59, %v797_v5  ;;  %v3692_v62 = vld [vmem:[%s4871_s6 + $0x58] sm:$0xff]   ;;  %v3715_v59 = vld [vmem:[%s4871_s6 + $0x1f0] sm:$0xff]   ;;  %v3719_v2 = vld [vmem:[%s4871_s6 + $0x1e8] sm:$0xff]  }
  0x44   :  { %732 = vmatmul.mubr.bf16.vlgmr.msra.gmra.mxu0 %v2897_v38  ;;  %v2900_v12 = vcombine.high %v328_v8, %v338_v3  ;;  %v2899_v13 = vcombine.low %v328_v8, %v338_v3  ;;  %v2952_v15 = vcombine.high %v788_v4, %v798_v9  ;;  %v2951_v16 = vcombine.low %v788_v4, %v798_v9  ;;  %v3694_v22 = vld [vmem:[%s4871_s6 + $0x18] sm:$0xff]   ;;  %v3720_v3 = vld [vmem:[%s4871_s6 + $0x1a8] sm:$0xff]   ;;  %v3721_v8 = vld [vmem:[%s4871_s6 + $0x160] sm:$0xff]  }
  0x45   :  { %977 = vmatmul.mubr.bf16.vlgmr.msra.gmra.mxu1 %v2949_v34  ;;  %3401 = vmatpush3.bf16.msra.mxu0 %v3677_v31  ;;  %v3704_v31 = vld [vmem:[%s4871_s6 + $0x40] sm:$0xff]   ;;  %v1051_v38 = vshrl.u32 %v1012_v36, 16  ;;  %v3717_v4 = vld [vmem:[%s4871_s6 + $0x168] sm:$0xff]  }
  0x46   :  { %3429 = vmatpush3.bf16.msra.mxu1 %v3678_v19  ;;  %3402 = vmatprep.subr.bf16.mxu0 %v3679_v11  ;;  %v3706_v34 = vld [vmem:[%s4871_s6] sm:$0xff]   ;;  %v4392_v19 = vld [vmem:[%s4868_s3 + $0x8] sm:$0xff]  ;;  %v1070_v11 = vshll.u32 %v4397_v37, 16 }
  0x47   :  { %3430 = vmatprep.subr.bf16.mxu1 %v3680_v41  ;;  %739 = vmatprep.mubr.bf16.mxu0 %v2900_v12  ;;  %v1060_v41 = vshll.u32 %v4392_v19, 16  ;;  %v1064_v42 = vshrl.u32 %v4392_v19, 16  ;;  %v3023_v43 = vcombine.high %v1012_v36, %v4392_v19  ;;  %v3022_v44 = vcombine.low %v1012_v36, %v4392_v19  ;;  %v3718_v5 = vld [vmem:[%s4871_s6 + $0x128] sm:$0xff]   ;;  %v3722_v9 = vld [vmem:[%s4871_s6 + $0x120] sm:$0xff]  }
  0x48   :  { %984 = vmatprep.mubr.bf16.mxu1 %v2952_v15  ;;  %v1072_v51 = vrot.slane %v1070_v11, 5  ;;  %v4466_v12 = vld [vmem:[%s4868_s3 + $0x20] sm:$0xff]  ;;  %v3725_v15 = vld [vmem:[%s4871_s6 + $0x158] sm:$0xff]  }
  0x49   :  { %3403 = vmatpush3.bf16.msra.mxu0 %v3681_v46  ;;  %v1053_v46 = vrot.slane %v1051_v38, 4  ;;  %v1062_v48 = vrot.slane %v1060_v41, 5  ;;  %v1066_v49 = vrot.slane %v1064_v42, 4  ;;  %v3731_v38 = vld [vmem:[%s4871_s6 + $0x150] sm:$0xff]  }
  0x4a   :  { %3431 = vmatpush3.bf16.msra.mxu1 %v3682_v47  ;;  %3404 = vmatprep.subr.bf16.mxu0 %v3683_v57  ;;  %v1056_v47 = vrot.slane %v1054_v40, 5 }
  0x4b   :  { %3432 = vmatprep.subr.bf16.mxu1 %v3684_v50  ;;  %v1067_v39 = vor.u32 %v1066_v49, %v1062_v48 }
  0x4c   :  { %740 = vmatmul.mubr.bf16.gmra.mxu0 %v2899_v13  ;;  %v1057_v50 = vor.u32 %v1056_v47, %v1053_v46  ;;  %v1465_v13 = vrot.slane %v4392_v19, 5  ;;  %v3732_v47 = vld [vmem:[%s4871_s6 + $0x110] sm:$0xff]  }
  0x4d   :  { %3405 = vmatpush3.bf16.msra.mxu0 %v3685_v0  ;;  %985 = vmatmul.mubr.bf16.gmra.mxu1 %v2951_v16  ;;  %v1068_v55 = vrot.slane %v1067_v39, 4  ;;  %v3713_v0 = vld [vmem:[%s4871_s6 + $0x170] sm:$0xff]   ;;  %v4475_v16 = vld [vmem:[%s4868_s3 + $0x28] sm:$0x11] }
  0x4e   :  { %3433 = vmatpush3.bf16.msra.mxu1 %v3686_v1  ;;  %3406 = vmatprep.subr.bf16.mxu0 %v3687_v7  ;;  %v1058_v54 = vrot.slane %v1057_v50, 4  ;;  %v3714_v1 = vld [vmem:[%s4871_s6 + $0x130] sm:$0xff]   ;;  %v3724_v7 = vld [vmem:[%s4871_s6 + $0x1a0] sm:$0xff]   ;;  %v1467_v40 = vrot.slane %v1465_v13, 4  ;;  %v3735_v39 = vld [vmem:[%s4871_s6 + $0x148] sm:$0xff]  }
  0x4f   :  { %3434 = vmatprep.subr.bf16.mxu1 %v3688_v6  ;;  %1440 = vmatprep.mubr.bf16.mxu1 %v3023_v43  ;;  %v1073_v58 = vsel %vm4258_vm8, %v1068_v55, %v1072_v51  ;;  %v3723_v6 = vld [vmem:[%s4871_s6 + $0x1e0] sm:$0xff]   ;;  %v3733_v43 = vld [vmem:[%s4871_s6 + $0x1d0] sm:$0xff]   ;;  %v1686_v51 = vrot.slane %v1064_v42, 5  ;;  %v3736_v42 = vld [vmem:[%s4871_s6 + $0x108] sm:$0xff]  }
  0x50   :  { %v1063_v57 = vsel %vm4258_vm8, %v1058_v54, %v1062_v48  ;;  %v1472_v48 = vrot.slane %v4466_v12, 5  ;;  %v1475_v54 = vrot.slane %v4475_v16, 5 }
  0x51   :  { %3407 = vmatpush3.bf16.msra.mxu0 %v3689_v10  ;;  %v3002_v60 = vcombine.low %v1063_v57, %v1073_v58  ;;  %v3003_v61 = vcombine.high %v1063_v57, %v1073_v58  ;;  %v1014_v10 = vld [vmem:[%s4868_s3 + $0x18] sm:$0xff]  ;;  %v3741_v57 = vld [vmem:[%s4871_s6 + $0x1c0] sm:$0xff]  }
  0x52   :  { %3435 = vmatpush3.bf16.msra.mxu1 %v3690_v18  ;;  %3408 = vmatprep.subr.bf16.mxu0 %v3691_v20  ;;  %v1075_v18 = vshrl.u32 %v1014_v10, 16  ;;  %v1084_v20 = vshll.u32 %v4466_v12, 16  ;;  %v1474_v55 = vrot.slane %v1472_v48, 4  ;;  %v1457_v58 = vld [vmem:[%s4868_s3] sm:$0xee] }
  0x53   :  { %3436 = vmatprep.subr.bf16.mxu1 %v3692_v62  ;;  %1275 = vmatprep.mubr.bf16.mxu0 %v3003_v61  ;;  %v1078_v62 = vshll.u32 %v1014_v10, 16 }
  0x55   :  { %3409 = vmatpush3.bf16.msra.mxu0 %v3693_v21  ;;  %v1088_v21 = vshrl.u32 %v4466_v12, 16 }
  0x56   :  { %3437 = vmatpush3.bf16.msra.mxu1 %v3694_v22  ;;  %3410 = vmatprep.subr.bf16.mxu0 %v3695_v24  ;;  %v1094_v22 = vshll.u32 %v4475_v16, 16  ;;  %v3728_v24 = vld [vmem:[%s4871_s6 + $0x1d8] sm:$0xff]   ;;  %v1932_v16 = vrot.slane %v4392_v19, 6  ;;  %v3756_v19 = vld [vmem:[%s4871_s6 + $0x208] sm:$0xff]  }
  0x57   :  { %3438 = vmatprep.subr.bf16.mxu1 %v3696_v23  ;;  %v3025_v23 = vcombine.high %v1014_v10, %v4466_v12 }
  0x58   :  { %v1096_v36 = vrot.slane %v1094_v22, 5 }
  0x59   :  { %3411 = vmatpush3.bf16.msra.mxu0 %v3697_v25  ;;  %v3024_v25 = vcombine.low %v1014_v10, %v4466_v12 }
  0x5a   :  { %3439 = vmatpush3.bf16.msra.mxu1 %v3698_v26  ;;  %3412 = vmatprep.subr.bf16.mxu0 %v3699_v28  ;;  %v1077_v26 = vrot.slane %v1075_v18, 4  ;;  %v1086_v28 = vrot.slane %v1084_v20, 5 }
  0x5b   :  { %3440 = vmatprep.subr.bf16.mxu1 %v3700_v27  ;;  %v1080_v27 = vrot.slane %v1078_v62, 5 }
  0x5d   :  { %3413 = vmatpush3.bf16.msra.mxu0 %v3701_v29  ;;  %v1090_v29 = vrot.slane %v1088_v21, 4 }
  0x5e   :  { %3441 = vmatpush3.bf16.msra.mxu1 %v3702_v30  ;;  %3414 = vmatprep.subr.bf16.mxu0 %v3703_v32  ;;  %v3730_v30 = vld [vmem:[%s4871_s6 + $0x198] sm:$0xff]  }
  0x5f   :  { %3442 = vmatprep.subr.bf16.mxu1 %v3704_v31  ;;  %v1468_v31 = vrot.slane %v4397_v37, 5  ;;  %v3726_v32 = vld [vmem:[%s4871_s6 + $0x118] sm:$0xff]  }
  0x61   :  { %3415 = vmatpush3.bf16.msra.mxu0 %v3705_v33  ;;  %v1081_v33 = vor.u32 %v1080_v27, %v1077_v26  ;;  %v1469_v61 = vsel %vm4069_vm2, %v1467_v40, %v1468_v31  ;;  %v1476_v26 = vsel %vm4069_vm2, %v1474_v55, %v1475_v54  ;;  %v4576_v27 = vld [vmem:[%s4868_s3 + $0x28] sm:$0x33] }
  0x62   :  { %3443 = vmatpush3.bf16.msra.mxu1 %v3706_v34  ;;  %3456 = vmatprep.subr.bf16.mxu0 %v3709_v45  ;;  %v1091_v34 = vor.u32 %v1090_v29, %v1086_v28  ;;  %v1718_v40 = vshll.u32 %v4576_v27, 16 }
  0x63   :  { %3484 = vmatprep.subr.bf16.mxu1 %v3711_v52  ;;  %v1082_v11 = vrot.slane %v1081_v33, 4  ;;  %v1687_v52 = vrot.slane %v1060_v41, 6  ;;  %v3739_v41 = vld [vmem:[%s4871_s6 + $0x140] sm:$0xff]  }
  0x64   :  { %1276 = vmatmul.mubr.bf16.vlgmr.msra.gmra.mxu0 %v3002_v60  ;;  %v1092_v37 = vrot.slane %v1091_v34, 4  ;;  %v3042_v60 = vrot.slane %v1457_v58, 9  ;;  %v1715_v34 = vshrl.u32 %v4576_v27, 16 }
  0x65   :  { %1441 = vmatmul.mubr.bf16.vlgmr.msra.gmra.mxu1 %v3022_v44  ;;  %3457 = vmatpush3.bf16.msra.mxu0 %v3710_v56  ;;  %v3734_v44 = vld [vmem:[%s4871_s6 + $0x190] sm:$0xff]   ;;  %v1087_v45 = vsel %vm4258_vm8, %v1082_v11, %v1086_v28  ;;  %v1709_v56 = vrot.slane %v1088_v21, 5 }
  0x66   :  { %3485 = vmatpush3.bf16.msra.mxu1 %v3712_v53  ;;  %3458 = vmatprep.subr.bf16.mxu0 %v3713_v0  ;;  %v1097_v46 = vsel %vm4258_vm8, %v1092_v37, %v1096_v36  ;;  %v3738_v53 = vld [vmem:[%s4871_s6 + $0x188] sm:$0xff]   ;;  %v1688_v0 = vor.u32 %v1687_v52, %v1686_v51 }
  0x67   :  { %3486 = vmatprep.subr.bf16.mxu1 %v3715_v59  ;;  %1448 = vmatprep.mubr.bf16.mxu1 %v3025_v23  ;;  %v3005_v49 = vcombine.high %v1087_v45, %v1097_v46  ;;  %v3004_v50 = vcombine.low %v1087_v45, %v1097_v46  ;;  %v1710_v59 = vrot.slane %v1084_v20, 6  ;;  %v3744_v20 = vld [vmem:[%s4871_s6 + $0x238] sm:$0xff]   ;;  %v3745_v23 = vld [vmem:[%s4871_s6 + $0x270] sm:$0xff]   ;;  %v3747_v46 = vld [vmem:[%s4871_s6 + $0x268] sm:$0xff]  }
  0x69   :  { %3459 = vmatpush3.bf16.msra.mxu0 %v3714_v1  ;;  %1283 = vmatprep.mubr.bf16.mxu0 %v3005_v49  ;;  %v3740_v1 = vld [vmem:[%s4871_s6 + $0x100] sm:$0xff]   ;;  %v1711_v29 = vor.u32 %v1710_v59, %v1709_v56  ;;  %v1720_v49 = vrot.slane %v1718_v40, 6 }
  0x6a   :  { %3487 = vmatpush3.bf16.msra.mxu1 %v3716_v63  ;;  %3460 = vmatprep.subr.bf16.mxu0 %v3717_v4  ;;  %v3742_v63 = vld [vmem:[%s4871_s6 + $0x180] sm:$0xff]   ;;  %v3743_v4 = vld [vmem:[%s4871_s6 + $0x278] sm:$0xff]  }
  0x6b   :  { %3488 = vmatprep.subr.bf16.mxu1 %v3719_v2  ;;  %v1678_v2 = vshrl.u32 %v1457_v58, 16  ;;  %v3750_v59 = vld [vmem:[%s4871_s6 + $0x220] sm:$0xff]  }
  0x6c   :  { %1284 = vmatmul.mubr.bf16.gmra.mxu0 %v3004_v50 }
  0x6d   :  { %3461 = vmatpush3.bf16.msra.mxu0 %v3718_v5  ;;  %1449 = vmatmul.mubr.bf16.gmra.mxu1 %v3024_v25  ;;  %v4557_v5 = vld [vmem:[%s4868_s3 + $0x10] sm:$0x33] }
  0x6e   :  { %3489 = vmatpush3.bf16.msra.mxu1 %v3720_v3  ;;  %3462 = vmatprep.subr.bf16.mxu0 %v3721_v8  ;;  %v1466_v3 = vsel %vm4069_vm2, %v3042_v60, %v1465_v13  ;;  %v1680_v8 = vrot.slane %v1678_v2, 5  ;;  %v1695_v13 = vshll.u32 %v4557_v5, 16  ;;  %v1935_v55 = vrot.slane %v4557_v5, 6  ;;  %v3751_v60 = vld [vmem:[%s4871_s6 + $0x258] sm:$0xff]  }
  0x6f   :  { %3490 = vmatprep.subr.bf16.mxu1 %v3723_v6  ;;  %v1681_v6 = vshll.u32 %v1457_v58, 16  ;;  %v3076_v18 = vcombine.low %v1466_v3, %v1469_v61 }
  0x70   :  { %v1697_v22 = vrot.slane %v1695_v13, 6 }
  0x71   :  { %3463 = vmatpush3.bf16.msra.mxu0 %v3722_v9  ;;  %v1692_v9 = vshrl.u32 %v4557_v5, 16  ;;  %v1683_v10 = vrot.slane %v1681_v6, 6  ;;  %v1922_v5 = vld [vmem:[%s4868_s3 + $0x18] sm:$0xcc]  ;;  %v1939_v6 = vrot.slane %v4466_v12, 6 }
  0x72   :  { %3491 = vmatpush3.bf16.msra.mxu1 %v3724_v7  ;;  %3464 = vmatprep.subr.bf16.mxu0 %v3725_v15  ;;  %v3077_v7 = vcombine.high %v1466_v3, %v1469_v61  ;;  %v1690_v15 = vrot.slane %v1688_v0, 4  ;;  %v3752_v61 = vld [vmem:[%s4871_s6 + $0x218] sm:$0xff]  }
  0x73   :  { %3492 = vmatprep.subr.bf16.mxu1 %v3728_v24  ;;  %v1694_v62 = vrot.slane %v1692_v9, 5  ;;  %v1684_v21 = vor.u32 %v1683_v10, %v1680_v8  ;;  %v1458_v24 = vld [vmem:[%s4868_s3 + $0x18] sm:$0xee]  ;;  %v1941_v8 = vrot.slane %v1939_v6, 4  ;;  %v3757_v9 = vld [vmem:[%s4871_s6 + $0x240] sm:$0xff]   ;;  %v3149_v10 = vrot.slane %v1922_v5, 10 }
  0x74   :  { %1654 = vmatprep.mubr.bf16.mxu0 %v3077_v7  ;;  %v3043_v25 = vrot.slane %v1458_v24, 9  ;;  %v1701_v28 = vshrl.u32 %v1458_v24, 16  ;;  %v1704_v33 = vshll.u32 %v1458_v24, 16  ;;  %v3755_v7 = vld [vmem:[%s4871_s6 + $0x248] sm:$0xff]  }
  0x75   :  { %3465 = vmatpush3.bf16.msra.mxu0 %v3726_v32  ;;  %v1698_v31 = vor.u32 %v1697_v22, %v1694_v62  ;;  %v3746_v32 = vld [vmem:[%s4871_s6 + $0x230] sm:$0xff]  }
  0x76   :  { %3493 = vmatpush3.bf16.msra.mxu1 %v3730_v30  ;;  %3466 = vmatprep.subr.bf16.mxu0 %v3731_v38  ;;  %v1685_v30 = vrot.slane %v1684_v21, 4  ;;  %v1473_v36 = vsel %vm4069_vm2, %v3043_v25, %v1472_v48  ;;  %v1703_v38 = vrot.slane %v1701_v28, 5  ;;  %v1706_v35 = vrot.slane %v1704_v33, 6 }
  0x77   :  { %3494 = vmatprep.subr.bf16.mxu1 %v3733_v43  ;;  %v1699_v37 = vsel %vm4248_vm7, %v1690_v15, %v1698_v31  ;;  %v3079_v43 = vcombine.high %v1473_v36, %v1476_v26  ;;  %v1713_v48 = vrot.slane %v1711_v29, 4  ;;  %v3078_v50 = vcombine.low %v1473_v36, %v1476_v26 }
  0x78   :  { %v1689_v11 = vsel %vm4248_vm7, %v1685_v30, %v1688_v0  ;;  %v1942_v15 = vrot.slane %v4576_v27, 6 }
  0x79   :  { %3467 = vmatpush3.bf16.msra.mxu0 %v3732_v47  ;;  %v3129_v45 = vcombine.high %v1689_v11, %v1699_v37  ;;  %v1717_v47 = vrot.slane %v1715_v34, 5 }
  0x7a   :  { %3495 = vmatpush3.bf16.msra.mxu1 %v3734_v44  ;;  %3468 = vmatprep.subr.bf16.mxu0 %v3735_v39  ;;  %v3128_v44 = vcombine.low %v1689_v11, %v1699_v37  ;;  %v1707_v39 = vor.u32 %v1706_v35, %v1703_v38 }
  0x7b   :  { %3496 = vmatprep.subr.bf16.mxu1 %v3737_v17  ;;  %1900 = vmatprep.mubr.bf16.mxu1 %v3129_v45  ;;  %v1721_v51 = vor.u32 %v1720_v49, %v1717_v47  ;;  %v3748_v17 = vld [vmem:[%s4871_s6 + $0x228] sm:$0xff]  }
  0x7c   :  { %v1708_v52 = vrot.slane %v1707_v39, 4 }
  0x7d   :  { %3469 = vmatpush3.bf16.msra.mxu0 %v3736_v42  ;;  %v1722_v54 = vsel %vm4248_vm7, %v1713_v48, %v1721_v51  ;;  %v1934_v42 = vrot.slane %v1932_v16, 4 }
  0x7e   :  { %3497 = vmatpush3.bf16.msra.mxu1 %v3738_v53  ;;  %3470 = vmatprep.subr.bf16.mxu0 %v3739_v41  ;;  %v3749_v53 = vld [vmem:[%s4871_s6 + $0x260] sm:$0xff]   ;;  %v1712_v41 = vsel %vm4248_vm7, %v1708_v52, %v1711_v29 }
  0x7f   :  { %3498 = vmatprep.subr.bf16.mxu1 %v3741_v57  ;;  %v3131_v57 = vcombine.high %v1712_v41, %v1722_v54  ;;  %v3130_v58 = vcombine.low %v1712_v41, %v1722_v54  ;;  %v1936_v0 = vsel %vm4608_vm11, %v1934_v42, %v1935_v55 }
  0x81   :  { %3471 = vmatpush3.bf16.msra.mxu0 %v3740_v1  ;;  %v3753_v1 = vld [vmem:[%s4871_s6 + $0x250] sm:$0xff]  }
  0x82   :  { %3499 = vmatpush3.bf16.msra.mxu1 %v3742_v63  ;;  %3512 = vmatprep.subr.bf16.mxu0 %v3743_v4  ;;  %v3148_v63 = vrot.slane %v1921_v14, 10  ;;  %v3754_v4 = vld [vmem:[%s4871_s6 + $0x210] sm:$0xff]  }
  0x84   :  { %1655 = vmatmul.mubr.bf16.vlgmr.msra.gmra.mxu0 %v3076_v18  ;;  %v1933_v2 = vsel %vm4608_vm11, %v3148_v63, %v1932_v16 }
  0x85   :  { %3513 = vmatpush3.bf16.msra.mxu0 %v3744_v20  ;;  %1662 = vmatprep.mubr.bf16.mxu0 %v3079_v43  ;;  %v3183_v3 = vcombine.high %v1933_v2, %v1936_v0 }
  0x86   :  { %3514 = vmatprep.subr.bf16.mxu0 %v3745_v23  ;;  %1901 = vmatmul.mubr.bf16.vlgmr.msra.gmra.mxu1 %v3128_v44 }
  0x87   :  { %1908 = vmatprep.mubr.bf16.mxu1 %v3131_v57 }
  0x89   :  { %3515 = vmatpush3.bf16.msra.mxu0 %v3746_v32 }
  0x8a   :  { %3516 = vmatprep.subr.bf16.mxu0 %v3747_v46 }
  0x8c   :  { %1663 = vmatmul.mubr.bf16.gmra.mxu0 %v3078_v50 }
  0x8d   :  { %3517 = vmatpush3.bf16.msra.mxu0 %v3748_v17  ;;  %2121 = vmatprep.mubr.bf16.mxu0 %v3183_v3 }
  0x8e   :  { %3518 = vmatprep.subr.bf16.mxu0 %v3749_v53  ;;  %1909 = vmatmul.mubr.bf16.gmra.mxu1 %v3130_v58 }
  0x91   :  { %3519 = vmatpush3.bf16.msra.mxu0 %v3750_v59 }
  0x92   :  { %3520 = vmatprep.subr.bf16.mxu0 %v3751_v60 }
  0x95   :  { %3521 = vmatpush3.bf16.msra.mxu0 %v3752_v61 }
  0x96   :  { %3522 = vmatprep.subr.bf16.mxu0 %v3753_v1 }
  0x99   :  { %3523 = vmatpush3.bf16.msra.mxu0 %v3754_v4 }
  0x9a   :  { %3524 = vmatprep.subr.bf16.mxu0 %v3755_v7 }
  0x9b   :  { %23 = vsyncpa [#allocation5], 0  ;;  %v3758_v12 = vld [vmem:[%s4871_s6 + $0x200] sm:$0xff]   ;;  %v1940_v13 = vsel %vm4608_vm11, %v3149_v10, %v1939_v6  ;;  %v1943_v16 = vsel %vm4608_vm11, %v1941_v8, %v1942_v15  ;;  %v3182_v18 = vcombine.low %v1933_v2, %v1936_v0  ;;  %v3761_v24 = vld [vmem:[%s4875_s10 + $0xac] ss:$12 sps:$4 sm:$0xff]   ;;  %v3871_v7 = vmov 0  }
  0x9c   :  { %v3185_v62 = vcombine.high %v1940_v13, %v1943_v16  ;;  %v3184_v20 = vcombine.low %v1940_v13, %v1943_v16  ;;  %v4663_v25 = vld [vmem:[%s4872_s7] ss:$0 sm:$0xff]  ;;  %v3759_v27 = vld [vmem:[%s4875_s10 + $0xa8] ss:$12 sps:$4 sm:$0xff]   ;;  %2408 = vmatprep.subr.bf16.mxu1 %v3761_v24  ;;  %v3762_v30 = vld [vmem:[%s4875_s10 + $0x90] ss:$12 sps:$4 sm:$0xff]   ;;  %2440 = vmatprep.mubr.bf16.mxu1 %v3871_v7 }
  0x9d   :  { %3525 = vmatpush3.bf16.msra.mxu0 %v3756_v19  ;;  %v3764_v28 = vld [vmem:[%s4875_s10 + $0x94] ss:$12 sps:$4 sm:$0xff]   ;;  %2409 = vmatpush1.bf16.msra.mxu1 %v3759_v27  ;;  %v3768_v31 = vld [vmem:[%s4875_s10 + $0xb0] ss:$12 sps:$4 sm:$0xff]   ;;  %v3772_v36 = vld [vmem:[%s4875_s10 + $0x98] ss:$12 sps:$4 sm:$0xff]  }
  0x9e   :  { %3526 = vmatprep.subr.bf16.mxu0 %v3757_v9  ;;  %2410 = vmatprep.subr.bf16.mxu1 %v3764_v28  ;;  %v3767_v34 = vld [vmem:[%s4875_s10 + $0x7c] ss:$12 sps:$4 sm:$0xff]   ;;  %v3765_v40 = vld [vmem:[%s4875_s10 + $0x78] ss:$12 sps:$4 sm:$0xff]   ;;  %v3769_v46 = vld [vmem:[%s4875_s10 + $0x60] ss:$12 sps:$4 sm:$0xff]  }
  0x9f   :  { %v3771_v43 = vld [vmem:[%s4875_s10 + $0x64] ss:$12 sps:$4 sm:$0xff]   ;;  %v3775_v47 = vld [vmem:[%s4875_s10 + $0x4c] ss:$12 sps:$4 sm:$0xff]   ;;  %v3773_v49 = vld [vmem:[%s4875_s10 + $0x48] ss:$12 sps:$4 sm:$0xff]   ;;  %3610 = vset.pattern.permute.xlu0 %v3871_v7 }
  0xa0   :  { %v3776_v48 = vld [vmem:[%s4875_s10 + $0x80] ss:$12 sps:$4 sm:$0xff]   ;;  %v3780_v51 = vld [vmem:[%s4875_s10 + $0x68] ss:$12 sps:$4 sm:$0xff]   ;;  %v3777_v52 = vld [vmem:[%s4875_s10 + $0x30] ss:$12 sps:$4 sm:$0xff]  }
  0xa1   :  { %3527 = vmatpush3.bf16.msra.mxu0 %v3758_v12  ;;  %2411 = vmatpush1.bf16.msra.mxu1 %v3762_v30  ;;  %v3779_v39 = vld [vmem:[%s4875_s10 + $0x34] ss:$12 sps:$4 sm:$0xff]   ;;  %v3783_v55 = vld [vmem:[%s4875_s10 + $0x1c] ss:$12 sps:$4 sm:$0xff]   ;;  %v3781_v57 = vld [vmem:[%s4875_s10 + $0x18] ss:$12 sps:$4 sm:$0xff]  }
  0xa2   :  { %3558 = vmatprep.subr.bf16.mxu0 %v3768_v31  ;;  %2412 = vmatprep.subr.bf16.mxu1 %v3767_v34  ;;  %v3784_v41 = vld [vmem:[%s4875_s10 + $0x50] ss:$12 sps:$4 sm:$0xff]   ;;  %v3788_v0 = vld [vmem:[%s4875_s10 + $0x38] ss:$12 sps:$4 sm:$0xff]   ;;  %v3785_v1 = vld [vmem:[%s4875_s10] ss:$12 sps:$4 sm:$0xff]  }
  0xa3   :  { %v3787_v63 = vld [vmem:[%s4875_s10 + $0x4] ss:$12 sps:$4 sm:$0xff]   ;;  %v3789_v6 = vld [vmem:[%s4875_s10 + $0x20] ss:$12 sps:$4 sm:$0xff]   ;;  %v3790_v9 = vld [vmem:[%s4875_s10 + $0x8] ss:$12 sps:$4 sm:$0xff]  }
  0xa4   :  { %2122 = vmatmul.mubr.bf16.vlgmr.msra.gmra.mxu0 %v3182_v18  ;;  %v2969_v24 = vld [vmem:[%s4873_s8] ss:$0 sm:$0xff]  ;;  %vm3873_vm12 = vmmov 0   ;;  %s4892_s29 = sld [smem:[#allocation9_spill]]  ;;  %vm2624_vm14 = vcmask 130048   ;;  %s3875_s17 = smov [#allocation2]  }
  0xa5   :  { %2129 = vmatprep.mubr.bf16.mxu0 %v3185_v62  ;;  %3559 = vmatpush3.bf16.msra.mxu0 %v3768_v31  ;;  %s2770_s18 = sshll.u32 %s3875_s17, 4  ;;  %s2771_s18 = int_to_ptr.vmem [resolvable:$true] %s2770_s18 }
  0xa6   :  { %3560 = vmatprep.subr.bf16.mxu0 %v3772_v36  ;;  %2413 = vmatpush1.bf16.msra.mxu1 %v3765_v40 }
  0xa7   :  { %2414 = vmatprep.subr.bf16.mxu1 %v3771_v43 }
  0xa9   :  { %3561 = vmatpush3.bf16.msra.mxu0 %v3772_v36 }
  0xaa   :  { %2415 = vmatpush1.bf16.msra.mxu1 %v3769_v46  ;;  %3562 = vmatprep.subr.bf16.mxu0 %v3776_v48 }
  0xab   :  { %2416 = vmatprep.subr.bf16.mxu1 %v3775_v47 }
  0xac   :  { %2130 = vmatmul.mubr.bf16.gmra.mxu0 %v3184_v20 }
  0xad   :  { %3563 = vmatpush3.bf16.msra.mxu0 %v3776_v48 }
  0xae   :  { %2417 = vmatpush1.bf16.msra.mxu1 %v3773_v49  ;;  %3564 = vmatprep.subr.bf16.mxu0 %v3780_v51 }
  0xaf   :  { %2418 = vmatprep.subr.bf16.mxu1 %v3779_v39 }
  0xb1   :  { %3565 = vmatpush3.bf16.msra.mxu0 %v3780_v51 }
  0xb2   :  { %2419 = vmatpush1.bf16.msra.mxu1 %v3777_v52  ;;  %3566 = vmatprep.subr.bf16.mxu0 %v3784_v41 }
  0xb3   :  { %2420 = vmatprep.subr.bf16.mxu1 %v3783_v55 }
  0xb5   :  { %3567 = vmatpush3.bf16.msra.mxu0 %v3784_v41 }
  0xb6   :  { %2421 = vmatpush1.bf16.msra.mxu1 %v3781_v57  ;;  %3568 = vmatprep.subr.bf16.mxu0 %v3788_v0 }
  0xb7   :  { %2422 = vmatprep.subr.bf16.mxu1 %v3787_v63 }
  0xb9   :  { %3569 = vmatpush3.bf16.msra.mxu0 %v3788_v0 }
  0xba   :  { %2423 = vmatpush1.bf16.msra.mxu1 %v3785_v1  ;;  %3570 = vmatprep.subr.bf16.mxu0 %v3789_v6 }
  0xbd   :  { %3571 = vmatpush3.bf16.msra.mxu0 %v3789_v6 }
  0xbe   :  { %3572 = vmatprep.subr.bf16.mxu0 %v3790_v9 }
  0xc1   :  { %3573 = vmatpush3.bf16.msra.mxu0 %v3790_v9 }
  0xe4   :  { %v3304_v21 = vpop.f32.mrf.mxu0 }
  0xe5   :  { %v4701_v45 = vpop.f32.mrf.mxu1 }
  0xe6   :  { %v3305_v22 = vpop.f32.mrf.mxu0 }
  0xe7   :  { %v3306_v23 = vadd.f32 %v3305_v22, %v3304_v21  ;;  %v3333_v35 = vpop.f32.mrf.mxu1 }
  0xe8   :  { %v3307_v26 = vpop.f32.mrf.mxu0  ;;  %v3334_v16 = vadd.f32 %v3333_v35, %v4701_v45 }
  0xe9   :  { %v4678_v32 = vadd.f32 %v3306_v23, %v4663_v25  ;;  %v4715_v50 = vpop.f32.mrf.mxu1 }
  0xea   :  { %v3308_v29 = vpop.f32.mrf.mxu0 }
  0xeb   :  { %v3309_v33 = vadd.f32 %v3308_v29, %v3307_v26  ;;  %v278_v11 = vmax.f32 %v4678_v32, 0.0  ;;  %v3336_v53 = vpop.f32.mrf.mxu1 }
  0xec   :  { %v3310_v17 = vpop.f32.mrf.mxu0  ;;  %v3337_v26 = vadd.f32 %v3336_v53, %v4715_v50 }
  0xed   :  { %v4687_v38 = vadd.f32 %v3309_v33, %v4663_v25  ;;  %v3338_v59 = vpop.f32.mrf.mxu1 }
  0xee   :  { %v3311_v54 = vpop.f32.mrf.mxu0 }
  0xef   :  { %v279_v37 = vmax.f32 %v4687_v38, 0.0  ;;  %v3312_v42 = vadd.f32 %v3311_v54, %v3310_v17  ;;  %v3339_v61 = vpop.f32.mrf.mxu1 }
  0xf0   :  { %v3313_v56 = vpop.f32.mrf.mxu0  ;;  %v3340_v43 = vadd.f32 %v3339_v61, %v3338_v59 }
  0xf1   :  { %v3258_v44 = vpack.c.bf16 %v279_v37, %v278_v11  ;;  %v4736_v58 = vadd.f32 %v3312_v42, %v4663_v25  ;;  %v3341_v4 = vpop.f32.mrf.mxu1 }
  0xf2   :  { %v3314_v60 = vpop.f32.mrf.mxu0 }
  0xf3   :  { %3259 = vst [vmem:[#allocation2] sm:$0xff] %v3258_v44   ;;  %v3315_v14 = vadd.f32 %v3314_v60, %v3313_v56  ;;  %v280_v2 = vmax.f32 %v4736_v58, 0.0  ;;  %v3342_v8 = vpop.f32.mrf.mxu1 }
  0xf4   :  { %v3343_v51 = vadd.f32 %v3342_v8, %v3341_v4 }
  0xf5   :  { %v4749_v3 = vadd.f32 %v3315_v14, %v4663_v25 }
  0xf7   :  { %v281_v5 = vmax.f32 %v4749_v3, 0.0 }
  0xf9   :  { %v3263_v19 = vpack.c.bf16 %v281_v5, %v280_v2 }
  0xfb   :  { %3285 = vst [vmem:[#allocation2 + $0x8] sm:$0xff] %v3263_v19  }
 0x104   :  { %v3360_v15 = vpop.f32.mrf.mxu0 }
 0x105   :  { %v3388_v10 = vpop.f32.mrf.mxu1 }
 0x106   :  { %v3361_v13 = vpop.f32.mrf.mxu0 }
 0x107   :  { %v3389_v12 = vpop.f32.mrf.mxu1  ;;  %v3362_v18 = vadd.f32 %v3361_v13, %v3360_v15 }
 0x108   :  { %v3390_v62 = vadd.f32 %v3389_v12, %v3388_v10  ;;  %v3363_v21 = vpop.f32.mrf.mxu0 }
 0x109   :  { %v3391_v20 = vpop.f32.mrf.mxu1  ;;  %v734_v22 = vadd.f32 %v3362_v18, %v3334_v16 }
 0x10a   :  { %v3364_v25 = vpop.f32.mrf.mxu0 }
 0x10b   :  { %v3392_v23 = vpop.f32.mrf.mxu1  ;;  %v993_v27 = vadd.f32 %v3390_v62, %v734_v22  ;;  %v3365_v28 = vadd.f32 %v3364_v25, %v3363_v21 }
 0x10c   :  { %v3393_v29 = vadd.f32 %v3392_v23, %v3391_v20  ;;  %v3366_v34 = vpop.f32.mrf.mxu0 }
 0x10d   :  { %v1004_v30 = vadd.f32 %v2969_v24, %v993_v27  ;;  %v737_v31 = vadd.f32 %v3365_v28, %v3337_v26  ;;  %v3394_v40 = vpop.f32.mrf.mxu1 }
 0x10e   :  { %v3367_v46 = vpop.f32.mrf.mxu0 }
 0x10f   :  { %v1008_v33 = vmax.f32 %v1004_v30, 0.0  ;;  %v994_v36 = vadd.f32 %v3393_v29, %v737_v31  ;;  %v3395_v35 = vpop.f32.mrf.mxu1  ;;  %v3368_v47 = vadd.f32 %v3367_v46, %v3366_v34 }
 0x110   :  { %v3396_v48 = vadd.f32 %v3395_v35, %v3394_v40  ;;  %v3369_v50 = vpop.f32.mrf.mxu0 }
 0x111   :  { %v4771_v44 = vadd.f32 %v1008_v33, %v278_v11  ;;  %v1005_v45 = vadd.f32 %v2969_v24, %v994_v36  ;;  %v3397_v39 = vpop.f32.mrf.mxu1  ;;  %v742_v17 = vadd.f32 %v3368_v47, %v3340_v43 }
 0x112   :  { %v3370_v54 = vpop.f32.mrf.mxu0 }
 0x113   :  { %v1009_v49 = vmax.f32 %v1005_v45, 0.0  ;;  %v3398_v42 = vpop.f32.mrf.mxu1  ;;  %v995_v32 = vadd.f32 %v3396_v48, %v742_v17  ;;  %v3371_v11 = vadd.f32 %v3370_v54, %v3369_v50 }
 0x114   :  { %v3399_v55 = vadd.f32 %v3398_v42, %v3397_v39 }
 0x115   :  { %v3268_v52 = vpack.c.bf16 %v1009_v49, %v1008_v33  ;;  %v4775_v53 = vadd.f32 %v1009_v49, %v279_v37  ;;  %v1006_v41 = vadd.f32 %v2969_v24, %v995_v32  ;;  %v745_v56 = vadd.f32 %v3371_v11, %v3343_v51 }
 0x117   :  { %3269 = vst [vmem:[#allocation4] sm:$0xff] %v3268_v52   ;;  %v1010_v57 = vmax.f32 %v1006_v41, 0.0  ;;  %v996_v59 = vadd.f32 %v3399_v55, %v745_v56  ;;  %v3202_v56 = vld [vmem:[%s4874_s9] ss:$0 sm:$0xff] }
 0x119   :  { %v4779_v60 = vadd.f32 %v1010_v57, %v280_v2  ;;  %v1007_v14 = vadd.f32 %v2969_v24, %v996_v59 }
 0x11b   :  { %v1011_v61 = vmax.f32 %v1007_v14, 0.0 }
 0x11d   :  { %v3273_v63 = vpack.c.bf16 %v1011_v61, %v1010_v57  ;;  %v4783_v38 = vadd.f32 %v1011_v61, %v281_v5 }
 0x11f   :  { %3286 = vst [vmem:[#allocation4 + $0x8] sm:$0xff] %v3273_v63  }
 0x124   :  { %v3416_v37 = vpop.f32.mrf.mxu0 }
 0x125   :  { %v3444_v4 = vpop.f32.mrf.mxu1 }
 0x126   :  { %v3417_v0 = vpop.f32.mrf.mxu0 }
 0x127   :  { %v3445_v19 = vpop.f32.mrf.mxu1  ;;  %v3418_v27 = vadd.f32 %v3417_v0, %v3416_v37 }
 0x128   :  { %v3419_v1 = vpop.f32.mrf.mxu0  ;;  %v3446_v28 = vadd.f32 %v3445_v19, %v3444_v4 }
 0x129   :  { %v3447_v9 = vpop.f32.mrf.mxu1 }
 0x12a   :  { %v3420_v6 = vpop.f32.mrf.mxu0  ;;  %v1443_v33 = vadd.f32 %v3446_v28, %v3418_v27 }
 0x12b   :  { %v3448_v58 = vpop.f32.mrf.mxu1  ;;  %v3421_v34 = vadd.f32 %v3420_v6, %v3419_v1 }
 0x12c   :  { %v3422_v8 = vpop.f32.mrf.mxu0  ;;  %v3449_v36 = vadd.f32 %v3448_v58, %v3447_v9 }
 0x12d   :  { %v3450_v15 = vpop.f32.mrf.mxu1 }
 0x12e   :  { %v3423_v10 = vpop.f32.mrf.mxu0  ;;  %v1446_v50 = vadd.f32 %v3449_v36, %v3421_v34  ;;  %v3872_v34 = vmov 0.0  }
 0x12f   :  { %v3451_v13 = vpop.f32.mrf.mxu1  ;;  %v3424_v47 = vadd.f32 %v3423_v10, %v3422_v8  ;;  %3578 = vmatprep.subr.bf16.mxu1 %v3872_v34  ;;  %3596 = vmatprep.subr.bf16.mxu0 %v3872_v34 }
 0x130   :  { %v3425_v2 = vpop.f32.mrf.mxu0  ;;  %v3452_v48 = vadd.f32 %v3451_v13, %v3450_v15 }
 0x131   :  { %v3453_v18 = vpop.f32.mrf.mxu1 }
 0x132   :  { %v3426_v12 = vpop.f32.mrf.mxu0  ;;  %v1451_v11 = vadd.f32 %v3452_v48, %v3424_v47 }
 0x133   :  { %v3454_v5 = vpop.f32.mrf.mxu1  ;;  %v3427_v55 = vadd.f32 %v3426_v12, %v3425_v2 }
 0x134   :  { %v3455_v41 = vadd.f32 %v3454_v5, %v3453_v18 }
 0x136   :  { %v1454_v19 = vadd.f32 %v3455_v41, %v3427_v55 }
 0x144   :  { %v3472_v16 = vpop.f32.mrf.mxu0 }
 0x146   :  { %v3473_v3 = vpop.f32.mrf.mxu0  ;;  %v3500_v20 = vpop.f32.mrf.mxu1 }
 0x147   :  { %v3474_v30 = vadd.f32 %v3473_v3, %v3472_v16 }
 0x148   :  { %v3475_v62 = vpop.f32.mrf.mxu0  ;;  %v3501_v22 = vpop.f32.mrf.mxu1 }
 0x149   :  { %v1671_v43 = vadd.f32 %v3474_v30, %v1443_v33  ;;  %v3502_v45 = vadd.f32 %v3501_v22, %v3500_v20 }
 0x14a   :  { %v3476_v21 = vpop.f32.mrf.mxu0  ;;  %v3503_v24 = vpop.f32.mrf.mxu1 }
 0x14b   :  { %v3477_v46 = vadd.f32 %v3476_v21, %v3475_v62  ;;  %v1917_v17 = vadd.f32 %v3502_v45, %v1671_v43  ;;  %v2263_v45 = vld [vmem:[%s4876_s11] sm:$0x7]  ;;  %s3874_s11 = smov [#allocation4]  }
 0x14c   :  { %v3478_v23 = vpop.f32.mrf.mxu0  ;;  %v3504_v26 = vpop.f32.mrf.mxu1  ;;  %s2782_s0 = sshll.u32 %s3874_s11, 4  ;;  %s2783_s0 = int_to_ptr.vmem [resolvable:$true] %s2782_s0 }
 0x14d   :  { %v1672_v52 = vadd.f32 %v3477_v46, %v1446_v50  ;;  %v3505_v54 = vadd.f32 %v3504_v26, %v3503_v24  ;;  %s3807_s6 = scalar_lea.vmem %s2783_s0, 256  ;;  %p3812_p1 = scmp.lt.s32.totalorder %s2783_s0, %s2783_s0 }
 0x14e   :  { %v3479_v25 = vpop.f32.mrf.mxu0  ;;  %v3506_v31 = vpop.f32.mrf.mxu1  ;;  %p3808_p0 = scmp.ne.s32.totalorder %s2783_s0, %s3807_s6  ;;  %p3813_p2 = scmp.lt.s32.totalorder %s3807_s6, %s3807_s6 }
 0x14f   :  { %v3480_v39 = vadd.f32 %v3479_v25, %v3478_v23  ;;  %v1918_v37 = vadd.f32 %v3505_v54, %v1672_v52 }
 0x150   :  { %v3481_v29 = vpop.f32.mrf.mxu0  ;;  %v3507_v35 = vpop.f32.mrf.mxu1  ;;  %p3814_p3 = por %p3813_p2, %p3812_p1 }
 0x151   :  { %v1673_v14 = vadd.f32 %v3480_v39, %v1451_v11  ;;  %v3508_v0 = vadd.f32 %v3507_v35, %v3506_v31 }
 0x152   :  { %v3482_v40 = vpop.f32.mrf.mxu0  ;;  %v3509_v42 = vpop.f32.mrf.mxu1  ;;  %p3815_p4 = pnand %p3814_p3, %p3808_p0 }
 0x153   :  { %v3483_v61 = vadd.f32 %v3482_v40, %v3481_v29  ;;  %v1919_v12 = vadd.f32 %v3508_v0, %v1673_v14 }
 0x154   :  { %v3510_v1 = vpop.f32.mrf.mxu1 }
 0x155   :  { %v1674_v58 = vadd.f32 %v3483_v61, %v1454_v19  ;;  %v3511_v2 = vadd.f32 %v3510_v1, %v3509_v42 }
 0x157   :  { %v1920_v20 = vadd.f32 %v3511_v2, %v1674_v58 }
 0x164   :  { %v3528_v49 = vpop.f32.mrf.mxu0 }
 0x166   :  { %v3529_v51 = vpop.f32.mrf.mxu0 }
 0x167   :  { %v3530_v32 = vadd.f32 %v3529_v51, %v3528_v49 }
 0x168   :  { %v3531_v57 = vpop.f32.mrf.mxu0 }
 0x169   :  { %v2138_v59 = vadd.f32 %v3530_v32, %v1917_v17 }
 0x16a   :  { %v3532_v63 = vpop.f32.mrf.mxu0 }
 0x16b   :  { %v2149_v4 = vadd.f32 %v3202_v56, %v2138_v59  ;;  %v3533_v6 = vadd.f32 %v3532_v63, %v3531_v57 }
 0x16c   :  { %v3534_v8 = vpop.f32.mrf.mxu0 }
 0x16d   :  { %v2153_v9 = vmax.f32 %v2149_v4, 0.0  ;;  %v2139_v10 = vadd.f32 %v3533_v6, %v1918_v37 }
 0x16e   :  { %v3535_v15 = vpop.f32.mrf.mxu0 }
 0x16f   :  { %v2221_v13 = vadd.f32 %v4771_v44, %v2153_v9  ;;  %v2150_v16 = vadd.f32 %v3202_v56, %v2139_v10  ;;  %v3536_v18 = vadd.f32 %v3535_v15, %v3534_v8 }
 0x170   :  { %v3537_v3 = vpop.f32.mrf.mxu0 }
 0x171   :  { %2225 = vst [vmem:[%s4881_s16] sm:$0xff] %v2221_v13  ;;  %v2154_v5 = vmax.f32 %v2150_v16, 0.0  ;;  %v2140_v62 = vadd.f32 %v3536_v18, %v1919_v12 }
 0x172   :  { %v3538_v21 = vpop.f32.mrf.mxu0 }
 0x173   :  { %v3278_v22 = vpack.c.bf16 %v2154_v5, %v2153_v9  ;;  %v2222_v23 = vadd.f32 %v4775_v53, %v2154_v5  ;;  %v2151_v24 = vadd.f32 %v3202_v56, %v2140_v62  ;;  %v3539_v25 = vadd.f32 %v3538_v21, %v3537_v3 }
 0x175   :  { %3279 = vst [vmem:[#allocation6] sm:$0xff] %v3278_v22   ;;  %2226 = vst [vmem:[%s4881_s16 + $0x8] sm:$0xff] %v2222_v23  ;;  %v2229_v44 = vpack.c.bf16 %v2222_v23, %v2221_v13  ;;  %v2155_v26 = vmax.f32 %v2151_v24, 0.0  ;;  %v2141_v27 = vadd.f32 %v3539_v25, %v1920_v20 }
 0x177   :  { %v2152_v28 = vadd.f32 %v3202_v56, %v2141_v27  ;;  %2441 = vmatmul.mubr.bf16.vlgmr.msra.gmra.mxu1 %v2229_v44  ;;  %3574 = vmatprep.mubr.bf16.mxu0 %v2229_v44  ;;  %v2223_v29 = vadd.f32 %v4779_v60, %v2155_v26  ;;  %v3240_v60 = vld [vmem:[%s4892_s29 + $0x1] ss:$0 sm:$0xff] }
 0x178   :  { %2450 = vmatprep.mubr.bf16.mxu1 %v3871_v7  ;;  %v3239_v7 = vld [vmem:[%s4892_s29] ss:$0 sm:$0xff] }
 0x179   :  { %v2156_v30 = vmax.f32 %v2152_v28, 0.0  ;;  %2227 = vst [vmem:[%s4881_s16 + $0x10] sm:$0xff] %v2223_v29  ;;  %2613 = vperm.xlu0 %3610, %v3239_v7  }
 0x17b   :  { %v3283_v53 = vpack.c.bf16 %v2156_v30, %v2155_v26  ;;  %v2224_v31 = vadd.f32 %v4783_v38, %v2156_v30  ;;  %v2265_v38 = vlaneseq }
 0x17d   :  { %3287 = vst [vmem:[#allocation6 + $0x8] sm:$0xff] %v3283_v53   ;;  %2228 = vst [vmem:[%s4881_s16 + $0x18] sm:$0xff] %v2224_v31  ;;  %v2230_v33 = vpack.c.bf16 %v2224_v31, %v2223_v29  ;;  %2616 = vperm.xlu0 %3610, %v3240_v60   ;;  %v2266_v36 = vshrl.u32 %v2265_v38, 7  ;;  %v2601_v12 = vand.u32 127, %v2265_v38 }
 0x17f   :  { %2451 = vmatmul.mubr.bf16.gmra.mxu1 %v2230_v33  ;;  %3575 = vmatmul.mubr.bf16.vlgmr.msra.gmra.mxu0 %v2230_v33  ;;  %v2271_v40 = vsub.s32 1, %v2266_v36  ;;  %v2275_v48 = vsub.s32 2, %v2266_v36  ;;  %v2267_v49 = vsub.s32 0, %v2266_v36 }
 0x180   :  { %3580 = vmatprep.mubr.msk.bf16.mxu1 %vm3873_vm12, %v3872_v34  ;;  %3598 = vmatprep.mubr.msk.bf16.mxu0 %vm3873_vm12, %v3872_v34 }
 0x181   :  { %v2272_v35 = vrot.slane %v2263_v45, %v2271_v40  ;;  %v2276_v42 = vrot.slane %v2263_v45, %v2275_v48  ;;  %v2268_v32 = vrot.slane %v2263_v45, %v2267_v49 }
 0x1f4   :  { %v2614_v13 = vpop.permute.xlu0 %2613 }
 0x1f5   :  { %vm2618_vm13 = vcmp.lt.s32.totalorder %v2601_v12, %v2614_v13 }
 0x1f8   :  { %v2617_v23 = vpop.permute.xlu0 %2616 }
 0x1f9   :  { %vm2619_vm15 = vcmp.lt.s32.totalorder %v2601_v12, %v2617_v23 }
 0x237   :  { %v2442_v43 = vpop.f32.mrf.mxu1 }
 0x238   :  { %v2443_v61 = vadd.f32 %v2442_v43, %v2268_v32 }
 0x239   :  { %v2444_v46 = vpop.f32.mrf.mxu1 }
 0x23a   :  { %v2445_v39 = vadd.f32 %v2444_v46, %v2272_v35 }
 0x23b   :  { %v2446_v47 = vpop.f32.mrf.mxu1 }
 0x23c   :  { %v2447_v41 = vadd.f32 %v2446_v47, %v2268_v32 }
 0x23d   :  { %v2448_v50 = vpop.f32.mrf.mxu1 }
 0x23e   :  { %v2449_v51 = vadd.f32 %v2448_v50, %v2272_v35  ;;  %v2510_v4 = vpack.c.bf16 %v2447_v41, %v2443_v61 }
 0x23f   :  { %v2452_v17 = vpop.f32.mrf.mxu1  ;;  %v3576_v52 = vpop.f32.mrf.mxu0 }
 0x240   :  { %v2512_v54 = vpack.c.bf16 %v2449_v51, %v2445_v39  ;;  %v4816_v59 = vadd.f32 %v3576_v52, %v2276_v42  ;;  %v2453_v10 = vadd.f32 %v2452_v17, %v2268_v32 }
 0x241   :  { %v2454_v11 = vpop.f32.mrf.mxu1  ;;  %v2495_v55 = vpop.f32.mrf.mxu0 }
 0x242   :  { %3579 = vmatpush3.bf16.xpose.msra.mxu1 %v2512_v54  ;;  %v2455_v37 = vadd.f32 %v2454_v11, %v2272_v35  ;;  %v4825_v58 = vadd.f32 %v2495_v55, %v2276_v42 }
 0x243   :  { %v2456_v56 = vpop.f32.mrf.mxu1  ;;  %v3577_v57 = vpop.f32.mrf.mxu0  ;;  %3584 = vmatprep.subr.bf16.mxu1 %v3872_v34 }
 0x244   :  { %v4818_v14 = vadd.f32 %v3577_v57, %v2276_v42  ;;  %v2457_v8 = vadd.f32 %v2456_v56, %v2268_v32 }
 0x245   :  { %v2458_v63 = vpop.f32.mrf.mxu1  ;;  %v2498_v19 = vpop.f32.mrf.mxu0 }
 0x246   :  { %v2672_v0 = vpack.c.bf16 %v4818_v14, %v4816_v59  ;;  %v2459_v1 = vadd.f32 %v2458_v63, %v2272_v35  ;;  %v4823_v9 = vadd.f32 %v2498_v19, %v2276_v42  ;;  %v2511_v2 = vpack.c.bf16 %v2457_v8, %v2453_v10 }
 0x248   :  { %v2513_v6 = vpack.c.bf16 %v2459_v1, %v2455_v37  ;;  %3597 = vmatpush3.bf16.msra.mxu0 %v2672_v0  ;;  %v2671_v15 = vpack.c.bf16 %v4823_v9, %v4825_v58 }
 0x249   :  { %3581 = vmatmul.mubr.bf16.vlgmr.msra.gmra.mxu1 %v2510_v4 }
 0x24a   :  { %3585 = vmatpush3.bf16.xpose.msra.mxu1 %v2513_v6  ;;  %3586 = vmatprep.mubr.msk.bf16.mxu1 %vm3873_vm12, %v3872_v34 }
 0x24b   :  { %3590 = vmatprep.subr.bf16.mxu1 %v3872_v34 }
 0x251   :  { %3587 = vmatmul.mubr.bf16.vlgmr.msra.gmra.mxu1 %v2511_v2 }
 0x252   :  { %3591 = vmatpush3.bf16.msra.mxu1 %v2671_v15  ;;  %3592 = vmatprep.mubr.msk.bf16.mxu1 %vm3873_vm12, %v3872_v34 }
 0x309   :  { %v2548_v16 = vpop.f32.mrf.mxu1 }
 0x30a   :  { %v2596_v18 = vmul.f32 0.088388346, %v2548_v16 }
 0x30b   :  { %v3582_v3 = vpop.f32.mrf.mxu1 }
 0x30c   :  { %v2620_v5 = vsel %vm2618_vm13, %v2596_v18, -1e+30 }
 0x30d   :  { %v2551_v62 = vpop.f32.mrf.mxu1  ;;  %v2625_v20 = vsel %vm2624_vm14, %v2620_v5, -inf }
 0x30e   :  { %v2597_v21 = vmul.f32 0.088388346, %v2551_v62  ;;  %2626 = vmax.xlane.f32.xlu1 %v2625_v20 }
 0x30f   :  { %v3583_v22 = vpop.f32.mrf.mxu1 }
 0x310   :  { %v2621_v24 = vsel %vm2618_vm13, %v2597_v21, -1e+30 }
 0x311   :  { %v2589_v25 = vpop.f32.mrf.mxu1  ;;  %v2628_v44 = vsel %vm2624_vm14, %v2621_v24, -inf }
 0x312   :  { %v2598_v26 = vmul.f32 0.088388346, %v2589_v25  ;;  %2629 = vmax.xlane.f32.xlu1 %v2628_v44 }
 0x313   :  { %v3588_v27 = vpop.f32.mrf.mxu1 }
 0x314   :  { %v2622_v28 = vsel %vm2619_vm15, %v2598_v26, -1e+30 }
 0x315   :  { %v2592_v29 = vpop.f32.mrf.mxu1  ;;  %v2631_v30 = vsel %vm2624_vm14, %v2622_v28, -inf }
 0x316   :  { %v2599_v53 = vmul.f32 0.088388346, %v2592_v29  ;;  %2632 = vmax.xlane.f32.xlu0 %v2631_v30 }
 0x317   :  { %v3589_v31 = vpop.f32.mrf.mxu1 }
 0x318   :  { %v2623_v33 = vsel %vm2619_vm15, %v2599_v53, -1e+30 }
 0x319   :  { %v2634_v34 = vsel %vm2624_vm14, %v2623_v33, -inf }
 0x31a   :  { %2635 = vmax.xlane.f32.xlu1 %v2634_v34 }
 0x397   :  { %v2627_v7 = vpop.xlane.xlu1 %2626 }
 0x398   :  { %v2637_v60 = vsub.f32 %v2620_v5, %v2627_v7 }
 0x39a   :  { %v2641_v38 = vmul.f32 1.442695, %v2637_v60 }
 0x39b   :  { %v2630_v36 = vpop.xlane.xlu1 %2629 }
 0x39c   :  { %3791 = vpow2.f32 %v2641_v38  ;;  %v2638_v40 = vsub.f32 %v2621_v24, %v2630_v36 }
 0x39e   :  { %v2643_v43 = vmul.f32 1.442695, %v2638_v40 }
 0x39f   :  { %v2633_v45 = vpop.xlane.xlu0 %2632 }
 0x3a0   :  { %3793 = vpow2.f32 %v2643_v43  ;;  %v2639_v46 = vsub.f32 %v2622_v28, %v2633_v45 }
 0x3a2   :  { %v2645_v35 = vmul.f32 1.442695, %v2639_v46 }
 0x3a3   :  { %v2636_v47 = vpop.xlane.xlu1 %2635 }
 0x3a4   :  { %3795 = vpow2.f32 %v2645_v35  ;;  %v2640_v48 = vsub.f32 %v2623_v33, %v2636_v47 }
 0x3a6   :  { %v2647_v49 = vmul.f32 1.442695, %v2640_v48 }
 0x3a8   :  { %3797 = vpow2.f32 %v2647_v49 }
 0x3a9   :  { %v3792_v50 = vpop.eup %3791 }
 0x3aa   :  { %v2649_v39 = vsel %vm2624_vm14, %v3792_v50, 0.0 }
 0x3ab   :  { %2650 = vadd.xlane.f32.xlu1 %v2649_v39 }
 0x3ad   :  { %v3794_v51 = vpop.eup %3793 }
 0x3ae   :  { %v2652_v17 = vsel %vm2624_vm14, %v3794_v51, 0.0 }
 0x3af   :  { %2653 = vadd.xlane.f32.xlu1 %v2652_v17 }
 0x3b1   :  { %v3796_v52 = vpop.eup %3795 }
 0x3b2   :  { %v2655_v54 = vsel %vm2624_vm14, %v3796_v52, 0.0 }
 0x3b3   :  { %2656 = vadd.xlane.f32.xlu1 %v2655_v54 }
 0x3b5   :  { %v3798_v42 = vpop.eup %3797 }
 0x3b6   :  { %v2658_v32 = vsel %vm2624_vm14, %v3798_v42, 0.0 }
 0x3b7   :  { %2659 = vadd.xlane.f32.xlu1 %v2658_v32 }
 0x434   :  { %v2651_v11 = vpop.xlane.xlu1 %2650 }
 0x435   :  { %3799 = vrcp.f32 %v2651_v11 }
 0x438   :  { %v2654_v55 = vpop.xlane.xlu1 %2653 }
 0x439   :  { %3801 = vrcp.f32 %v2654_v55 }
 0x43c   :  { %v2657_v41 = vpop.xlane.xlu1 %2656 }
 0x43d   :  { %3803 = vrcp.f32 %v2657_v41 }
 0x440   :  { %v2660_v56 = vpop.xlane.xlu1 %2659 }
 0x441   :  { %3805 = vrcp.f32 %v2660_v56 }
 0x442   :  { %v3800_v57 = vpop.eup %3799 }
 0x443   :  { %v2665_v63 = vmul.f32 %v3800_v57, %v3792_v50 }
 0x446   :  { %v3802_v61 = vpop.eup %3801 }
 0x447   :  { %v2666_v37 = vmul.f32 %v3802_v61, %v3794_v51 }
 0x449   :  { %v2669_v0 = vpack.c.bf16 %v2666_v37, %v2665_v63 }
 0x44a   :  { %v3804_v1 = vpop.eup %3803 }
 0x44b   :  { %3593 = vmatmul.mubr.msk.bf16.vlgmr.msra.gmra.mxu1 %vm2624_vm14, %v2669_v0  ;;  %v2667_v19 = vmul.f32 %v3804_v1, %v3796_v52 }
 0x44e   :  { %v3806_v4 = vpop.eup %3805 }
 0x44f   :  { %v2668_v6 = vmul.f32 %v3806_v4, %v3798_v42 }
 0x451   :  { %v2670_v8 = vpack.c.bf16 %v2668_v6, %v2667_v19 }
 0x453   :  { %3599 = vmatmul.mubr.msk.bf16.vlgmr.msra.gmra.mxu0 %vm2624_vm14, %v2670_v8 }
 0x454   :  { %3818 = shalt.err (!%p3815_p4)
}
 0x455   :  { %s3876_s5 = smov 64   ;;  %s3877_s19 = smov 4  }
 0x456   :  { %2788 = dma.vmem_to_hbm [thread:$0]  %s2783_s0, 256, %s4878_s13, [#allocation5], %s3876_s5, %s3876_s5, %s3877_s19  }
 0x457   :  { %s3827_s1 = scalar_lea.vmem %s2771_s18, 256  ;;  %p3832_p6 = scmp.lt.s32.totalorder %s2771_s18, %s2771_s18 }
 0x458   :  { %p3828_p5 = scmp.ne.s32.totalorder %s2771_s18, %s3827_s1  ;;  %p3833_p7 = scmp.lt.s32.totalorder %s3827_s1, %s3827_s1 }
 0x45a   :  { %p3834_p8 = por %p3833_p7, %p3832_p6 }
 0x45c   :  { %p3835_p9 = pnand %p3834_p8, %p3828_p5 }
 0x45e   :  { %3838 = shalt.err (!%p3835_p9)
}
 0x45f   :  { %2776 = dma.vmem_to_hbm [thread:$0]  %s2771_s18, 256, %s4877_s12, [#allocation3], %s3876_s5, %s3876_s5, %s3877_s19  }
 0x460   :  { %s3878_s9 = smov [#allocation6]  }
 0x461   :  { %s2794_s22 = sshll.u32 %s3878_s9, 4  ;;  %s2795_s22 = int_to_ptr.vmem [resolvable:$true] %s2794_s22 }
 0x462   :  { %s3847_s23 = scalar_lea.vmem %s2795_s22, 256  ;;  %p3852_p11 = scmp.lt.s32.totalorder %s2795_s22, %s2795_s22 }
 0x463   :  { %p3848_p10 = scmp.ne.s32.totalorder %s2795_s22, %s3847_s23  ;;  %p3853_p12 = scmp.lt.s32.totalorder %s3847_s23, %s3847_s23 }
 0x465   :  { %p3854_p13 = por %p3853_p12, %p3852_p11 }
 0x467   :  { %p3855_p0 = pnand %p3854_p13, %p3848_p10 }
 0x469   :  { %3858 = shalt.err (!%p3855_p0)
}
 0x46a   :  { %2800 = dma.vmem_to_hbm [thread:$0]  %s2795_s22, 256, %s4879_s14, [#allocation5], %s3876_s5, %s3876_s5, %s3877_s19  }
 0x50b   :  { %v2710_v10 = vpop.f32.mrf.mxu1 }
 0x50c   :  { %v2711_v2 = vadd.f32 %v2710_v10, %v4825_v58 }
 0x50d   :  { %v3594_v15 = vpop.f32.mrf.mxu1 }
 0x50e   :  { %2761 = vst [vmem:[%s4880_s15] sm:$0xff] %v2711_v2 }
 0x50f   :  { %v2713_v12 = vpop.f32.mrf.mxu1 }
 0x510   :  { %v2714_v13 = vadd.f32 %v2713_v12, %v4823_v9 }
 0x511   :  { %v3595_v16 = vpop.f32.mrf.mxu1 }
 0x512   :  { %2762 = vst [vmem:[%s4880_s15 + $0x8] sm:$0xff] %v2714_v13 }
 0x513   :  { %v2754_v18 = vpop.f32.mrf.mxu0 }
 0x514   :  { %v2755_v3 = vadd.f32 %v2754_v18, %v4816_v59 }
 0x515   :  { %v3600_v5 = vpop.f32.mrf.mxu0 }
 0x516   :  { %2763 = vst [vmem:[%s4880_s15 + $0x10] sm:$0xff] %v2755_v3 }
 0x517   :  { %v2757_v58 = vpop.f32.mrf.mxu0 }
 0x518   :  { %v2758_v62 = vadd.f32 %v2757_v58, %v4818_v14 }
 0x519   :  { %v3601_v20 = vpop.f32.mrf.mxu0 }
 0x51a   :  { %2764 = vst [vmem:[%s4880_s15 + $0x18] sm:$0xff] %v2758_v62 }
 0x51b   :  { %3867 = dma.done.wait [#allocation3], 256  }
 0x51c   :  { %3868 = vsyncadd [#allocation3], 4294967040 }
 0x51d   :  { %3869 = dma.done.wait [#allocation5], 512  }
 0x51e   :  { %3870 = vsyncadd [#allocation5], 4294966784 }
 0x51f   :  { %2818 = vsyncpa [#allocation3], 1 }
 0x520   :  { %2819 = vsyncpa [#allocation5], 1 }

// kernel: task_shared_forward.4
= control target key start
LH: loop header
LB: loop body
LE: loop exit
PB: predicated region body
PF: predicated region fallthrough
CT: control target
= control target key end

     0   :  { %s10561_s0 = inlined_call_operand.vmem [shape: s32[2,1,1], index: 0, kind: input, shape index: {}]   ;;  %s10562_s1 = inlined_call_operand.vmem [shape: bf16[2,20,512], index: 1, kind: input, shape index: {}]   ;;  %s10563_s2 = inlined_call_operand.vmem [shape: bf16[2,20,512], index: 2, kind: input, shape index: {}]   ;;  %s10564_s3 = inlined_call_operand.vmem [shape: bf16[2,20,512], index: 3, kind: input, shape index: {}]   ;;  %s10565_s4 = inlined_call_operand.vmem [shape: bf16[1,512,256], index: 4, kind: input, shape index: {}]   ;;  %s10566_s5 = inlined_call_operand.vmem [shape: bf16[3,512,256], index: 5, kind: input, shape index: {}]   ;;  %s10567_s6 = inlined_call_operand.hbm [shape: bf16[5,512,256], index: 6, kind: input, shape index: {}]   ;;  %s10568_s7 = inlined_call_operand.hbm [shape: f32[1,256], index: 7, kind: input, shape index: {}]   ;;  %s10569_s8 = inlined_call_operand.hbm [shape: f32[1,256], index: 8, kind: input, shape index: {}]   ;;  %s10570_s9 = inlined_call_operand.hbm [shape: f32[1,256], index: 9, kind: input, shape index: {}]   ;;  %s10571_s10 = inlined_call_operand.hbm [shape: bf16[256,384], index: 10, kind: input, shape index: {}]   ;;  %s10572_s11 = inlined_call_operand.hbm [shape: f32[1,384], index: 11, kind: input, shape index: {}]   ;;  %s10573_s12 = inlined_call_operand.vmem [shape: bf16[2,16,256], index: 12, kind: output, shape index: {0}]   ;;  %s10574_s13 = inlined_call_operand.vmem [shape: bf16[2,16,256], index: 13, kind: output, shape index: {1}]   ;;  %s10575_s14 = inlined_call_operand.vmem [shape: bf16[2,16,256], index: 14, kind: output, shape index: {2}]   ;;  %s10576_s15 = inlined_call_operand.vmem [shape: f32[2,16,128], index: 15, kind: output, shape index: {3}]   ;;  %s10577_s16 = inlined_call_operand.hbm [shape: f32[2,16,256], index: 16, kind: output, shape index: {4}]  }
   0x1   :  { %10632 = sst [smem:[#allocation49_spill]] %s10561_s0 }
   0x2   :  { %22 = vsyncpa [#allocation3], 0 }
   0x3   :  { %23 = vsyncpa [#allocation6], 0 }
   0x4   :  { %24 = vsyncpa [#allocation9], 0 }
   0x5   :  { %25 = vsyncpa [#allocation12], 0 }
   0x6   :  { %26 = vsyncpa [#allocation4], 0  ;;  %s8439_s21 = smov [#allocation5]   ;;  %s8440_s23 = smov [#allocation8]  }
   0x7   :  { %s57_s22 = sshll.u32 %s8439_s21, 4  ;;  %s77_s24 = sshll.u32 %s8440_s23, 4  ;;  %s58_s22 = int_to_ptr.vmem [resolvable:$true] %s57_s22  ;;  %s78_s24 = int_to_ptr.vmem [resolvable:$true] %s77_s24 }
   0x8   :  { %s8297_s25 = scalar_lea.vmem %s58_s22, 32  ;;  %p8302_p1 = scmp.lt.s32.totalorder %s58_s22, %s58_s22 }
   0x9   :  { %p8298_p0 = scmp.ne.s32.totalorder %s58_s22, %s8297_s25  ;;  %p8303_p2 = scmp.lt.s32.totalorder %s8297_s25, %s8297_s25 }
   0xb   :  { %p8304_p3 = por %p8303_p2, %p8302_p1 }
   0xd   :  { %p8305_p4 = pnand %p8304_p3, %p8298_p0 }
   0xf   :  { %8308 = shalt.err (!%p8305_p4)
}
  0x10   :  { %60 = dma.hbm_to_vmem [thread:$0]  %s10568_s7, 32, %s58_s22, [#allocation6]  }
  0x11   :  { %s8317_s28 = scalar_lea.vmem %s78_s24, 32  ;;  %p8322_p6 = scmp.lt.s32.totalorder %s78_s24, %s78_s24 }
  0x12   :  { %p8318_p5 = scmp.ne.s32.totalorder %s78_s24, %s8317_s28  ;;  %p8323_p7 = scmp.lt.s32.totalorder %s8317_s28, %s8317_s28 }
  0x14   :  { %p8324_p8 = por %p8323_p7, %p8322_p6 }
  0x16   :  { %p8325_p9 = pnand %p8324_p8, %p8318_p5 }
  0x18   :  { %8328 = shalt.err (!%p8325_p9)
}
  0x19   :  { %80 = dma.hbm_to_vmem [thread:$0]  %s10570_s9, 32, %s78_s24, [#allocation9]  }
  0x1a   :  { %s8441_s0 = smov [#allocation2]  }
  0x1b   :  { %s44_s17 = sshll.u32 %s8441_s0, 4  ;;  %s45_s17 = int_to_ptr.vmem [resolvable:$true] %s44_s17 }
  0x1c   :  { %s8337_s18 = scalar_lea.vmem %s45_s17, 40960  ;;  %p8342_p11 = scmp.lt.s32.totalorder %s45_s17, %s45_s17 }
  0x1d   :  { %p8338_p10 = scmp.ne.s32.totalorder %s45_s17, %s8337_s18  ;;  %p8343_p12 = scmp.lt.s32.totalorder %s8337_s18, %s8337_s18 }
  0x1f   :  { %p8344_p13 = por %p8343_p12, %p8342_p11 }
  0x21   :  { %p8345_p0 = pnand %p8344_p13, %p8338_p10 }
  0x23   :  { %8348 = shalt.err (!%p8345_p0)
}
  0x24   :  { %s8442_s7 = smov 128   ;;  %s8443_s19 = smov 8  }
  0x25   :  { %50 = dma.hbm_to_vmem [thread:$0]  %s10567_s6, 40960, %s45_s17, [#allocation3], %s8442_s7, %s8442_s7, %s8443_s19  }
  0x26   :  { %s8444_s22 = smov [#allocation7]   ;;  %s8445_s9 = smov [#allocation10]  }
  0x27   :  { %s67_s23 = sshll.u32 %s8444_s22, 4  ;;  %s86_s24 = sshll.u32 %s8445_s9, 4  ;;  %s68_s23 = int_to_ptr.vmem [resolvable:$true] %s67_s23  ;;  %s87_s24 = int_to_ptr.vmem [resolvable:$true] %s86_s24 }
  0x28   :  { %s8357_s25 = scalar_lea.vmem %s68_s23, 32  ;;  %p8362_p2 = scmp.lt.s32.totalorder %s68_s23, %s68_s23 }
  0x29   :  { %p8358_p1 = scmp.ne.s32.totalorder %s68_s23, %s8357_s25  ;;  %p8363_p3 = scmp.lt.s32.totalorder %s8357_s25, %s8357_s25 }
  0x2b   :  { %p8364_p4 = por %p8363_p3, %p8362_p2 }
  0x2d   :  { %p8365_p5 = pnand %p8364_p4, %p8358_p1 }
  0x2f   :  { %8368 = shalt.err (!%p8365_p5)
}
  0x30   :  { %70 = dma.hbm_to_vmem [thread:$0]  %s10569_s8, 32, %s68_s23, [#allocation6]  }
  0x31   :  { %s8377_s28 = scalar_lea.vmem %s87_s24, 6144  ;;  %p8382_p7 = scmp.lt.s32.totalorder %s87_s24, %s87_s24 }
  0x32   :  { %p8378_p6 = scmp.ne.s32.totalorder %s87_s24, %s8377_s28  ;;  %p8383_p8 = scmp.lt.s32.totalorder %s8377_s28, %s8377_s28 }
  0x34   :  { %p8384_p9 = por %p8383_p8, %p8382_p7 }
  0x36   :  { %p8385_p10 = pnand %p8384_p9, %p8378_p6 }
  0x38   :  { %8388 = shalt.err (!%p8385_p10)
}
  0x39   :  { %s8446_s6 = smov 192   ;;  %s8447_s29 = smov 12  }
  0x3a   :  { %92 = dma.hbm_to_vmem [thread:$0]  %s10571_s10, 6144, %s87_s24, [#allocation9], %s8446_s6, %s8446_s6, %s8447_s29  }
  0x3b   :  { %s8448_s17 = smov [#allocation11]  }
  0x3c   :  { %s99_s18 = sshll.u32 %s8448_s17, 4  ;;  %s100_s18 = int_to_ptr.vmem [resolvable:$true] %s99_s18 }
  0x3d   :  { %s8397_s7 = scalar_lea.vmem %s100_s18, 48  ;;  %s8401_s8 = scalar_lea.vmem %s100_s18, 64 }
  0x3e   :  { %p8398_p11 = scmp.ne.s32.totalorder %s100_s18, %s8397_s7  ;;  %p8402_p12 = scmp.lt.s32.totalorder %s100_s18, %s100_s18 }
  0x3f   :  { %p8403_p13 = scmp.lt.s32.totalorder %s8401_s8, %s8397_s7 }
  0x41   :  { %p8404_p0 = por %p8403_p13, %p8402_p12 }
  0x43   :  { %p8405_p1 = pnand %p8404_p0, %p8398_p11 }
  0x45   :  { %8408 = shalt.err (!%p8405_p1)
}
  0x46   :  { %102 = dma.hbm_to_vmem [thread:$0]  %s10572_s11, 48, %s100_s18, [#allocation12]  }
  0x47   :  { %8429 = dma.done.wait [#allocation3], 40960  }
  0x48   :  { %8430 = vsyncadd [#allocation3], 4294926336 }
  0x49   :  { %8431 = dma.done.wait [#allocation6], 64  }
  0x4a   :  { %8432 = vsyncadd [#allocation6], 4294967232 }
  0x4b   :  { %8433 = dma.done.wait [#allocation9], 6176  }
  0x4c   :  { %8434 = vsyncadd [#allocation9], 4294961120 }
  0x4d   :  { %8435 = dma.done.wait [#allocation12], 48  }
  0x4e   :  { %8436 = vsyncadd [#allocation12], 4294967248  ;;  %v7325_v0 = vld [vmem:[%s10565_s4 + $0x74] ss:$8 sps:$4 sm:$0xff]   ;;  %v7329_v2 = vld [vmem:[%s10565_s4 + $0x70] ss:$8 sps:$4 sm:$0xff]  }
  0x4f   :  { %v7327_v1 = vld [vmem:[%s10565_s4 + $0x174] ss:$8 sps:$4 sm:$0xff]   ;;  %605 = vmatprep.subr.bf16.mxu0 %v7325_v0  ;;  %v7330_v3 = vld [vmem:[%s10565_s4 + $0x170] ss:$8 sps:$4 sm:$0xff]   ;;  %v7331_v4 = vld [vmem:[%s10565_s4 + $0x64] ss:$8 sps:$4 sm:$0xff]  }
  0x50   :  { %658 = vmatprep.subr.bf16.mxu1 %v7327_v1  ;;  %606 = vmatpush1.bf16.msra.mxu0 %v7329_v2  ;;  %v7333_v5 = vld [vmem:[%s10565_s4 + $0x164] ss:$8 sps:$4 sm:$0xff]   ;;  %v7335_v6 = vld [vmem:[%s10565_s4 + $0x60] ss:$8 sps:$4 sm:$0xff]   ;;  %v7337_v8 = vld [vmem:[%s10565_s4 + $0x54] ss:$8 sps:$4 sm:$0xff]  }
  0x51   :  { %659 = vmatpush1.bf16.msra.mxu1 %v7330_v3  ;;  %607 = vmatprep.subr.bf16.mxu0 %v7331_v4  ;;  %v7336_v7 = vld [vmem:[%s10565_s4 + $0x160] ss:$8 sps:$4 sm:$0xff]   ;;  %v7339_v9 = vld [vmem:[%s10565_s4 + $0x154] ss:$8 sps:$4 sm:$0xff]   ;;  %v7341_v10 = vld [vmem:[%s10565_s4 + $0x50] ss:$8 sps:$4 sm:$0xff]  }
  0x52   :  { %660 = vmatprep.subr.bf16.mxu1 %v7333_v5  ;;  %v7342_v11 = vld [vmem:[%s10565_s4 + $0x150] ss:$8 sps:$4 sm:$0xff]   ;;  %v7343_v12 = vld [vmem:[%s10565_s4 + $0x44] ss:$8 sps:$4 sm:$0xff]   ;;  %v7347_v14 = vld [vmem:[%s10565_s4 + $0x40] ss:$8 sps:$4 sm:$0xff]  }
  0x53   :  { %v7345_v13 = vld [vmem:[%s10565_s4 + $0x144] ss:$8 sps:$4 sm:$0xff]   ;;  %v7348_v15 = vld [vmem:[%s10565_s4 + $0x140] ss:$8 sps:$4 sm:$0xff]   ;;  %v7349_v16 = vld [vmem:[%s10565_s4 + $0x34] ss:$8 sps:$4 sm:$0xff]  }
  0x54   :  { %608 = vmatpush1.bf16.msra.mxu0 %v7335_v6  ;;  %v7351_v17 = vld [vmem:[%s10565_s4 + $0x134] ss:$8 sps:$4 sm:$0xff]   ;;  %v7353_v18 = vld [vmem:[%s10565_s4 + $0x30] ss:$8 sps:$4 sm:$0xff]   ;;  %v7355_v20 = vld [vmem:[%s10565_s4 + $0x24] ss:$8 sps:$4 sm:$0xff]  }
  0x55   :  { %661 = vmatpush1.bf16.msra.mxu1 %v7336_v7  ;;  %609 = vmatprep.subr.bf16.mxu0 %v7337_v8  ;;  %v7354_v19 = vld [vmem:[%s10565_s4 + $0x130] ss:$8 sps:$4 sm:$0xff]   ;;  %v7357_v21 = vld [vmem:[%s10565_s4 + $0x124] ss:$8 sps:$4 sm:$0xff]   ;;  %v7359_v22 = vld [vmem:[%s10565_s4 + $0x20] ss:$8 sps:$4 sm:$0xff]  }
  0x56   :  { %662 = vmatprep.subr.bf16.mxu1 %v7339_v9  ;;  %v7360_v23 = vld [vmem:[%s10565_s4 + $0x120] ss:$8 sps:$4 sm:$0xff]   ;;  %v7361_v24 = vld [vmem:[%s10565_s4 + $0x14] ss:$8 sps:$4 sm:$0xff]   ;;  %v7365_v26 = vld [vmem:[%s10565_s4 + $0x10] ss:$8 sps:$4 sm:$0xff]  }
  0x57   :  { %v7363_v25 = vld [vmem:[%s10565_s4 + $0x114] ss:$8 sps:$4 sm:$0xff]   ;;  %v7366_v27 = vld [vmem:[%s10565_s4 + $0x110] ss:$8 sps:$4 sm:$0xff]   ;;  %v7367_v28 = vld [vmem:[%s10565_s4 + $0x4] ss:$8 sps:$4 sm:$0xff]  }
  0x58   :  { %610 = vmatpush1.bf16.msra.mxu0 %v7341_v10  ;;  %v7369_v29 = vld [vmem:[%s10565_s4 + $0x104] ss:$8 sps:$4 sm:$0xff]   ;;  %v7371_v30 = vld [vmem:[%s10565_s4] ss:$8 sps:$4 sm:$0xff]   ;;  %v7373_v32 = vld [vmem:[%s10565_s4 + $0xf4] ss:$8 sps:$4 sm:$0xff]  }
  0x59   :  { %663 = vmatpush1.bf16.msra.mxu1 %v7342_v11  ;;  %611 = vmatprep.subr.bf16.mxu0 %v7343_v12  ;;  %v7372_v31 = vld [vmem:[%s10565_s4 + $0x100] ss:$8 sps:$4 sm:$0xff]   ;;  %v7375_v33 = vld [vmem:[%s10565_s4 + $0x1f4] ss:$8 sps:$4 sm:$0xff]   ;;  %v7377_v34 = vld [vmem:[%s10565_s4 + $0xf0] ss:$8 sps:$4 sm:$0xff]  }
  0x5a   :  { %664 = vmatprep.subr.bf16.mxu1 %v7345_v13  ;;  %v7378_v35 = vld [vmem:[%s10565_s4 + $0x1f0] ss:$8 sps:$4 sm:$0xff]   ;;  %v7379_v36 = vld [vmem:[%s10565_s4 + $0xe4] ss:$8 sps:$4 sm:$0xff]   ;;  %v7383_v38 = vld [vmem:[%s10565_s4 + $0xe0] ss:$8 sps:$4 sm:$0xff]  }
  0x5b   :  { %v7381_v37 = vld [vmem:[%s10565_s4 + $0x1e4] ss:$8 sps:$4 sm:$0xff]   ;;  %vm146_vm0 = vcmask 1042432   ;;  %v7384_v39 = vld [vmem:[%s10565_s4 + $0x1e0] ss:$8 sps:$4 sm:$0xff]   ;;  %vm147_vm1 = vcmask 1046532  }
  0x5c   :  { %612 = vmatpush1.bf16.msra.mxu0 %v7347_v14  ;;  %v7385_v40 = vld [vmem:[%s10565_s4 + $0xd4] ss:$8 sps:$4 sm:$0xff]   ;;  %v7389_v42 = vld [vmem:[%s10565_s4 + $0xd0] ss:$8 sps:$4 sm:$0xff]   ;;  %vm8690_vm2 = vmor %vm146_vm0, %vm147_vm1  ;;  %vm731_vm3 = vsmask.f32 3328 }
  0x5d   :  { %665 = vmatpush1.bf16.msra.mxu1 %v7348_v15  ;;  %613 = vmatprep.subr.bf16.mxu0 %v7349_v16  ;;  %v7387_v41 = vld [vmem:[%s10565_s4 + $0x1d4] ss:$8 sps:$4 sm:$0xff]   ;;  %v7390_v43 = vld [vmem:[%s10565_s4 + $0x1d0] ss:$8 sps:$4 sm:$0xff]   ;;  %v7391_v45 = vld [vmem:[%s10565_s4 + $0xc4] ss:$8 sps:$4 sm:$0xff]  }
  0x5e   :  { %666 = vmatprep.subr.bf16.mxu1 %v7351_v17  ;;  %v7393_v46 = vld [vmem:[%s10565_s4 + $0x1c4] ss:$8 sps:$4 sm:$0xff]   ;;  %v7395_v47 = vld [vmem:[%s10565_s4 + $0xc0] ss:$8 sps:$4 sm:$0xff]   ;;  %v7397_v50 = vld [vmem:[%s10565_s4 + $0xb4] ss:$8 sps:$4 sm:$0xff]  }
  0x5f   :  { %v7396_v48 = vld [vmem:[%s10565_s4 + $0x1c0] ss:$8 sps:$4 sm:$0xff]   ;;  %v124_v51 = vld [vmem:[%s10562_s1 + $0x10] sm:$0xff]  ;;  %v125_v57 = vld [vmem:[%s10562_s1 + $0x18] sm:$0xff]  ;;  %vm732_vm4 = vsmask.f32 7440 }
  0x60   :  { %614 = vmatpush1.bf16.msra.mxu0 %v7353_v18  ;;  %v122_v49 = vld [vmem:[%s10562_s1] sm:$0xee]  ;;  %v126_v52 = vld [vmem:[%s10562_s1 + $0x20] sm:$0x11]  ;;  %v123_v54 = vld [vmem:[%s10562_s1 + $0x8] sm:$0xee] }
  0x61   :  { %667 = vmatpush1.bf16.msra.mxu1 %v7354_v19  ;;  %615 = vmatprep.subr.bf16.mxu0 %v7355_v20  ;;  %v6380_v53 = vrot.slane %v122_v49, 9  ;;  %v151_v55 = vrot.slane %v124_v51, 5  ;;  %v158_v56 = vrot.slane %v126_v52, 5  ;;  %v127_v58 = vld [vmem:[%s10562_s1 + $0x28] sm:$0x11]  ;;  %v6381_v59 = vrot.slane %v123_v54, 9  ;;  %vm9184_vm5 = vmor %vm731_vm3, %vm732_vm4 }
  0x62   :  { %668 = vmatprep.subr.bf16.mxu1 %v7357_v21  ;;  %v7399_v60 = vld [vmem:[%s10565_s4 + $0x1b4] ss:$8 sps:$4 sm:$0xff]   ;;  %v155_v61 = vrot.slane %v125_v57, 5  ;;  %v161_v62 = vrot.slane %v127_v58, 5  ;;  %v7401_v1 = vld [vmem:[%s10565_s4 + $0xb0] ss:$8 sps:$4 sm:$0xff]  }
  0x63   :  { %v152_v63 = vsel %vm8690_vm2, %v6380_v53, %v151_v55  ;;  %v157_v0 = vrot.slane %v151_v55, 4  ;;  %v7402_v4 = vld [vmem:[%s10565_s4 + $0x1b0] ss:$8 sps:$4 sm:$0xff]   ;;  %v7403_v5 = vld [vmem:[%s10565_s4 + $0xa4] ss:$8 sps:$4 sm:$0xff]   ;;  %vm4948_vm9 = vcmask 1041408  }
  0x64   :  { %616 = vmatpush1.bf16.msra.mxu0 %v7359_v22  ;;  %v156_v2 = vsel %vm8690_vm2, %v6381_v59, %v155_v61  ;;  %v160_v3 = vrot.slane %v155_v61, 4  ;;  %v7405_v7 = vld [vmem:[%s10565_s4 + $0x1a4] ss:$8 sps:$4 sm:$0xff]   ;;  %v7407_v11 = vld [vmem:[%s10565_s4 + $0xa0] ss:$8 sps:$4 sm:$0xff]   ;;  %vm4949_vm10 = vcmask 1045508  }
  0x65   :  { %669 = vmatpush1.bf16.msra.mxu1 %v7360_v23  ;;  %617 = vmatprep.subr.bf16.mxu0 %v7361_v24  ;;  %v159_v6 = vsel %vm8690_vm2, %v157_v0, %v158_v56  ;;  %v7408_v12 = vld [vmem:[%s10565_s4 + $0x1a0] ss:$8 sps:$4 sm:$0xff]   ;;  %v7409_v13 = vld [vmem:[%s10565_s4 + $0x94] ss:$8 sps:$4 sm:$0xff]   ;;  %v7413_v15 = vld [vmem:[%s10565_s4 + $0x90] ss:$8 sps:$4 sm:$0xff]  }
  0x66   :  { %670 = vmatprep.subr.bf16.mxu1 %v7363_v25  ;;  %v6385_v8 = vcombine.high %v152_v63, %v159_v6  ;;  %v162_v9 = vsel %vm8690_vm2, %v160_v3, %v161_v62  ;;  %v7411_v14 = vld [vmem:[%s10565_s4 + $0x194] ss:$8 sps:$4 sm:$0xff]   ;;  %v7414_v16 = vld [vmem:[%s10565_s4 + $0x190] ss:$8 sps:$4 sm:$0xff]   ;;  %v7415_v17 = vld [vmem:[%s10565_s4 + $0x84] ss:$8 sps:$4 sm:$0xff]   ;;  %v6384_v23 = vcombine.low %v152_v63, %v159_v6 }
  0x67   :  { %v6387_v10 = vcombine.high %v156_v2, %v162_v9  ;;  %v7417_v18 = vld [vmem:[%s10565_s4 + $0x184] ss:$8 sps:$4 sm:$0xff]   ;;  %v7419_v19 = vld [vmem:[%s10565_s4 + $0x80] ss:$8 sps:$4 sm:$0xff]   ;;  %v7423_v21 = vld [vmem:[%s10566_s5 + $0x274] ss:$8 sps:$4 sm:$0xff]   ;;  %v6386_v24 = vcombine.low %v156_v2, %v162_v9 }
  0x68   :  { %618 = vmatpush1.bf16.msra.mxu0 %v7365_v26  ;;  %637 = vmatprep.mubr.bf16.mxu0 %v6385_v8  ;;  %v7420_v20 = vld [vmem:[%s10565_s4 + $0x180] ss:$8 sps:$4 sm:$0xff]   ;;  %v7426_v22 = vld [vmem:[%s10566_s5 + $0x374] ss:$8 sps:$4 sm:$0xff]   ;;  %v7421_v25 = vld [vmem:[%s10566_s5 + $0x270] ss:$8 sps:$4 sm:$0xff]  }
  0x69   :  { %671 = vmatpush1.bf16.msra.mxu1 %v7366_v27  ;;  %619 = vmatprep.subr.bf16.mxu0 %v7367_v28  ;;  %v7424_v26 = vld [vmem:[%s10566_s5 + $0x370] ss:$8 sps:$4 sm:$0xff]   ;;  %v7429_v27 = vld [vmem:[%s10566_s5 + $0x264] ss:$8 sps:$4 sm:$0xff]   ;;  %v7451_v61 = vld [vmem:[%s10566_s5 + $0x220] ss:$8 sps:$4 sm:$0xff]  }
  0x6a   :  { %672 = vmatprep.subr.bf16.mxu1 %v7369_v29  ;;  %690 = vmatprep.mubr.bf16.mxu1 %v6387_v10  ;;  %v7432_v28 = vld [vmem:[%s10566_s5 + $0x364] ss:$8 sps:$4 sm:$0xff]   ;;  %v7427_v29 = vld [vmem:[%s10566_s5 + $0x260] ss:$8 sps:$4 sm:$0xff]   ;;  %v7448_v49 = vld [vmem:[%s10566_s5 + $0x330] ss:$8 sps:$4 sm:$0xff]  }
  0x6b   :  { %v7456_v51 = vld [vmem:[%s10566_s5 + $0x324] ss:$8 sps:$4 sm:$0xff]   ;;  %v129_v55 = vld [vmem:[%s10562_s1 + $0x38] sm:$0xee]  ;;  %v133_v56 = vld [vmem:[%s10562_s1 + $0x58] sm:$0x11] }
  0x6c   :  { %620 = vmatpush1.bf16.msra.mxu0 %v7371_v30  ;;  %v7430_v30 = vld [vmem:[%s10566_s5 + $0x360] ss:$8 sps:$4 sm:$0xff]   ;;  %v6383_v59 = vrot.slane %v129_v55, 9  ;;  %v7459_v3 = vld [vmem:[%s10566_s5 + $0x214] ss:$8 sps:$4 sm:$0xff]   ;;  %vm10292_vm11 = vmor %vm4948_vm9, %vm4949_vm10  ;;  %vm8450_vm12 = vmmov 0  }
  0x6d   :  { %673 = vmatpush1.bf16.msra.mxu1 %v7372_v31  ;;  %621 = vmatprep.subr.bf16.mxu0 %v7373_v32  ;;  %v7435_v31 = vld [vmem:[%s10566_s5 + $0x254] ss:$8 sps:$4 sm:$0xff]   ;;  %v131_v54 = vld [vmem:[%s10562_s1 + $0x48] sm:$0xff]  ;;  %v7460_v9 = vld [vmem:[%s10566_s5 + $0x310] ss:$8 sps:$4 sm:$0xff]   ;;  %s10754_s9 = sld [smem:[#allocation49_spill]] }
  0x6e   :  { %674 = vmatprep.subr.bf16.mxu1 %v7375_v33  ;;  %v7438_v32 = vld [vmem:[%s10566_s5 + $0x354] ss:$8 sps:$4 sm:$0xff]   ;;  %v7433_v33 = vld [vmem:[%s10566_s5 + $0x250] ss:$8 sps:$4 sm:$0xff]   ;;  %v169_v57 = vrot.slane %v131_v54, 5  ;;  %vm6203_vm14 = vcmask 130048  }
  0x6f   :  { %v7465_v10 = vld [vmem:[%s10566_s5 + $0x204] ss:$8 sps:$4 sm:$0xff]   ;;  %v7496_v54 = vld [vmem:[%s10566_s5 + $0x3b0] ss:$8 sps:$4 sm:$0xff]   ;;  %vm1923_vm6 = vsmask.f32 2304 }
  0x70   :  { %622 = vmatpush2.bf16.msra.mxu0 %v7377_v34  ;;  %v7436_v34 = vld [vmem:[%s10566_s5 + $0x350] ss:$8 sps:$4 sm:$0xff]   ;;  %v174_v0 = vrot.slane %v169_v57, 4  ;;  %v170_v2 = vsel %vm8690_vm2, %v6383_v59, %v169_v57  ;;  %v7501_v55 = vld [vmem:[%s10566_s5 + $0x2a4] ss:$8 sps:$4 sm:$0xff]  }
  0x71   :  { %675 = vmatpush2.bf16.msra.mxu1 %v7378_v35  ;;  %623 = vmatprep.subr.bf16.mxu0 %v7379_v36  ;;  %v7441_v35 = vld [vmem:[%s10566_s5 + $0x244] ss:$8 sps:$4 sm:$0xff]   ;;  %v7499_v57 = vld [vmem:[%s10566_s5 + $0x2a0] ss:$8 sps:$4 sm:$0xff]   ;;  %v7507_v59 = vld [vmem:[%s10566_s5 + $0x294] ss:$8 sps:$4 sm:$0xff]  }
  0x72   :  { %676 = vmatprep.subr.bf16.mxu1 %v7381_v37  ;;  %v7444_v36 = vld [vmem:[%s10566_s5 + $0x344] ss:$8 sps:$4 sm:$0xff]   ;;  %v7439_v37 = vld [vmem:[%s10566_s5 + $0x240] ss:$8 sps:$4 sm:$0xff]   ;;  %vm1924_vm7 = vsmask.f32 6416 }
  0x73   :  { %vm9396_vm8 = vmor %vm1923_vm6, %vm1924_vm7 }
  0x74   :  { %624 = vmatpush2.bf16.msra.mxu0 %v7383_v38  ;;  %v7442_v38 = vld [vmem:[%s10566_s5 + $0x340] ss:$8 sps:$4 sm:$0xff]  }
  0x75   :  { %677 = vmatpush2.bf16.msra.mxu1 %v7384_v39  ;;  %625 = vmatprep.subr.bf16.mxu0 %v7385_v40  ;;  %v7447_v39 = vld [vmem:[%s10566_s5 + $0x234] ss:$8 sps:$4 sm:$0xff]  }
  0x76   :  { %678 = vmatprep.subr.bf16.mxu1 %v7387_v41  ;;  %v7450_v40 = vld [vmem:[%s10566_s5 + $0x334] ss:$8 sps:$4 sm:$0xff]  }
  0x77   :  { %v128_v41 = vld [vmem:[%s10562_s1 + $0x30] sm:$0xee] }
  0x78   :  { %626 = vmatpush2.bf16.msra.mxu0 %v7389_v42  ;;  %v130_v42 = vld [vmem:[%s10562_s1 + $0x40] sm:$0xff] }
  0x79   :  { %679 = vmatpush2.bf16.msra.mxu1 %v7390_v43  ;;  %627 = vmatprep.subr.bf16.mxu0 %v7391_v45  ;;  %v132_v43 = vld [vmem:[%s10562_s1 + $0x50] sm:$0x11]  ;;  %v6382_v45 = vrot.slane %v128_v41, 9  ;;  %v7478_v41 = vld [vmem:[%s10566_s5 + $0x3e0] ss:$8 sps:$4 sm:$0xff]  }
  0x7a   :  { %680 = vmatprep.subr.bf16.mxu1 %v7393_v46  ;;  %v165_v46 = vrot.slane %v130_v42, 5  ;;  %v7483_v42 = vld [vmem:[%s10566_s5 + $0x2d4] ss:$8 sps:$4 sm:$0xff]  }
  0x7c   :  { %628 = vmatpush2.bf16.msra.mxu0 %v7395_v47  ;;  %v172_v47 = vrot.slane %v132_v43, 5  ;;  %v166_v52 = vsel %vm8690_vm2, %v6382_v45, %v165_v46  ;;  %v171_v53 = vrot.slane %v165_v46, 4  ;;  %v7486_v43 = vld [vmem:[%s10566_s5 + $0x3d4] ss:$8 sps:$4 sm:$0xff]   ;;  %v7481_v45 = vld [vmem:[%s10566_s5 + $0x2d0] ss:$8 sps:$4 sm:$0xff]  }
  0x7d   :  { %681 = vmatpush2.bf16.msra.mxu1 %v7396_v48  ;;  %629 = vmatprep.subr.bf16.mxu0 %v7397_v50  ;;  %v7445_v48 = vld [vmem:[%s10566_s5 + $0x230] ss:$8 sps:$4 sm:$0xff]   ;;  %v7453_v50 = vld [vmem:[%s10566_s5 + $0x224] ss:$8 sps:$4 sm:$0xff]  }
  0x7e   :  { %682 = vmatprep.subr.bf16.mxu1 %v7399_v60  ;;  %v173_v58 = vsel %vm8690_vm2, %v171_v53, %v172_v47  ;;  %v175_v60 = vrot.slane %v133_v56, 5  ;;  %v7484_v46 = vld [vmem:[%s10566_s5 + $0x3d0] ss:$8 sps:$4 sm:$0xff]   ;;  %v7489_v47 = vld [vmem:[%s10566_s5 + $0x2c4] ss:$8 sps:$4 sm:$0xff]  }
  0x7f   :  { %v6389_v62 = vcombine.high %v166_v52, %v173_v58  ;;  %v6388_v63 = vcombine.low %v166_v52, %v173_v58  ;;  %v7498_v52 = vld [vmem:[%s10566_s5 + $0x3b4] ss:$8 sps:$4 sm:$0xff]   ;;  %v7493_v53 = vld [vmem:[%s10566_s5 + $0x2b0] ss:$8 sps:$4 sm:$0xff]   ;;  %v7504_v56 = vld [vmem:[%s10566_s5 + $0x3a4] ss:$8 sps:$4 sm:$0xff]  }
  0x80   :  { %630 = vmatpush2.bf16.msra.mxu0 %v7401_v1  ;;  %v7454_v1 = vld [vmem:[%s10566_s5 + $0x320] ss:$8 sps:$4 sm:$0xff]  }
  0x81   :  { %683 = vmatpush2.bf16.msra.mxu1 %v7402_v4  ;;  %631 = vmatprep.subr.bf16.mxu0 %v7403_v5  ;;  %v7462_v4 = vld [vmem:[%s10566_s5 + $0x314] ss:$8 sps:$4 sm:$0xff]   ;;  %v176_v5 = vsel %vm8690_vm2, %v174_v0, %v175_v60  ;;  %v7502_v58 = vld [vmem:[%s10566_s5 + $0x3a0] ss:$8 sps:$4 sm:$0xff]   ;;  %v7516_v0 = vld [vmem:[%s10566_s5 + $0x384] ss:$8 sps:$4 sm:$0xff]  }
  0x82   :  { %684 = vmatprep.subr.bf16.mxu1 %v7405_v7  ;;  %v6391_v6 = vcombine.high %v170_v2, %v176_v5  ;;  %v7457_v7 = vld [vmem:[%s10566_s5 + $0x210] ss:$8 sps:$4 sm:$0xff]   ;;  %v6390_v8 = vcombine.low %v170_v2, %v176_v5  ;;  %v7510_v60 = vld [vmem:[%s10566_s5 + $0x394] ss:$8 sps:$4 sm:$0xff]   ;;  %v7511_v2 = vld [vmem:[%s10566_s5 + $0x280] ss:$8 sps:$4 sm:$0xff]  }
  0x83   :  { %v7522_v5 = vld [vmem:[%s10566_s5 + $0x174] ss:$8 sps:$4 sm:$0xff]  }
  0x84   :  { %632 = vmatpush2.bf16.msra.mxu0 %v7407_v11  ;;  %v7468_v11 = vld [vmem:[%s10566_s5 + $0x304] ss:$8 sps:$4 sm:$0xff]  }
  0x85   :  { %685 = vmatpush2.bf16.msra.mxu1 %v7408_v12  ;;  %633 = vmatprep.subr.bf16.mxu0 %v7409_v13  ;;  %v8899_v12 = vld [vmem:[%s10563_s2 + $0x10] sm:$0xff]  ;;  %v7463_v13 = vld [vmem:[%s10566_s5 + $0x200] ss:$8 sps:$4 sm:$0xff]  }
  0x86   :  { %686 = vmatprep.subr.bf16.mxu1 %v7411_v14  ;;  %v7466_v14 = vld [vmem:[%s10566_s5 + $0x300] ss:$8 sps:$4 sm:$0xff]  }
  0x88   :  { %634 = vmatpush2.bf16.msra.mxu0 %v7413_v15  ;;  %v8910_v15 = vld [vmem:[%s10563_s2 + $0x20] sm:$0x11] }
  0x89   :  { %687 = vmatpush2.bf16.msra.mxu1 %v7414_v16  ;;  %635 = vmatprep.subr.bf16.mxu0 %v7415_v17  ;;  %v8915_v16 = vld [vmem:[%s10563_s2] sm:$0xee]  ;;  %v912_v17 = vrot.slane %v8899_v12, 5 }
  0x8a   :  { %688 = vmatprep.subr.bf16.mxu1 %v7417_v18  ;;  %v8921_v18 = vld [vmem:[%s10563_s2 + $0x18] sm:$0xff] }
  0x8c   :  { %636 = vmatpush2.bf16.msra.mxu0 %v7419_v19  ;;  %v6456_v19 = vrot.slane %v8915_v16, 9 }
  0x8d   :  { %689 = vmatpush2.bf16.msra.mxu1 %v7420_v20  ;;  %1355 = vmatprep.subr.bf16.mxu0 %v7423_v21  ;;  %v919_v20 = vrot.slane %v8910_v15, 5  ;;  %v8928_v21 = vld [vmem:[%s10563_s2 + $0x28] sm:$0x11] }
  0x8e   :  { %1408 = vmatprep.subr.bf16.mxu1 %v7426_v22  ;;  %v8933_v22 = vld [vmem:[%s10563_s2 + $0x8] sm:$0xee] }
  0x8f   :  { %638 = vmatmul.mubr.bf16.vlgmr.msra.gmra.mxu0 %v6384_v23  ;;  %v918_v23 = vrot.slane %v912_v17, 4 }
  0x90   :  { %691 = vmatmul.mubr.bf16.vlgmr.msra.gmra.mxu1 %v6386_v24  ;;  %1356 = vmatpush1.bf16.msra.mxu0 %v7421_v25  ;;  %v6457_v24 = vrot.slane %v8933_v22, 9  ;;  %v916_v25 = vrot.slane %v8921_v18, 5 }
  0x91   :  { %1409 = vmatpush1.bf16.msra.mxu1 %v7424_v26  ;;  %1357 = vmatprep.subr.bf16.mxu0 %v7429_v27  ;;  %v922_v26 = vrot.slane %v8928_v21, 5  ;;  %v7471_v27 = vld [vmem:[%s10566_s5 + $0x2f4] ss:$8 sps:$4 sm:$0xff]  }
  0x92   :  { %1410 = vmatprep.subr.bf16.mxu1 %v7432_v28  ;;  %647 = vmatprep.mubr.bf16.mxu0 %v6389_v62  ;;  %v7474_v28 = vld [vmem:[%s10566_s5 + $0x3f4] ss:$8 sps:$4 sm:$0xff]   ;;  %v7508_v62 = vld [vmem:[%s10566_s5 + $0x390] ss:$8 sps:$4 sm:$0xff]  }
  0x93   :  { %700 = vmatprep.mubr.bf16.mxu1 %v6391_v6  ;;  %v7517_v6 = vld [vmem:[%s10566_s5 + $0x70] ss:$8 sps:$4 sm:$0xff]  }
  0x94   :  { %1358 = vmatpush1.bf16.msra.mxu0 %v7427_v29  ;;  %v8946_v29 = vsel %vm8690_vm2, %v6456_v19, %v912_v17  ;;  %v7528_v17 = vld [vmem:[%s10566_s5 + $0x164] ss:$8 sps:$4 sm:$0xff]  }
  0x95   :  { %1411 = vmatpush1.bf16.msra.mxu1 %v7430_v30  ;;  %1359 = vmatprep.subr.bf16.mxu0 %v7435_v31  ;;  %v8950_v30 = vsel %vm8690_vm2, %v918_v23, %v919_v20  ;;  %v8954_v31 = vsel %vm8690_vm2, %v6457_v24, %v916_v25  ;;  %v9086_v19 = vld [vmem:[%s10563_s2 + $0x40] sm:$0xff]  ;;  %v9091_v20 = vld [vmem:[%s10563_s2 + $0x50] sm:$0x11]  ;;  %v9096_v23 = vld [vmem:[%s10563_s2 + $0x30] sm:$0xee]  ;;  %v772_v24 = vshrl.u32 %v8921_v18, 16 }
  0x96   :  { %1412 = vmatprep.subr.bf16.mxu1 %v7438_v32  ;;  %v921_v32 = vrot.slane %v916_v25, 4  ;;  %v6458_v25 = vrot.slane %v9096_v23, 9 }
  0x97   :  { %648 = vmatmul.mubr.bf16.gmra.mxu0 %v6388_v63  ;;  %v7513_v63 = vld [vmem:[%s10566_s5 + $0x284] ss:$8 sps:$4 sm:$0xff]  }
  0x98   :  { %1360 = vmatpush1.bf16.msra.mxu0 %v7433_v33  ;;  %701 = vmatmul.mubr.bf16.gmra.mxu1 %v6390_v8  ;;  %v7469_v33 = vld [vmem:[%s10566_s5 + $0x2f0] ss:$8 sps:$4 sm:$0xff]  }
  0x99   :  { %1413 = vmatpush1.bf16.msra.mxu1 %v7436_v34  ;;  %1361 = vmatprep.subr.bf16.mxu0 %v7441_v35  ;;  %v6525_v34 = vcombine.high %v8946_v29, %v8950_v30  ;;  %v7472_v35 = vld [vmem:[%s10566_s5 + $0x3f0] ss:$8 sps:$4 sm:$0xff]  }
  0x9a   :  { %1414 = vmatprep.subr.bf16.mxu1 %v7444_v36  ;;  %v8966_v36 = vsel %vm8690_vm2, %v921_v32, %v922_v26  ;;  %v926_v26 = vrot.slane %v9086_v19, 5 }
  0x9b   :  { %1387 = vmatprep.mubr.bf16.mxu0 %v6525_v34 }
  0x9c   :  { %1362 = vmatpush1.bf16.msra.mxu0 %v7439_v37  ;;  %v7477_v37 = vld [vmem:[%s10566_s5 + $0x2e4] ss:$8 sps:$4 sm:$0xff]   ;;  %v927_v34 = vsel %vm8690_vm2, %v6458_v25, %v926_v26 }
  0x9d   :  { %1415 = vmatpush1.bf16.msra.mxu1 %v7442_v38  ;;  %1363 = vmatprep.subr.bf16.mxu0 %v7447_v39  ;;  %v7480_v38 = vld [vmem:[%s10566_s5 + $0x3e4] ss:$8 sps:$4 sm:$0xff]   ;;  %v6527_v39 = vcombine.high %v8954_v31, %v8966_v36 }
  0x9e   :  { %1416 = vmatprep.subr.bf16.mxu1 %v7450_v40  ;;  %v7475_v40 = vld [vmem:[%s10566_s5 + $0x2e0] ss:$8 sps:$4 sm:$0xff]  }
  0x9f   :  { %1440 = vmatprep.mubr.bf16.mxu1 %v6527_v39 }
  0xa0   :  { %1364 = vmatpush1.bf16.msra.mxu0 %v7445_v48  ;;  %v7492_v48 = vld [vmem:[%s10566_s5 + $0x3c4] ss:$8 sps:$4 sm:$0xff]  }
  0xa1   :  { %1417 = vmatpush1.bf16.msra.mxu1 %v7448_v49  ;;  %1365 = vmatprep.subr.bf16.mxu0 %v7453_v50  ;;  %v7487_v49 = vld [vmem:[%s10566_s5 + $0x2c0] ss:$8 sps:$4 sm:$0xff]  }
  0xa2   :  { %1418 = vmatprep.subr.bf16.mxu1 %v7456_v51  ;;  %v7490_v50 = vld [vmem:[%s10566_s5 + $0x3c0] ss:$8 sps:$4 sm:$0xff]   ;;  %v7495_v51 = vld [vmem:[%s10566_s5 + $0x2b4] ss:$8 sps:$4 sm:$0xff]  }
  0xa4   :  { %1366 = vmatpush1.bf16.msra.mxu0 %v7451_v61  ;;  %v7505_v61 = vld [vmem:[%s10566_s5 + $0x290] ss:$8 sps:$4 sm:$0xff]  }
  0xa5   :  { %1419 = vmatpush1.bf16.msra.mxu1 %v7454_v1  ;;  %1367 = vmatprep.subr.bf16.mxu0 %v7459_v3  ;;  %v744_v1 = vshll.u32 %v8899_v12, 16  ;;  %v7514_v3 = vld [vmem:[%s10566_s5 + $0x380] ss:$8 sps:$4 sm:$0xff]  }
  0xa6   :  { %1420 = vmatprep.subr.bf16.mxu1 %v7462_v4  ;;  %v7519_v4 = vld [vmem:[%s10566_s5 + $0x74] ss:$8 sps:$4 sm:$0xff]  }
  0xa7   :  { %v9069_v8 = vrot.slane %v744_v1, 5 }
  0xa8   :  { %1368 = vmatpush1.bf16.msra.mxu0 %v7457_v7  ;;  %v7520_v7 = vld [vmem:[%s10566_s5 + $0x170] ss:$8 sps:$4 sm:$0xff]  }
  0xa9   :  { %1421 = vmatpush1.bf16.msra.mxu1 %v7460_v9  ;;  %1369 = vmatprep.subr.bf16.mxu0 %v7465_v10  ;;  %v762_v9 = vshrl.u32 %v8899_v12, 16  ;;  %v758_v10 = vshll.u32 %v8921_v18, 16 }
  0xaa   :  { %1422 = vmatprep.subr.bf16.mxu1 %v7468_v11  ;;  %v6524_v11 = vcombine.low %v8946_v29, %v8950_v30  ;;  %v9110_v29 = vld [vmem:[%s10563_s2 + $0x58] sm:$0x11]  ;;  %v9115_v30 = vld [vmem:[%s10563_s2 + $0x38] sm:$0xee] }
  0xab   :  { %v936_v32 = vrot.slane %v9110_v29, 5 }
  0xac   :  { %1370 = vmatpush1.bf16.msra.mxu0 %v7463_v13  ;;  %v6526_v13 = vcombine.low %v8954_v31, %v8966_v36  ;;  %v6459_v36 = vrot.slane %v9115_v30, 9 }
  0xad   :  { %1423 = vmatpush1.bf16.msra.mxu1 %v7466_v14  ;;  %1371 = vmatprep.subr.bf16.mxu0 %v7471_v27  ;;  %v7525_v14 = vld [vmem:[%s10566_s5 + $0x64] ss:$8 sps:$4 sm:$0xff]   ;;  %v933_v27 = vrot.slane %v9091_v20, 5 }
  0xae   :  { %1424 = vmatprep.subr.bf16.mxu1 %v7474_v28  ;;  %v9105_v28 = vld [vmem:[%s10563_s2 + $0x48] sm:$0xff] }
  0xaf   :  { %v930_v31 = vrot.slane %v9105_v28, 5 }
  0xb0   :  { %1372 = vmatpush2.bf16.msra.mxu0 %v7469_v33  ;;  %v7523_v33 = vld [vmem:[%s10566_s5 + $0x60] ss:$8 sps:$4 sm:$0xff]  }
  0xb1   :  { %1425 = vmatpush2.bf16.msra.mxu1 %v7472_v35  ;;  %1373 = vmatprep.subr.bf16.mxu0 %v7477_v37  ;;  %v932_v35 = vrot.slane %v926_v26, 4  ;;  %v764_v37 = vrot.slane %v762_v9, 4  ;;  %v935_v39 = vrot.slane %v930_v31, 4 }
  0xb2   :  { %1426 = vmatprep.subr.bf16.mxu1 %v7480_v38  ;;  %v7526_v38 = vld [vmem:[%s10566_s5 + $0x160] ss:$8 sps:$4 sm:$0xff]  }
  0xb4   :  { %1374 = vmatpush2.bf16.msra.mxu0 %v7475_v40  ;;  %v7531_v40 = vld [vmem:[%s10566_s5 + $0x54] ss:$8 sps:$4 sm:$0xff]  }
  0xb5   :  { %1427 = vmatpush2.bf16.msra.mxu1 %v7478_v41  ;;  %1375 = vmatprep.subr.bf16.mxu0 %v7483_v42  ;;  %v934_v41 = vsel %vm8690_vm2, %v932_v35, %v933_v27  ;;  %v931_v42 = vsel %vm8690_vm2, %v6459_v36, %v930_v31  ;;  %v7541_v31 = vld [vmem:[%s10566_s5 + $0x30] ss:$8 sps:$4 sm:$0xff]   ;;  %v7549_v36 = vld [vmem:[%s10566_s5 + $0x24] ss:$8 sps:$4 sm:$0xff]  }
  0xb6   :  { %1428 = vmatprep.subr.bf16.mxu1 %v7486_v43  ;;  %v768_v43 = vshll.u32 %v8910_v15, 16  ;;  %v765_v15 = vor.u32 %v764_v37, %v9069_v8  ;;  %v7552_v37 = vld [vmem:[%s10566_s5 + $0x124] ss:$8 sps:$4 sm:$0xff]  }
  0xb8   :  { %1376 = vmatpush2.bf16.msra.mxu0 %v7481_v45  ;;  %v7534_v45 = vld [vmem:[%s10566_s5 + $0x154] ss:$8 sps:$4 sm:$0xff]  }
  0xb9   :  { %1429 = vmatpush2.bf16.msra.mxu1 %v7484_v46  ;;  %1377 = vmatprep.subr.bf16.mxu0 %v7489_v47  ;;  %v6529_v46 = vcombine.high %v927_v34, %v934_v41  ;;  %v937_v47 = vsel %vm8690_vm2, %v935_v39, %v936_v32 }
  0xba   :  { %1430 = vmatprep.subr.bf16.mxu1 %v7492_v48  ;;  %v9145_v48 = vrot.slane %v758_v10, 5 }
  0xbc   :  { %1378 = vmatpush2.bf16.msra.mxu0 %v7487_v49  ;;  %v774_v49 = vrot.slane %v772_v24, 4 }
  0xbd   :  { %1431 = vmatpush2.bf16.msra.mxu1 %v7490_v50  ;;  %1379 = vmatprep.subr.bf16.mxu0 %v7495_v51  ;;  %v6531_v50 = vcombine.high %v931_v42, %v937_v47  ;;  %v7529_v51 = vld [vmem:[%s10566_s5 + $0x50] ss:$8 sps:$4 sm:$0xff]  }
  0xbe   :  { %1432 = vmatprep.subr.bf16.mxu1 %v7498_v52  ;;  %v6528_v52 = vcombine.low %v927_v34, %v934_v41  ;;  %v7547_v41 = vld [vmem:[%s10566_s5 + $0x20] ss:$8 sps:$4 sm:$0xff]  }
  0xc0   :  { %1380 = vmatpush2.bf16.msra.mxu0 %v7493_v53  ;;  %v6530_v53 = vcombine.low %v931_v42, %v937_v47  ;;  %v7558_v47 = vld [vmem:[%s10566_s5 + $0x114] ss:$8 sps:$4 sm:$0xff]  }
  0xc1   :  { %1433 = vmatpush2.bf16.msra.mxu1 %v7496_v54  ;;  %1381 = vmatprep.subr.bf16.mxu0 %v7501_v55  ;;  %v7532_v54 = vld [vmem:[%s10566_s5 + $0x150] ss:$8 sps:$4 sm:$0xff]   ;;  %v770_v55 = vrot.slane %v768_v43, 5 }
  0xc2   :  { %1434 = vmatprep.subr.bf16.mxu1 %v7504_v56  ;;  %v7537_v56 = vld [vmem:[%s10566_s5 + $0x44] ss:$8 sps:$4 sm:$0xff]  }
  0xc4   :  { %1382 = vmatpush2.bf16.msra.mxu0 %v7499_v57  ;;  %v7540_v57 = vld [vmem:[%s10566_s5 + $0x144] ss:$8 sps:$4 sm:$0xff]  }
  0xc5   :  { %1435 = vmatpush2.bf16.msra.mxu1 %v7502_v58  ;;  %1383 = vmatprep.subr.bf16.mxu0 %v7507_v59  ;;  %v719_v58 = vld [vmem:[%s10563_s2] sm:$0xff]  ;;  %v775_v59 = vor.u32 %v774_v49, %v9145_v48  ;;  %v7556_v49 = vld [vmem:[%s10566_s5 + $0x110] ss:$8 sps:$4 sm:$0xff]  }
  0xc6   :  { %1436 = vmatprep.subr.bf16.mxu1 %v7510_v60  ;;  %v778_v60 = vshll.u32 %v8928_v21, 16  ;;  %v7543_v21 = vld [vmem:[%s10566_s5 + $0x34] ss:$8 sps:$4 sm:$0xff]  }
  0xc7   :  { %v776_v25 = vrot.slane %v775_v59, 4  ;;  %v7573_v59 = vld [vmem:[%s10566_s5 + $0xe4] ss:$8 sps:$4 sm:$0xff]  }
  0xc8   :  { %1384 = vmatpush2.bf16.msra.mxu0 %v7505_v61  ;;  %v7535_v61 = vld [vmem:[%s10566_s5 + $0x40] ss:$8 sps:$4 sm:$0xff]   ;;  %v780_v26 = vrot.slane %v778_v60, 5  ;;  %v7576_v60 = vld [vmem:[%s10566_s5 + $0x1e4] ss:$8 sps:$4 sm:$0xff]  }
  0xc9   :  { %1437 = vmatpush2.bf16.msra.mxu1 %v7508_v62  ;;  %1385 = vmatprep.subr.bf16.mxu0 %v7513_v63  ;;  %v735_v62 = vshrl.u32 %v719_v58, 16  ;;  %v738_v63 = vshll.u32 %v719_v58, 16  ;;  %v7568_v58 = vld [vmem:[%s10566_s5 + $0x1f0] ss:$8 sps:$4 sm:$0xff]  }
  0xca   :  { %1438 = vmatprep.subr.bf16.mxu1 %v7516_v0  ;;  %v766_v0 = vrot.slane %v765_v15, 4  ;;  %v9206_v39 = vsel %vm9184_vm5, %v776_v25, %v780_v26  ;;  %v7564_v15 = vld [vmem:[%s10566_s5 + $0x104] ss:$8 sps:$4 sm:$0xff]   ;;  %v1930_v25 = vshll.u32 %v8915_v16, 16 }
  0xcb   :  { %v7588_v26 = vld [vmem:[%s10566_s5 + $0x1c4] ss:$8 sps:$4 sm:$0xff]  }
  0xcc   :  { %1386 = vmatpush2.bf16.msra.mxu0 %v7511_v2  ;;  %v720_v2 = vld [vmem:[%s10563_s2 + $0x8] sm:$0xff]  ;;  %v9196_v35 = vsel %vm9184_vm5, %v766_v0, %v770_v55  ;;  %v7565_v55 = vld [vmem:[%s10566_s5 + $0xf0] ss:$8 sps:$4 sm:$0xff]  }
  0xcd   :  { %1439 = vmatpush2.bf16.msra.mxu1 %v7514_v3  ;;  %1813 = vmatprep.subr.bf16.mxu0 %v7519_v4  ;;  %v7538_v3 = vld [vmem:[%s10566_s5 + $0x140] ss:$8 sps:$4 sm:$0xff]   ;;  %v749_v4 = vshrl.u32 %v720_v2, 16 }
  0xce   :  { %1866 = vmatprep.subr.bf16.mxu1 %v7522_v5  ;;  %v752_v5 = vshll.u32 %v720_v2, 16  ;;  %v7571_v0 = vld [vmem:[%s10566_s5 + $0xe0] ss:$8 sps:$4 sm:$0xff]  }
  0xcf   :  { %1388 = vmatmul.mubr.bf16.vlgmr.msra.gmra.mxu0 %v6524_v11  ;;  %v740_v11 = vrot.slane %v738_v63, 5  ;;  %v820_v63 = vshrl.u32 %v9105_v28, 16  ;;  %v7574_v2 = vld [vmem:[%s10566_s5 + $0x1e0] ss:$8 sps:$4 sm:$0xff]  }
  0xd0   :  { %1441 = vmatmul.mubr.bf16.vlgmr.msra.gmra.mxu1 %v6526_v13  ;;  %1814 = vmatpush1.bf16.msra.mxu0 %v7517_v6  ;;  %v7546_v6 = vld [vmem:[%s10566_s5 + $0x134] ss:$8 sps:$4 sm:$0xff]  }
  0xd1   :  { %1867 = vmatpush1.bf16.msra.mxu1 %v7520_v7  ;;  %1815 = vmatprep.subr.bf16.mxu0 %v7525_v14  ;;  %v737_v7 = vrot.slane %v735_v62, 4  ;;  %v751_v14 = vrot.slane %v749_v4, 4  ;;  %v806_v4 = vshll.u32 %v9105_v28, 16  ;;  %v7585_v28 = vld [vmem:[%s10566_s5 + $0xc4] ss:$8 sps:$4 sm:$0xff]  }
  0xd2   :  { %1868 = vmatprep.subr.bf16.mxu1 %v7528_v17  ;;  %1397 = vmatprep.mubr.bf16.mxu0 %v6529_v46  ;;  %v754_v17 = vrot.slane %v752_v5, 5  ;;  %v7555_v46 = vld [vmem:[%s10566_s5 + $0x14] ss:$8 sps:$4 sm:$0xff]   ;;  %v1994_v5 = vrot.slane %v820_v63, 5 }
  0xd3   :  { %1450 = vmatprep.mubr.bf16.mxu1 %v6531_v50  ;;  %v741_v27 = vor.u32 %v740_v11, %v737_v7  ;;  %v7561_v50 = vld [vmem:[%s10566_s5 + $0x4] ss:$8 sps:$4 sm:$0xff]   ;;  %v7577_v7 = vld [vmem:[%s10566_s5 + $0xd0] ss:$8 sps:$4 sm:$0xff]   ;;  %v1927_v11 = vshrl.u32 %v8915_v16, 16  ;;  %v1986_v16 = vshrl.u32 %v9115_v30, 16 }
  0xd4   :  { %1816 = vmatpush1.bf16.msra.mxu0 %v7523_v33  ;;  %v755_v32 = vor.u32 %v754_v17, %v751_v14  ;;  %v7544_v33 = vld [vmem:[%s10566_s5 + $0x130] ss:$8 sps:$4 sm:$0xff]   ;;  %v1995_v14 = vrot.slane %v806_v4, 6  ;;  %v7819_v13 = vld [vmem:[#allocation2 + $0x54] ss:$8 sps:$4 sm:$0xff]  }
  0xd5   :  { %1869 = vmatpush1.bf16.msra.mxu1 %v7526_v38  ;;  %1817 = vmatprep.subr.bf16.mxu0 %v7531_v40  ;;  %v742_v34 = vrot.slane %v741_v27, 4  ;;  %v7580_v17 = vld [vmem:[%s10566_s5 + $0x1d0] ss:$8 sps:$4 sm:$0xff]  }
  0xd6   :  { %1870 = vmatprep.subr.bf16.mxu1 %v7534_v45  ;;  %v756_v38 = vrot.slane %v755_v32, 4  ;;  %v7550_v45 = vld [vmem:[%s10566_s5 + $0x120] ss:$8 sps:$4 sm:$0xff]   ;;  %v725_v27 = vld [vmem:[%s10563_s2 + $0x30] sm:$0xff]  ;;  %v1973_v32 = vshrl.u32 %v9096_v23, 16 }
  0xd7   :  { %1398 = vmatmul.mubr.bf16.gmra.mxu0 %v6528_v52  ;;  %v9211_v40 = vsel %vm9184_vm5, %v742_v34, %v9069_v8  ;;  %v7562_v52 = vld [vmem:[%s10566_s5 + $0x100] ss:$8 sps:$4 sm:$0xff]   ;;  %v1989_v34 = vshll.u32 %v9115_v30, 16  ;;  %v726_v30 = vld [vmem:[%s10563_s2 + $0x38] sm:$0xff] }
  0xd8   :  { %1451 = vmatmul.mubr.bf16.gmra.mxu1 %v6530_v53  ;;  %1818 = vmatpush1.bf16.msra.mxu0 %v7529_v51  ;;  %v6597_v42 = vcombine.high %v9211_v40, %v9196_v35  ;;  %v9221_v43 = vsel %vm9184_vm5, %v756_v38, %v9145_v48  ;;  %v7553_v48 = vld [vmem:[%s10566_s5 + $0x10] ss:$8 sps:$4 sm:$0xff]   ;;  %v7559_v51 = vld [vmem:[%s10566_s5] ss:$8 sps:$4 sm:$0xff]   ;;  %v7567_v53 = vld [vmem:[%s10566_s5 + $0xf4] ss:$8 sps:$4 sm:$0xff]  }
  0xd9   :  { %1871 = vmatpush1.bf16.msra.mxu1 %v7532_v54  ;;  %1819 = vmatprep.subr.bf16.mxu0 %v7537_v56  ;;  %v6599_v8 = vcombine.high %v9221_v43, %v9206_v39  ;;  %v7570_v54 = vld [vmem:[%s10566_s5 + $0x1f4] ss:$8 sps:$4 sm:$0xff]   ;;  %v792_v56 = vshll.u32 %v9086_v19, 16  ;;  %v1940_v38 = vshrl.u32 %v8933_v22, 16 }
  0xda   :  { %1872 = vmatprep.subr.bf16.mxu1 %v7540_v57  ;;  %1845 = vmatprep.mubr.bf16.mxu0 %v6597_v42  ;;  %v810_v57 = vshrl.u32 %v9086_v19, 16  ;;  %v9329_v42 = vrot.slane %v1927_v11, 5  ;;  %v7600_v19 = vld [vmem:[%s10566_s5 + $0x1a4] ss:$8 sps:$4 sm:$0xff]   ;;  %v826_v11 = vshll.u32 %v9110_v29, 16 }
  0xdb   :  { %1898 = vmatprep.mubr.bf16.mxu1 %v6599_v8  ;;  %v1982_v62 = vrot.slane %v792_v56, 6  ;;  %v7594_v8 = vld [vmem:[%s10566_s5 + $0x1b4] ss:$8 sps:$4 sm:$0xff]   ;;  %v1919_v29 = vld [vmem:[%s10563_s2 + $0x20] sm:$0x33] }
  0xdc   :  { %1820 = vmatpush1.bf16.msra.mxu0 %v7535_v61  ;;  %v1981_v61 = vrot.slane %v810_v57, 5 }
  0xdd   :  { %1873 = vmatpush1.bf16.msra.mxu1 %v7538_v3  ;;  %1821 = vmatprep.subr.bf16.mxu0 %v7543_v21  ;;  %v7579_v21 = vld [vmem:[%s10566_s5 + $0xd4] ss:$8 sps:$4 sm:$0xff]  }
  0xde   :  { %1874 = vmatprep.subr.bf16.mxu1 %v7546_v6  ;;  %v9283_v3 = vor.u32 %v1982_v62, %v1981_v61  ;;  %v7582_v6 = vld [vmem:[%s10566_s5 + $0x1d4] ss:$8 sps:$4 sm:$0xff]   ;;  %v822_v61 = vrot.slane %v820_v63, 4  ;;  %v9357_v62 = vrot.slane %v1940_v38, 5  ;;  %v7598_v63 = vld [vmem:[%s10566_s5 + $0x1a0] ss:$8 sps:$4 sm:$0xff]  }
  0xdf   :  { %v8109_v38 = vld [vmem:[#allocation2 + $0x864] ss:$8 sps:$4 sm:$0xff]  }
  0xe0   :  { %1822 = vmatpush1.bf16.msra.mxu0 %v7541_v31  ;;  %v9309_v31 = vor.u32 %v1995_v14, %v1994_v5  ;;  %v7606_v14 = vld [vmem:[%s10566_s5 + $0x194] ss:$8 sps:$4 sm:$0xff]  }
  0xe1   :  { %1875 = vmatpush1.bf16.msra.mxu1 %v7544_v33  ;;  %1823 = vmatprep.subr.bf16.mxu0 %v7549_v36  ;;  %v1976_v33 = vshll.u32 %v9096_v23, 16  ;;  %v7583_v36 = vld [vmem:[%s10566_s5 + $0xc0] ss:$8 sps:$4 sm:$0xff]   ;;  %v7591_v23 = vld [vmem:[%s10566_s5 + $0xb4] ss:$8 sps:$4 sm:$0xff]  }
  0xe2   :  { %1876 = vmatprep.subr.bf16.mxu1 %v7552_v37  ;;  %v7586_v37 = vld [vmem:[%s10566_s5 + $0x1c0] ss:$8 sps:$4 sm:$0xff]  }
  0xe4   :  { %1824 = vmatpush1.bf16.msra.mxu0 %v7547_v41  ;;  %v1943_v41 = vshll.u32 %v8933_v22, 16  ;;  %v786_v22 = vshll.u32 %v725_v27, 16 }
  0xe5   :  { %1877 = vmatpush1.bf16.msra.mxu1 %v7550_v45  ;;  %1825 = vmatprep.subr.bf16.mxu0 %v7555_v46  ;;  %v9331_v45 = vrot.slane %v1930_v25, 6  ;;  %v783_v46 = vshrl.u32 %v725_v27, 16 }
  0xe6   :  { %1878 = vmatprep.subr.bf16.mxu1 %v7558_v47  ;;  %v1935_v47 = vrot.slane %v762_v9, 5  ;;  %v812_v9 = vrot.slane %v810_v57, 4  ;;  %v788_v12 = vrot.slane %v786_v22, 5 }
  0xe7   :  { %v1933_v27 = vor.u32 %v9331_v45, %v9329_v42  ;;  %v7612_v42 = vld [vmem:[%s10566_s5 + $0x184] ss:$8 sps:$4 sm:$0xff]  }
  0xe8   :  { %1826 = vmatpush1.bf16.msra.mxu0 %v7553_v48  ;;  %v1975_v48 = vrot.slane %v1973_v32, 5  ;;  %v1945_v32 = vrot.slane %v1943_v41, 6 }
  0xe9   :  { %1879 = vmatpush1.bf16.msra.mxu1 %v7556_v49  ;;  %1827 = vmatprep.subr.bf16.mxu0 %v7561_v50  ;;  %v1978_v49 = vrot.slane %v1976_v33, 6  ;;  %v1988_v50 = vrot.slane %v1986_v16, 5  ;;  %v1948_v33 = vrot.slane %v772_v24, 5  ;;  %v7604_v16 = vld [vmem:[%s10566_s5 + $0x190] ss:$8 sps:$4 sm:$0xff]   ;;  %v828_v24 = vrot.slane %v826_v11, 5 }
  0xea   :  { %1880 = vmatprep.subr.bf16.mxu1 %v7564_v15  ;;  %v1991_v15 = vrot.slane %v1989_v34, 6  ;;  %v7609_v34 = vld [vmem:[%s10566_s5 + $0x84] ss:$8 sps:$4 sm:$0xff]   ;;  %v1998_v11 = vrot.slane %v9283_v3, 4 }
  0xec   :  { %1828 = vmatpush1.bf16.msra.mxu0 %v7559_v51  ;;  %v7589_v51 = vld [vmem:[%s10566_s5 + $0xb0] ss:$8 sps:$4 sm:$0xff]   ;;  %v1992_v57 = vor.u32 %v1991_v15, %v1988_v50  ;;  %v1957_v50 = vshll.u32 %v1919_v29, 16  ;;  %v1949_v15 = vrot.slane %v758_v10, 6  ;;  %v1946_v10 = vor.u32 %v1945_v32, %v9357_v62 }
  0xed   :  { %1881 = vmatpush1.bf16.msra.mxu1 %v7562_v52  ;;  %1829 = vmatprep.subr.bf16.mxu0 %v7567_v53  ;;  %v797_v52 = vshrl.u32 %v726_v30, 16  ;;  %v800_v53 = vshll.u32 %v726_v30, 16  ;;  %v1920_v30 = vld [vmem:[%s10563_s2 + $0x28] sm:$0x33]  ;;  %v1921_v62 = vld [vmem:[%s10563_s2 + $0x50] sm:$0x33] }
  0xee   :  { %1882 = vmatprep.subr.bf16.mxu1 %v7570_v54  ;;  %v7592_v54 = vld [vmem:[%s10566_s5 + $0x1b0] ss:$8 sps:$4 sm:$0xff]   ;;  %v1993_v25 = vrot.slane %v1992_v57, 4 }
  0xef   :  { %v1922_v57 = vld [vmem:[%s10563_s2 + $0x58] sm:$0x33] }
  0xf0   :  { %1830 = vmatpush2.bf16.msra.mxu0 %v7565_v55  ;;  %v9346_v55 = vrot.slane %v792_v56, 5  ;;  %v785_v56 = vrot.slane %v783_v46, 4  ;;  %v9416_v22 = vsel %vm9396_vm8, %v1993_v25, %v9309_v31 }
  0xf1   :  { %1883 = vmatpush2.bf16.msra.mxu1 %v7568_v58  ;;  %1831 = vmatprep.subr.bf16.mxu0 %v7573_v59  ;;  %v1936_v58 = vrot.slane %v744_v1, 6  ;;  %v7597_v59 = vld [vmem:[%s10566_s5 + $0xa4] ss:$8 sps:$4 sm:$0xff]   ;;  %v1979_v1 = vor.u32 %v1978_v49, %v1975_v48  ;;  %v9421_v49 = vrot.slane %v1933_v27, 4 }
  0xf2   :  { %1884 = vmatprep.subr.bf16.mxu1 %v7576_v60  ;;  %v9355_v60 = vrot.slane %v806_v4, 5  ;;  %v7603_v4 = vld [vmem:[%s10566_s5 + $0x94] ss:$8 sps:$4 sm:$0xff]   ;;  %v813_v5 = vor.u32 %v812_v9, %v9346_v55 }
  0xf3   :  { %v7615_v9 = vld [vmem:[%s10566_s5 + $0x474] ss:$8 sps:$4 sm:$0xff]  }
  0xf4   :  { %1832 = vmatpush2.bf16.msra.mxu0 %v7571_v0  ;;  %v7595_v0 = vld [vmem:[%s10566_s5 + $0xa0] ss:$8 sps:$4 sm:$0xff]  }
  0xf5   :  { %1885 = vmatpush2.bf16.msra.mxu1 %v7574_v2  ;;  %1833 = vmatprep.subr.bf16.mxu0 %v7579_v21  ;;  %v799_v2 = vrot.slane %v797_v52, 4  ;;  %v802_v21 = vrot.slane %v800_v53, 5  ;;  %v1964_v52 = vshrl.u32 %v1920_v30, 16  ;;  %v1967_v53 = vshll.u32 %v1920_v30, 16 }
  0xf6   :  { %1886 = vmatprep.subr.bf16.mxu1 %v7582_v6  ;;  %v816_v6 = vshll.u32 %v9091_v20, 16  ;;  %v7601_v20 = vld [vmem:[%s10566_s5 + $0x90] ss:$8 sps:$4 sm:$0xff]  }
  0xf8   :  { %1834 = vmatpush2.bf16.msra.mxu0 %v7577_v7  ;;  %v823_v7 = vor.u32 %v822_v61, %v9355_v60 }
  0xf9   :  { %1887 = vmatpush2.bf16.msra.mxu1 %v7580_v17  ;;  %1835 = vmatprep.subr.bf16.mxu0 %v7585_v28  ;;  %v789_v17 = vor.u32 %v788_v12, %v785_v56  ;;  %v1980_v28 = vrot.slane %v1979_v1, 4  ;;  %v1959_v56 = vrot.slane %v1957_v50, 6  ;;  %v1950_v12 = vor.u32 %v1949_v15, %v1948_v33 }
  0xfa   :  { %1888 = vmatprep.subr.bf16.mxu1 %v7588_v26  ;;  %v803_v26 = vor.u32 %v802_v21, %v799_v2  ;;  %v824_v41 = vrot.slane %v823_v7, 4  ;;  %v2000_v1 = vshrl.u32 %v1921_v62, 16  ;;  %v1966_v2 = vrot.slane %v1964_v52, 5 }
  0xfb   :  { %v790_v45 = vrot.slane %v789_v17, 4  ;;  %v9411_v46 = vsel %vm9396_vm8, %v1980_v28, %v9283_v3  ;;  %v1969_v21 = vrot.slane %v1967_v53, 6  ;;  %v1947_v7 = vrot.slane %v1946_v10, 4  ;;  %v7622_v3 = vld [vmem:[%s10566_s5 + $0x560] ss:$8 sps:$4 sm:$0xff]  }
  0xfc   :  { %1836 = vmatpush2.bf16.msra.mxu0 %v7583_v36  ;;  %v814_v36 = vrot.slane %v813_v5, 4  ;;  %v804_v48 = vrot.slane %v803_v26, 4  ;;  %v9451_v61 = vsel %vm9184_vm5, %v824_v41, %v828_v24  ;;  %v2002_v5 = vrot.slane %v2000_v1, 5  ;;  %v7630_v41 = vld [vmem:[%s10566_s5 + $0x554] ss:$8 sps:$4 sm:$0xff]  }
  0xfd   :  { %1889 = vmatpush2.bf16.msra.mxu1 %v7586_v37  ;;  %1837 = vmatprep.subr.bf16.mxu0 %v7591_v23  ;;  %v818_v37 = vrot.slane %v816_v6, 5  ;;  %v9400_v23 = vor.u32 %v1936_v58, %v1935_v47  ;;  %v7607_v47 = vld [vmem:[%s10566_s5 + $0x80] ss:$8 sps:$4 sm:$0xff]   ;;  %v2013_v6 = vshll.u32 %v1922_v57, 16  ;;  %v1962_v32 = vrot.slane %v1950_v12, 4 }
  0xfe   :  { %1890 = vmatprep.subr.bf16.mxu1 %v7594_v8  ;;  %v1954_v8 = vshrl.u32 %v1919_v29, 16  ;;  %v7619_v29 = vld [vmem:[%s10566_s5 + $0x460] ss:$8 sps:$4 sm:$0xff]   ;;  %v1970_v33 = vor.u32 %v1969_v21, %v1966_v2  ;;  %v9506_v30 = vsel %vm9396_vm8, %v1947_v7, %v1950_v12  ;;  %v7636_v53 = vld [vmem:[%s10566_s5 + $0x544] ss:$8 sps:$4 sm:$0xff]  }
  0xff   :  { %v9435_v58 = vsel %vm9184_vm5, %v814_v36, %v818_v37  ;;  %v1952_v18 = vrot.slane %v9400_v23, 4  ;;  %v2015_v26 = vrot.slane %v2013_v6, 6  ;;  %v9502_v24 = vsel %vm9396_vm8, %v9421_v49, %v9400_v23  ;;  %v7628_v49 = vld [vmem:[%s10566_s5 + $0x550] ss:$8 sps:$4 sm:$0xff]   ;;  %v7633_v23 = vld [vmem:[%s10566_s5 + $0x444] ss:$8 sps:$4 sm:$0xff]  }
 0x100   :  { %1838 = vmatpush2.bf16.msra.mxu0 %v7589_v51  ;;  %v7610_v51 = vld [vmem:[%s10566_s5 + $0x180] ss:$8 sps:$4 sm:$0xff]   ;;  %v9534_v15 = vsel %vm9396_vm8, %v1962_v32, %v1970_v33  ;;  %v7639_v10 = vld [vmem:[%s10566_s5 + $0x434] ss:$8 sps:$4 sm:$0xff]   ;;  %v7652_v12 = vld [vmem:[%s10566_s5 + $0x510] ss:$8 sps:$4 sm:$0xff]  }
 0x101   :  { %1891 = vmatpush2.bf16.msra.mxu1 %v7592_v54  ;;  %1839 = vmatprep.subr.bf16.mxu0 %v7597_v59  ;;  %v6596_v54 = vcombine.low %v9211_v40, %v9196_v35  ;;  %v6598_v59 = vcombine.low %v9221_v43, %v9206_v39  ;;  %v7618_v35 = vld [vmem:[%s10566_s5 + $0x574] ss:$8 sps:$4 sm:$0xff]   ;;  %v9447_v40 = vsel %vm9184_vm5, %v790_v45, %v9346_v55  ;;  %v7613_v39 = vld [vmem:[%s10566_s5 + $0x470] ss:$8 sps:$4 sm:$0xff]   ;;  %v7657_v1 = vld [vmem:[%s10566_s5 + $0x404] ss:$8 sps:$4 sm:$0xff]  }
 0x102   :  { %1892 = vmatprep.subr.bf16.mxu1 %v7600_v19  ;;  %v1956_v19 = vrot.slane %v1954_v8, 5  ;;  %v7616_v43 = vld [vmem:[%s10566_s5 + $0x570] ss:$8 sps:$4 sm:$0xff]   ;;  %v9465_v55 = vsel %vm9184_vm5, %v804_v48, %v9355_v60  ;;  %v7624_v60 = vld [vmem:[%s10566_s5 + $0x564] ss:$8 sps:$4 sm:$0xff]   ;;  %v6601_v28 = vcombine.high %v9447_v40, %v9435_v58 }
 0x103   :  { %v6603_v25 = vcombine.high %v9465_v55, %v9451_v61  ;;  %v6602_v36 = vcombine.low %v9465_v55, %v9451_v61  ;;  %v7625_v48 = vld [vmem:[%s10566_s5 + $0x450] ss:$8 sps:$4 sm:$0xff]   ;;  %v7645_v61 = vld [vmem:[%s10566_s5 + $0x424] ss:$8 sps:$4 sm:$0xff]   ;;  %v7654_v55 = vld [vmem:[%s10566_s5 + $0x514] ss:$8 sps:$4 sm:$0xff]  }
 0x104   :  { %1840 = vmatpush2.bf16.msra.mxu0 %v7595_v0  ;;  %v7621_v0 = vld [vmem:[%s10566_s5 + $0x464] ss:$8 sps:$4 sm:$0xff]   ;;  %v1960_v27 = vor.u32 %v1959_v56, %v1956_v19  ;;  %v7649_v56 = vld [vmem:[%s10566_s5 + $0x410] ss:$8 sps:$4 sm:$0xff]   ;;  %v7658_v2 = vld [vmem:[%s10566_s5 + $0x500] ss:$8 sps:$4 sm:$0xff]  }
 0x105   :  { %1893 = vmatpush2.bf16.msra.mxu1 %v7598_v63  ;;  %1841 = vmatprep.subr.bf16.mxu0 %v7603_v4  ;;  %v2003_v63 = vshll.u32 %v1921_v62, 16  ;;  %v2010_v4 = vshrl.u32 %v1922_v57, 16  ;;  %v7648_v19 = vld [vmem:[%s10566_s5 + $0x524] ss:$8 sps:$4 sm:$0xff]   ;;  %v7643_v62 = vld [vmem:[%s10566_s5 + $0x420] ss:$8 sps:$4 sm:$0xff]  }
 0x106   :  { %1894 = vmatprep.subr.bf16.mxu1 %v7606_v14  ;;  %v9530_v50 = vsel %vm9396_vm8, %v1952_v18, %v1960_v27  ;;  %v7634_v18 = vld [vmem:[%s10566_s5 + $0x540] ss:$8 sps:$4 sm:$0xff]   ;;  %v7660_v57 = vld [vmem:[%s10566_s5 + $0x504] ss:$8 sps:$4 sm:$0xff]   ;;  %v7663_v21 = vld [vmem:[%s10566_s5 + $0x4f4] ss:$8 sps:$4 sm:$0xff]  }
 0x107   :  { %v2005_v14 = vrot.slane %v2003_v63, 6  ;;  %v2012_v17 = vrot.slane %v2010_v4, 5  ;;  %v7666_v63 = vld [vmem:[%s10566_s5 + $0x5f4] ss:$8 sps:$4 sm:$0xff]   ;;  %v7661_v4 = vld [vmem:[%s10566_s5 + $0x4f0] ss:$8 sps:$4 sm:$0xff]  }
 0x108   :  { %1842 = vmatpush2.bf16.msra.mxu0 %v7601_v20  ;;  %v2008_v20 = vrot.slane %v9309_v31, 4  ;;  %v6600_v31 = vcombine.low %v9447_v40, %v9435_v58  ;;  %v7631_v58 = vld [vmem:[%s10566_s5 + $0x440] ss:$8 sps:$4 sm:$0xff]   ;;  %v7640_v40 = vld [vmem:[%s10566_s5 + $0x530] ss:$8 sps:$4 sm:$0xff]  }
 0x109   :  { %1895 = vmatpush2.bf16.msra.mxu1 %v7604_v16  ;;  %1843 = vmatprep.subr.bf16.mxu0 %v7609_v34  ;;  %v2006_v16 = vor.u32 %v2005_v14, %v2002_v5  ;;  %v7627_v34 = vld [vmem:[%s10566_s5 + $0x454] ss:$8 sps:$4 sm:$0xff]   ;;  %v2016_v37 = vor.u32 %v2015_v26, %v2012_v17  ;;  %v7669_v5 = vld [vmem:[%s10566_s5 + $0x4e4] ss:$8 sps:$4 sm:$0xff]   ;;  %v7667_v7 = vld [vmem:[%s10566_s5 + $0x4e0] ss:$8 sps:$4 sm:$0xff]  }
 0x10a   :  { %1896 = vmatprep.subr.bf16.mxu1 %v7612_v42  ;;  %v7672_v6 = vld [vmem:[%s10566_s5 + $0x5e4] ss:$8 sps:$4 sm:$0xff]   ;;  %v7675_v14 = vld [vmem:[%s10566_s5 + $0x4d4] ss:$8 sps:$4 sm:$0xff]   ;;  %v7685_v33 = vld [vmem:[%s10566_s5 + $0x4b0] ss:$8 sps:$4 sm:$0xff]  }
 0x10b   :  { %v9510_v42 = vsel %vm9396_vm8, %v1998_v11, %v2006_v16  ;;  %v9516_v8 = vsel %vm9396_vm8, %v2008_v20, %v2016_v37  ;;  %v7670_v11 = vld [vmem:[%s10566_s5 + $0x5e0] ss:$8 sps:$4 sm:$0xff]   ;;  %v7678_v17 = vld [vmem:[%s10566_s5 + $0x5d4] ss:$8 sps:$4 sm:$0xff]   ;;  %v7681_v20 = vld [vmem:[%s10566_s5 + $0x4c4] ss:$8 sps:$4 sm:$0xff]  }
 0x10c   :  { %1844 = vmatpush2.bf16.msra.mxu0 %v7607_v47  ;;  %v6737_v45 = vcombine.high %v9411_v46, %v9510_v42  ;;  %v6736_v47 = vcombine.low %v9411_v46, %v9510_v42  ;;  %v6738_v52 = vcombine.low %v9416_v22, %v9516_v8  ;;  %v7684_v26 = vld [vmem:[%s10566_s5 + $0x5c4] ss:$8 sps:$4 sm:$0xff]   ;;  %v7687_v27 = vld [vmem:[%s10566_s5 + $0x4b4] ss:$8 sps:$4 sm:$0xff]   ;;  %v7688_v16 = vld [vmem:[%s10566_s5 + $0x5b0] ss:$8 sps:$4 sm:$0xff]  }
 0x10d   :  { %1897 = vmatpush2.bf16.msra.mxu1 %v7610_v51  ;;  %2435 = vmatprep.subr.bf16.mxu0 %v7615_v9  ;;  %v6739_v51 = vcombine.high %v9416_v22, %v9516_v8  ;;  %v6735_v9 = vcombine.high %v9506_v30, %v9534_v15  ;;  %v7690_v32 = vld [vmem:[%s10566_s5 + $0x5b4] ss:$8 sps:$4 sm:$0xff]   ;;  %v7691_v37 = vld [vmem:[%s10566_s5 + $0x4a0] ss:$8 sps:$4 sm:$0xff]   ;;  %v7733_v8 = vld [vmem:[#allocation2 + $0x230] ss:$8 sps:$4 sm:$0xff]  }
 0x10e   :  { %2488 = vmatprep.subr.bf16.mxu1 %v7618_v35  ;;  %v7637_v35 = vld [vmem:[%s10566_s5 + $0x430] ss:$8 sps:$4 sm:$0xff]   ;;  %v7738_v46 = vld [vmem:[#allocation2 + $0x334] ss:$8 sps:$4 sm:$0xff]  }
 0x10f   :  { %1846 = vmatmul.mubr.bf16.vlgmr.msra.gmra.mxu0 %v6596_v54  ;;  %v6733_v54 = vcombine.high %v9502_v24, %v9530_v50 }
 0x110   :  { %1899 = vmatmul.mubr.bf16.vlgmr.msra.gmra.mxu1 %v6598_v59  ;;  %2436 = vmatpush1.bf16.msra.mxu0 %v7613_v39  ;;  %v7642_v59 = vld [vmem:[%s10566_s5 + $0x534] ss:$8 sps:$4 sm:$0xff]   ;;  %v7646_v39 = vld [vmem:[%s10566_s5 + $0x520] ss:$8 sps:$4 sm:$0xff]  }
 0x111   :  { %2489 = vmatpush1.bf16.msra.mxu1 %v7616_v43  ;;  %2437 = vmatprep.subr.bf16.mxu0 %v7621_v0  ;;  %v7651_v43 = vld [vmem:[%s10566_s5 + $0x414] ss:$8 sps:$4 sm:$0xff]   ;;  %v7655_v0 = vld [vmem:[%s10566_s5 + $0x400] ss:$8 sps:$4 sm:$0xff]  }
 0x112   :  { %2490 = vmatprep.subr.bf16.mxu1 %v7624_v60  ;;  %1855 = vmatprep.mubr.bf16.mxu0 %v6601_v28  ;;  %v7664_v60 = vld [vmem:[%s10566_s5 + $0x5f0] ss:$8 sps:$4 sm:$0xff]  }
 0x113   :  { %1908 = vmatprep.mubr.bf16.mxu1 %v6603_v25  ;;  %v7673_v28 = vld [vmem:[%s10566_s5 + $0x4d0] ss:$8 sps:$4 sm:$0xff]  }
 0x114   :  { %2438 = vmatpush1.bf16.msra.mxu0 %v7619_v29  ;;  %v7676_v25 = vld [vmem:[%s10566_s5 + $0x5d0] ss:$8 sps:$4 sm:$0xff]   ;;  %v7679_v29 = vld [vmem:[%s10566_s5 + $0x4c0] ss:$8 sps:$4 sm:$0xff]  }
 0x115   :  { %2491 = vmatpush1.bf16.msra.mxu1 %v7622_v3  ;;  %2439 = vmatprep.subr.bf16.mxu0 %v7627_v34  ;;  %v7682_v3 = vld [vmem:[%s10566_s5 + $0x5c0] ss:$8 sps:$4 sm:$0xff]   ;;  %v7696_v34 = vld [vmem:[%s10566_s5 + $0x5a4] ss:$8 sps:$4 sm:$0xff]  }
 0x116   :  { %2492 = vmatprep.subr.bf16.mxu1 %v7630_v41  ;;  %v7694_v41 = vld [vmem:[%s10566_s5 + $0x5a0] ss:$8 sps:$4 sm:$0xff]  }
 0x117   :  { %1856 = vmatmul.mubr.bf16.gmra.mxu0 %v6600_v31  ;;  %v7693_v31 = vld [vmem:[%s10566_s5 + $0x4a4] ss:$8 sps:$4 sm:$0xff]  }
 0x118   :  { %1909 = vmatmul.mubr.bf16.gmra.mxu1 %v6602_v36  ;;  %2440 = vmatpush1.bf16.msra.mxu0 %v7625_v48  ;;  %v9673_v36 = vld [vmem:[%s10564_s3] sm:$0xff]  ;;  %v9684_v48 = vld [vmem:[%s10564_s3 + $0x10] sm:$0xff] }
 0x119   :  { %2493 = vmatpush1.bf16.msra.mxu1 %v7628_v49  ;;  %2441 = vmatprep.subr.bf16.mxu0 %v7633_v23  ;;  %v9689_v49 = vld [vmem:[%s10564_s3 + $0x8] sm:$0xff]  ;;  %v7699_v23 = vld [vmem:[%s10566_s5 + $0x494] ss:$8 sps:$4 sm:$0xff]  }
 0x11a   :  { %2494 = vmatprep.subr.bf16.mxu1 %v7636_v53  ;;  %2467 = vmatprep.mubr.bf16.mxu0 %v6733_v54  ;;  %v10579_v53 = vlaneseq  ;;  %v9697_v54 = vld [vmem:[%s10564_s3 + $0x18] sm:$0xff] }
 0x11b   :  { %2520 = vmatprep.mubr.bf16.mxu1 %v6735_v9  ;;  %v7702_v9 = vld [vmem:[%s10566_s5 + $0x594] ss:$8 sps:$4 sm:$0xff]  }
 0x11c   :  { %2442 = vmatpush1.bf16.msra.mxu0 %v7631_v58  ;;  %v2654_v58 = vshrl.u32 %v9673_v36, 16 }
 0x11d   :  { %2495 = vmatpush1.bf16.msra.mxu1 %v7634_v18  ;;  %2443 = vmatprep.subr.bf16.mxu0 %v7639_v10  ;;  %v2657_v18 = vshll.u32 %v9673_v36, 16  ;;  %v10594_v10 = vshll.u32 %v9684_v48, 16 }
 0x11e   :  { %2496 = vmatprep.subr.bf16.mxu1 %v7642_v59  ;;  %v10595_v59 = vshrl.u32 %v9684_v48, 16 }
 0x120   :  { %2444 = vmatpush1.bf16.msra.mxu0 %v7637_v35  ;;  %v2668_v35 = vshrl.u32 %v9689_v49, 16 }
 0x121   :  { %2497 = vmatpush1.bf16.msra.mxu1 %v7640_v40  ;;  %2445 = vmatprep.subr.bf16.mxu0 %v7645_v61  ;;  %v2671_v40 = vshll.u32 %v9689_v49, 16  ;;  %v7697_v61 = vld [vmem:[%s10566_s5 + $0x490] ss:$8 sps:$4 sm:$0xff]  }
 0x122   :  { %2498 = vmatprep.subr.bf16.mxu1 %v7648_v19  ;;  %v7700_v19 = vld [vmem:[%s10566_s5 + $0x590] ss:$8 sps:$4 sm:$0xff]  }
 0x124   :  { %2446 = vmatpush1.bf16.msra.mxu0 %v7643_v62  ;;  %v10592_v62 = vshll.u32 %v9697_v54, 16 }
 0x125   :  { %2499 = vmatpush1.bf16.msra.mxu1 %v7646_v39  ;;  %2447 = vmatprep.subr.bf16.mxu0 %v7651_v43  ;;  %v10593_v39 = vshrl.u32 %v9697_v54, 16  ;;  %v7705_v43 = vld [vmem:[%s10566_s5 + $0x484] ss:$8 sps:$4 sm:$0xff]  }
 0x126   :  { %2500 = vmatprep.subr.bf16.mxu1 %v7654_v55  ;;  %v9720_v55 = vshrl.u32 %v10579_v53, 7 }
 0x128   :  { %2448 = vmatpush1.bf16.msra.mxu0 %v7649_v56  ;;  %10639 = vst [vmem:[#allocation19_spill] sm:$0xff] %v9720_v55  ;;  %v7708_v56 = vld [vmem:[%s10566_s5 + $0x584] ss:$8 sps:$4 sm:$0xff]  }
 0x129   :  { %2501 = vmatpush1.bf16.msra.mxu1 %v7652_v12  ;;  %2449 = vmatprep.subr.bf16.mxu0 %v7657_v1  ;;  %v2656_v12 = vrot.slane %v2654_v58, 4  ;;  %v2659_v1 = vrot.slane %v2657_v18, 5 }
 0x12a   :  { %2502 = vmatprep.subr.bf16.mxu1 %v7660_v57  ;;  %v2665_v57 = vrot.slane %v10594_v10, 5  ;;  %v10043_v10 = vld [vmem:[%s10564_s3 + $0x48] sm:$0xff] }
 0x12b   :  { %10658 = vst [vmem:[#allocation38_spill] sm:$0xff] %v10043_v10 }
 0x12c   :  { %2450 = vmatpush1.bf16.msra.mxu0 %v7655_v0  ;;  %v2683_v0 = vrot.slane %v10595_v59, 4  ;;  %v10054_v59 = vld [vmem:[%s10564_s3 + $0x30] sm:$0xee] }
 0x12d   :  { %2503 = vmatpush1.bf16.msra.mxu1 %v7658_v2  ;;  %2451 = vmatprep.subr.bf16.mxu0 %v7663_v21  ;;  %v2670_v2 = vrot.slane %v2668_v35, 4  ;;  %v2673_v21 = vrot.slane %v2671_v40, 5  ;;  %10660 = vst [vmem:[#allocation40_spill] sm:$0xff] %v10054_v59 }
 0x12e   :  { %2504 = vmatprep.subr.bf16.mxu1 %v7666_v63  ;;  %v7703_v63 = vld [vmem:[%s10566_s5 + $0x480] ss:$8 sps:$4 sm:$0xff]  }
 0x130   :  { %2452 = vmatpush2.bf16.msra.mxu0 %v7661_v4  ;;  %v7706_v4 = vld [vmem:[%s10566_s5 + $0x580] ss:$8 sps:$4 sm:$0xff]  }
 0x131   :  { %2505 = vmatpush2.bf16.msra.mxu1 %v7664_v60  ;;  %2453 = vmatprep.subr.bf16.mxu0 %v7669_v5  ;;  %v2649_v60 = vld [vmem:[%s10564_s3 + $0x20] sm:$0x11]  ;;  %v2679_v5 = vrot.slane %v10592_v62, 5 }
 0x132   :  { %2506 = vmatprep.subr.bf16.mxu1 %v7672_v6  ;;  %v2693_v6 = vrot.slane %v10593_v39, 4  ;;  %v7996_v39 = vld [vmem:[#allocation2 + $0x590] ss:$8 sps:$4 sm:$0xff]  }
 0x134   :  { %2454 = vmatpush2.bf16.msra.mxu0 %v7667_v7  ;;  %v2650_v7 = vld [vmem:[%s10564_s3 + $0x28] sm:$0x11] }
 0x135   :  { %2507 = vmatpush2.bf16.msra.mxu1 %v7670_v11  ;;  %2455 = vmatprep.subr.bf16.mxu0 %v7675_v14  ;;  %v241_v11 = vld [vmem:[#allocation5] sm:$0x3]  ;;  %v9746_v14 = vsub.s32 0, %v9720_v55 }
 0x136   :  { %2508 = vmatprep.subr.bf16.mxu1 %v7678_v17  ;;  %v9749_v17 = vsub.s32 1, %v9720_v55 }
 0x138   :  { %2456 = vmatpush2.bf16.msra.mxu0 %v7673_v28  ;;  %10640 = vst [vmem:[#allocation20_spill] sm:$0xff] %v9749_v17  ;;  %v7711_v28 = vld [vmem:[#allocation2 + $0x274] ss:$8 sps:$4 sm:$0xff]   ;;  %v9759_v40 = vrot.slane %v241_v11, %v9749_v17 }
 0x139   :  { %2509 = vmatpush2.bf16.msra.mxu1 %v7676_v25  ;;  %2457 = vmatprep.subr.bf16.mxu0 %v7681_v20  ;;  %v7714_v25 = vld [vmem:[#allocation2 + $0x374] ss:$8 sps:$4 sm:$0xff]   ;;  %v2660_v20 = vor.u32 %v2659_v1, %v2656_v12 }
 0x13a   :  { %2510 = vmatprep.subr.bf16.mxu1 %v7684_v26  ;;  %v2684_v26 = vor.u32 %v2683_v0, %v2665_v57  ;;  %v7723_v1 = vld [vmem:[#allocation2 + $0x254] ss:$8 sps:$4 sm:$0xff]  }
 0x13b   :  { %v7726_v0 = vld [vmem:[#allocation2 + $0x354] ss:$8 sps:$4 sm:$0xff]  }
 0x13c   :  { %2458 = vmatpush2.bf16.msra.mxu0 %v7679_v29  ;;  %v2687_v29 = vshll.u32 %v2649_v60, 16  ;;  %v2685_v58 = vrot.slane %v2684_v26, 4  ;;  %v7732_v26 = vld [vmem:[#allocation2 + $0x344] ss:$8 sps:$4 sm:$0xff]  }
 0x13d   :  { %2511 = vmatpush2.bf16.msra.mxu1 %v7682_v3  ;;  %2459 = vmatprep.subr.bf16.mxu0 %v7687_v27  ;;  %v2674_v3 = vor.u32 %v2673_v21, %v2670_v2  ;;  %v7709_v27 = vld [vmem:[#allocation2 + $0x270] ss:$8 sps:$4 sm:$0xff]  }
 0x13e   :  { %2512 = vmatprep.subr.bf16.mxu1 %v7690_v32  ;;  %v7712_v32 = vld [vmem:[#allocation2 + $0x370] ss:$8 sps:$4 sm:$0xff]   ;;  %v2689_v18 = vrot.slane %v2687_v29, 5 }
 0x13f   :  { %v2675_v35 = vrot.slane %v2674_v3, 4 }
 0x140   :  { %2460 = vmatpush2.bf16.msra.mxu0 %v7685_v33  ;;  %v2694_v33 = vor.u32 %v2693_v6, %v2679_v5  ;;  %v9768_v21 = vsel %vm9184_vm5, %v2685_v58, %v2689_v18  ;;  %v7741_v58 = vld [vmem:[#allocation2 + $0x224] ss:$8 sps:$4 sm:$0xff]  }
 0x141   :  { %2513 = vmatpush2.bf16.msra.mxu1 %v7688_v16  ;;  %2461 = vmatprep.subr.bf16.mxu0 %v7693_v31  ;;  %v2697_v16 = vshll.u32 %v2650_v7, 16  ;;  %v6732_v31 = vcombine.low %v9502_v24, %v9530_v50  ;;  %v7744_v18 = vld [vmem:[#allocation2 + $0x324] ss:$8 sps:$4 sm:$0xff]  }
 0x142   :  { %2514 = vmatprep.subr.bf16.mxu1 %v7696_v34  ;;  %v6734_v34 = vcombine.low %v9506_v30, %v9534_v15  ;;  %v2695_v24 = vrot.slane %v2694_v33, 4  ;;  %v7715_v15 = vld [vmem:[#allocation2 + $0x260] ss:$8 sps:$4 sm:$0xff]  }
 0x143   :  { %v2699_v50 = vrot.slane %v2697_v16, 5 }
 0x144   :  { %2462 = vmatpush2.bf16.msra.mxu0 %v7691_v37  ;;  %v7717_v37 = vld [vmem:[#allocation2 + $0x264] ss:$8 sps:$4 sm:$0xff]  }
 0x145   :  { %2515 = vmatpush2.bf16.msra.mxu1 %v7694_v41  ;;  %2463 = vmatprep.subr.bf16.mxu0 %v7699_v23  ;;  %v9756_v41 = vrot.slane %v241_v11, %v9746_v14  ;;  %v7720_v23 = vld [vmem:[#allocation2 + $0x364] ss:$8 sps:$4 sm:$0xff]  }
 0x146   :  { %2516 = vmatprep.subr.bf16.mxu1 %v7702_v9  ;;  %v2661_v9 = vrot.slane %v2660_v20, 4 }
 0x148   :  { %2464 = vmatpush2.bf16.msra.mxu0 %v7697_v61  ;;  %v9764_v2 = vsel %vm9184_vm5, %v2661_v9, %v2665_v57  ;;  %v9785_v57 = vsel %vm9184_vm5, %v2695_v24, %v2699_v50  ;;  %v7735_v9 = vld [vmem:[#allocation2 + $0x234] ss:$8 sps:$4 sm:$0xff]   ;;  %v7742_v24 = vld [vmem:[#allocation2 + $0x320] ss:$8 sps:$4 sm:$0xff]  }
 0x149   :  { %2517 = vmatpush2.bf16.msra.mxu1 %v7700_v19  ;;  %2465 = vmatprep.subr.bf16.mxu0 %v7705_v43  ;;  %v7718_v43 = vld [vmem:[#allocation2 + $0x360] ss:$8 sps:$4 sm:$0xff]   ;;  %v7747_v50 = vld [vmem:[#allocation2 + $0x214] ss:$8 sps:$4 sm:$0xff]  }
 0x14a   :  { %2518 = vmatprep.subr.bf16.mxu1 %v7708_v56 }
 0x14c   :  { %2466 = vmatpush2.bf16.msra.mxu0 %v7703_v63  ;;  %v9772_v63 = vsel %vm9184_vm5, %v2675_v35, %v2679_v5  ;;  %v7721_v5 = vld [vmem:[#allocation2 + $0x250] ss:$8 sps:$4 sm:$0xff]   ;;  %v7739_v35 = vld [vmem:[#allocation2 + $0x220] ss:$8 sps:$4 sm:$0xff]  }
 0x14d   :  { %2519 = vmatpush2.bf16.msra.mxu1 %v7706_v4  ;;  %3166 = vmatprep.subr.bf16.mxu0 %v7711_v28  ;;  %v6807_v29 = vcombine.high %v9772_v63, %v9785_v57 }
 0x14e   :  { %3219 = vmatprep.subr.bf16.mxu1 %v7714_v25  ;;  %v7724_v25 = vld [vmem:[#allocation2 + $0x350] ss:$8 sps:$4 sm:$0xff]  }
 0x14f   :  { %v639_v61 = vpop.f32.mrf.mxu0  ;;  %2468 = vmatmul.mubr.bf16.vlgmr.msra.gmra.mxu0 %v6732_v31 }
 0x150   :  { %v692_v30 = vpop.f32.mrf.mxu1  ;;  %2521 = vmatmul.mubr.bf16.vlgmr.msra.gmra.mxu1 %v6734_v34  ;;  %v640_v19 = vadd.f32 %v639_v61, %v9756_v41  ;;  %3167 = vmatpush1.bf16.msra.mxu0 %v7709_v27  ;;  %v7750_v61 = vld [vmem:[#allocation2 + $0x314] ss:$8 sps:$4 sm:$0xff]  }
 0x151   :  { %3220 = vmatpush1.bf16.msra.mxu1 %v7712_v32  ;;  %v641_v56 = vpop.f32.mrf.mxu0  ;;  %3168 = vmatprep.subr.bf16.mxu0 %v7717_v37  ;;  %v7727_v37 = vld [vmem:[#allocation2 + $0x240] ss:$8 sps:$4 sm:$0xff]  }
 0x152   :  { %v694_v12 = vpop.f32.mrf.mxu1  ;;  %3221 = vmatprep.subr.bf16.mxu1 %v7720_v23  ;;  %v9774_v4 = vadd.f32 %v692_v30, %v640_v19  ;;  %v642_v60 = vadd.f32 %v641_v56, %v9759_v40  ;;  %2477 = vmatprep.mubr.bf16.mxu0 %v6737_v45  ;;  %v7729_v45 = vld [vmem:[#allocation2 + $0x244] ss:$8 sps:$4 sm:$0xff]   ;;  %v7730_v23 = vld [vmem:[#allocation2 + $0x340] ss:$8 sps:$4 sm:$0xff]   ;;  %v7748_v19 = vld [vmem:[#allocation2 + $0x310] ss:$8 sps:$4 sm:$0xff]  }
 0x153   :  { %2530 = vmatprep.mubr.bf16.mxu1 %v6739_v51  ;;  %v643_v6 = vpop.f32.mrf.mxu0  ;;  %v6805_v51 = vcombine.high %v9764_v2, %v9768_v21  ;;  %v7753_v56 = vld [vmem:[#allocation2 + $0x204] ss:$8 sps:$4 sm:$0xff]  }
 0x154   :  { %10641 = vst [vmem:[#allocation21_spill] sm:$0xff] %v9774_v4  ;;  %v696_v7 = vpop.f32.mrf.mxu1  ;;  %v9787_v11 = vadd.f32 %v694_v12, %v642_v60  ;;  %v644_v28 = vadd.f32 %v643_v6, %v9756_v41  ;;  %3169 = vmatpush1.bf16.msra.mxu0 %v7715_v15  ;;  %v10587_v3 = vmax.f32 %v9774_v4, 0.0  ;;  %v7745_v15 = vld [vmem:[#allocation2 + $0x210] ss:$8 sps:$4 sm:$0xff]   ;;  %v7756_v12 = vld [vmem:[#allocation2 + $0x304] ss:$8 sps:$4 sm:$0xff]  }
 0x155   :  { %3222 = vmatpush1.bf16.msra.mxu1 %v7718_v43  ;;  %v645_v20 = vpop.f32.mrf.mxu0  ;;  %3170 = vmatprep.subr.bf16.mxu0 %v7723_v1 }
 0x156   :  { %10642 = vst [vmem:[#allocation22_spill] sm:$0xff] %v9787_v11  ;;  %3223 = vmatprep.subr.bf16.mxu1 %v7726_v0  ;;  %v10586_v27 = vmax.f32 %v9787_v11, 0.0  ;;  %v9796_v32 = vadd.f32 %v696_v7, %v644_v28  ;;  %v646_v33 = vadd.f32 %v645_v20, %v9759_v40  ;;  %v698_v16 = vpop.f32.mrf.mxu1  ;;  %v7751_v7 = vld [vmem:[#allocation2 + $0x200] ss:$8 sps:$4 sm:$0xff]   ;;  %v7759_v20 = vld [vmem:[#allocation2 + $0x2f4] ss:$8 sps:$4 sm:$0xff]  }
 0x157   :  { %2478 = vmatmul.mubr.bf16.gmra.mxu0 %v6736_v47  ;;  %v7736_v47 = vld [vmem:[#allocation2 + $0x330] ss:$8 sps:$4 sm:$0xff]   ;;  %v649_v30 = vpop.f32.mrf.mxu0 }
 0x158   :  { %10643 = vst [vmem:[#allocation23_spill] sm:$0xff] %v9796_v32  ;;  %2531 = vmatmul.mubr.bf16.gmra.mxu1 %v6738_v52  ;;  %v7236_v31 = vpack.c.bf16 %v10586_v27, %v10587_v3  ;;  %v9809_v34 = vadd.f32 %v698_v16, %v646_v33  ;;  %3171 = vmatpush1.bf16.msra.mxu0 %v7721_v5  ;;  %v10585_v22 = vmax.f32 %v9796_v32, 0.0  ;;  %v702_v60 = vpop.f32.mrf.mxu1  ;;  %v7754_v5 = vld [vmem:[#allocation2 + $0x300] ss:$8 sps:$4 sm:$0xff]   ;;  %v10063_v32 = vld [vmem:[%s10564_s3 + $0x38] sm:$0xee] }
 0x159   :  { %3224 = vmatpush1.bf16.msra.mxu1 %v7724_v25  ;;  %3172 = vmatprep.subr.bf16.mxu0 %v7729_v45  ;;  %v650_v43 = vadd.f32 %v649_v30, %v9756_v41  ;;  %v651_v1 = vpop.f32.mrf.mxu0  ;;  %v7762_v45 = vld [vmem:[#allocation2 + $0x3f4] ss:$8 sps:$4 sm:$0xff]   ;;  %10663 = vst [vmem:[#allocation41_spill] sm:$0xff] %v10063_v32 }
 0x15a   :  { %10644 = vst [vmem:[#allocation24_spill] sm:$0xff] %v9809_v34  ;;  %3225 = vmatprep.subr.bf16.mxu1 %v7732_v26  ;;  %5562 = vst [vmem:[%s10573_s12] sm:$0xff] %v7236_v31  ;;  %v10584_v42 = vmax.f32 %v9809_v34, 0.0  ;;  %3198 = vmatprep.mubr.bf16.mxu0 %v6805_v51  ;;  %v652_v0 = vadd.f32 %v651_v1, %v9759_v40  ;;  %v704_v26 = vpop.f32.mrf.mxu1  ;;  %v7778_v1 = vld [vmem:[#allocation2 + $0x3c0] ss:$8 sps:$4 sm:$0xff]  }
 0x15b   :  { %3251 = vmatprep.mubr.bf16.mxu1 %v6807_v29  ;;  %v653_v6 = vpop.f32.mrf.mxu0  ;;  %v9825_v28 = vadd.f32 %v702_v60, %v650_v43  ;;  %v7777_v43 = vld [vmem:[#allocation2 + $0x2c4] ss:$8 sps:$4 sm:$0xff]  }
 0x15c   :  { %v7237_v52 = vpack.c.bf16 %v10584_v42, %v10585_v22  ;;  %3173 = vmatpush1.bf16.msra.mxu0 %v7727_v37  ;;  %v654_v25 = vadd.f32 %v653_v6, %v9756_v41  ;;  %v9829_v33 = vadd.f32 %v704_v26, %v652_v0  ;;  %v706_v31 = vpop.f32.mrf.mxu1  ;;  %v7757_v37 = vld [vmem:[#allocation2 + $0x2f0] ss:$8 sps:$4 sm:$0xff]   ;;  %v9861_v60 = vld [vmem:[%s10564_s3 + $0x40] sm:$0xff] }
 0x15d   :  { %3226 = vmatpush1.bf16.msra.mxu1 %v7730_v23  ;;  %3174 = vmatprep.subr.bf16.mxu0 %v7735_v9  ;;  %10645 = vst [vmem:[#allocation25_spill] sm:$0xff] %v9825_v28  ;;  %v655_v51 = vpop.f32.mrf.mxu0  ;;  %v10583_v29 = vmax.f32 %v9825_v28, 0.0  ;;  %v7760_v23 = vld [vmem:[#allocation2 + $0x3f0] ss:$8 sps:$4 sm:$0xff]   ;;  %10649 = vst [vmem:[#allocation29_spill] sm:$0xff] %v9861_v60  ;;  %v10662_v28 = vshll.u32 %v9684_v48, 16 }
 0x15e   :  { %3227 = vmatprep.subr.bf16.mxu1 %v7738_v46  ;;  %5563 = vst [vmem:[%s10573_s12 + $0x8] sm:$0xff] %v7237_v52  ;;  %10646 = vst [vmem:[#allocation26_spill] sm:$0xff] %v9829_v33  ;;  %v656_v16 = vadd.f32 %v655_v51, %v9759_v40  ;;  %v10582_v9 = vmax.f32 %v9829_v33, 0.0  ;;  %v9833_v41 = vadd.f32 %v706_v31, %v654_v25  ;;  %v7765_v46 = vld [vmem:[#allocation2 + $0x2e4] ss:$8 sps:$4 sm:$0xff]   ;;  %v9856_v0 = vld [vmem:[%s10564_s3 + $0x30] sm:$0xff] }
 0x15f   :  { %v9866_v6 = vld [vmem:[%s10564_s3 + $0x38] sm:$0xff]  ;;  %v2705_v26 = vshll.u32 %v9856_v0, 16  ;;  %v10590_v51 = vshll.u32 %v9861_v60, 16  ;;  %v4323_v34 = vrot.slane %v10662_v28, 6  ;;  %v8004_v28 = vld [vmem:[#allocation2 + $0x584] ss:$8 sps:$4 sm:$0xff]  }
 0x160   :  { %3175 = vmatpush1.bf16.msra.mxu0 %v7733_v8  ;;  %10647 = vst [vmem:[#allocation27_spill] sm:$0xff] %v9833_v41  ;;  %v7768_v8 = vld [vmem:[#allocation2 + $0x3e4] ss:$8 sps:$4 sm:$0xff]   ;;  %v7238_v52 = vpack.c.bf16 %v10582_v9, %v10583_v29  ;;  %v10581_v40 = vmax.f32 %v9833_v41, 0.0  ;;  %v7786_v25 = vld [vmem:[#allocation2 + $0x3b4] ss:$8 sps:$4 sm:$0xff]  }
 0x161   :  { %3228 = vmatpush1.bf16.msra.mxu1 %v7736_v47  ;;  %3176 = vmatprep.subr.bf16.mxu0 %v7741_v58  ;;  %v708_v47 = vpop.f32.mrf.mxu1  ;;  %v2716_v31 = vshrl.u32 %v9866_v6, 16  ;;  %v7793_v9 = vld [vmem:[#allocation2 + $0x290] ss:$8 sps:$4 sm:$0xff]   ;;  %v7804_v29 = vld [vmem:[#allocation2 + $0x384] ss:$8 sps:$4 sm:$0xff]   ;;  %v10661_v41 = vshrl.u32 %v9684_v48, 16 }
 0x162   :  { %3229 = vmatprep.subr.bf16.mxu1 %v7744_v18  ;;  %v9840_v58 = vadd.f32 %v708_v47, %v656_v16  ;;  %v7763_v18 = vld [vmem:[#allocation2 + $0x2e0] ss:$8 sps:$4 sm:$0xff]   ;;  %5564 = vst [vmem:[%s10573_s12 + $0x10] sm:$0xff] %v7238_v52  ;;  %v10591_v16 = vshrl.u32 %v9861_v60, 16  ;;  %v7789_v47 = vld [vmem:[#allocation2 + $0x2a4] ss:$8 sps:$4 sm:$0xff]  }
 0x163   :  { %v7792_v52 = vld [vmem:[#allocation2 + $0x3a4] ss:$8 sps:$4 sm:$0xff]   ;;  %v4322_v33 = vrot.slane %v10661_v41, 5 }
 0x164   :  { %3177 = vmatpush1.bf16.msra.mxu0 %v7739_v35  ;;  %10648 = vst [vmem:[#allocation28_spill] sm:$0xff] %v9840_v58  ;;  %v7766_v35 = vld [vmem:[#allocation2 + $0x3e0] ss:$8 sps:$4 sm:$0xff]  }
 0x165   :  { %3230 = vmatpush1.bf16.msra.mxu1 %v7742_v24  ;;  %3178 = vmatprep.subr.bf16.mxu0 %v7747_v50  ;;  %v10580_v24 = vmax.f32 %v9840_v58, 0.0  ;;  %v7771_v50 = vld [vmem:[#allocation2 + $0x2d4] ss:$8 sps:$4 sm:$0xff]  }
 0x166   :  { %3231 = vmatprep.subr.bf16.mxu1 %v7750_v61  ;;  %v7774_v61 = vld [vmem:[#allocation2 + $0x3d4] ss:$8 sps:$4 sm:$0xff]  }
 0x167   :  { %v7239_v30 = vpack.c.bf16 %v10580_v24, %v10581_v40 }
 0x168   :  { %3179 = vmatpush1.bf16.msra.mxu0 %v7745_v15  ;;  %v7769_v15 = vld [vmem:[#allocation2 + $0x2d0] ss:$8 sps:$4 sm:$0xff]  }
 0x169   :  { %3232 = vmatpush1.bf16.msra.mxu1 %v7748_v19  ;;  %3180 = vmatprep.subr.bf16.mxu0 %v7753_v56  ;;  %v7772_v19 = vld [vmem:[#allocation2 + $0x3d0] ss:$8 sps:$4 sm:$0xff]   ;;  %5565 = vst [vmem:[%s10573_s12 + $0x18] sm:$0xff] %v7239_v30  ;;  %v7780_v56 = vld [vmem:[#allocation2 + $0x3c4] ss:$8 sps:$4 sm:$0xff]   ;;  %v2713_v30 = vrot.slane %v10590_v51, 5 }
 0x16a   :  { %3233 = vmatprep.subr.bf16.mxu1 %v7756_v12  ;;  %v7775_v12 = vld [vmem:[#allocation2 + $0x2c0] ss:$8 sps:$4 sm:$0xff]  }
 0x16b   :  { %v7990_v51 = vld [vmem:[#allocation2 + $0x5a0] ss:$8 sps:$4 sm:$0xff]  }
 0x16c   :  { %3181 = vmatpush1.bf16.msra.mxu0 %v7751_v7  ;;  %v9871_v7 = vld [vmem:[%s10564_s3 + $0x48] sm:$0xff] }
 0x16d   :  { %3234 = vmatpush1.bf16.msra.mxu1 %v7754_v5  ;;  %3182 = vmatprep.subr.bf16.mxu0 %v7759_v20  ;;  %10650 = vst [vmem:[#allocation30_spill] sm:$0xff] %v9871_v7  ;;  %v7783_v5 = vld [vmem:[#allocation2 + $0x2b4] ss:$8 sps:$4 sm:$0xff]   ;;  %v7781_v20 = vld [vmem:[#allocation2 + $0x2b0] ss:$8 sps:$4 sm:$0xff]  }
 0x16e   :  { %3235 = vmatprep.subr.bf16.mxu1 %v7762_v45  ;;  %v2702_v45 = vshrl.u32 %v9856_v0, 16 }
 0x170   :  { %3183 = vmatpush2.bf16.msra.mxu0 %v7757_v37  ;;  %v2719_v37 = vshll.u32 %v9866_v6, 16 }
 0x171   :  { %3236 = vmatpush2.bf16.msra.mxu1 %v7760_v23  ;;  %3184 = vmatprep.subr.bf16.mxu0 %v7765_v46  ;;  %v10588_v23 = vshll.u32 %v9871_v7, 16  ;;  %v10589_v46 = vshrl.u32 %v9871_v7, 16 }
 0x172   :  { %3237 = vmatprep.subr.bf16.mxu1 %v7768_v8  ;;  %v7784_v8 = vld [vmem:[#allocation2 + $0x3b0] ss:$8 sps:$4 sm:$0xff]  }
 0x174   :  { %3185 = vmatpush2.bf16.msra.mxu0 %v7763_v18  ;;  %v2651_v18 = vld [vmem:[%s10564_s3 + $0x50] sm:$0x11] }
 0x175   :  { %3238 = vmatpush2.bf16.msra.mxu1 %v7766_v35  ;;  %3186 = vmatprep.subr.bf16.mxu0 %v7771_v50  ;;  %v7787_v35 = vld [vmem:[#allocation2 + $0x2a0] ss:$8 sps:$4 sm:$0xff]   ;;  %v2704_v50 = vrot.slane %v2702_v45, 4  ;;  %v7798_v45 = vld [vmem:[#allocation2 + $0x394] ss:$8 sps:$4 sm:$0xff]  }
 0x176   :  { %3239 = vmatprep.subr.bf16.mxu1 %v7774_v61  ;;  %v2707_v61 = vrot.slane %v2705_v26, 5 }
 0x178   :  { %3187 = vmatpush2.bf16.msra.mxu0 %v7769_v15  ;;  %v2731_v15 = vrot.slane %v10591_v16, 4  ;;  %v2708_v26 = vor.u32 %v2707_v61, %v2704_v50  ;;  %v7802_v50 = vld [vmem:[#allocation2 + $0x380] ss:$8 sps:$4 sm:$0xff]   ;;  %v7810_v61 = vld [vmem:[#allocation2 + $0x174] ss:$8 sps:$4 sm:$0xff]  }
 0x179   :  { %3240 = vmatpush2.bf16.msra.mxu1 %v7772_v19  ;;  %3188 = vmatprep.subr.bf16.mxu0 %v7777_v43  ;;  %v2718_v19 = vrot.slane %v2716_v31, 4  ;;  %v2721_v43 = vrot.slane %v2719_v37, 5  ;;  %v2735_v31 = vshll.u32 %v2651_v18, 16  ;;  %v7799_v18 = vld [vmem:[#allocation2 + $0x280] ss:$8 sps:$4 sm:$0xff]  }
 0x17a   :  { %3241 = vmatprep.subr.bf16.mxu1 %v7780_v56  ;;  %v2727_v56 = vrot.slane %v10588_v23, 5  ;;  %v2732_v37 = vor.u32 %v2731_v15, %v2713_v30  ;;  %v2709_v42 = vrot.slane %v2708_v26, 4  ;;  %v6804_v15 = vcombine.low %v9764_v2, %v9768_v21  ;;  %v7813_v2 = vld [vmem:[#allocation2 + $0x64] ss:$8 sps:$4 sm:$0xff]  }
 0x17b   :  { %v2722_v53 = vor.u32 %v2721_v43, %v2718_v19  ;;  %v2737_v22 = vrot.slane %v2735_v31, 5  ;;  %v6806_v19 = vcombine.low %v9772_v63, %v9785_v57  ;;  %v7816_v21 = vld [vmem:[#allocation2 + $0x164] ss:$8 sps:$4 sm:$0xff]   ;;  %v6879_v26 = vcombine.high %v9689_v49, %v9697_v54  ;;  %v7826_v31 = vld [vmem:[#allocation2 + $0x140] ss:$8 sps:$4 sm:$0xff]  }
 0x17c   :  { %3189 = vmatpush2.bf16.msra.mxu0 %v7775_v12  ;;  %v2741_v12 = vrot.slane %v10589_v46, 4  ;;  %v2714_v43 = vsel %vm9184_vm5, %v2709_v42, %v2713_v30  ;;  %v7814_v42 = vld [vmem:[#allocation2 + $0x160] ss:$8 sps:$4 sm:$0xff]  }
 0x17d   :  { %3242 = vmatpush2.bf16.msra.mxu1 %v7778_v1  ;;  %3190 = vmatprep.subr.bf16.mxu0 %v7783_v5  ;;  %v7790_v1 = vld [vmem:[#allocation2 + $0x3a0] ss:$8 sps:$4 sm:$0xff]   ;;  %v2652_v5 = vld [vmem:[%s10564_s3 + $0x58] sm:$0x11] }
 0x17e   :  { %3243 = vmatprep.subr.bf16.mxu1 %v7786_v25  ;;  %v7795_v25 = vld [vmem:[#allocation2 + $0x294] ss:$8 sps:$4 sm:$0xff]   ;;  %v2742_v24 = vor.u32 %v2741_v12, %v2727_v56  ;;  %v2745_v40 = vshll.u32 %v2652_v5, 16  ;;  %v7820_v12 = vld [vmem:[#allocation2 + $0x150] ss:$8 sps:$4 sm:$0xff]  }
 0x17f   :  { %v7828_v5 = vld [vmem:[#allocation2 + $0x144] ss:$8 sps:$4 sm:$0xff]   ;;  %v7838_v49 = vld [vmem:[#allocation2 + $0x120] ss:$8 sps:$4 sm:$0xff]  }
 0x180   :  { %3191 = vmatpush2.bf16.msra.mxu0 %v7781_v20  ;;  %v7796_v20 = vld [vmem:[#allocation2 + $0x390] ss:$8 sps:$4 sm:$0xff]   ;;  %v2743_v27 = vrot.slane %v2742_v24, 4  ;;  %v2747_v3 = vrot.slane %v2745_v40, 5 }
 0x181   :  { %3244 = vmatpush2.bf16.msra.mxu1 %v7784_v8  ;;  %3192 = vmatprep.subr.bf16.mxu0 %v7789_v47  ;;  %v7801_v8 = vld [vmem:[#allocation2 + $0x284] ss:$8 sps:$4 sm:$0xff]   ;;  %v2733_v47 = vrot.slane %v2732_v37, 4  ;;  %v7805_v40 = vld [vmem:[#allocation2 + $0x70] ss:$8 sps:$4 sm:$0xff]  }
 0x182   :  { %3245 = vmatprep.subr.bf16.mxu1 %v7792_v52  ;;  %v2723_v52 = vrot.slane %v2722_v53, 4  ;;  %v7808_v24 = vld [vmem:[#allocation2 + $0x170] ss:$8 sps:$4 sm:$0xff]   ;;  %v7831_v37 = vld [vmem:[#allocation2 + $0x34] ss:$8 sps:$4 sm:$0xff]  }
 0x183   :  { %v2738_v53 = vsel %vm9184_vm5, %v2733_v47, %v2737_v22  ;;  %v7811_v22 = vld [vmem:[#allocation2 + $0x60] ss:$8 sps:$4 sm:$0xff]   ;;  %v7832_v47 = vld [vmem:[#allocation2 + $0x130] ss:$8 sps:$4 sm:$0xff]  }
 0x184   :  { %3193 = vmatpush2.bf16.msra.mxu0 %v7787_v35  ;;  %v7807_v35 = vld [vmem:[#allocation2 + $0x74] ss:$8 sps:$4 sm:$0xff]   ;;  %v6809_v63 = vcombine.high %v2714_v43, %v2738_v53 }
 0x185   :  { %3246 = vmatpush2.bf16.msra.mxu1 %v7790_v1  ;;  %3194 = vmatprep.subr.bf16.mxu0 %v7795_v25  ;;  %v7825_v1 = vld [vmem:[#allocation2 + $0x44] ss:$8 sps:$4 sm:$0xff]   ;;  %v7823_v25 = vld [vmem:[#allocation2 + $0x40] ss:$8 sps:$4 sm:$0xff]  }
 0x186   :  { %3247 = vmatprep.subr.bf16.mxu1 %v7798_v45  ;;  %v6877_v45 = vcombine.high %v9673_v36, %v9684_v48  ;;  %v7835_v36 = vld [vmem:[#allocation2 + $0x20] ss:$8 sps:$4 sm:$0xff]  }
 0x188   :  { %3195 = vmatpush2.bf16.msra.mxu0 %v7793_v9  ;;  %v2728_v9 = vsel %vm9184_vm5, %v2723_v52, %v2727_v56  ;;  %v7817_v56 = vld [vmem:[#allocation2 + $0x50] ss:$8 sps:$4 sm:$0xff]   ;;  %v7837_v52 = vld [vmem:[#allocation2 + $0x24] ss:$8 sps:$4 sm:$0xff]  }
 0x189   :  { %3248 = vmatpush2.bf16.msra.mxu1 %v7796_v20  ;;  %3196 = vmatprep.subr.bf16.mxu0 %v7801_v8  ;;  %v7834_v20 = vld [vmem:[#allocation2 + $0x134] ss:$8 sps:$4 sm:$0xff]   ;;  %v7829_v8 = vld [vmem:[#allocation2 + $0x30] ss:$8 sps:$4 sm:$0xff]  }
 0x18a   :  { %3249 = vmatprep.subr.bf16.mxu1 %v7804_v29  ;;  %v2748_v29 = vsel %vm9184_vm5, %v2743_v27, %v2747_v3  ;;  %v7822_v3 = vld [vmem:[#allocation2 + $0x154] ss:$8 sps:$4 sm:$0xff]   ;;  %v6808_v27 = vcombine.low %v2714_v43, %v2738_v53  ;;  %v7852_v43 = vld [vmem:[#allocation2 + $0x104] ss:$8 sps:$4 sm:$0xff]   ;;  %v7847_v53 = vld [vmem:[#allocation2] ss:$8 sps:$4 sm:$0xff]  }
 0x18b   :  { %v6811_v57 = vcombine.high %v2728_v9, %v2748_v29  ;;  %v6810_v30 = vcombine.low %v2728_v9, %v2748_v29  ;;  %v7850_v9 = vld [vmem:[#allocation2 + $0x100] ss:$8 sps:$4 sm:$0xff]   ;;  %v7855_v29 = vld [vmem:[#allocation2 + $0xf4] ss:$8 sps:$4 sm:$0xff]  }
 0x18c   :  { %3197 = vmatpush2.bf16.msra.mxu0 %v7799_v18  ;;  %v7840_v18 = vld [vmem:[#allocation2 + $0x124] ss:$8 sps:$4 sm:$0xff]  }
 0x18d   :  { %3250 = vmatpush2.bf16.msra.mxu1 %v7802_v50  ;;  %3632 = vmatprep.subr.bf16.mxu0 %v7807_v35  ;;  %v7843_v50 = vld [vmem:[#allocation2 + $0x14] ss:$8 sps:$4 sm:$0xff]  }
 0x18e   :  { %3685 = vmatprep.subr.bf16.mxu1 %v7810_v61  ;;  %v7846_v35 = vld [vmem:[#allocation2 + $0x114] ss:$8 sps:$4 sm:$0xff]   ;;  %v7841_v61 = vld [vmem:[#allocation2 + $0x10] ss:$8 sps:$4 sm:$0xff]  }
 0x18f   :  { %3199 = vmatmul.mubr.bf16.vlgmr.msra.gmra.mxu0 %v6804_v15  ;;  %v7844_v15 = vld [vmem:[#allocation2 + $0x110] ss:$8 sps:$4 sm:$0xff]  }
 0x190   :  { %3252 = vmatmul.mubr.bf16.vlgmr.msra.gmra.mxu1 %v6806_v19  ;;  %3633 = vmatpush1.bf16.msra.mxu0 %v7805_v40  ;;  %v7849_v19 = vld [vmem:[#allocation2 + $0x4] ss:$8 sps:$4 sm:$0xff]   ;;  %v7858_v40 = vld [vmem:[#allocation2 + $0x1f4] ss:$8 sps:$4 sm:$0xff]  }
 0x191   :  { %3686 = vmatpush1.bf16.msra.mxu1 %v7808_v24  ;;  %3634 = vmatprep.subr.bf16.mxu0 %v7813_v2  ;;  %v7853_v24 = vld [vmem:[#allocation2 + $0xf0] ss:$8 sps:$4 sm:$0xff]  }
 0x192   :  { %3687 = vmatprep.subr.bf16.mxu1 %v7816_v21  ;;  %3208 = vmatprep.mubr.bf16.mxu0 %v6809_v63  ;;  %v7856_v2 = vld [vmem:[#allocation2 + $0x1f0] ss:$8 sps:$4 sm:$0xff]   ;;  %v7861_v21 = vld [vmem:[#allocation2 + $0xe4] ss:$8 sps:$4 sm:$0xff]  }
 0x193   :  { %3261 = vmatprep.mubr.bf16.mxu1 %v6811_v57  ;;  %v7864_v63 = vld [vmem:[#allocation2 + $0x1e4] ss:$8 sps:$4 sm:$0xff]   ;;  %v7859_v57 = vld [vmem:[#allocation2 + $0xe0] ss:$8 sps:$4 sm:$0xff]  }
 0x194   :  { %3635 = vmatpush1.bf16.msra.mxu0 %v7811_v22  ;;  %v7862_v22 = vld [vmem:[#allocation2 + $0x1e0] ss:$8 sps:$4 sm:$0xff]  }
 0x195   :  { %3688 = vmatpush1.bf16.msra.mxu1 %v7814_v42  ;;  %3636 = vmatprep.subr.bf16.mxu0 %v7819_v13  ;;  %v7867_v42 = vld [vmem:[#allocation2 + $0xd4] ss:$8 sps:$4 sm:$0xff]  }
 0x196   :  { %3689 = vmatprep.subr.bf16.mxu1 %v7822_v3  ;;  %v7870_v13 = vld [vmem:[#allocation2 + $0x1d4] ss:$8 sps:$4 sm:$0xff]   ;;  %v7865_v3 = vld [vmem:[#allocation2 + $0xd0] ss:$8 sps:$4 sm:$0xff]  }
 0x197   :  { %3209 = vmatmul.mubr.bf16.gmra.mxu0 %v6808_v27  ;;  %v7868_v27 = vld [vmem:[#allocation2 + $0x1d0] ss:$8 sps:$4 sm:$0xff]  }
 0x198   :  { %3262 = vmatmul.mubr.bf16.gmra.mxu1 %v6810_v30  ;;  %3637 = vmatpush1.bf16.msra.mxu0 %v7817_v56  ;;  %v7873_v30 = vld [vmem:[#allocation2 + $0xc4] ss:$8 sps:$4 sm:$0xff]  }
 0x199   :  { %3690 = vmatpush1.bf16.msra.mxu1 %v7820_v12  ;;  %3638 = vmatprep.subr.bf16.mxu0 %v7825_v1  ;;  %v7876_v56 = vld [vmem:[#allocation2 + $0x1c4] ss:$8 sps:$4 sm:$0xff]   ;;  %v7871_v12 = vld [vmem:[#allocation2 + $0xc0] ss:$8 sps:$4 sm:$0xff]  }
 0x19a   :  { %3691 = vmatprep.subr.bf16.mxu1 %v7828_v5  ;;  %3664 = vmatprep.mubr.bf16.mxu0 %v6877_v45  ;;  %v7874_v1 = vld [vmem:[#allocation2 + $0x1c0] ss:$8 sps:$4 sm:$0xff]   ;;  %v7879_v5 = vld [vmem:[#allocation2 + $0xb4] ss:$8 sps:$4 sm:$0xff]   ;;  %v7877_v45 = vld [vmem:[#allocation2 + $0xb0] ss:$8 sps:$4 sm:$0xff]  }
 0x19b   :  { %3717 = vmatprep.mubr.bf16.mxu1 %v6879_v26  ;;  %v7880_v26 = vld [vmem:[#allocation2 + $0x1b0] ss:$8 sps:$4 sm:$0xff]  }
 0x19c   :  { %3639 = vmatpush1.bf16.msra.mxu0 %v7823_v25  ;;  %v7882_v25 = vld [vmem:[#allocation2 + $0x1b4] ss:$8 sps:$4 sm:$0xff]  }
 0x19d   :  { %3692 = vmatpush1.bf16.msra.mxu1 %v7826_v31  ;;  %3640 = vmatprep.subr.bf16.mxu0 %v7831_v37  ;;  %v7885_v31 = vld [vmem:[#allocation2 + $0xa4] ss:$8 sps:$4 sm:$0xff]  }
 0x19e   :  { %3693 = vmatprep.subr.bf16.mxu1 %v7834_v20  ;;  %v7888_v37 = vld [vmem:[#allocation2 + $0x1a4] ss:$8 sps:$4 sm:$0xff]   ;;  %v7883_v20 = vld [vmem:[#allocation2 + $0xa0] ss:$8 sps:$4 sm:$0xff]  }
 0x1a0   :  { %3641 = vmatpush1.bf16.msra.mxu0 %v7829_v8  ;;  %v7886_v8 = vld [vmem:[#allocation2 + $0x1a0] ss:$8 sps:$4 sm:$0xff]  }
 0x1a1   :  { %3694 = vmatpush1.bf16.msra.mxu1 %v7832_v47  ;;  %3642 = vmatprep.subr.bf16.mxu0 %v7837_v52  ;;  %v7891_v47 = vld [vmem:[#allocation2 + $0x94] ss:$8 sps:$4 sm:$0xff]  }
 0x1a2   :  { %3695 = vmatprep.subr.bf16.mxu1 %v7840_v18  ;;  %v7894_v52 = vld [vmem:[#allocation2 + $0x194] ss:$8 sps:$4 sm:$0xff]   ;;  %v7889_v18 = vld [vmem:[#allocation2 + $0x90] ss:$8 sps:$4 sm:$0xff]  }
 0x1a4   :  { %3643 = vmatpush1.bf16.msra.mxu0 %v7835_v36  ;;  %v7892_v36 = vld [vmem:[#allocation2 + $0x190] ss:$8 sps:$4 sm:$0xff]  }
 0x1a5   :  { %3696 = vmatpush1.bf16.msra.mxu1 %v7838_v49  ;;  %3644 = vmatprep.subr.bf16.mxu0 %v7843_v50  ;;  %v7897_v49 = vld [vmem:[#allocation2 + $0x84] ss:$8 sps:$4 sm:$0xff]  }
 0x1a6   :  { %3697 = vmatprep.subr.bf16.mxu1 %v7846_v35  ;;  %v7900_v50 = vld [vmem:[#allocation2 + $0x184] ss:$8 sps:$4 sm:$0xff]   ;;  %v7895_v35 = vld [vmem:[#allocation2 + $0x80] ss:$8 sps:$4 sm:$0xff]  }
 0x1a8   :  { %3645 = vmatpush1.bf16.msra.mxu0 %v7841_v61  ;;  %v7898_v61 = vld [vmem:[#allocation2 + $0x180] ss:$8 sps:$4 sm:$0xff]  }
 0x1a9   :  { %3698 = vmatpush1.bf16.msra.mxu1 %v7844_v15  ;;  %3646 = vmatprep.subr.bf16.mxu0 %v7849_v19  ;;  %v7907_v15 = vld [vmem:[#allocation2 + $0x474] ss:$8 sps:$4 sm:$0xff]  }
 0x1aa   :  { %3699 = vmatprep.subr.bf16.mxu1 %v7852_v43  ;;  %v7910_v19 = vld [vmem:[#allocation2 + $0x574] ss:$8 sps:$4 sm:$0xff]   ;;  %v7905_v43 = vld [vmem:[#allocation2 + $0x470] ss:$8 sps:$4 sm:$0xff]  }
 0x1ac   :  { %3647 = vmatpush1.bf16.msra.mxu0 %v7847_v53  ;;  %v7908_v53 = vld [vmem:[#allocation2 + $0x570] ss:$8 sps:$4 sm:$0xff]  }
 0x1ad   :  { %3700 = vmatpush1.bf16.msra.mxu1 %v7850_v9  ;;  %3648 = vmatprep.subr.bf16.mxu0 %v7855_v29  ;;  %v9914_v9 = vld [vmem:[%s10564_s3] sm:$0xee]  ;;  %v8277_v29 = vld [vmem:[%s10564_s3 + $0x10] sm:$0xff] }
 0x1ae   :  { %3701 = vmatprep.subr.bf16.mxu1 %v7858_v40  ;;  %v3752_v40 = vrot.slane %v8277_v29, 5  ;;  %v4314_v46 = vshrl.u32 %v9914_v9, 16 }
 0x1b0   :  { %3649 = vmatpush2.bf16.msra.mxu0 %v7853_v24  ;;  %v9922_v24 = vld [vmem:[%s10564_s3 + $0x8] sm:$0xee]  ;;  %v4316_v55 = vrot.slane %v4314_v46, 5  ;;  %v10664_v46 = vshrl.u32 %v9697_v54, 16 }
 0x1b1   :  { %3702 = vmatpush2.bf16.msra.mxu1 %v7856_v2  ;;  %3650 = vmatprep.subr.bf16.mxu0 %v7861_v21  ;;  %v8278_v2 = vld [vmem:[%s10564_s3] sm:$0xff]  ;;  %v4327_v62 = vshrl.u32 %v9922_v24, 16 }
 0x1b2   :  { %3703 = vmatprep.subr.bf16.mxu1 %v7864_v63  ;;  %v6876_v21 = vcombine.low %v8278_v2, %v8277_v29  ;;  %v8279_v63 = vld [vmem:[%s10564_s3 + $0x8] sm:$0xff]  ;;  %v9971_v29 = vpop.f32.mrf.mxu1 }
 0x1b3   :  { %v7930_v2 = vld [vmem:[#allocation2 + $0x540] ss:$8 sps:$4 sm:$0xff]  }
 0x1b4   :  { %3651 = vmatpush2.bf16.msra.mxu0 %v7859_v57  ;;  %v8280_v57 = vld [vmem:[%s10564_s3 + $0x18] sm:$0xff] }
 0x1b5   :  { %3704 = vmatpush2.bf16.msra.mxu1 %v7862_v22  ;;  %3652 = vmatprep.subr.bf16.mxu0 %v7867_v42  ;;  %v6878_v22 = vcombine.low %v8279_v63, %v8280_v57  ;;  %v3756_v42 = vrot.slane %v8280_v57, 5  ;;  %v7935_v63 = vld [vmem:[#allocation2 + $0x434] ss:$8 sps:$4 sm:$0xff]  }
 0x1b6   :  { %3705 = vmatprep.subr.bf16.mxu1 %v7870_v13  ;;  %v7913_v13 = vld [vmem:[#allocation2 + $0x464] ss:$8 sps:$4 sm:$0xff]   ;;  %v7938_v57 = vld [vmem:[#allocation2 + $0x534] ss:$8 sps:$4 sm:$0xff]  }
 0x1b8   :  { %3653 = vmatpush2.bf16.msra.mxu0 %v7865_v3  ;;  %v7916_v3 = vld [vmem:[#allocation2 + $0x564] ss:$8 sps:$4 sm:$0xff]  }
 0x1b9   :  { %3706 = vmatpush2.bf16.msra.mxu1 %v7868_v27  ;;  %3654 = vmatprep.subr.bf16.mxu0 %v7873_v30  ;;  %v7911_v27 = vld [vmem:[#allocation2 + $0x460] ss:$8 sps:$4 sm:$0xff]  }
 0x1ba   :  { %3707 = vmatprep.subr.bf16.mxu1 %v7876_v56  ;;  %v7914_v30 = vld [vmem:[#allocation2 + $0x560] ss:$8 sps:$4 sm:$0xff]   ;;  %v6881_v56 = vcombine.high %v9856_v0, %v9861_v60 }
 0x1bc   :  { %3655 = vmatpush2.bf16.msra.mxu0 %v7871_v12  ;;  %v6883_v12 = vcombine.high %v9866_v6, %v9871_v7 }
 0x1bd   :  { %3708 = vmatpush2.bf16.msra.mxu1 %v7874_v1  ;;  %3656 = vmatprep.subr.bf16.mxu0 %v7879_v5  ;;  %v3758_v1 = vrot.slane %v3752_v40, 4  ;;  %v8281_v5 = vld [vmem:[%s10564_s3 + $0x20] sm:$0x11] }
 0x1be   :  { %3709 = vmatprep.subr.bf16.mxu1 %v7882_v25  ;;  %v3759_v25 = vrot.slane %v8281_v5, 5 }
 0x1c0   :  { %3657 = vmatpush2.bf16.msra.mxu0 %v7877_v45  ;;  %v7921_v45 = vld [vmem:[#allocation2 + $0x454] ss:$8 sps:$4 sm:$0xff]  }
 0x1c1   :  { %3710 = vmatpush2.bf16.msra.mxu1 %v7880_v26  ;;  %3658 = vmatprep.subr.bf16.mxu0 %v7885_v31  ;;  %v6948_v26 = vrot.slane %v9914_v9, 9  ;;  %v6949_v31 = vrot.slane %v9922_v24, 9 }
 0x1c2   :  { %3711 = vmatprep.subr.bf16.mxu1 %v7888_v37  ;;  %v3761_v37 = vrot.slane %v3756_v42, 4 }
 0x1c4   :  { %3659 = vmatpush2.bf16.msra.mxu0 %v7883_v20  ;;  %v8282_v20 = vld [vmem:[%s10564_s3 + $0x28] sm:$0x11] }
 0x1c5   :  { %3712 = vmatpush2.bf16.msra.mxu1 %v7886_v8  ;;  %3660 = vmatprep.subr.bf16.mxu0 %v7891_v47  ;;  %v3762_v8 = vrot.slane %v8282_v20, 5  ;;  %v7924_v47 = vld [vmem:[#allocation2 + $0x554] ss:$8 sps:$4 sm:$0xff]   ;;  %v7948_v20 = vld [vmem:[#allocation2 + $0x510] ss:$8 sps:$4 sm:$0xff]  }
 0x1c6   :  { %3713 = vmatprep.subr.bf16.mxu1 %v7894_v52  ;;  %v6880_v52 = vcombine.low %v9856_v0, %v9861_v60 }
 0x1c7   :  { %v9963_v0 = vsel %vm8690_vm2, %v3761_v37, %v3762_v8  ;;  %v7945_v37 = vld [vmem:[#allocation2 + $0x410] ss:$8 sps:$4 sm:$0xff]  }
 0x1c8   :  { %3661 = vmatpush2.bf16.msra.mxu0 %v7889_v18  ;;  %v7919_v18 = vld [vmem:[#allocation2 + $0x450] ss:$8 sps:$4 sm:$0xff]  }
 0x1c9   :  { %3714 = vmatpush2.bf16.msra.mxu1 %v7892_v36  ;;  %3662 = vmatprep.subr.bf16.mxu0 %v7897_v49  ;;  %v6882_v36 = vcombine.low %v9866_v6, %v9871_v7  ;;  %v7922_v49 = vld [vmem:[#allocation2 + $0x550] ss:$8 sps:$4 sm:$0xff]   ;;  %v9965_v6 = vpop.f32.mrf.mxu0 }
 0x1ca   :  { %3715 = vmatprep.subr.bf16.mxu1 %v7900_v50  ;;  %v7929_v50 = vld [vmem:[#allocation2 + $0x444] ss:$8 sps:$4 sm:$0xff]  }
 0x1cc   :  { %3663 = vmatpush2.bf16.msra.mxu0 %v7895_v35  ;;  %v7932_v35 = vld [vmem:[#allocation2 + $0x544] ss:$8 sps:$4 sm:$0xff]  }
 0x1cd   :  { %3716 = vmatpush2.bf16.msra.mxu1 %v7898_v61  ;;  %4195 = vmatprep.subr.bf16.mxu0 %v7907_v15  ;;  %v9951_v61 = vsel %vm8690_vm2, %v6948_v26, %v3752_v40  ;;  %v9955_v15 = vsel %vm8690_vm2, %v3758_v1, %v3759_v25  ;;  %v7927_v40 = vld [vmem:[#allocation2 + $0x440] ss:$8 sps:$4 sm:$0xff]   ;;  %v7947_v25 = vld [vmem:[#allocation2 + $0x414] ss:$8 sps:$4 sm:$0xff]  }
 0x1ce   :  { %4248 = vmatprep.subr.bf16.mxu1 %v7910_v19  ;;  %v9959_v19 = vsel %vm8690_vm2, %v6949_v31, %v3756_v42  ;;  %v7933_v42 = vld [vmem:[#allocation2 + $0x430] ss:$8 sps:$4 sm:$0xff]   ;;  %v7942_v1 = vld [vmem:[#allocation2 + $0x520] ss:$8 sps:$4 sm:$0xff]  }
 0x1cf   :  { %3665 = vmatmul.mubr.bf16.vlgmr.msra.gmra.mxu0 %v6876_v21  ;;  %v9973_v21 = vpop.f32.mrf.mxu0 }
 0x1d0   :  { %3718 = vmatmul.mubr.bf16.vlgmr.msra.gmra.mxu1 %v6878_v22  ;;  %4196 = vmatpush1.bf16.msra.mxu0 %v7905_v43  ;;  %v6953_v43 = vcombine.high %v9951_v61, %v9955_v15  ;;  %v9975_v22 = vpop.f32.mrf.mxu1 }
 0x1d1   :  { %4249 = vmatpush1.bf16.msra.mxu1 %v7908_v53  ;;  %4197 = vmatprep.subr.bf16.mxu0 %v7913_v13  ;;  %v6955_v53 = vcombine.high %v9959_v19, %v9963_v0  ;;  %v7936_v13 = vld [vmem:[#allocation2 + $0x530] ss:$8 sps:$4 sm:$0xff]  }
 0x1d2   :  { %4250 = vmatprep.subr.bf16.mxu1 %v7916_v3  ;;  %3674 = vmatprep.mubr.bf16.mxu0 %v6881_v56  ;;  %v9977_v3 = vpop.f32.mrf.mxu0  ;;  %v9979_v56 = vpop.f32.mrf.mxu1 }
 0x1d3   :  { %3727 = vmatprep.mubr.bf16.mxu1 %v6883_v12  ;;  %v7939_v12 = vld [vmem:[#allocation2 + $0x420] ss:$8 sps:$4 sm:$0xff]  }
 0x1d4   :  { %4198 = vmatpush1.bf16.msra.mxu0 %v7911_v27  ;;  %v7941_v27 = vld [vmem:[#allocation2 + $0x424] ss:$8 sps:$4 sm:$0xff]   ;;  %v9981_v5 = vpop.f32.mrf.mxu0  ;;  %v9983_v26 = vpop.f32.mrf.mxu1 }
 0x1d5   :  { %4251 = vmatpush1.bf16.msra.mxu1 %v7914_v30  ;;  %4199 = vmatprep.subr.bf16.mxu0 %v7921_v45  ;;  %v7944_v30 = vld [vmem:[#allocation2 + $0x524] ss:$8 sps:$4 sm:$0xff]   ;;  %v7950_v45 = vld [vmem:[#allocation2 + $0x514] ss:$8 sps:$4 sm:$0xff]  }
 0x1d6   :  { %4252 = vmatprep.subr.bf16.mxu1 %v7924_v47  ;;  %v9985_v31 = vpop.f32.mrf.mxu0  ;;  %v9987_v8 = vpop.f32.mrf.mxu1  ;;  %v7953_v47 = vld [vmem:[#allocation2 + $0x404] ss:$8 sps:$4 sm:$0xff]  }
 0x1d7   :  { %3675 = vmatmul.mubr.bf16.gmra.mxu0 %v6880_v52  ;;  %v7956_v52 = vld [vmem:[#allocation2 + $0x504] ss:$8 sps:$4 sm:$0xff]  }
 0x1d8   :  { %3728 = vmatmul.mubr.bf16.gmra.mxu1 %v6882_v36  ;;  %4200 = vmatpush1.bf16.msra.mxu0 %v7919_v18  ;;  %v9989_v18 = vpop.f32.mrf.mxu0  ;;  %v7951_v36 = vld [vmem:[#allocation2 + $0x400] ss:$8 sps:$4 sm:$0xff]  }
 0x1d9   :  { %4253 = vmatpush1.bf16.msra.mxu1 %v7922_v49  ;;  %4201 = vmatprep.subr.bf16.mxu0 %v7929_v50  ;;  %v7954_v49 = vld [vmem:[#allocation2 + $0x500] ss:$8 sps:$4 sm:$0xff]   ;;  %v9991_v50 = vpop.f32.mrf.mxu1 }
 0x1da   :  { %4254 = vmatprep.subr.bf16.mxu1 %v7932_v35  ;;  %4227 = vmatprep.mubr.bf16.mxu0 %v6953_v43  ;;  %v7959_v35 = vld [vmem:[#allocation2 + $0x4f4] ss:$8 sps:$4 sm:$0xff]  }
 0x1db   :  { %4280 = vmatprep.mubr.bf16.mxu1 %v6955_v53  ;;  %v7962_v43 = vld [vmem:[#allocation2 + $0x5f4] ss:$8 sps:$4 sm:$0xff]   ;;  %v9993_v53 = vpop.f32.mrf.mxu0 }
 0x1dc   :  { %4202 = vmatpush1.bf16.msra.mxu0 %v7927_v40  ;;  %v7957_v40 = vld [vmem:[#allocation2 + $0x4f0] ss:$8 sps:$4 sm:$0xff]  }
 0x1dd   :  { %4255 = vmatpush1.bf16.msra.mxu1 %v7930_v2  ;;  %4203 = vmatprep.subr.bf16.mxu0 %v7935_v63  ;;  %v7960_v2 = vld [vmem:[#allocation2 + $0x5f0] ss:$8 sps:$4 sm:$0xff]   ;;  %v9995_v63 = vpop.f32.mrf.mxu1 }
 0x1de   :  { %4256 = vmatprep.subr.bf16.mxu1 %v7938_v57  ;;  %v7965_v57 = vld [vmem:[#allocation2 + $0x4e4] ss:$8 sps:$4 sm:$0xff]  }
 0x1e0   :  { %4204 = vmatpush1.bf16.msra.mxu0 %v7933_v42  ;;  %v7968_v42 = vld [vmem:[#allocation2 + $0x5e4] ss:$8 sps:$4 sm:$0xff]  }
 0x1e1   :  { %4257 = vmatpush1.bf16.msra.mxu1 %v7936_v13  ;;  %4205 = vmatprep.subr.bf16.mxu0 %v7941_v27  ;;  %v9997_v13 = vpop.f32.mrf.mxu0  ;;  %v7963_v27 = vld [vmem:[#allocation2 + $0x4e0] ss:$8 sps:$4 sm:$0xff]  }
 0x1e2   :  { %4258 = vmatprep.subr.bf16.mxu1 %v7944_v30  ;;  %10651 = vst [vmem:[#allocation31_spill] sm:$0xff] %v9997_v13  ;;  %v7966_v30 = vld [vmem:[#allocation2 + $0x5e0] ss:$8 sps:$4 sm:$0xff]  }
 0x1e4   :  { %4206 = vmatpush1.bf16.msra.mxu0 %v7939_v12  ;;  %v9999_v12 = vpop.f32.mrf.mxu1 }
 0x1e5   :  { %4259 = vmatpush1.bf16.msra.mxu1 %v7942_v1  ;;  %4207 = vmatprep.subr.bf16.mxu0 %v7947_v25  ;;  %10652 = vst [vmem:[#allocation32_spill] sm:$0xff] %v9999_v12  ;;  %v10001_v1 = vpop.f32.mrf.mxu0  ;;  %v7971_v25 = vld [vmem:[#allocation2 + $0x4d4] ss:$8 sps:$4 sm:$0xff]  }
 0x1e6   :  { %4260 = vmatprep.subr.bf16.mxu1 %v7950_v45  ;;  %v7974_v45 = vld [vmem:[#allocation2 + $0x5d4] ss:$8 sps:$4 sm:$0xff]  }
 0x1e8   :  { %4208 = vmatpush1.bf16.msra.mxu0 %v7945_v37  ;;  %v10003_v37 = vpop.f32.mrf.mxu1 }
 0x1e9   :  { %4261 = vmatpush1.bf16.msra.mxu1 %v7948_v20  ;;  %4209 = vmatprep.subr.bf16.mxu0 %v7953_v47  ;;  %v7969_v20 = vld [vmem:[#allocation2 + $0x4d0] ss:$8 sps:$4 sm:$0xff]  }
 0x1ea   :  { %4262 = vmatprep.subr.bf16.mxu1 %v7956_v52  ;;  %v7972_v47 = vld [vmem:[#allocation2 + $0x5d0] ss:$8 sps:$4 sm:$0xff]   ;;  %v10005_v52 = vpop.f32.mrf.mxu0 }
 0x1ec   :  { %4210 = vmatpush1.bf16.msra.mxu0 %v7951_v36  ;;  %v7977_v36 = vld [vmem:[#allocation2 + $0x4c4] ss:$8 sps:$4 sm:$0xff]  }
 0x1ed   :  { %4263 = vmatpush1.bf16.msra.mxu1 %v7954_v49  ;;  %4211 = vmatprep.subr.bf16.mxu0 %v7959_v35  ;;  %v7980_v49 = vld [vmem:[#allocation2 + $0x5c4] ss:$8 sps:$4 sm:$0xff]   ;;  %v10007_v35 = vpop.f32.mrf.mxu1 }
 0x1ee   :  { %4264 = vmatprep.subr.bf16.mxu1 %v7962_v43  ;;  %v7975_v43 = vld [vmem:[#allocation2 + $0x4c0] ss:$8 sps:$4 sm:$0xff]  }
 0x1f0   :  { %4212 = vmatpush2.bf16.msra.mxu0 %v7957_v40  ;;  %v7978_v40 = vld [vmem:[#allocation2 + $0x5c0] ss:$8 sps:$4 sm:$0xff]  }
 0x1f1   :  { %4265 = vmatpush2.bf16.msra.mxu1 %v7960_v2  ;;  %4213 = vmatprep.subr.bf16.mxu0 %v7965_v57  ;;  %v10009_v2 = vpop.f32.mrf.mxu0  ;;  %v7983_v57 = vld [vmem:[#allocation2 + $0x4b4] ss:$8 sps:$4 sm:$0xff]  }
 0x1f2   :  { %4266 = vmatprep.subr.bf16.mxu1 %v7968_v42  ;;  %v7986_v42 = vld [vmem:[#allocation2 + $0x5b4] ss:$8 sps:$4 sm:$0xff]  }
 0x1f4   :  { %4214 = vmatpush2.bf16.msra.mxu0 %v7963_v27  ;;  %v10011_v27 = vpop.f32.mrf.mxu1 }
 0x1f5   :  { %4267 = vmatpush2.bf16.msra.mxu1 %v7966_v30  ;;  %4215 = vmatprep.subr.bf16.mxu0 %v7971_v25  ;;  %v7981_v30 = vld [vmem:[#allocation2 + $0x4b0] ss:$8 sps:$4 sm:$0xff]  }
 0x1f6   :  { %4268 = vmatprep.subr.bf16.mxu1 %v7974_v45  ;;  %v7984_v25 = vld [vmem:[#allocation2 + $0x5b0] ss:$8 sps:$4 sm:$0xff]   ;;  %v10013_v45 = vpop.f32.mrf.mxu0  ;;  %v10015_v23 = vpop.f32.mrf.mxu1 }
 0x1f7   :  { %10653 = vst [vmem:[#allocation33_spill] sm:$0xff] %v10015_v23  ;;  %v8007_v23 = vld [vmem:[#allocation2 + $0x674] ss:$8 sps:$4 sm:$0xff]  }
 0x1f8   :  { %4216 = vmatpush2.bf16.msra.mxu0 %v7969_v20  ;;  %v7989_v20 = vld [vmem:[#allocation2 + $0x4a4] ss:$8 sps:$4 sm:$0xff]   ;;  %v10021_v16 = vpop.f32.mrf.mxu1 }
 0x1f9   :  { %4269 = vmatpush2.bf16.msra.mxu1 %v7972_v47  ;;  %4217 = vmatprep.subr.bf16.mxu0 %v7977_v36  ;;  %v7992_v47 = vld [vmem:[#allocation2 + $0x5a4] ss:$8 sps:$4 sm:$0xff]   ;;  %v4317_v36 = vshll.u32 %v9914_v9, 16  ;;  %10655 = vst [vmem:[#allocation35_spill] sm:$0xff] %v10021_v16  ;;  %v4330_v9 = vshll.u32 %v9922_v24, 16  ;;  %v3770_v24 = vrot.slane %v10043_v10, 5 }
 0x1fa   :  { %4270 = vmatprep.subr.bf16.mxu1 %v7980_v49  ;;  %v7987_v49 = vld [vmem:[#allocation2 + $0x4a0] ss:$8 sps:$4 sm:$0xff]   ;;  %v10665_v10 = vshll.u32 %v9697_v54, 16  ;;  %v10073_v48 = vpop.f32.mrf.mxu1 }
 0x1fb   :  { %v4319_v58 = vrot.slane %v4317_v36, 6  ;;  %v4335_v36 = vrot.slane %v10664_v46, 5  ;;  %10667 = vst [vmem:[#allocation43_spill] sm:$0xff] %v10073_v48  ;;  %v6950_v46 = vrot.slane %v10054_v59, 9  ;;  %v6952_v59 = vcombine.low %v9951_v61, %v9955_v15 }
 0x1fc   :  { %4218 = vmatpush2.bf16.msra.mxu0 %v7975_v43  ;;  %v7995_v43 = vld [vmem:[#allocation2 + $0x494] ss:$8 sps:$4 sm:$0xff]   ;;  %v4336_v41 = vrot.slane %v10665_v10, 6 }
 0x1fd   :  { %4271 = vmatpush2.bf16.msra.mxu1 %v7978_v40  ;;  %4219 = vmatprep.subr.bf16.mxu0 %v7983_v57  ;;  %v10019_v40 = vpop.f32.mrf.mxu0  ;;  %v7998_v57 = vld [vmem:[#allocation2 + $0x594] ss:$8 sps:$4 sm:$0xff]   ;;  %v4320_v16 = vor.u32 %v4319_v58, %v4316_v55 }
 0x1fe   :  { %4272 = vmatprep.subr.bf16.mxu1 %v7986_v42  ;;  %10654 = vst [vmem:[#allocation34_spill] sm:$0xff] %v10019_v40  ;;  %v10026_v42 = vld [vmem:[%s10564_s3 + $0x20] sm:$0x33]  ;;  %v8285_v10 = vld [vmem:[%s10564_s3 + $0x50] sm:$0x11]  ;;  %v4337_v55 = vor.u32 %v4336_v41, %v4335_v36  ;;  %v1449_v41 = vadd.f32 %v9983_v26, %v9981_v5 }
 0x1ff   :  { %10656 = vst [vmem:[#allocation36_spill] sm:$0xff] %v10026_v42  ;;  %v4341_v11 = vshrl.u32 %v10026_v42, 16  ;;  %v4344_v4 = vshll.u32 %v10026_v42, 16  ;;  %v1445_v42 = vadd.f32 %v9975_v22, %v9973_v21  ;;  %v3773_v48 = vrot.slane %v8285_v10, 5  ;;  %v7999_v21 = vld [vmem:[#allocation2 + $0x480] ss:$8 sps:$4 sm:$0xff]  }
 0x200   :  { %4220 = vmatpush2.bf16.msra.mxu0 %v7981_v30  ;;  %v10032_v30 = vadd.f32 %v9971_v29, %v9965_v6  ;;  %v10049_v6 = vld [vmem:[%s10564_s3 + $0x28] sm:$0x33]  ;;  %v8010_v40 = vld [vmem:[#allocation2 + $0x774] ss:$8 sps:$4 sm:$0xff]   ;;  %v4321_v61 = vrot.slane %v4320_v16, 4 }
 0x201   :  { %4273 = vmatpush2.bf16.msra.mxu1 %v7984_v25  ;;  %4221 = vmatprep.subr.bf16.mxu0 %v7989_v20  ;;  %v7993_v25 = vld [vmem:[#allocation2 + $0x490] ss:$8 sps:$4 sm:$0xff]   ;;  %v10037_v20 = vld [vmem:[%s10564_s3 + $0x40] sm:$0xff]  ;;  %10659 = vst [vmem:[#allocation39_spill] sm:$0xff] %v10049_v6  ;;  %v4351_v7 = vshrl.u32 %v10049_v6, 16  ;;  %v4354_v60 = vshll.u32 %v10049_v6, 16 }
 0x202   :  { %4274 = vmatprep.subr.bf16.mxu1 %v7992_v47  ;;  %10657 = vst [vmem:[#allocation37_spill] sm:$0xff] %v10037_v20  ;;  %v3766_v47 = vrot.slane %v10037_v20, 5  ;;  %v8001_v29 = vld [vmem:[#allocation2 + $0x484] ss:$8 sps:$4 sm:$0xff]   ;;  %v10071_v20 = vpop.f32.mrf.mxu0  ;;  %v8002_v22 = vld [vmem:[#allocation2 + $0x580] ss:$8 sps:$4 sm:$0xff]   ;;  %v1848_v15 = vadd.f32 %v10001_v1, %v10032_v30 }
 0x203   :  { %10666 = vst [vmem:[#allocation42_spill] sm:$0xff] %v10071_v20  ;;  %v4324_v20 = vor.u32 %v4323_v34, %v4322_v33  ;;  %v4343_v12 = vrot.slane %v4341_v11, 5  ;;  %v4346_v10 = vrot.slane %v4344_v4, 6  ;;  %v4353_v58 = vrot.slane %v4351_v7, 5  ;;  %v8013_v16 = vld [vmem:[#allocation2 + $0x664] ss:$8 sps:$4 sm:$0xff]  }
 0x204   :  { %4222 = vmatpush2.bf16.msra.mxu0 %v7987_v49  ;;  %v4332_v49 = vrot.slane %v4330_v9, 6  ;;  %v3772_v54 = vrot.slane %v3766_v47, 4  ;;  %v8286_v9 = vld [vmem:[%s10564_s3 + $0x58] sm:$0x11]  ;;  %v10089_v13 = vpop.f32.mrf.mxu0  ;;  %v6954_v34 = vcombine.low %v9959_v19, %v9963_v0  ;;  %v10106_v33 = vsel %vm8690_vm2, %v6950_v46, %v3766_v47 }
 0x205   :  { %4275 = vmatpush2.bf16.msra.mxu1 %v7990_v51  ;;  %4223 = vmatprep.subr.bf16.mxu0 %v7995_v43  ;;  %v4329_v51 = vrot.slane %v4327_v62, 5  ;;  %v2549_v43 = vld [vmem:[#allocation7] sm:$0x3]  ;;  %v3775_v62 = vrot.slane %v3770_v24, 4  ;;  %v3776_v6 = vrot.slane %v8286_v9, 5  ;;  %v4347_v47 = vor.u32 %v4346_v10, %v4343_v12 }
 0x206   :  { %4276 = vmatprep.subr.bf16.mxu1 %v7998_v57  ;;  %v6951_v57 = vrot.slane %v10063_v32, 9  ;;  %v10091_v32 = vpop.f32.mrf.mxu1  ;;  %v10098_v4 = vrot.slane %v2549_v43, %v9746_v14  ;;  %v10102_v11 = vsel %vm8690_vm2, %v3772_v54, %v3773_v48  ;;  %v8005_v19 = vld [vmem:[#allocation2 + $0x670] ss:$8 sps:$4 sm:$0xff]   ;;  %v4349_v30 = vrot.slane %v4337_v55, 4  ;;  %v8019_v54 = vld [vmem:[#allocation2 + $0x654] ss:$8 sps:$4 sm:$0xff]  }
 0x207   :  { %v4333_v9 = vor.u32 %v4332_v49, %v4329_v51  ;;  %v10114_v7 = vsel %vm8690_vm2, %v3775_v62, %v3776_v6  ;;  %v8008_v0 = vld [vmem:[#allocation2 + $0x770] ss:$8 sps:$4 sm:$0xff]   ;;  %v8016_v6 = vld [vmem:[#allocation2 + $0x764] ss:$8 sps:$4 sm:$0xff]   ;;  %v1453_v48 = vadd.f32 %v9987_v8, %v9985_v31  ;;  %v6957_v12 = vcombine.high %v10106_v33, %v10102_v11  ;;  %v8011_v8 = vld [vmem:[#allocation2 + $0x660] ss:$8 sps:$4 sm:$0xff]  }
 0x208   :  { %4224 = vmatpush2.bf16.msra.mxu0 %v7993_v25  ;;  %v1447_v25 = vadd.f32 %v9979_v56, %v9977_v3  ;;  %v10119_v3 = vrot.slane %v2549_v43, %v9749_v17  ;;  %v4339_v56 = vrot.slane %v4324_v20, 4  ;;  %v10124_v44 = vpop.f32.mrf.mxu1  ;;  %v10139_v5 = vsel %vm9396_vm8, %v4321_v61, %v4324_v20  ;;  %v8014_v51 = vld [vmem:[#allocation2 + $0x760] ss:$8 sps:$4 sm:$0xff]   ;;  %v8022_v20 = vld [vmem:[#allocation2 + $0x754] ss:$8 sps:$4 sm:$0xff]  }
 0x209   :  { %4277 = vmatpush2.bf16.msra.mxu1 %v7996_v39  ;;  %4225 = vmatprep.subr.bf16.mxu0 %v8001_v29  ;;  %v4356_v39 = vrot.slane %v4354_v60, 6  ;;  %v10110_v60 = vsel %vm8690_vm2, %v6951_v57, %v3770_v24  ;;  %v1850_v24 = vadd.f32 %v10005_v52, %v1445_v42  ;;  %v10122_v29 = vpop.f32.mrf.mxu0  ;;  %v4334_v1 = vrot.slane %v4333_v9, 4  ;;  %v10669_v61 = vld [vmem:[#allocation33_spill] sm:$0xff] }
 0x20a   :  { %4278 = vmatprep.subr.bf16.mxu1 %v8004_v28  ;;  %v6959_v52 = vcombine.high %v10110_v60, %v10114_v7  ;;  %v6956_v28 = vcombine.low %v10106_v33, %v10102_v11  ;;  %v1901_v26 = vadd.f32 %v10003_v37, %v1848_v15  ;;  %v1854_v57 = vadd.f32 %v10013_v45, %v1449_v41  ;;  %v8020_v11 = vld [vmem:[#allocation2 + $0x750] ss:$8 sps:$4 sm:$0xff]  }
 0x20b   :  { %v4357_v36 = vor.u32 %v4356_v39, %v4353_v58  ;;  %v10149_v37 = vsel %vm9396_vm8, %v4334_v1, %v4337_v55  ;;  %v6958_v58 = vcombine.low %v10110_v60, %v10114_v7 }
 0x20c   :  { %4226 = vmatpush2.bf16.msra.mxu0 %v7999_v21  ;;  %v1907_v15 = vadd.f32 %v10669_v61, %v1854_v57 }
 0x20d   :  { %4279 = vmatpush2.bf16.msra.mxu1 %v8002_v22  ;;  %4822 = vmatprep.subr.bf16.mxu0 %v8007_v23  ;;  %v1852_v23 = vadd.f32 %v10009_v2, %v1447_v25  ;;  %v10144_v2 = vsel %vm9396_vm8, %v4339_v56, %v4347_v47  ;;  %v10153_v43 = vsel %vm9396_vm8, %v4349_v30, %v4357_v36  ;;  %v10670_v47 = vld [vmem:[#allocation31_spill] sm:$0xff] }
 0x20e   :  { %4875 = vmatprep.subr.bf16.mxu1 %v8010_v40  ;;  %v1457_v22 = vadd.f32 %v9995_v63, %v9993_v53  ;;  %v8025_v63 = vld [vmem:[#allocation2 + $0x644] ss:$8 sps:$4 sm:$0xff]   ;;  %v7025_v60 = vcombine.high %v10139_v5, %v10144_v2  ;;  %v7027_v7 = vcombine.high %v10149_v37, %v10153_v43 }
 0x20f   :  { %v2469_v40 = vpop.f32.mrf.mxu0  ;;  %4228 = vmatmul.mubr.bf16.vlgmr.msra.gmra.mxu0 %v6952_v59  ;;  %v1903_v59 = vadd.f32 %v10007_v35, %v1850_v24  ;;  %v1455_v35 = vadd.f32 %v9991_v50, %v9989_v18  ;;  %v1905_v10 = vadd.f32 %v10011_v27, %v1852_v23  ;;  %v10668_v18 = vld [vmem:[#allocation34_spill] sm:$0xff]  ;;  %v10671_v24 = vld [vmem:[#allocation32_spill] sm:$0xff] }
 0x210   :  { %v2522_v42 = vpop.f32.mrf.mxu1  ;;  %4281 = vmatmul.mubr.bf16.vlgmr.msra.gmra.mxu1 %v6954_v34  ;;  %4823 = vmatpush1.bf16.msra.mxu0 %v8005_v19  ;;  %v8017_v34 = vld [vmem:[#allocation2 + $0x650] ss:$8 sps:$4 sm:$0xff]   ;;  %v1858_v50 = vadd.f32 %v10668_v18, %v1453_v48  ;;  %v8028_v27 = vld [vmem:[#allocation2 + $0x744] ss:$8 sps:$4 sm:$0xff]   ;;  %v1862_v30 = vadd.f32 %v10089_v13, %v1457_v22 }
 0x211   :  { %v2523_v31 = vadd.f32 %v2522_v42, %v2469_v40  ;;  %4876 = vmatpush1.bf16.msra.mxu1 %v8008_v0  ;;  %v2471_v49 = vpop.f32.mrf.mxu0  ;;  %4824 = vmatprep.subr.bf16.mxu0 %v8013_v16  ;;  %v1459_v16 = vadd.f32 %v10671_v24, %v10670_v47  ;;  %v8023_v40 = vld [vmem:[#allocation2 + $0x640] ss:$8 sps:$4 sm:$0xff]   ;;  %v8043_v47 = vld [vmem:[#allocation2 + $0x614] ss:$8 sps:$4 sm:$0xff]  }
 0x212   :  { %v2524_v46 = vpop.f32.mrf.mxu1  ;;  %4877 = vmatprep.subr.bf16.mxu1 %v8016_v6  ;;  %4237 = vmatprep.mubr.bf16.mxu0 %v6957_v12  ;;  %v10672_v6 = vld [vmem:[#allocation42_spill] sm:$0xff]  ;;  %v8046_v24 = vld [vmem:[#allocation2 + $0x714] ss:$8 sps:$4 sm:$0xff]  }
 0x213   :  { %v2541_v62 = vadd.f32 %v2523_v31, %v1901_v26  ;;  %v2525_v21 = vadd.f32 %v2524_v46, %v2471_v49  ;;  %4290 = vmatprep.mubr.bf16.mxu1 %v6959_v52  ;;  %v2473_v9 = vpop.f32.mrf.mxu0  ;;  %v1860_v1 = vadd.f32 %v10672_v6, %v1455_v35  ;;  %v8026_v42 = vld [vmem:[#allocation2 + $0x740] ss:$8 sps:$4 sm:$0xff]   ;;  %v1864_v49 = vadd.f32 %v10122_v29, %v1459_v16 }
 0x214   :  { %v2526_v55 = vpop.f32.mrf.mxu1  ;;  %4825 = vmatpush1.bf16.msra.mxu0 %v8011_v8  ;;  %v10673_v26 = vld [vmem:[#allocation35_spill] sm:$0xff] }
 0x215   :  { %v10164_v39 = vadd.f32 %v10098_v4, %v2541_v62  ;;  %v2542_v45 = vadd.f32 %v2525_v21, %v1903_v59  ;;  %v2527_v25 = vadd.f32 %v2526_v55, %v2473_v9  ;;  %4878 = vmatpush1.bf16.msra.mxu1 %v8014_v51  ;;  %v2475_v33 = vpop.f32.mrf.mxu0  ;;  %4826 = vmatprep.subr.bf16.mxu0 %v8019_v54  ;;  %v8034_v59 = vld [vmem:[#allocation2 + $0x734] ss:$8 sps:$4 sm:$0xff]  }
 0x216   :  { %v2528_v53 = vpop.f32.mrf.mxu1  ;;  %4879 = vmatprep.subr.bf16.mxu1 %v8022_v20  ;;  %v1911_v31 = vadd.f32 %v10673_v26, %v1858_v50  ;;  %v10675_v20 = vld [vmem:[#allocation43_spill] sm:$0xff]  ;;  %v8055_v26 = vld [vmem:[#allocation2 + $0x6f4] ss:$8 sps:$4 sm:$0xff]  }
 0x217   :  { %v10173_v19 = vadd.f32 %v10119_v3, %v2542_v45  ;;  %v2543_v0 = vadd.f32 %v2527_v25, %v1905_v10  ;;  %v2529_v56 = vadd.f32 %v2528_v53, %v2475_v33  ;;  %v2479_v36 = vpop.f32.mrf.mxu0  ;;  %4238 = vmatmul.mubr.bf16.gmra.mxu0 %v6956_v28  ;;  %v10624_v48 = vmax.f32 %v10164_v39, 0.0  ;;  %v8031_v28 = vld [vmem:[#allocation2 + $0x634] ss:$8 sps:$4 sm:$0xff]   ;;  %v8032_v45 = vld [vmem:[#allocation2 + $0x730] ss:$8 sps:$4 sm:$0xff]  }
 0x218   :  { %v2532_v41 = vpop.f32.mrf.mxu1  ;;  %4291 = vmatmul.mubr.bf16.gmra.mxu1 %v6958_v58  ;;  %4827 = vmatpush1.bf16.msra.mxu0 %v8017_v34  ;;  %v1913_v57 = vadd.f32 %v10675_v20, %v1860_v1  ;;  %v1915_v10 = vadd.f32 %v10091_v32, %v1862_v30  ;;  %v8029_v58 = vld [vmem:[#allocation2 + $0x630] ss:$8 sps:$4 sm:$0xff]   ;;  %v8037_v32 = vld [vmem:[#allocation2 + $0x624] ss:$8 sps:$4 sm:$0xff]   ;;  %v1917_v33 = vadd.f32 %v10124_v44, %v1864_v49  ;;  %v8035_v44 = vld [vmem:[#allocation2 + $0x620] ss:$8 sps:$4 sm:$0xff]  }
 0x219   :  { %v10623_v12 = vmax.f32 %v10173_v19, 0.0  ;;  %v10182_v52 = vadd.f32 %v10098_v4, %v2543_v0  ;;  %v2544_v23 = vadd.f32 %v2529_v56, %v1907_v15  ;;  %4880 = vmatpush1.bf16.msra.mxu1 %v8020_v11  ;;  %v2533_v8 = vadd.f32 %v2532_v41, %v2479_v36  ;;  %v2481_v13 = vpop.f32.mrf.mxu0  ;;  %4828 = vmatprep.subr.bf16.mxu0 %v8025_v63  ;;  %v8040_v50 = vld [vmem:[#allocation2 + $0x724] ss:$8 sps:$4 sm:$0xff]   ;;  %v8038_v15 = vld [vmem:[#allocation2 + $0x720] ss:$8 sps:$4 sm:$0xff]  }
 0x21a   :  { %v2534_v51 = vpop.f32.mrf.mxu1  ;;  %4881 = vmatprep.subr.bf16.mxu1 %v8028_v27  ;;  %4854 = vmatprep.mubr.bf16.mxu0 %v7025_v60  ;;  %v8041_v30 = vld [vmem:[#allocation2 + $0x610] ss:$8 sps:$4 sm:$0xff]   ;;  %v8052_v41 = vld [vmem:[#allocation2 + $0x704] ss:$8 sps:$4 sm:$0xff]   ;;  %v8062_v49 = vld [vmem:[#allocation2 + $0x7e0] ss:$8 sps:$4 sm:$0xff]  }
 0x21b   :  { %v7240_v46 = vpack.c.bf16 %v10623_v12, %v10624_v48  ;;  %v10191_v54 = vadd.f32 %v10119_v3, %v2544_v23  ;;  %4907 = vmatprep.mubr.bf16.mxu1 %v7027_v7  ;;  %v2545_v62 = vadd.f32 %v2533_v8, %v1911_v31  ;;  %v2535_v21 = vadd.f32 %v2534_v51, %v2481_v13  ;;  %v2483_v35 = vpop.f32.mrf.mxu0  ;;  %v8044_v36 = vld [vmem:[#allocation2 + $0x710] ss:$8 sps:$4 sm:$0xff]   ;;  %v8058_v31 = vld [vmem:[#allocation2 + $0x7f4] ss:$8 sps:$4 sm:$0xff]   ;;  %v8061_v51 = vld [vmem:[#allocation2 + $0x6e4] ss:$8 sps:$4 sm:$0xff]  }
 0x21c   :  { %v2536_v22 = vpop.f32.mrf.mxu1  ;;  %v10622_v29 = vmax.f32 %v10182_v52, 0.0  ;;  %4829 = vmatpush1.bf16.msra.mxu0 %v8023_v40  ;;  %v8047_v40 = vld [vmem:[#allocation2 + $0x600] ss:$8 sps:$4 sm:$0xff]   ;;  %v8053_v8 = vld [vmem:[#allocation2 + $0x6f0] ss:$8 sps:$4 sm:$0xff]  }
 0x21d   :  { %10674 = vst [vmem:[#allocation34_spill] sm:$0xff] %v10191_v54  ;;  %5590 = vst [vmem:[%s10574_s13] sm:$0xff] %v7240_v46  ;;  %v10621_v9 = vmax.f32 %v10191_v54, 0.0  ;;  %v2537_v55 = vadd.f32 %v2536_v22, %v2483_v35  ;;  %4882 = vmatpush1.bf16.msra.mxu1 %v8026_v42  ;;  %v10201_v25 = vadd.f32 %v10098_v4, %v2545_v62  ;;  %v2485_v11 = vpop.f32.mrf.mxu0  ;;  %4830 = vmatprep.subr.bf16.mxu0 %v8031_v28  ;;  %v8050_v42 = vld [vmem:[#allocation2 + $0x700] ss:$8 sps:$4 sm:$0xff]   ;;  %v8056_v13 = vld [vmem:[#allocation2 + $0x7f0] ss:$8 sps:$4 sm:$0xff]  }
 0x21e   :  { %v2546_v34 = vadd.f32 %v2535_v21, %v1913_v57  ;;  %v2538_v18 = vpop.f32.mrf.mxu1  ;;  %4883 = vmatprep.subr.bf16.mxu1 %v8034_v59  ;;  %v8064_v28 = vld [vmem:[#allocation2 + $0x7e4] ss:$8 sps:$4 sm:$0xff]   ;;  %v8059_v59 = vld [vmem:[#allocation2 + $0x6e0] ss:$8 sps:$4 sm:$0xff]   ;;  %v8067_v46 = vld [vmem:[#allocation2 + $0x6d4] ss:$8 sps:$4 sm:$0xff]  }
 0x21f   :  { %10676 = vst [vmem:[#allocation33_spill] sm:$0xff] %v10201_v25  ;;  %v7241_v53 = vpack.c.bf16 %v10621_v9, %v10622_v29  ;;  %v2547_v63 = vadd.f32 %v2537_v55, %v1915_v10  ;;  %v2539_v27 = vadd.f32 %v2538_v18, %v2485_v11  ;;  %v10620_v0 = vmax.f32 %v10201_v25, 0.0  ;;  %v8070_v20 = vld [vmem:[#allocation2 + $0x7d4] ss:$8 sps:$4 sm:$0xff]   ;;  %v8065_v57 = vld [vmem:[#allocation2 + $0x6d0] ss:$8 sps:$4 sm:$0xff]  }
 0x220   :  { %v10209_v60 = vadd.f32 %v10119_v3, %v2546_v34  ;;  %4831 = vmatpush1.bf16.msra.mxu0 %v8029_v58  ;;  %v8068_v62 = vld [vmem:[#allocation2 + $0x7d0] ss:$8 sps:$4 sm:$0xff]   ;;  %v8073_v21 = vld [vmem:[#allocation2 + $0x6c4] ss:$8 sps:$4 sm:$0xff]   ;;  %v8071_v22 = vld [vmem:[#allocation2 + $0x6c0] ss:$8 sps:$4 sm:$0xff]  }
 0x221   :  { %5591 = vst [vmem:[%s10574_s13 + $0x8] sm:$0xff] %v7241_v53  ;;  %v10215_v7 = vadd.f32 %v10098_v4, %v2547_v63  ;;  %v2548_v61 = vadd.f32 %v2539_v27, %v1917_v33  ;;  %4884 = vmatpush1.bf16.msra.mxu1 %v8032_v45  ;;  %4832 = vmatprep.subr.bf16.mxu0 %v8037_v32  ;;  %v8076_v35 = vld [vmem:[#allocation2 + $0x7c4] ss:$8 sps:$4 sm:$0xff]   ;;  %v8074_v10 = vld [vmem:[#allocation2 + $0x7c0] ss:$8 sps:$4 sm:$0xff]   ;;  %v10680_v45 = vld [vmem:[#allocation40_spill] sm:$0xff] }
 0x222   :  { %10677 = vst [vmem:[#allocation31_spill] sm:$0xff] %v10209_v60  ;;  %v10619_v56 = vmax.f32 %v10209_v60, 0.0  ;;  %4885 = vmatprep.subr.bf16.mxu1 %v8040_v50  ;;  %v8079_v55 = vld [vmem:[#allocation2 + $0x6b4] ss:$8 sps:$4 sm:$0xff]   ;;  %v4360_v34 = vshrl.u32 %v10680_v45, 16  ;;  %v4363_v11 = vshll.u32 %v10680_v45, 16 }
 0x223   :  { %10678 = vst [vmem:[#allocation32_spill] sm:$0xff] %v10215_v7  ;;  %v10220_v16 = vadd.f32 %v10119_v3, %v2548_v61  ;;  %v10618_v6 = vmax.f32 %v10215_v7, 0.0  ;;  %v8049_v3 = vld [vmem:[#allocation2 + $0x604] ss:$8 sps:$4 sm:$0xff]   ;;  %v8082_v58 = vld [vmem:[#allocation2 + $0x7b4] ss:$8 sps:$4 sm:$0xff]  }
 0x224   :  { %v7242_v4 = vpack.c.bf16 %v10619_v56, %v10620_v0  ;;  %4833 = vmatpush1.bf16.msra.mxu0 %v8035_v44  ;;  %v10681_v18 = vld [vmem:[#allocation41_spill] sm:$0xff]  ;;  %v10244_v33 = vld [vmem:[%s10564_s3 + $0x50] sm:$0x33]  ;;  %v8085_v27 = vld [vmem:[#allocation2 + $0x6a4] ss:$8 sps:$4 sm:$0xff]  }
 0x225   :  { %10679 = vst [vmem:[#allocation42_spill] sm:$0xff] %v10220_v16  ;;  %v10617_v1 = vmax.f32 %v10220_v16, 0.0  ;;  %4886 = vmatpush1.bf16.msra.mxu1 %v8038_v15  ;;  %4834 = vmatprep.subr.bf16.mxu0 %v8043_v47  ;;  %v4373_v32 = vshrl.u32 %v10681_v18, 16  ;;  %v8077_v50 = vld [vmem:[#allocation2 + $0x6b0] ss:$8 sps:$4 sm:$0xff]   ;;  %v4376_v53 = vshll.u32 %v10681_v18, 16 }
 0x226   :  { %5592 = vst [vmem:[%s10574_s13 + $0x10] sm:$0xff] %v7242_v4  ;;  %4887 = vmatprep.subr.bf16.mxu1 %v8046_v24  ;;  %v8080_v63 = vld [vmem:[#allocation2 + $0x7b0] ss:$8 sps:$4 sm:$0xff]   ;;  %v8088_v44 = vld [vmem:[#allocation2 + $0x7a4] ss:$8 sps:$4 sm:$0xff]   ;;  %v4362_v15 = vrot.slane %v4360_v34, 5 }
 0x227   :  { %v7243_v23 = vpack.c.bf16 %v10617_v1, %v10618_v6  ;;  %v10250_v61 = vld [vmem:[%s10564_s3 + $0x58] sm:$0x33]  ;;  %v4365_v47 = vrot.slane %v4363_v11, 6  ;;  %v8097_v18 = vld [vmem:[#allocation2 + $0x684] ss:$8 sps:$4 sm:$0xff]  }
 0x228   :  { %4835 = vmatpush1.bf16.msra.mxu0 %v8041_v30  ;;  %v10682_v24 = vld [vmem:[#allocation29_spill] sm:$0xff] }
 0x229   :  { %5593 = vst [vmem:[%s10574_s13 + $0x18] sm:$0xff] %v7243_v23  ;;  %4888 = vmatpush1.bf16.msra.mxu1 %v8044_v36  ;;  %4836 = vmatprep.subr.bf16.mxu0 %v8049_v3  ;;  %v10683_v4 = vshrl.u32 %v10682_v24, 16  ;;  %v10684_v36 = vshll.u32 %v10682_v24, 16  ;;  %v4390_v23 = vshll.u32 %v10244_v33, 16  ;;  %v8089_v34 = vld [vmem:[#allocation2 + $0x690] ss:$8 sps:$4 sm:$0xff]  }
 0x22a   :  { %4889 = vmatprep.subr.bf16.mxu1 %v8052_v41  ;;  %v4387_v41 = vshrl.u32 %v10244_v33, 16  ;;  %v8092_v11 = vld [vmem:[#allocation2 + $0x790] ss:$8 sps:$4 sm:$0xff]   ;;  %v8098_v24 = vld [vmem:[#allocation2 + $0x780] ss:$8 sps:$4 sm:$0xff]   ;;  %s8452_s13 = smov [#allocation13]  }
 0x22b   :  { %v4368_v30 = vrot.slane %v10683_v4, 5  ;;  %v4369_v3 = vrot.slane %v10684_v36, 6  ;;  %v8103_v4 = vld [vmem:[#allocation2 + $0x874] ss:$8 sps:$4 sm:$0xff]   ;;  %v7024_v36 = vcombine.low %v10139_v5, %v10144_v2  ;;  %v4936_v2 = vld [vmem:[%s10564_s3] sm:$0xcc] }
 0x22c   :  { %4837 = vmatpush1.bf16.msra.mxu0 %v8047_v40  ;;  %v4375_v40 = vrot.slane %v4373_v32, 5  ;;  %v8100_v32 = vld [vmem:[#allocation2 + $0x784] ss:$8 sps:$4 sm:$0xff]   ;;  %s6357_s11 = sshll.u32 %s8452_s13, 4  ;;  %s6358_s11 = int_to_ptr.vmem [resolvable:$true] %s6357_s11 }
 0x22d   :  { %4890 = vmatpush1.bf16.msra.mxu1 %v8050_v42  ;;  %4838 = vmatprep.subr.bf16.mxu0 %v8055_v26  ;;  %v10685_v42 = vld [vmem:[#allocation30_spill] sm:$0xff]  ;;  %s8409_s25 = scalar_lea.vmem %s6358_s11, 1024  ;;  %p8414_p3 = scmp.lt.s32.totalorder %s6358_s11, %s6358_s11 }
 0x22e   :  { %4891 = vmatprep.subr.bf16.mxu1 %v8058_v31  ;;  %v10686_v26 = vshrl.u32 %v10685_v42, 16  ;;  %p8410_p2 = scmp.ne.s32.totalorder %s6358_s11, %s8409_s25  ;;  %p8415_p4 = scmp.lt.s32.totalorder %s8409_s25, %s8409_s25 }
 0x230   :  { %4839 = vmatpush2.bf16.msra.mxu0 %v8053_v8  ;;  %v4381_v31 = vrot.slane %v10686_v26, 5  ;;  %v4378_v8 = vrot.slane %v4376_v53, 6  ;;  %p8416_p5 = por %p8415_p4, %p8414_p3 }
 0x231   :  { %4892 = vmatpush2.bf16.msra.mxu1 %v8056_v13  ;;  %4840 = vmatprep.subr.bf16.mxu0 %v8061_v51  ;;  %v10687_v13 = vshll.u32 %v10685_v42, 16 }
 0x232   :  { %4893 = vmatprep.subr.bf16.mxu1 %v8064_v28  ;;  %v4397_v28 = vshrl.u32 %v10250_v61, 16  ;;  %p8417_p6 = pnand %p8416_p5, %p8410_p2 }
 0x233   :  { %v4382_v51 = vrot.slane %v10687_v13, 6  ;;  %v4937_v13 = vld [vmem:[%s10564_s3 + $0x8] sm:$0xcc] }
 0x234   :  { %4841 = vmatpush2.bf16.msra.mxu0 %v8059_v59  ;;  %v4400_v59 = vshll.u32 %v10250_v61, 16 }
 0x235   :  { %4894 = vmatpush2.bf16.msra.mxu1 %v8062_v49  ;;  %4842 = vmatprep.subr.bf16.mxu0 %v8067_v46  ;;  %v8083_v49 = vld [vmem:[#allocation2 + $0x6a0] ss:$8 sps:$4 sm:$0xff]  }
 0x236   :  { %4895 = vmatprep.subr.bf16.mxu1 %v8070_v20  ;;  %v8086_v46 = vld [vmem:[#allocation2 + $0x7a0] ss:$8 sps:$4 sm:$0xff]   ;;  %v8091_v20 = vld [vmem:[#allocation2 + $0x694] ss:$8 sps:$4 sm:$0xff]   ;;  %v4402_v45 = vrot.slane %v4400_v59, 6 }
 0x238   :  { %4843 = vmatpush2.bf16.msra.mxu0 %v8065_v57  ;;  %v8094_v57 = vld [vmem:[#allocation2 + $0x794] ss:$8 sps:$4 sm:$0xff]  }
 0x239   :  { %4896 = vmatpush2.bf16.msra.mxu1 %v8068_v62  ;;  %4844 = vmatprep.subr.bf16.mxu0 %v8073_v21  ;;  %v4366_v62 = vor.u32 %v4365_v47, %v4362_v15  ;;  %v4370_v21 = vor.u32 %v4369_v3, %v4368_v30  ;;  %v8095_v47 = vld [vmem:[#allocation2 + $0x680] ss:$8 sps:$4 sm:$0xff]   ;;  %v8106_v30 = vld [vmem:[#allocation2 + $0x974] ss:$8 sps:$4 sm:$0xff]   ;;  %v7026_v3 = vcombine.low %v10149_v37, %v10153_v43 }
 0x23a   :  { %4897 = vmatprep.subr.bf16.mxu1 %v8076_v35  ;;  %v4389_v35 = vrot.slane %v4387_v41, 5  ;;  %v8288_v37 = vld [vmem:[%s10564_s3 + $0x18] sm:$0xff] }
 0x23b   :  { %v4385_v53 = vrot.slane %v4370_v21, 4  ;;  %v4957_v43 = vrot.slane %v8288_v37, 6  ;;  %v8139_v37 = vld [vmem:[#allocation2 + $0x814] ss:$8 sps:$4 sm:$0xff]  }
 0x23c   :  { %4845 = vmatpush2.bf16.msra.mxu0 %v8071_v22  ;;  %v4392_v22 = vrot.slane %v4390_v23, 6  ;;  %v8287_v23 = vld [vmem:[%s10564_s3 + $0x10] sm:$0xff] }
 0x23d   :  { %4898 = vmatpush2.bf16.msra.mxu1 %v8074_v10  ;;  %4846 = vmatprep.subr.bf16.mxu0 %v8079_v55  ;;  %v4379_v10 = vor.u32 %v4378_v8, %v4375_v40  ;;  %v4383_v55 = vor.u32 %v4382_v51, %v4381_v31  ;;  %v4953_v40 = vrot.slane %v8287_v23, 6  ;;  %v8101_v31 = vld [vmem:[#allocation2 + $0x870] ss:$8 sps:$4 sm:$0xff]   ;;  %v8112_v51 = vld [vmem:[#allocation2 + $0x964] ss:$8 sps:$4 sm:$0xff]  }
 0x23e   :  { %4899 = vmatprep.subr.bf16.mxu1 %v8082_v58  ;;  %v4399_v58 = vrot.slane %v4397_v28, 5  ;;  %v8104_v8 = vld [vmem:[#allocation2 + $0x970] ss:$8 sps:$4 sm:$0xff]  }
 0x23f   :  { %v8125_v23 = vld [vmem:[#allocation2 + $0x830] ss:$8 sps:$4 sm:$0xff]  }
 0x240   :  { %4847 = vmatpush2.bf16.msra.mxu0 %v8077_v50  ;;  %v4367_v50 = vrot.slane %v4366_v62, 4  ;;  %v4403_v15 = vor.u32 %v4402_v45, %v4399_v58  ;;  %v7097_v62 = vrot.slane %v4937_v13, 10  ;;  %v8115_v45 = vld [vmem:[#allocation2 + $0x854] ss:$8 sps:$4 sm:$0xff]   ;;  %v8145_v13 = vld [vmem:[#allocation2 + $0x804] ss:$8 sps:$4 sm:$0xff]  }
 0x241   :  { %4900 = vmatpush2.bf16.msra.mxu1 %v8080_v63  ;;  %4848 = vmatprep.subr.bf16.mxu0 %v8085_v27  ;;  %v4393_v63 = vor.u32 %v4392_v22, %v4389_v35  ;;  %v4380_v27 = vrot.slane %v4379_v10, 4  ;;  %v10689_v35 = vld [vmem:[#allocation39_spill] sm:$0xff] }
 0x242   :  { %4901 = vmatprep.subr.bf16.mxu1 %v8088_v44  ;;  %v4395_v44 = vrot.slane %v4383_v55, 4  ;;  %v4371_v41 = vsel %vm9396_vm8, %v4367_v50, %v4370_v21  ;;  %v4962_v21 = vrot.slane %v4957_v43, 4  ;;  %v4963_v22 = vrot.slane %v10689_v35, 6  ;;  %v8107_v10 = vld [vmem:[#allocation2 + $0x860] ss:$8 sps:$4 sm:$0xff]  }
 0x243   :  { %v4394_v42 = vsel %vm9396_vm8, %v4385_v53, %v4393_v63  ;;  %v4384_v26 = vsel %vm9396_vm8, %v4380_v27, %v4383_v55  ;;  %v8110_v55 = vld [vmem:[#allocation2 + $0x960] ss:$8 sps:$4 sm:$0xff]   ;;  %v10306_v53 = vsel %vm10292_vm11, %v7097_v62, %v4957_v43  ;;  %v8113_v27 = vld [vmem:[#allocation2 + $0x850] ss:$8 sps:$4 sm:$0xff]   ;;  %v8142_v43 = vld [vmem:[#allocation2 + $0x914] ss:$8 sps:$4 sm:$0xff]  }
 0x244   :  { %4849 = vmatpush2.bf16.msra.mxu0 %v8083_v49  ;;  %v4404_v5 = vsel %vm9396_vm8, %v4395_v44, %v4403_v15  ;;  %v7029_v28 = vcombine.high %v4371_v41, %v4394_v42  ;;  %v7096_v49 = vrot.slane %v4936_v2, 10  ;;  %v10310_v63 = vsel %vm10292_vm11, %v4962_v21, %v4963_v22  ;;  %v8116_v44 = vld [vmem:[#allocation2 + $0x950] ss:$8 sps:$4 sm:$0xff]   ;;  %v8121_v15 = vld [vmem:[#allocation2 + $0x844] ss:$8 sps:$4 sm:$0xff]  }
 0x245   :  { %4902 = vmatpush2.bf16.msra.mxu1 %v8086_v46  ;;  %4850 = vmatprep.subr.bf16.mxu0 %v8091_v20  ;;  %v7031_v59 = vcombine.high %v4384_v26, %v4404_v5  ;;  %v4959_v46 = vrot.slane %v4953_v40, 4  ;;  %v10688_v20 = vld [vmem:[#allocation36_spill] sm:$0xff]  ;;  %v8134_v2 = vld [vmem:[#allocation2 + $0x920] ss:$8 sps:$4 sm:$0xff]   ;;  %v8160_v62 = vld [vmem:[#allocation2 + $0x9e4] ss:$8 sps:$4 sm:$0xff]  }
 0x246   :  { %4903 = vmatprep.subr.bf16.mxu1 %v8094_v57  ;;  %v4960_v57 = vrot.slane %v10688_v20, 6  ;;  %v8152_v20 = vld [vmem:[#allocation2 + $0x9f0] ss:$8 sps:$4 sm:$0xff]   ;;  %v8155_v21 = vld [vmem:[#allocation2 + $0x8e0] ss:$8 sps:$4 sm:$0xff]  }
 0x247   :  { %v8158_v35 = vld [vmem:[#allocation2 + $0x9e0] ss:$8 sps:$4 sm:$0xff]   ;;  %v8163_v22 = vld [vmem:[#allocation2 + $0x8d4] ss:$8 sps:$4 sm:$0xff]  }
 0x248   :  { %4851 = vmatpush2.bf16.msra.mxu0 %v8089_v34  ;;  %v8118_v34 = vld [vmem:[#allocation2 + $0x954] ss:$8 sps:$4 sm:$0xff]   ;;  %v10302_v50 = vsel %vm10292_vm11, %v4959_v46, %v4960_v57  ;;  %v8149_v46 = vld [vmem:[#allocation2 + $0x8f0] ss:$8 sps:$4 sm:$0xff]   ;;  %v8157_v57 = vld [vmem:[#allocation2 + $0x8e4] ss:$8 sps:$4 sm:$0xff]  }
 0x249   :  { %4904 = vmatpush2.bf16.msra.mxu1 %v8092_v11  ;;  %4852 = vmatprep.subr.bf16.mxu0 %v8097_v18  ;;  %v7028_v11 = vcombine.low %v4371_v41, %v4394_v42  ;;  %v7030_v18 = vcombine.low %v4384_v26, %v4404_v5  ;;  %v8130_v41 = vld [vmem:[#allocation2 + $0x934] ss:$8 sps:$4 sm:$0xff]   ;;  %v8133_v42 = vld [vmem:[#allocation2 + $0x824] ss:$8 sps:$4 sm:$0xff]   ;;  %v8131_v5 = vld [vmem:[#allocation2 + $0x820] ss:$8 sps:$4 sm:$0xff]  }
 0x24a   :  { %4905 = vmatprep.subr.bf16.mxu1 %v8100_v32  ;;  %v10298_v32 = vsel %vm10292_vm11, %v7096_v49, %v4953_v40  ;;  %v8128_v40 = vld [vmem:[#allocation2 + $0x930] ss:$8 sps:$4 sm:$0xff]   ;;  %v8136_v26 = vld [vmem:[#allocation2 + $0x924] ss:$8 sps:$4 sm:$0xff]   ;;  %v8154_v49 = vld [vmem:[#allocation2 + $0x9f4] ss:$8 sps:$4 sm:$0xff]  }
 0x24b   :  { %v8197_v58 = vld [vmem:[#allocation10 + $0xa8] ss:$12 sps:$4 sm:$0xff]  }
 0x24c   :  { %4853 = vmatpush2.bf16.msra.mxu0 %v8095_v47  ;;  %v8124_v47 = vld [vmem:[#allocation2 + $0x944] ss:$8 sps:$4 sm:$0xff]  }
 0x24d   :  { %4906 = vmatpush2.bf16.msra.mxu1 %v8098_v24  ;;  %5396 = vmatprep.subr.bf16.mxu0 %v8103_v4  ;;  %v7101_v24 = vcombine.high %v10298_v32, %v10302_v50  ;;  %v7103_v4 = vcombine.high %v10306_v53, %v10310_v63 }
 0x24e   :  { %5449 = vmatprep.subr.bf16.mxu1 %v8106_v30  ;;  %v8119_v30 = vld [vmem:[#allocation2 + $0x840] ss:$8 sps:$4 sm:$0xff]  }
 0x24f   :  { %4855 = vmatmul.mubr.bf16.vlgmr.msra.gmra.mxu0 %v7024_v36  ;;  %v8122_v36 = vld [vmem:[#allocation2 + $0x940] ss:$8 sps:$4 sm:$0xff]  }
 0x250   :  { %4908 = vmatmul.mubr.bf16.vlgmr.msra.gmra.mxu1 %v7026_v3  ;;  %5397 = vmatpush1.bf16.msra.mxu0 %v8101_v31  ;;  %v8127_v3 = vld [vmem:[#allocation2 + $0x834] ss:$8 sps:$4 sm:$0xff]   ;;  %v8137_v31 = vld [vmem:[#allocation2 + $0x810] ss:$8 sps:$4 sm:$0xff]  }
 0x251   :  { %5450 = vmatpush1.bf16.msra.mxu1 %v8104_v8  ;;  %5398 = vmatprep.subr.bf16.mxu0 %v8109_v38  ;;  %v8140_v8 = vld [vmem:[#allocation2 + $0x910] ss:$8 sps:$4 sm:$0xff]   ;;  %v8148_v38 = vld [vmem:[#allocation2 + $0x904] ss:$8 sps:$4 sm:$0xff]  }
 0x252   :  { %5451 = vmatprep.subr.bf16.mxu1 %v8112_v51  ;;  %4864 = vmatprep.mubr.bf16.mxu0 %v7029_v28  ;;  %v8143_v51 = vld [vmem:[#allocation2 + $0x800] ss:$8 sps:$4 sm:$0xff]  }
 0x253   :  { %4917 = vmatprep.mubr.bf16.mxu1 %v7031_v59  ;;  %v8146_v28 = vld [vmem:[#allocation2 + $0x900] ss:$8 sps:$4 sm:$0xff]   ;;  %v8151_v59 = vld [vmem:[#allocation2 + $0x8f4] ss:$8 sps:$4 sm:$0xff]  }
 0x254   :  { %5399 = vmatpush1.bf16.msra.mxu0 %v8107_v10  ;;  %v8166_v10 = vld [vmem:[#allocation2 + $0x9d4] ss:$8 sps:$4 sm:$0xff]  }
 0x255   :  { %5452 = vmatpush1.bf16.msra.mxu1 %v8110_v55  ;;  %5400 = vmatprep.subr.bf16.mxu0 %v8115_v45  ;;  %v8161_v55 = vld [vmem:[#allocation2 + $0x8d0] ss:$8 sps:$4 sm:$0xff]  }
 0x256   :  { %5453 = vmatprep.subr.bf16.mxu1 %v8118_v34  ;;  %v8164_v45 = vld [vmem:[#allocation2 + $0x9d0] ss:$8 sps:$4 sm:$0xff]   ;;  %v8169_v34 = vld [vmem:[#allocation2 + $0x8c4] ss:$8 sps:$4 sm:$0xff]  }
 0x257   :  { %4865 = vmatmul.mubr.bf16.gmra.mxu0 %v7028_v11  ;;  %v8172_v11 = vld [vmem:[#allocation2 + $0x9c4] ss:$8 sps:$4 sm:$0xff]  }
 0x258   :  { %4918 = vmatmul.mubr.bf16.gmra.mxu1 %v7030_v18  ;;  %5401 = vmatpush1.bf16.msra.mxu0 %v8113_v27  ;;  %v8167_v18 = vld [vmem:[#allocation2 + $0x8c0] ss:$8 sps:$4 sm:$0xff]  }
 0x259   :  { %5454 = vmatpush1.bf16.msra.mxu1 %v8116_v44  ;;  %5402 = vmatprep.subr.bf16.mxu0 %v8121_v15  ;;  %v8170_v27 = vld [vmem:[#allocation2 + $0x9c0] ss:$8 sps:$4 sm:$0xff]   ;;  %v8175_v44 = vld [vmem:[#allocation2 + $0x8b4] ss:$8 sps:$4 sm:$0xff]  }
 0x25a   :  { %5455 = vmatprep.subr.bf16.mxu1 %v8124_v47  ;;  %5428 = vmatprep.mubr.bf16.mxu0 %v7101_v24  ;;  %v8178_v15 = vld [vmem:[#allocation2 + $0x9b4] ss:$8 sps:$4 sm:$0xff]   ;;  %v8173_v47 = vld [vmem:[#allocation2 + $0x8b0] ss:$8 sps:$4 sm:$0xff]  }
 0x25b   :  { %5481 = vmatprep.mubr.bf16.mxu1 %v7103_v4  ;;  %v8176_v24 = vld [vmem:[#allocation2 + $0x9b0] ss:$8 sps:$4 sm:$0xff]   ;;  %v8181_v4 = vld [vmem:[#allocation2 + $0x8a4] ss:$8 sps:$4 sm:$0xff]  }
 0x25c   :  { %5403 = vmatpush1.bf16.msra.mxu0 %v8119_v30  ;;  %v8184_v30 = vld [vmem:[#allocation2 + $0x9a4] ss:$8 sps:$4 sm:$0xff]  }
 0x25d   :  { %5456 = vmatpush1.bf16.msra.mxu1 %v8122_v36  ;;  %5404 = vmatprep.subr.bf16.mxu0 %v8127_v3  ;;  %v8179_v36 = vld [vmem:[#allocation2 + $0x8a0] ss:$8 sps:$4 sm:$0xff]  }
 0x25e   :  { %5457 = vmatprep.subr.bf16.mxu1 %v8130_v41  ;;  %v8182_v3 = vld [vmem:[#allocation2 + $0x9a0] ss:$8 sps:$4 sm:$0xff]   ;;  %v8187_v41 = vld [vmem:[#allocation2 + $0x894] ss:$8 sps:$4 sm:$0xff]  }
 0x260   :  { %5405 = vmatpush1.bf16.msra.mxu0 %v8125_v23  ;;  %v10692_v23 = vld [vmem:[#allocation37_spill] sm:$0xff] }
 0x261   :  { %5458 = vmatpush1.bf16.msra.mxu1 %v8128_v40  ;;  %5406 = vmatprep.subr.bf16.mxu0 %v8133_v42  ;;  %v4967_v40 = vrot.slane %v10692_v23, 6  ;;  %v8190_v42 = vld [vmem:[#allocation2 + $0x994] ss:$8 sps:$4 sm:$0xff]  }
 0x262   :  { %5459 = vmatprep.subr.bf16.mxu1 %v8136_v26  ;;  %v4938_v26 = vld [vmem:[%s10564_s3 + $0x30] sm:$0xcc] }
 0x263   :  { %v8212_v23 = vld [vmem:[#allocation10 + $0x30] ss:$12 sps:$4 sm:$0xff]  }
 0x264   :  { %5407 = vmatpush1.bf16.msra.mxu0 %v8131_v5  ;;  %v10693_v5 = vld [vmem:[#allocation38_spill] sm:$0xff] }
 0x265   :  { %5460 = vmatpush1.bf16.msra.mxu1 %v8134_v2  ;;  %5408 = vmatprep.subr.bf16.mxu0 %v8139_v37  ;;  %v4971_v2 = vrot.slane %v10693_v5, 6  ;;  %v4939_v37 = vld [vmem:[%s10564_s3 + $0x38] sm:$0xcc]  ;;  %v8218_v5 = vld [vmem:[#allocation10] ss:$12 sps:$4 sm:$0xff]  }
 0x266   :  { %5461 = vmatprep.subr.bf16.mxu1 %v8142_v43  ;;  %v8185_v43 = vld [vmem:[#allocation2 + $0x890] ss:$8 sps:$4 sm:$0xff]  }
 0x268   :  { %5409 = vmatpush1.bf16.msra.mxu0 %v8137_v31  ;;  %v8188_v31 = vld [vmem:[#allocation2 + $0x990] ss:$8 sps:$4 sm:$0xff]  }
 0x269   :  { %5462 = vmatpush1.bf16.msra.mxu1 %v8140_v8  ;;  %5410 = vmatprep.subr.bf16.mxu0 %v8145_v13  ;;  %v8193_v8 = vld [vmem:[#allocation2 + $0x884] ss:$8 sps:$4 sm:$0xff]   ;;  %v7098_v13 = vrot.slane %v4938_v26, 10 }
 0x26a   :  { %5463 = vmatprep.subr.bf16.mxu1 %v8148_v38  ;;  %v4973_v38 = vrot.slane %v4967_v40, 4  ;;  %v8220_v26 = vld [vmem:[#allocation10 + $0x4] ss:$12 sps:$4 sm:$0xff]  }
 0x26c   :  { %5411 = vmatpush1.bf16.msra.mxu0 %v8143_v51  ;;  %v8196_v51 = vld [vmem:[#allocation2 + $0x984] ss:$8 sps:$4 sm:$0xff]  }
 0x26d   :  { %5464 = vmatpush1.bf16.msra.mxu1 %v8146_v28  ;;  %5412 = vmatprep.subr.bf16.mxu0 %v8151_v59  ;;  %v4974_v28 = vrot.slane %v10244_v33, 6  ;;  %v7099_v59 = vrot.slane %v4939_v37, 10  ;;  %v8221_v37 = vld [vmem:[#allocation10 + $0x168] ss:$12 sps:$4 sm:$0xff]  }
 0x26e   :  { %5465 = vmatprep.subr.bf16.mxu1 %v8154_v49  ;;  %v4976_v49 = vrot.slane %v4971_v2, 4 }
 0x270   :  { %5413 = vmatpush2.bf16.msra.mxu0 %v8149_v46  ;;  %v4977_v46 = vrot.slane %v10250_v61, 6  ;;  %v7100_v61 = vcombine.low %v10298_v32, %v10302_v50  ;;  %v8200_v32 = vld [vmem:[#allocation10 + $0x90] ss:$12 sps:$4 sm:$0xff]  }
 0x271   :  { %5466 = vmatpush2.bf16.msra.mxu1 %v8152_v20  ;;  %5414 = vmatprep.subr.bf16.mxu0 %v8157_v57  ;;  %v8191_v20 = vld [vmem:[#allocation2 + $0x880] ss:$8 sps:$4 sm:$0xff]  }
 0x272   :  { %5467 = vmatprep.subr.bf16.mxu1 %v8160_v62  ;;  %v8194_v57 = vld [vmem:[#allocation2 + $0x980] ss:$8 sps:$4 sm:$0xff]   ;;  %v4968_v62 = vsel %vm10292_vm11, %v7098_v13, %v4967_v40  ;;  %v4978_v33 = vsel %vm10292_vm11, %v4976_v49, %v4977_v46 }
 0x273   :  { %v8205_v50 = vld [vmem:[#allocation10 + $0x7c] ss:$12 sps:$4 sm:$0xff]   ;;  %v8231_v13 = vld [vmem:[#allocation10 + $0x138] ss:$12 sps:$4 sm:$0xff]  }
 0x274   :  { %5415 = vmatpush2.bf16.msra.mxu0 %v8155_v21  ;;  %v4975_v21 = vsel %vm10292_vm11, %v4973_v38, %v4974_v28  ;;  %v8217_v40 = vld [vmem:[#allocation10 + $0x1c] ss:$12 sps:$4 sm:$0xff]   ;;  %v8238_v38 = vld [vmem:[#allocation10 + $0x124] ss:$12 sps:$4 sm:$0xff]   ;;  %v8236_v28 = vld [vmem:[#allocation10 + $0x120] ss:$12 sps:$4 sm:$0xff]  }
 0x275   :  { %5468 = vmatpush2.bf16.msra.mxu1 %v8158_v35  ;;  %5416 = vmatprep.subr.bf16.mxu0 %v8163_v22  ;;  %v4972_v35 = vsel %vm10292_vm11, %v7099_v59, %v4971_v2  ;;  %v7102_v22 = vcombine.low %v10306_v53, %v10310_v63  ;;  %v8224_v53 = vld [vmem:[#allocation10 + $0x170] ss:$12 sps:$4 sm:$0xff]   ;;  %v8223_v2 = vld [vmem:[#allocation10 + $0x16c] ss:$12 sps:$4 sm:$0xff]   ;;  %v8240_v59 = vld [vmem:[#allocation10 + $0x68] ss:$12 sps:$4 sm:$0xff]  }
 0x276   :  { %5469 = vmatprep.subr.bf16.mxu1 %v8166_v10  ;;  %v7105_v10 = vcombine.high %v4968_v62, %v4975_v21  ;;  %v8225_v63 = vld [vmem:[#allocation10 + $0xb0] ss:$12 sps:$4 sm:$0xff]   ;;  %v8243_v49 = vld [vmem:[#allocation10 + $0x10c] ss:$12 sps:$4 sm:$0xff]  }
 0x277   :  { %v8244_v46 = vld [vmem:[#allocation10 + $0x110] ss:$12 sps:$4 sm:$0xff]  }
 0x278   :  { %5417 = vmatpush2.bf16.msra.mxu0 %v8161_v55  ;;  %v7107_v55 = vcombine.high %v4972_v35, %v4978_v33 }
 0x279   :  { %5470 = vmatpush2.bf16.msra.mxu1 %v8164_v45  ;;  %5418 = vmatprep.subr.bf16.mxu0 %v8169_v34  ;;  %v7104_v45 = vcombine.low %v4968_v62, %v4975_v21  ;;  %v7106_v34 = vcombine.low %v4972_v35, %v4978_v33  ;;  %v8248_v62 = vld [vmem:[#allocation10 + $0xf4] ss:$12 sps:$4 sm:$0xff]   ;;  %v8249_v21 = vld [vmem:[#allocation10 + $0xf8] ss:$12 sps:$4 sm:$0xff]   ;;  %v8246_v35 = vld [vmem:[#allocation10 + $0xf0] ss:$12 sps:$4 sm:$0xff]  }
 0x27a   :  { %5471 = vmatprep.subr.bf16.mxu1 %v8172_v11  ;;  %v8199_v11 = vld [vmem:[#allocation10 + $0xac] ss:$12 sps:$4 sm:$0xff]  }
 0x27b   :  { %v8250_v33 = vld [vmem:[#allocation10 + $0x38] ss:$12 sps:$4 sm:$0xff]  }
 0x27c   :  { %5419 = vmatpush2.bf16.msra.mxu0 %v8167_v18  ;;  %v8202_v18 = vld [vmem:[#allocation10 + $0x94] ss:$12 sps:$4 sm:$0xff]  }
 0x27d   :  { %5472 = vmatpush2.bf16.msra.mxu1 %v8170_v27  ;;  %5420 = vmatprep.subr.bf16.mxu0 %v8175_v44  ;;  %v8203_v27 = vld [vmem:[#allocation10 + $0x78] ss:$12 sps:$4 sm:$0xff]  }
 0x27e   :  { %5473 = vmatprep.subr.bf16.mxu1 %v8178_v15  ;;  %v8229_v44 = vld [vmem:[#allocation10 + $0x158] ss:$12 sps:$4 sm:$0xff]  }
 0x27f   :  { %v8208_v15 = vld [vmem:[#allocation10 + $0x64] ss:$12 sps:$4 sm:$0xff]  }
 0x280   :  { %5421 = vmatpush2.bf16.msra.mxu0 %v8173_v47  ;;  %v8230_v47 = vld [vmem:[#allocation10 + $0x98] ss:$12 sps:$4 sm:$0xff]  }
 0x281   :  { %5474 = vmatpush2.bf16.msra.mxu1 %v8176_v24  ;;  %5422 = vmatprep.subr.bf16.mxu0 %v8181_v4  ;;  %v8234_v24 = vld [vmem:[#allocation10 + $0x140] ss:$12 sps:$4 sm:$0xff]  }
 0x282   :  { %5475 = vmatprep.subr.bf16.mxu1 %v8184_v30  ;;  %v8206_v4 = vld [vmem:[#allocation10 + $0x60] ss:$12 sps:$4 sm:$0xff]  }
 0x283   :  { %v8211_v30 = vld [vmem:[#allocation10 + $0x4c] ss:$12 sps:$4 sm:$0xff]  }
 0x284   :  { %5423 = vmatpush2.bf16.msra.mxu0 %v8179_v36  ;;  %v8235_v36 = vld [vmem:[#allocation10 + $0x80] ss:$12 sps:$4 sm:$0xff]  }
 0x285   :  { %5476 = vmatpush2.bf16.msra.mxu1 %v8182_v3  ;;  %5424 = vmatprep.subr.bf16.mxu0 %v8187_v41  ;;  %v8209_v3 = vld [vmem:[#allocation10 + $0x48] ss:$12 sps:$4 sm:$0xff]  }
 0x286   :  { %5477 = vmatprep.subr.bf16.mxu1 %v8190_v42  ;;  %v8214_v41 = vld [vmem:[#allocation10 + $0x34] ss:$12 sps:$4 sm:$0xff]   ;;  %v8215_v42 = vld [vmem:[#allocation10 + $0x18] ss:$12 sps:$4 sm:$0xff]  }
 0x288   :  { %5425 = vmatpush2.bf16.msra.mxu0 %v8185_v43  ;;  %v8228_v43 = vld [vmem:[#allocation10 + $0x154] ss:$12 sps:$4 sm:$0xff]  }
 0x289   :  { %5478 = vmatpush2.bf16.msra.mxu1 %v8188_v31  ;;  %5426 = vmatprep.subr.bf16.mxu0 %v8193_v8  ;;  %v8226_v31 = vld [vmem:[#allocation10 + $0x150] ss:$12 sps:$4 sm:$0xff]  }
 0x28a   :  { %5479 = vmatprep.subr.bf16.mxu1 %v8196_v51  ;;  %v8233_v8 = vld [vmem:[#allocation10 + $0x13c] ss:$12 sps:$4 sm:$0xff]  }
 0x28b   :  { %v8239_v51 = vld [vmem:[#allocation10 + $0x128] ss:$12 sps:$4 sm:$0xff]  }
 0x28c   :  { %5427 = vmatpush2.bf16.msra.mxu0 %v8191_v20  ;;  %v8241_v20 = vld [vmem:[#allocation10 + $0x108] ss:$12 sps:$4 sm:$0xff]  }
 0x28d   :  { %5480 = vmatpush2.bf16.msra.mxu1 %v8194_v57  ;;  %5987 = vmatprep.subr.bf16.mxu0 %v8199_v11  ;;  %v8245_v57 = vld [vmem:[#allocation10 + $0x50] ss:$12 sps:$4 sm:$0xff]  }
 0x28e   :  { %7248 = vmatprep.subr.bf16.mxu1 %v8224_v53  ;;  %v8258_v11 = vld [vmem:[#allocation10 + $0xc4] ss:$12 sps:$4 sm:$0xff]   ;;  %v8260_v53 = vld [vmem:[#allocation10 + $0x8] ss:$12 sps:$4 sm:$0xff]  }
 0x28f   :  { %5429 = vmatmul.mubr.bf16.vlgmr.msra.gmra.mxu0 %v7100_v61  ;;  %v10338_v61 = vpop.f32.mrf.mxu0 }
 0x290   :  { %5482 = vmatmul.mubr.bf16.vlgmr.msra.gmra.mxu1 %v7102_v22  ;;  %5438 = vmatprep.mubr.bf16.mxu0 %v7105_v10  ;;  %v8253_v22 = vld [vmem:[#allocation10 + $0xdc] ss:$12 sps:$4 sm:$0xff]   ;;  %v8254_v10 = vld [vmem:[#allocation10 + $0xe0] ss:$12 sps:$4 sm:$0xff]  }
 0x291   :  { %5491 = vmatprep.mubr.bf16.mxu1 %v7107_v55  ;;  %5988 = vmatpush1.bf16.msra.mxu0 %v8197_v58  ;;  %v10340_v55 = vpop.f32.mrf.mxu1  ;;  %v10342_v58 = vpop.f32.mrf.mxu0 }
 0x292   :  { %5989 = vmatprep.subr.bf16.mxu0 %v8202_v18  ;;  %7249 = vmatpush3.bf16.msra.mxu1 %v8225_v63  ;;  %v8259_v18 = vld [vmem:[#allocation10 + $0xc8] ss:$12 sps:$4 sm:$0xff]  }
 0x293   :  { %7250 = vmatprep.subr.bf16.mxu1 %v8229_v44  ;;  %v3204_v63 = vpop.f32.mrf.mxu0 }
 0x295   :  { %5990 = vmatpush1.bf16.msra.mxu0 %v8200_v32  ;;  %v10344_v32 = vpop.f32.mrf.mxu1  ;;  %v3206_v44 = vpop.f32.mrf.mxu0 }
 0x296   :  { %5991 = vmatprep.subr.bf16.mxu0 %v8205_v50  ;;  %7251 = vmatpush3.bf16.msra.mxu1 %v8230_v47  ;;  %v8256_v50 = vld [vmem:[#allocation10 + $0xc0] ss:$12 sps:$4 sm:$0xff]  }
 0x297   :  { %5439 = vmatmul.mubr.bf16.gmra.mxu0 %v7104_v45  ;;  %7252 = vmatprep.subr.bf16.mxu1 %v8234_v24  ;;  %v8251_v45 = vld [vmem:[#allocation10 + $0xd8] ss:$12 sps:$4 sm:$0xff]   ;;  %v3210_v47 = vpop.f32.mrf.mxu0 }
 0x298   :  { %5492 = vmatmul.mubr.bf16.gmra.mxu1 %v7106_v34  ;;  %v8255_v34 = vld [vmem:[#allocation10 + $0x20] ss:$12 sps:$4 sm:$0xff]  }
 0x299   :  { %5992 = vmatpush1.bf16.msra.mxu0 %v8203_v27  ;;  %v3257_v27 = vpop.f32.mrf.mxu1 }
 0x29a   :  { %5993 = vmatprep.subr.bf16.mxu0 %v8208_v15  ;;  %7253 = vmatpush3.bf16.msra.mxu1 %v8235_v36 }
 0x29b   :  { %7254 = vmatprep.subr.bf16.mxu1 %v8239_v51  ;;  %v3259_v15 = vpop.f32.mrf.mxu1 }
 0x29d   :  { %5994 = vmatpush1.bf16.msra.mxu0 %v8206_v4  ;;  %v3263_v24 = vpop.f32.mrf.mxu1  ;;  %v3212_v4 = vpop.f32.mrf.mxu0 }
 0x29e   :  { %5995 = vmatprep.subr.bf16.mxu0 %v8211_v30  ;;  %7255 = vmatpush3.bf16.msra.mxu1 %v8240_v59 }
 0x29f   :  { %7256 = vmatprep.subr.bf16.mxu1 %v8244_v46  ;;  %v3265_v30 = vpop.f32.mrf.mxu1  ;;  %v10346_v36 = vpop.f32.mrf.mxu0 }
 0x2a1   :  { %5996 = vmatpush1.bf16.msra.mxu0 %v8209_v3  ;;  %v3267_v3 = vpop.f32.mrf.mxu1 }
 0x2a2   :  { %5997 = vmatprep.subr.bf16.mxu0 %v8214_v41  ;;  %7257 = vmatpush3.bf16.msra.mxu1 %v8245_v57  ;;  %v10348_v41 = vpop.f32.mrf.mxu0 }
 0x2a3   :  { %7258 = vmatprep.subr.bf16.mxu1 %v8249_v21 }
 0x2a5   :  { %5998 = vmatpush1.bf16.msra.mxu0 %v8212_v23  ;;  %v10350_v23 = vpop.f32.mrf.mxu1 }
 0x2a6   :  { %5999 = vmatprep.subr.bf16.mxu0 %v8217_v40  ;;  %7259 = vmatpush3.bf16.msra.mxu1 %v8250_v33  ;;  %v3666_v40 = vpop.f32.mrf.mxu0 }
 0x2a7   :  { %7260 = vmatprep.subr.bf16.mxu1 %v8254_v10 }
 0x2a9   :  { %6000 = vmatpush1.bf16.msra.mxu0 %v8215_v42  ;;  %v3719_v42 = vpop.f32.mrf.mxu1 }
 0x2aa   :  { %6001 = vmatprep.subr.bf16.mxu0 %v8220_v26  ;;  %7261 = vmatpush3.bf16.msra.mxu1 %v8255_v34  ;;  %v3668_v26 = vpop.f32.mrf.mxu0 }
 0x2ab   :  { %7262 = vmatprep.subr.bf16.mxu1 %v8259_v18 }
 0x2ad   :  { %6002 = vmatpush1.bf16.msra.mxu0 %v8218_v5  ;;  %v10352_v5 = vpop.f32.mrf.mxu1 }
 0x2ae   :  { %6003 = vmatprep.subr.bf16.mxu0 %v8223_v2  ;;  %7263 = vmatpush3.bf16.msra.mxu1 %v8260_v53  ;;  %v3670_v2 = vpop.f32.mrf.mxu0 }
 0x2b1   :  { %6004 = vmatpush2.bf16.msra.mxu0 %v8221_v37  ;;  %v10354_v37 = vpop.f32.mrf.mxu1 }
 0x2b2   :  { %6005 = vmatprep.subr.bf16.mxu0 %v8228_v43  ;;  %v3672_v43 = vpop.f32.mrf.mxu0 }
 0x2b5   :  { %6006 = vmatpush2.bf16.msra.mxu0 %v8226_v31  ;;  %v10356_v31 = vpop.f32.mrf.mxu1 }
 0x2b6   :  { %6007 = vmatprep.subr.bf16.mxu0 %v8233_v8  ;;  %v3676_v8 = vpop.f32.mrf.mxu0 }
 0x2b9   :  { %6008 = vmatpush2.bf16.msra.mxu0 %v8231_v13  ;;  %v10358_v13 = vpop.f32.mrf.mxu1 }
 0x2ba   :  { %6009 = vmatprep.subr.bf16.mxu0 %v8238_v38  ;;  %v3678_v38 = vpop.f32.mrf.mxu0 }
 0x2bb   :  { %v10360_v51 = vpop.f32.mrf.mxu1 }
 0x2bd   :  { %6010 = vmatpush2.bf16.msra.mxu0 %v8236_v28  ;;  %v3680_v28 = vpop.f32.mrf.mxu0  ;;  %v10362_v59 = vpop.f32.mrf.mxu1 }
 0x2be   :  { %6011 = vmatprep.subr.bf16.mxu0 %v8243_v49  ;;  %10694 = vst [vmem:[#allocation35_spill] sm:$0xff] %v10362_v59 }
 0x2bf   :  { %v10364_v49 = vpop.f32.mrf.mxu0  ;;  %v10366_v46 = vpop.f32.mrf.mxu1 }
 0x2c0   :  { %10695 = vst [vmem:[#allocation43_spill] sm:$0xff] %v10364_v49  ;;  %10696 = vst [vmem:[#allocation40_spill] sm:$0xff] %v10366_v46 }
 0x2c1   :  { %6012 = vmatpush2.bf16.msra.mxu0 %v8241_v20 }
 0x2c2   :  { %6013 = vmatprep.subr.bf16.mxu0 %v8248_v62 }
 0x2c5   :  { %6014 = vmatpush2.bf16.msra.mxu0 %v8246_v35 }
 0x2c6   :  { %6015 = vmatprep.subr.bf16.mxu0 %v8253_v22 }
 0x2c9   :  { %6016 = vmatpush2.bf16.msra.mxu0 %v8251_v45 }
 0x2ca   :  { %6017 = vmatprep.subr.bf16.mxu0 %v8258_v11 }
 0x2cd   :  { %6018 = vmatpush2.bf16.msra.mxu0 %v8256_v50 }
 0x2cf   :  { %v4229_v20 = vpop.f32.mrf.mxu0 }
 0x2d0   :  { %v4282_v57 = vpop.f32.mrf.mxu1 }
 0x2d1   :  { %v4231_v62 = vpop.f32.mrf.mxu0 }
 0x2d2   :  { %v4284_v21 = vpop.f32.mrf.mxu1 }
 0x2d3   :  { %v4233_v35 = vpop.f32.mrf.mxu0 }
 0x2d4   :  { %v4286_v33 = vpop.f32.mrf.mxu1 }
 0x2d5   :  { %v4235_v22 = vpop.f32.mrf.mxu0 }
 0x2d6   :  { %v4288_v10 = vpop.f32.mrf.mxu1 }
 0x2d7   :  { %v10368_v45 = vpop.f32.mrf.mxu0 }
 0x2d8   :  { %10697 = vst [vmem:[#allocation41_spill] sm:$0xff] %v10368_v45  ;;  %v10370_v34 = vpop.f32.mrf.mxu1 }
 0x2d9   :  { %10698 = vst [vmem:[#allocation29_spill] sm:$0xff] %v10370_v34  ;;  %v10372_v11 = vpop.f32.mrf.mxu0  ;;  %v3266_v34 = vadd.f32 %v3265_v30, %v3212_v4  ;;  %v4285_v4 = vadd.f32 %v4284_v21, %v4231_v62 }
 0x2da   :  { %10699 = vst [vmem:[#allocation30_spill] sm:$0xff] %v10372_v11  ;;  %v10374_v18 = vpop.f32.mrf.mxu1  ;;  %v3264_v11 = vadd.f32 %v3263_v24, %v3210_v47 }
 0x2db   :  { %10700 = vst [vmem:[#allocation36_spill] sm:$0xff] %v10374_v18  ;;  %v10376_v50 = vpop.f32.mrf.mxu0 }
 0x2dc   :  { %10701 = vst [vmem:[#allocation39_spill] sm:$0xff] %v10376_v50  ;;  %v10378_v53 = vpop.f32.mrf.mxu1  ;;  %v3260_v50 = vadd.f32 %v3259_v15, %v3206_v44  ;;  %v3679_v44 = vadd.f32 %v3678_v38, %v3266_v34  ;;  %v10715_v15 = vld [vmem:[#allocation23_spill] sm:$0xff]  ;;  %v4287_v38 = vadd.f32 %v4286_v33, %v4233_v35 }
 0x2dd   :  { %10702 = vst [vmem:[#allocation37_spill] sm:$0xff] %v10378_v53  ;;  %v10380_v1 = vpop.f32.mrf.mxu0  ;;  %v3258_v53 = vadd.f32 %v3257_v27, %v3204_v63  ;;  %v3677_v27 = vadd.f32 %v3676_v8, %v3264_v11  ;;  %v10716_v47 = vmax.f32 %v10715_v15, 0.0 }
 0x2de   :  { %10703 = vst [vmem:[#allocation38_spill] sm:$0xff] %v10380_v1  ;;  %v10382_v6 = vpop.f32.mrf.mxu1  ;;  %v3254_v1 = vadd.f32 %v10340_v55, %v10338_v61  ;;  %v3673_v61 = vadd.f32 %v3672_v43, %v3260_v50  ;;  %v4283_v55 = vadd.f32 %v4282_v57, %v4229_v20  ;;  %v10718_v20 = vld [vmem:[#allocation43_spill] sm:$0xff] }
 0x2df   :  { %10704 = vst [vmem:[#allocation44_spill] sm:$0xff] %v10382_v6  ;;  %v3256_v6 = vadd.f32 %v10344_v32, %v10342_v58  ;;  %v3671_v17 = vadd.f32 %v3670_v2, %v3258_v53  ;;  %v10712_v58 = vld [vmem:[#allocation22_spill] sm:$0xff]  ;;  %v10721_v34 = vld [vmem:[#allocation41_spill] sm:$0xff] }
 0x2e0   :  { %v3667_v18 = vadd.f32 %v3666_v40, %v3254_v1  ;;  %v10713_v32 = vmax.f32 %v10712_v58, 0.0  ;;  %v10714_v1 = vmax.f32 %v10173_v19, 0.0  ;;  %v5510_v40 = vld [vmem:[#allocation8] sm:$0x3]  ;;  %v10722_v11 = vld [vmem:[#allocation29_spill] sm:$0xff] }
 0x2e1   :  { %v3669_v45 = vadd.f32 %v3668_v26, %v3256_v6  ;;  %v3268_v6 = vadd.f32 %v3267_v3, %v10346_v36  ;;  %v3270_v26 = vadd.f32 %v10350_v23, %v10348_v41  ;;  %v3724_v2 = vadd.f32 %v10354_v37, %v3671_v17 }
 0x2e2   :  { %v10410_v63 = vadd.f32 %v10714_v1, %v10713_v32 }
 0x2e3   :  { %v3722_v19 = vadd.f32 %v10352_v5, %v3669_v45  ;;  %v3681_v36 = vadd.f32 %v3680_v28, %v3268_v6  ;;  %v10431_v5 = vrot.slane %v5510_v40, %v9746_v14  ;;  %v3683_v57 = vadd.f32 %v10718_v20, %v3270_v26  ;;  %v10725_v53 = vld [vmem:[#allocation39_spill] sm:$0xff] }
 0x2e5   :  { %v4302_v17 = vadd.f32 %v4285_v4, %v3722_v19 }
 0x30f   :  { %v4856_v56 = vpop.f32.mrf.mxu0 }
 0x310   :  { %v4909_v0 = vpop.f32.mrf.mxu1 }
 0x311   :  { %v4858_v9 = vpop.f32.mrf.mxu0  ;;  %v4910_v30 = vadd.f32 %v4909_v0, %v4856_v56  ;;  %v3730_v0 = vadd.f32 %v10358_v13, %v3677_v27  ;;  %v3732_v56 = vadd.f32 %v10360_v51, %v3679_v44  ;;  %v10720_v13 = vld [vmem:[#allocation20_spill] sm:$0xff]  ;;  %v4303_v51 = vadd.f32 %v4287_v38, %v3724_v2 }
 0x312   :  { %v4911_v29 = vpop.f32.mrf.mxu1  ;;  %v10436_v35 = vrot.slane %v5510_v40, %v10720_v13  ;;  %v10727_v27 = vld [vmem:[#allocation40_spill] sm:$0xff] }
 0x313   :  { %v4860_v12 = vpop.f32.mrf.mxu0  ;;  %v3736_v44 = vadd.f32 %v10727_v27, %v3683_v57  ;;  %v10732_v57 = vld [vmem:[#allocation38_spill] sm:$0xff] }
 0x314   :  { %v4913_v48 = vpop.f32.mrf.mxu1 }
 0x315   :  { %v4862_v16 = vpop.f32.mrf.mxu0  ;;  %v4914_v28 = vadd.f32 %v4913_v48, %v4860_v12  ;;  %v10723_v48 = vld [vmem:[#allocation30_spill] sm:$0xff]  ;;  %v10724_v12 = vld [vmem:[#allocation36_spill] sm:$0xff] }
 0x316   :  { %v4915_v7 = vpop.f32.mrf.mxu1  ;;  %v4295_v50 = vadd.f32 %v10724_v12, %v10723_v48 }
 0x317   :  { %v10384_v60 = vpop.f32.mrf.mxu0  ;;  %v4916_v21 = vadd.f32 %v4915_v7, %v4862_v16  ;;  %v4930_v58 = vadd.f32 %v4914_v28, %v4303_v51 }
 0x318   :  { %10705 = vst [vmem:[#allocation45_spill] sm:$0xff] %v10384_v60  ;;  %v10386_v25 = vpop.f32.mrf.mxu1 }
 0x319   :  { %10706 = vst [vmem:[#allocation46_spill] sm:$0xff] %v10386_v25  ;;  %v10388_v54 = vpop.f32.mrf.mxu0 }
 0x31a   :  { %10707 = vst [vmem:[#allocation47_spill] sm:$0xff] %v10388_v54  ;;  %v10390_v46 = vpop.f32.mrf.mxu1  ;;  %v10709_v54 = vld [vmem:[#allocation21_spill] sm:$0xff] }
 0x31b   :  { %10708 = vst [vmem:[#allocation48_spill] sm:$0xff] %v10390_v46  ;;  %v10396_v60 = vpop.f32.mrf.mxu0  ;;  %v10710_v59 = vmax.f32 %v10709_v54, 0.0  ;;  %v10711_v46 = vmax.f32 %v10164_v39, 0.0  ;;  %v10717_v54 = vmax.f32 %v10182_v52, 0.0  ;;  %v3720_v39 = vadd.f32 %v3719_v42, %v3667_v18 }
 0x31c   :  { %v10398_v25 = vpop.f32.mrf.mxu1  ;;  %v3726_v52 = vadd.f32 %v10356_v31, %v3673_v61  ;;  %v4912_v42 = vadd.f32 %v4911_v29, %v4858_v9  ;;  %v10719_v31 = vld [vmem:[#allocation35_spill] sm:$0xff]  ;;  %v4293_v18 = vadd.f32 %v10722_v11, %v10721_v34  ;;  %v10726_v61 = vld [vmem:[#allocation37_spill] sm:$0xff] }
 0x31d   :  { %v10404_v49 = vadd.f32 %v10711_v46, %v10710_v59  ;;  %v10417_v24 = vadd.f32 %v10717_v54, %v10716_v47  ;;  %v10423_v3 = vpop.f32.mrf.mxu0  ;;  %v4301_v8 = vadd.f32 %v4283_v55, %v3720_v39  ;;  %v4289_v59 = vadd.f32 %v4288_v10, %v4235_v22 }
 0x31e   :  { %v10425_v43 = vpop.f32.mrf.mxu1  ;;  %v3734_v62 = vadd.f32 %v10719_v31, %v3681_v36  ;;  %v4929_v33 = vadd.f32 %v4912_v42, %v4302_v17  ;;  %v4297_v55 = vadd.f32 %v10726_v61, %v10725_v53  ;;  %v4305_v38 = vadd.f32 %v4293_v18, %v3730_v0  ;;  %v10733_v31 = vld [vmem:[#allocation44_spill] sm:$0xff] }
 0x31f   :  { %v4928_v37 = vadd.f32 %v4910_v30, %v4301_v8  ;;  %v4304_v45 = vadd.f32 %v4289_v59, %v3726_v52  ;;  %v10728_v47 = vld [vmem:[#allocation45_spill] sm:$0xff]  ;;  %v4306_v42 = vadd.f32 %v4295_v50, %v3732_v56  ;;  %v10734_v53 = vld [vmem:[#allocation24_spill] sm:$0xff] }
 0x320   :  { %v10729_v54 = vld [vmem:[#allocation46_spill] sm:$0xff]  ;;  %v4307_v59 = vadd.f32 %v4297_v55, %v3734_v62  ;;  %v10735_v61 = vmax.f32 %v10734_v53, 0.0 }
 0x321   :  { %v4931_v15 = vadd.f32 %v4916_v21, %v4304_v45  ;;  %v4920_v39 = vadd.f32 %v10729_v54, %v10728_v47  ;;  %v10730_v4 = vld [vmem:[#allocation47_spill] sm:$0xff]  ;;  %v4299_v21 = vadd.f32 %v10733_v31, %v10732_v57  ;;  %v10736_v55 = vld [vmem:[#allocation34_spill] sm:$0xff] }
 0x322   :  { %v10731_v30 = vld [vmem:[#allocation48_spill] sm:$0xff] }
 0x323   :  { %v4922_v40 = vadd.f32 %v10731_v30, %v10730_v4 }
 0x34f   :  { %v5430_v41 = vpop.f32.mrf.mxu0 }
 0x350   :  { %v5483_v23 = vpop.f32.mrf.mxu1 }
 0x351   :  { %v5484_v46 = vadd.f32 %v5483_v23, %v5430_v41  ;;  %v5432_v29 = vpop.f32.mrf.mxu0  ;;  %v4924_v41 = vadd.f32 %v10398_v25, %v10396_v60 }
 0x352   :  { %v5485_v9 = vpop.f32.mrf.mxu1 }
 0x353   :  { %v5502_v22 = vadd.f32 %v5484_v46, %v4928_v37  ;;  %v5486_v10 = vadd.f32 %v5485_v9, %v5432_v29  ;;  %v5434_v7 = vpop.f32.mrf.mxu0  ;;  %v4932_v29 = vadd.f32 %v4920_v39, %v4305_v38  ;;  %v4933_v9 = vadd.f32 %v4922_v40, %v4306_v42 }
 0x354   :  { %v5487_v16 = vpop.f32.mrf.mxu1 }
 0x355   :  { %v5522_v32 = vadd.f32 %v10431_v5, %v5502_v22  ;;  %v5503_v1 = vadd.f32 %v5486_v10, %v4929_v33  ;;  %v5488_v6 = vadd.f32 %v5487_v16, %v5434_v7  ;;  %v5436_v26 = vpop.f32.mrf.mxu0  ;;  %v4934_v22 = vadd.f32 %v4924_v41, %v4307_v59 }
 0x356   :  { %v5489_v19 = vpop.f32.mrf.mxu1  ;;  %v10737_v7 = vmax.f32 %v10736_v55, 0.0 }
 0x357   :  { %v5530_v2 = vmax.f32 %v5522_v32, 0.0  ;;  %v5523_v36 = vadd.f32 %v10436_v35, %v5503_v1  ;;  %v5504_v52 = vadd.f32 %v5488_v6, %v4930_v58  ;;  %v5490_v8 = vadd.f32 %v5489_v19, %v5436_v26  ;;  %v5440_v23 = vpop.f32.mrf.mxu0  ;;  %v10740_v58 = vld [vmem:[#allocation33_spill] sm:$0xff]  ;;  %v10742_v19 = vld [vmem:[#allocation26_spill] sm:$0xff] }
 0x358   :  { %v5493_v17 = vpop.f32.mrf.mxu1  ;;  %v5625_v16 = vadd.f32 %v10737_v7, %v10735_v61  ;;  %v10741_v32 = vmax.f32 %v10740_v58, 0.0 }
 0x359   :  { %v5630_v37 = vadd.f32 %v10404_v49, %v5530_v2  ;;  %v5531_v28 = vmax.f32 %v5523_v36, 0.0  ;;  %v5524_v46 = vadd.f32 %v10431_v5, %v5504_v52  ;;  %v5505_v20 = vadd.f32 %v5490_v8, %v4931_v15  ;;  %v5442_v0 = vpop.f32.mrf.mxu0  ;;  %v10744_v36 = vld [vmem:[#allocation31_spill] sm:$0xff] }
 0x35a   :  { %v5494_v51 = vadd.f32 %v5493_v17, %v5440_v23  ;;  %v5495_v56 = vpop.f32.mrf.mxu1  ;;  %v4926_v49 = vadd.f32 %v10425_v43, %v10423_v3  ;;  %v10738_v3 = vld [vmem:[#allocation25_spill] sm:$0xff]  ;;  %v10745_v52 = vmax.f32 %v10744_v36, 0.0  ;;  %v10746_v23 = vld [vmem:[#allocation27_spill] sm:$0xff] }
 0x35b   :  { %5638 = vst [vmem:[#allocation13] sm:$0xff] %v5630_v37  ;;  %v7244_v62 = vpack.c.bf16 %v5531_v28, %v5530_v2  ;;  %v5532_v33 = vmax.f32 %v5524_v46, 0.0  ;;  %v5525_v25 = vadd.f32 %v10436_v35, %v5505_v20  ;;  %v5496_v60 = vadd.f32 %v5495_v56, %v5442_v0  ;;  %v5444_v45 = vpop.f32.mrf.mxu0 }
 0x35c   :  { %v5506_v10 = vadd.f32 %v5494_v51, %v4932_v29  ;;  %v5497_v34 = vpop.f32.mrf.mxu1  ;;  %v5631_v11 = vadd.f32 %v10410_v63, %v5531_v28  ;;  %v10739_v43 = vmax.f32 %v10738_v3, 0.0  ;;  %v4308_v63 = vadd.f32 %v4299_v21, %v3736_v44  ;;  %v10750_v29 = vld [vmem:[#allocation28_spill] sm:$0xff]  ;;  %v10752_v51 = vld [vmem:[#allocation42_spill] sm:$0xff]  ;;  %v10755_v3 = vld [vmem:[#allocation19_spill] sm:$0xff] }
 0x35d   :  { %5618 = vst [vmem:[%s10575_s14] sm:$0xff] %v7244_v62  ;;  %v5632_v18 = vadd.f32 %v10417_v24, %v5532_v33  ;;  %v5533_v48 = vmax.f32 %v5525_v25, 0.0  ;;  %v5507_v12 = vadd.f32 %v5496_v60, %v4933_v9  ;;  %v5498_v50 = vadd.f32 %v5497_v34, %v5444_v45  ;;  %v5446_v27 = vpop.f32.mrf.mxu0  ;;  %v7233_v45 = vld [vmem:[%s10754_s9 + $0x1] ss:$0 sm:$0xff] }
 0x35e   :  { %v5626_v1 = vadd.f32 %v10741_v32, %v10739_v43  ;;  %v5526_v6 = vadd.f32 %v10431_v5, %v5506_v10  ;;  %v5499_v15 = vpop.f32.mrf.mxu1  ;;  %5639 = vst [vmem:[#allocation13 + $0x8] sm:$0xff] %v5631_v11  ;;  %v4935_v4 = vadd.f32 %v4926_v49, %v4308_v63  ;;  %v10743_v2 = vmax.f32 %v10742_v19, 0.0  ;;  %v7232_v49 = vld [vmem:[%s10754_s9] ss:$0 sm:$0xff] }
 0x35f   :  { %5640 = vst [vmem:[#allocation13 + $0x10] sm:$0xff] %v5632_v18  ;;  %v5646_v24 = vpack.c.bf16 %v5632_v18, %v5630_v37  ;;  %v7245_v47 = vpack.c.bf16 %v5533_v48, %v5532_v33  ;;  %v5527_v54 = vadd.f32 %v10436_v35, %v5507_v12  ;;  %v5508_v39 = vadd.f32 %v5498_v50, %v4934_v22  ;;  %v10748_v37 = vld [vmem:[#allocation32_spill] sm:$0xff]  ;;  %v5714_v18 = vld [vmem:[#allocation11] sm:$0x7] }
 0x360   :  { %v5534_v30 = vmax.f32 %v5526_v6, 0.0  ;;  %v5500_v40 = vadd.f32 %v5499_v15, %v5446_v27  ;;  %v5633_v26 = vadd.f32 %v5625_v16, %v5533_v48  ;;  %v5627_v44 = vadd.f32 %v10745_v52, %v10743_v2 }
 0x361   :  { %5619 = vst [vmem:[%s10575_s14 + $0x8] sm:$0xff] %v7245_v47  ;;  %v5535_v8 = vmax.f32 %v5527_v54, 0.0  ;;  %v5528_v38 = vadd.f32 %v10431_v5, %v5508_v39  ;;  %v10747_v17 = vmax.f32 %v10746_v23, 0.0  ;;  %v10749_v28 = vmax.f32 %v10748_v37, 0.0 }
 0x362   :  { %v5509_v42 = vadd.f32 %v5500_v40, %v4935_v4  ;;  %5641 = vst [vmem:[#allocation13 + $0x18] sm:$0xff] %v5633_v26  ;;  %v5647_v59 = vpack.c.bf16 %v5633_v26, %v5631_v11  ;;  %v5634_v41 = vadd.f32 %v5626_v1, %v5534_v30  ;;  %v10751_v9 = vmax.f32 %v10750_v29, 0.0 }
 0x363   :  { %v5628_v46 = vadd.f32 %v10749_v28, %v10747_v17  ;;  %v7246_v20 = vpack.c.bf16 %v5535_v8, %v5534_v30  ;;  %v5536_v57 = vmax.f32 %v5528_v38, 0.0  ;;  %v5635_v31 = vadd.f32 %v5627_v44, %v5535_v8 }
 0x364   :  { %v5529_v21 = vadd.f32 %v10436_v35, %v5509_v42  ;;  %6019 = vmatprep.mubr.bf16.mxu0 %v5647_v59  ;;  %6072 = vmatprep.mubr.bf16.mxu1 %v5647_v59  ;;  %5642 = vst [vmem:[#allocation13 + $0x20] sm:$0xff] %v5634_v41  ;;  %v10753_v0 = vmax.f32 %v10752_v51, 0.0  ;;  %v8449_v22 = vmov 0.0   ;;  %v8451_v10 = vmov 0  }
 0x365   :  { %5620 = vst [vmem:[%s10575_s14 + $0x10] sm:$0xff] %v7246_v20  ;;  %6020 = vmatmul.mubr.bf16.vlgmr.msra.gmra.mxu0 %v5646_v24  ;;  %6073 = vmatmul.mubr.bf16.vlgmr.msra.gmra.mxu1 %v5646_v24  ;;  %5643 = vst [vmem:[#allocation13 + $0x28] sm:$0xff] %v5635_v31  ;;  %v5636_v5 = vadd.f32 %v5628_v46, %v5536_v57  ;;  %v5723_v50 = vrot.slane %v5714_v18, %v10720_v13  ;;  %v5726_v43 = vsub.s32 2, %v10755_v3  ;;  %v10756_v28 = vlaneseq }
 0x366   :  { %v5629_v56 = vadd.f32 %v10753_v0, %v10751_v9  ;;  %v5537_v62 = vmax.f32 %v5529_v21, 0.0  ;;  %7284 = vmatprep.subr.bf16.mxu1 %v8449_v22  ;;  %7324 = vset.pattern.permute.xlu0 %v8451_v10  ;;  %v5719_v6 = vrot.slane %v5714_v18, %v9746_v14 }
 0x367   :  { %5644 = vst [vmem:[#allocation13 + $0x30] sm:$0xff] %v5636_v5  ;;  %v5648_v33 = vpack.c.bf16 %v5636_v5, %v5634_v41  ;;  %6192 = vperm.xlu0 %7324, %v7232_v49   ;;  %v5727_v24 = vrot.slane %v5714_v18, %v5726_v43  ;;  %v6180_v46 = vand.u32 127, %v10756_v28 }
 0x368   :  { %v7247_v35 = vpack.c.bf16 %v5537_v62, %v5536_v57  ;;  %v5637_v25 = vadd.f32 %v5629_v56, %v5537_v62 }
 0x36a   :  { %5621 = vst [vmem:[%s10575_s14 + $0x18] sm:$0xff] %v7247_v35  ;;  %5645 = vst [vmem:[#allocation13 + $0x38] sm:$0xff] %v5637_v25  ;;  %v5649_v60 = vpack.c.bf16 %v5637_v25, %v5635_v31 }
 0x36b   :  { %6195 = vperm.xlu0 %7324, %v7233_v45  }
 0x36c   :  { %6029 = vmatprep.mubr.bf16.mxu0 %v5649_v60  ;;  %6080 = vmatprep.mubr.bf16.mxu1 %v5649_v60 }
 0x36d   :  { %6030 = vmatmul.mubr.bf16.gmra.mxu0 %v5648_v33  ;;  %6081 = vmatmul.mubr.bf16.gmra.mxu1 %v5648_v33 }
 0x36e   :  { %7286 = vmatprep.mubr.msk.bf16.mxu1 %vm8450_vm12, %v8449_v22 }
 0x3e2   :  { %v6193_v20 = vpop.permute.xlu0 %6192 }
 0x3e3   :  { %vm6197_vm13 = vcmp.lt.s32.totalorder %v6180_v46, %v6193_v20 }
 0x3e6   :  { %v6196_v56 = vpop.permute.xlu0 %6195 }
 0x3e7   :  { %vm6198_vm15 = vcmp.lt.s32.totalorder %v6180_v46, %v6196_v56 }
 0x425   :  { %v6021_v34 = vpop.f32.mrf.mxu0  ;;  %v7264_v11 = vpop.f32.mrf.mxu1 }
 0x426   :  { %v6022_v30 = vadd.f32 %v6021_v34, %v5719_v6 }
 0x427   :  { %v6023_v48 = vpop.f32.mrf.mxu0  ;;  %v7265_v12 = vpop.f32.mrf.mxu1 }
 0x428   :  { %v6024_v16 = vadd.f32 %v6023_v48, %v5723_v50  ;;  %v7266_v38 = vadd.f32 %v7265_v12, %v7264_v11 }
 0x429   :  { %v6025_v53 = vpop.f32.mrf.mxu0  ;;  %v7267_v61 = vpop.f32.mrf.mxu1 }
 0x42a   :  { %v6026_v54 = vadd.f32 %v6025_v53, %v5719_v6  ;;  %v10520_v23 = vadd.f32 %v7266_v38, %v5727_v24 }
 0x42b   :  { %v6027_v55 = vpop.f32.mrf.mxu0  ;;  %v7268_v7 = vpop.f32.mrf.mxu1 }
 0x42c   :  { %v6028_v58 = vadd.f32 %v6027_v55, %v5723_v50  ;;  %v6089_v52 = vpack.c.bf16 %v6026_v54, %v6022_v30  ;;  %v7269_v14 = vadd.f32 %v7268_v7, %v7267_v61 }
 0x42d   :  { %v6031_v32 = vpop.f32.mrf.mxu0  ;;  %v7270_v1 = vpop.f32.mrf.mxu1 }
 0x42e   :  { %v6091_v63 = vpack.c.bf16 %v6028_v58, %v6024_v16  ;;  %v10518_v59 = vadd.f32 %v7269_v14, %v5727_v24  ;;  %v6032_v41 = vadd.f32 %v6031_v32, %v5719_v6 }
 0x42f   :  { %v6033_v27 = vpop.f32.mrf.mxu0  ;;  %v7271_v15 = vpop.f32.mrf.mxu1 }
 0x430   :  { %v7272_v47 = vadd.f32 %v7271_v15, %v7270_v1  ;;  %7285 = vmatpush3.bf16.xpose.msra.mxu1 %v6091_v63  ;;  %v6034_v19 = vadd.f32 %v6033_v27, %v5723_v50  ;;  %v6250_v37 = vpack.c.bf16 %v10518_v59, %v10520_v23 }
 0x431   :  { %v6035_v13 = vpop.f32.mrf.mxu0  ;;  %v7273_v39 = vpop.f32.mrf.mxu1  ;;  %7290 = vmatprep.subr.bf16.mxu1 %v8449_v22 }
 0x432   :  { %v10511_v4 = vadd.f32 %v7272_v47, %v5727_v24  ;;  %v6036_v42 = vadd.f32 %v6035_v13, %v5719_v6 }
 0x433   :  { %v6037_v40 = vpop.f32.mrf.mxu0  ;;  %v7274_v26 = vpop.f32.mrf.mxu1 }
 0x434   :  { %v6038_v2 = vadd.f32 %v6037_v40, %v5723_v50  ;;  %v7275_v36 = vadd.f32 %v7274_v26, %v7273_v39  ;;  %v6090_v17 = vpack.c.bf16 %v6036_v42, %v6032_v41 }
 0x436   :  { %v6092_v44 = vpack.c.bf16 %v6038_v2, %v6034_v19  ;;  %v10513_v8 = vadd.f32 %v7275_v36, %v5727_v24 }
 0x437   :  { %7287 = vmatmul.mubr.bf16.vlgmr.msra.gmra.mxu1 %v6089_v52 }
 0x438   :  { %7291 = vmatpush3.bf16.xpose.msra.mxu1 %v6092_v44  ;;  %7292 = vmatprep.mubr.msk.bf16.mxu1 %vm8450_vm12, %v8449_v22  ;;  %v6251_v44 = vpack.c.bf16 %v10513_v8, %v10511_v4 }
 0x439   :  { %7296 = vmatprep.subr.bf16.mxu1 %v8449_v22 }
 0x43f   :  { %7293 = vmatmul.mubr.bf16.vlgmr.msra.gmra.mxu1 %v6090_v17 }
 0x440   :  { %7297 = vmatpush3.bf16.msra.mxu1 %v6250_v37  ;;  %7298 = vmatprep.mubr.msk.bf16.mxu1 %vm8450_vm12, %v8449_v22 }
 0x441   :  { %7302 = vmatprep.subr.bf16.mxu1 %v8449_v22 }
 0x4f7   :  { %v6127_v57 = vpop.f32.mrf.mxu1 }
 0x4f8   :  { %v6175_v31 = vmul.f32 0.088388346, %v6127_v57 }
 0x4f9   :  { %v7288_v21 = vpop.f32.mrf.mxu1 }
 0x4fa   :  { %v6199_v5 = vsel %vm6197_vm13, %v6175_v31, -1e+30 }
 0x4fb   :  { %v6130_v29 = vpop.f32.mrf.mxu1  ;;  %v6204_v9 = vsel %vm6203_vm14, %v6199_v5, -inf }
 0x4fc   :  { %v6176_v51 = vmul.f32 0.088388346, %v6130_v29  ;;  %6205 = vmax.xlane.f32.xlu1 %v6204_v9 }
 0x4fd   :  { %v7289_v0 = vpop.f32.mrf.mxu1 }
 0x4fe   :  { %v6200_v62 = vsel %vm6197_vm13, %v6176_v51, -1e+30 }
 0x4ff   :  { %v6168_v33 = vpop.f32.mrf.mxu1  ;;  %v6207_v35 = vsel %vm6203_vm14, %v6200_v62, -inf }
 0x500   :  { %v6177_v25 = vmul.f32 0.088388346, %v6168_v33  ;;  %6208 = vmax.xlane.f32.xlu1 %v6207_v35 }
 0x501   :  { %v7294_v60 = vpop.f32.mrf.mxu1 }
 0x502   :  { %v6201_v49 = vsel %vm6198_vm15, %v6177_v25, -1e+30 }
 0x503   :  { %v6171_v10 = vpop.f32.mrf.mxu1  ;;  %v6210_v45 = vsel %vm6203_vm14, %v6201_v49, -inf }
 0x504   :  { %v6178_v34 = vmul.f32 0.088388346, %v6171_v10  ;;  %6211 = vmax.xlane.f32.xlu0 %v6210_v45 }
 0x505   :  { %v7295_v11 = vpop.f32.mrf.mxu1 }
 0x506   :  { %v6202_v18 = vsel %vm6198_vm15, %v6178_v34, -1e+30 }
 0x507   :  { %v6213_v48 = vsel %vm6203_vm14, %v6202_v18, -inf }
 0x508   :  { %6214 = vmax.xlane.f32.xlu1 %v6213_v48 }
 0x585   :  { %v6206_v12 = vpop.xlane.xlu1 %6205 }
 0x586   :  { %v6216_v50 = vsub.f32 %v6199_v5, %v6206_v12 }
 0x588   :  { %v6220_v53 = vmul.f32 1.442695, %v6216_v50 }
 0x589   :  { %v6209_v61 = vpop.xlane.xlu1 %6208 }
 0x58a   :  { %8261 = vpow2.f32 %v6220_v53  ;;  %v6217_v55 = vsub.f32 %v6200_v62, %v6209_v61 }
 0x58c   :  { %v6222_v7 = vmul.f32 1.442695, %v6217_v55 }
 0x58d   :  { %v6212_v16 = vpop.xlane.xlu0 %6211 }
 0x58e   :  { %8263 = vpow2.f32 %v6222_v7  ;;  %v6218_v3 = vsub.f32 %v6201_v49, %v6212_v16 }
 0x590   :  { %v6224_v43 = vmul.f32 1.442695, %v6218_v3 }
 0x591   :  { %v6215_v58 = vpop.xlane.xlu1 %6214 }
 0x592   :  { %8265 = vpow2.f32 %v6224_v43  ;;  %v6219_v32 = vsub.f32 %v6202_v18, %v6215_v58 }
 0x594   :  { %v6226_v1 = vmul.f32 1.442695, %v6219_v32 }
 0x596   :  { %8267 = vpow2.f32 %v6226_v1 }
 0x597   :  { %v8262_v63 = vpop.eup %8261 }
 0x598   :  { %v6228_v6 = vsel %vm6203_vm14, %v8262_v63, 0.0 }
 0x599   :  { %6229 = vadd.xlane.f32.xlu1 %v6228_v6 }
 0x59b   :  { %v8264_v27 = vpop.eup %8263 }
 0x59c   :  { %v6231_v15 = vsel %vm6203_vm14, %v8264_v27, 0.0 }
 0x59d   :  { %6232 = vadd.xlane.f32.xlu1 %v6231_v15 }
 0x59f   :  { %v8266_v24 = vpop.eup %8265 }
 0x5a0   :  { %v6234_v47 = vsel %vm6203_vm14, %v8266_v24, 0.0 }
 0x5a1   :  { %6235 = vadd.xlane.f32.xlu1 %v6234_v47 }
 0x5a3   :  { %v8268_v54 = vpop.eup %8267 }
 0x5a4   :  { %v6237_v13 = vsel %vm6203_vm14, %v8268_v54, 0.0 }
 0x5a5   :  { %6238 = vadd.xlane.f32.xlu1 %v6237_v13 }
 0x622   :  { %v6230_v39 = vpop.xlane.xlu1 %6229 }
 0x623   :  { %8269 = vrcp.f32 %v6230_v39 }
 0x626   :  { %v6233_v30 = vpop.xlane.xlu1 %6232 }
 0x627   :  { %8271 = vrcp.f32 %v6233_v30 }
 0x62a   :  { %v6236_v40 = vpop.xlane.xlu1 %6235 }
 0x62b   :  { %8273 = vrcp.f32 %v6236_v40 }
 0x62e   :  { %v6239_v26 = vpop.xlane.xlu1 %6238 }
 0x62f   :  { %8275 = vrcp.f32 %v6239_v26 }
 0x630   :  { %v8270_v19 = vpop.eup %8269 }
 0x631   :  { %v6244_v36 = vmul.f32 %v8270_v19, %v8262_v63 }
 0x634   :  { %v8272_v2 = vpop.eup %8271 }
 0x635   :  { %v6245_v52 = vmul.f32 %v8272_v2, %v8264_v27 }
 0x637   :  { %v6248_v14 = vpack.c.bf16 %v6245_v52, %v6244_v36 }
 0x638   :  { %v8274_v38 = vpop.eup %8273 }
 0x639   :  { %7299 = vmatmul.mubr.msk.bf16.vlgmr.msra.gmra.mxu1 %vm6203_vm14, %v6248_v14  ;;  %v6246_v17 = vmul.f32 %v8274_v38, %v8266_v24 }
 0x63a   :  { %7303 = vmatpush3.bf16.msra.mxu1 %v6251_v44  ;;  %7304 = vmatprep.mubr.msk.bf16.mxu1 %vm8450_vm12, %v8449_v22 }
 0x63c   :  { %v8276_v42 = vpop.eup %8275 }
 0x63d   :  { %v6247_v41 = vmul.f32 %v8276_v42, %v8268_v54 }
 0x63f   :  { %v6249_v37 = vpack.c.bf16 %v6247_v41, %v6246_v17 }
 0x641   :  { %7305 = vmatmul.mubr.msk.bf16.vlgmr.msra.gmra.mxu1 %vm6203_vm14, %v6249_v37 }
 0x642   :  { %8420 = shalt.err (!%p8417_p6)
}
 0x643   :  { %s8453_s1 = smov 256   ;;  %s8454_s26 = smov 16  }
 0x644   :  { %6363 = dma.vmem_to_hbm [thread:$0]  %s6358_s11, 1024, %s10577_s16, [#allocation4], %s8453_s1, %s8453_s1, %s8454_s26  }
 0x6f9   :  { %v6289_v22 = vpop.f32.mrf.mxu1 }
 0x6fa   :  { %v6290_v28 = vadd.f32 %v6289_v22, %v10520_v23 }
 0x6fb   :  { %v7300_v46 = vpop.f32.mrf.mxu1 }
 0x6fc   :  { %6340 = vst [vmem:[%s10576_s15] sm:$0xff] %v6290_v28 }
 0x6fd   :  { %v6292_v20 = vpop.f32.mrf.mxu1 }
 0x6fe   :  { %v6293_v57 = vadd.f32 %v6292_v20, %v10518_v59 }
 0x6ff   :  { %v7301_v31 = vpop.f32.mrf.mxu1 }
 0x700   :  { %6341 = vst [vmem:[%s10576_s15 + $0x8] sm:$0xff] %v6293_v57 }
 0x701   :  { %v6333_v21 = vpop.f32.mrf.mxu1 }
 0x702   :  { %v6334_v5 = vadd.f32 %v6333_v21, %v10511_v4 }
 0x703   :  { %v7306_v29 = vpop.f32.mrf.mxu1 }
 0x704   :  { %6342 = vst [vmem:[%s10576_s15 + $0x10] sm:$0xff] %v6334_v5 }
 0x705   :  { %v6336_v23 = vpop.f32.mrf.mxu1 }
 0x706   :  { %v6337_v9 = vadd.f32 %v6336_v23, %v10513_v8 }
 0x707   :  { %v7307_v51 = vpop.f32.mrf.mxu1 }
 0x708   :  { %6343 = vst [vmem:[%s10576_s15 + $0x18] sm:$0xff] %v6337_v9 }
 0x709   :  { %8437 = dma.done.wait [#allocation4], 1024  }
 0x70a   :  { %8438 = vsyncadd [#allocation4], 4294966272 }
 0x70b   :  { %6375 = vsyncpa [#allocation3], 1 }
 0x70c   :  { %6376 = vsyncpa [#allocation6], 1 }
 0x70d   :  { %6377 = vsyncpa [#allocation9], 1 }
 0x70e   :  { %6378 = vsyncpa [#allocation12], 1 }
 0x70f   :  { %6379 = vsyncpa [#allocation4], 1 }

</bundles_post_ra>
